<compile_context>
chip_gen: v7x
topology: tpu7x:2x2x1
jax: 0.10.0
libtpu: 0.0.40
codegen_flags: <defaults>
</compile_context>

<pallas_src>
import jax
import jax.numpy as jnp
from jax import lax
from jax.experimental import pallas as pl
from jax.experimental.pallas import tpu as pltpu

NEG_SLOPE = 0.01   # nn.LeakyReLU default
BN_EPS = 1e-5      # nn.BatchNorm2d default
LANE = 128


def _rows_per_chunk(H, Wp):
    # Largest whole-image-row chunk with flat size <= ~144 rows (<= ~18 f32 acc vregs),
    # preferring 8-row-aligned output stores.  Misaligned fallbacks are still correct.
    hi = max(1, min(H, 144 // Wp))
    for cand in range(hi, 0, -1):
        if (cand * Wp) % 8 == 0:
            return cand
    return hi


def _make_kernel(H, W, Cp, rpc):
    Wp = W + 2
    R_out = H * Wp           # flattened output rows (2 junk columns per image row)
    head = Wp + 1            # flat index of interior cell (1,1) in the padded slab

    def kernel(xp_ref, w1_ref, w2_ref, sb_ref, out_ref, hpad_ref):
        # xp_ref:   (R_in, Cp)  bf16  zero-padded input, flattened spatial grid
        # w1/w2:    (9, Cp, Cp) bf16  per-tap (Cin_p, Cout_p) weights
        # sb_ref:   (8, Cp)     f32   rows 0..3 = s1, b1, s2, b2 (folded eval-mode BN)
        # out_ref:  (R_out, Cp) f32
        # hpad_ref: (R_in, Cp)  bf16  VMEM scratch: padded intermediate activation
        R_in = hpad_ref.shape[0]

        sbv = sb_ref[...]                      # load folded BN once, reuse per chunk
        s1, b1 = sbv[0:1, :], sbv[1:2, :]
        s2, b2 = sbv[2:3, :], sbv[3:4, :]

        # Static column-validity mask for one chunk of `rpc` image rows: flat row
        # y*Wp + x is a real output column iff x < W.  3-D iota along the Wp axis
        # (reshaped by merging leading dims) -> no integer modulo.
        col = lax.broadcasted_iota(jnp.int32, (rpc, Wp, Cp), 1).reshape(rpc * Wp, Cp)
        colmask = col < W

        # Zero only the halo strips of the intermediate slab; the interior (including
        # the junk/halo cells inside it) is fully overwritten below.
        hpad_ref[pl.ds(0, head), :] = jnp.zeros((head, Cp), hpad_ref.dtype)
        tail = R_in - head - R_out
        hpad_ref[pl.ds(head + R_out, tail), :] = jnp.zeros((tail, Cp), hpad_ref.dtype)

        def conv_chunk(src_ref, w_ref, r0, rows):
            # 9 contiguous shifted row-slices; chained SSA f32 accumulation
            # (register tiles on v5e/v6e, MRB-friendly on v7x) — no ref RMW per tap.
            # Sources are already bf16, so there is no per-tap cast.
            acc = None
            for t in range(9):
                dy, dx = divmod(t, 3)
                lhs = src_ref[pl.ds(r0 + dy * Wp + dx, rows), :]
                d = jnp.dot(lhs, w_ref[t], preferred_element_type=jnp.float32)
                acc = d if acc is None else acc + d
            return acc

        def lrelu(v):
            return jnp.where(v >= 0, v, NEG_SLOPE * v)

        # -------- conv1 -> BN1 -> LeakyReLU, staged (bf16) into the padded scratch ----
        for y0 in range(0, H, rpc):
            rows = min(rpc, H - y0) * Wp
            r0 = y0 * Wp
            h = lrelu(conv_chunk(xp_ref, w1_ref, r0, rows) * s1 + b1)
            # The junk columns land exactly on the halo cells of the padded
            # intermediate slab, so masking here IS the zero padding for conv2.
            h = jnp.where(colmask[:rows], h, 0.0)
            hpad_ref[pl.ds(head + r0, rows), :] = h.astype(hpad_ref.dtype)

        # -------- conv2 -> BN2 -> LeakyReLU -> + skip, one store per chunk ------------
        # (All conv1 chunks are written before any conv2 chunk reads its row halo.)
        for y0 in range(0, H, rpc):
            rows = min(rpc, H - y0) * Wp
            r0 = y0 * Wp
            h2 = lrelu(conv_chunk(hpad_ref, w2_ref, r0, rows) * s2 + b2)
            skip = xp_ref[pl.ds(head + r0, rows), :].astype(jnp.float32)
            out_ref[pl.ds(r0, rows), :] = h2 + skip

    return kernel


def residual_block(x_nchw, params):
    """Pallas TPU implementation of ResidualBlock.forward (eval-mode BN).

    x_nchw: (N, C, H, W) float32.
    """
    (w1, w2, g1, be1, m1, v1, g2, be2, m2, v2) = params
    N, C, H, W = x_nchw.shape
    Cp = ((C + LANE - 1) // LANE) * LANE      # channels padded to lane width
    Wp = W + 2
    # Pad H by (1, 2): the extra bottom row keeps every shifted tap slice in bounds.
    R_in = (H + 3) * Wp
    R_out = H * Wp

    # Fold eval-mode BatchNorm into per-channel scale/bias (f32).
    s1 = g1 / jnp.sqrt(v1 + BN_EPS)
    b1 = be1 - m1 * s1
    s2 = g2 / jnp.sqrt(v2 + BN_EPS)
    b2 = be2 - m2 * s2
    sb = jnp.stack([s1, b1, s2, b2])                       # (4, C)
    sb = jnp.pad(sb, ((0, 4), (0, Cp - C)))                # (8, Cp)

    # NCHW -> NHWC, zero-pad spatial halo + channels, flatten to lane-dense slabs.
    # Shipped in bf16: conv operands are bf16 anyway; halves HBM read bytes.
    x_nhwc = jnp.transpose(x_nchw, (0, 2, 3, 1)).astype(jnp.bfloat16)
    xp = jnp.pad(x_nhwc, ((0, 0), (1, 2), (1, 1), (0, Cp - C))).reshape(N, R_in, Cp)

    # PyTorch conv weight (Cout, Cin, 3, 3) -> (9, Cin_p, Cout_p), bf16 for the MXU.
    def prep_w(w):
        wk = jnp.transpose(w, (2, 3, 1, 0)).reshape(9, C, C)
        return jnp.pad(wk, ((0, 0), (0, Cp - C), (0, Cp - C))).astype(jnp.bfloat16)

    rpc = _rows_per_chunk(H, Wp)

    # Per-step VMEM working set: double-buffered x/out blocks + bf16 scratch +
    # resident weights (double-buffered allocation) + BN.  32 MiB floor, capped
    # below v5e/v6e physical.  TODO(synk): row-tile before this grows past v7x 64 MiB.
    est = (2 * R_in * Cp * 2 + 2 * R_out * Cp * 4 + R_in * Cp * 2
           + 2 * 2 * 9 * Cp * Cp * 2 + 2 * 8 * Cp * 4)
    vmem_limit = int(min(max(32 * 1024 * 1024, 3 * est // 2), 100 * 1024 * 1024))

    out = pl.pallas_call(
        _make_kernel(H, W, Cp, rpc),
        out_shape=jax.ShapeDtypeStruct((N, R_out, Cp), jnp.float32),
        grid_spec=pltpu.PrefetchScalarGridSpec(
            num_scalar_prefetch=0,
            grid=(N,),
            in_specs=[
                pl.BlockSpec((None, R_in, Cp), lambda n: (n, 0, 0)),   # x slab / image
                pl.BlockSpec((9, Cp, Cp), lambda n: (0, 0, 0)),        # w1 (resident)
                pl.BlockSpec((9, Cp, Cp), lambda n: (0, 0, 0)),        # w2 (resident)
                pl.BlockSpec((8, Cp), lambda n: (0, 0)),               # folded BN
            ],
            out_specs=pl.BlockSpec((None, R_out, Cp), lambda n: (n, 0, 0)),
            scratch_shapes=[pltpu.VMEM((R_in, Cp), jnp.bfloat16)],     # padded h (bf16)
        ),
        compiler_params=pltpu.CompilerParams(
            dimension_semantics=("parallel",),       # pipelined + megacore over batch
            vmem_limit_bytes=vmem_limit,
        ),
    )(xp, prep_w(w1), prep_w(w2), sb)

    # (N, H*Wp, Cp) -> (N, H, Wp, Cp): drop junk columns / padded channels -> NCHW.
    out = out.reshape(N, H, Wp, Cp)[:, :, :W, :C]
    return jnp.transpose(out, (0, 3, 1, 2))


# ---------------- pure-JAX reference (for correctness check) ----------------
def residual_block_ref(x_nchw, params):
    (w1, w2, g1, be1, m1, v1, g2, be2, m2, v2) = params

    def conv(x, w):
        return lax.conv_general_dilated(
            x, w, window_strides=(1, 1), padding=((1, 1), (1, 1)),
            dimension_numbers=('NCHW', 'OIHW', 'NCHW'))

    def bn(x, g, b, m, v):
        inv = 1.0 / jnp.sqrt(v + BN_EPS)
        return ((x - m[None, :, None, None]) * inv[None, :, None, None]
                * g[None, :, None, None] + b[None, :, None, None])

    def lrelu(x):
        return jnp.where(x >= 0, x, NEG_SLOPE * x)

    h = lrelu(bn(conv(x_nchw, w1), g1, be1, m1, v1))
    h = lrelu(bn(conv(h, w2), g2, be2, m2, v2))
    return h + x_nchw


def make_params(key, C):
    ks = jax.random.split(key, 10)
    fan_in = C * 3 * 3
    bound = 1.0 / jnp.sqrt(fan_in)
    w1 = jax.random.uniform(ks[0], (C, C, 3, 3), jnp.float32, -bound, bound)
    w2 = jax.random.uniform(ks[1], (C, C, 3, 3), jnp.float32, -bound, bound)
    g1 = jax.random.uniform(ks[2], (C,), jnp.float32, 0.5, 1.5)
    be1 = 0.1 * jax.random.normal(ks[3], (C,), jnp.float32)
    m1 = 0.1 * jax.random.normal(ks[4], (C,), jnp.float32)
    v1 = jax.random.uniform(ks[5], (C,), jnp.float32, 0.5, 1.5)
    g2 = jax.random.uniform(ks[6], (C,), jnp.float32, 0.5, 1.5)
    be2 = 0.1 * jax.random.normal(ks[7], (C,), jnp.float32)
    m2 = 0.1 * jax.random.normal(ks[8], (C,), jnp.float32)
    v2 = jax.random.uniform(ks[9], (C,), jnp.float32, 0.5, 1.5)
    return (w1, w2, g1, be1, m1, v1, g2, be2, m2, v2)


if __name__ == "__main__":
    key = jax.random.PRNGKey(0)
    k_x, k_p = jax.random.split(key)

    N, C, H, W = 2, 8, 16, 16
    x = jax.random.normal(k_x, (N, C, H, W), jnp.float32)
    params = make_params(k_p, C)

    out = jax.jit(residual_block)(x, params)
    out = jax.block_until_ready(out)

    ref = residual_block_ref(x, params)
    assert out.shape == (N, C, H, W)
    max_err = float(jnp.max(jnp.abs(out - ref)))
    # bf16 MXU operands + bf16 skip input (f32 accumulation) -> loosened tolerance.
    assert jnp.allclose(out, ref, rtol=5e-2, atol=5e-2), (
        "mismatch: max abs err = %e" % max_err)

    print("KERNEL_OK")
</pallas_src>

<mosaic_0001>
module attributes {stable_mosaic.version = 11 : i64} {
  func.func @kernel(%arg0: i32, %arg1: memref<1x342x128xbf16, #tpu.memory_space<vmem>>, %arg2: memref<9x128x128xbf16, #tpu.memory_space<vmem>>, %arg3: memref<9x128x128xbf16, #tpu.memory_space<vmem>>, %arg4: memref<8x128xf32, #tpu.memory_space<vmem>>, %arg5: memref<1x288x128xf32, #tpu.memory_space<vmem>>, %arg6: memref<342x128xbf16, #tpu.memory_space<vmem>>) attributes {dimension_semantics = [#tpu.dimension_semantics<parallel>], iteration_bounds = array<i64: 2>, scalar_prefetch = 0 : i64, scratch_operands = 1 : i64, tpu.core_type = #tpu.core_type<tc>, window_params = [{transform_indices = @transform_0, window_bounds = array<i64: 1, 342, 128>}, {pipeline_mode = #tpu.pipeline_mode<synchronous>, transform_indices = @transform_1, window_bounds = array<i64: 9, 128, 128>}, {pipeline_mode = #tpu.pipeline_mode<synchronous>, transform_indices = @transform_2, window_bounds = array<i64: 9, 128, 128>}, {pipeline_mode = #tpu.pipeline_mode<synchronous>, transform_indices = @transform_3, window_bounds = array<i64: 8, 128>}, {transform_indices = @transform_4, window_bounds = array<i64: 1, 288, 128>}]} {
    %c0 = arith.constant 0 : index
    %c0_0 = arith.constant 0 : index
    %0 = vector.load %arg4[%c0, %c0_0] : memref<8x128xf32, #tpu.memory_space<vmem>>, vector<8x128xf32>
    %1 = vector.extract_strided_slice %0 {offsets = [0, 0], sizes = [1, 128], strides = [1, 1]} : vector<8x128xf32> to vector<1x128xf32>
    %2 = vector.extract_strided_slice %0 {offsets = [1, 0], sizes = [1, 128], strides = [1, 1]} : vector<8x128xf32> to vector<1x128xf32>
    %3 = vector.extract_strided_slice %0 {offsets = [2, 0], sizes = [1, 128], strides = [1, 1]} : vector<8x128xf32> to vector<1x128xf32>
    %4 = vector.extract_strided_slice %0 {offsets = [3, 0], sizes = [1, 128], strides = [1, 1]} : vector<8x128xf32> to vector<1x128xf32>
    %5 = tpu.iota {dimensions = array<i32: 1>} : vector<8x18x128xi32>
    %6 = vector.shape_cast %5 : vector<8x18x128xi32> to vector<144x128xi32>
    %c16_i32 = arith.constant 16 : i32
    %7 = vector.broadcast %c16_i32 : i32 to vector<144x128xi32>
    %8 = arith.cmpi slt, %6, %7 : vector<144x128xi32>
    %cst = arith.constant 0.000000e+00 : bf16
    %9 = vector.broadcast %cst : bf16 to vector<19x128xbf16>
    %c0_1 = arith.constant 0 : index
    %c0_2 = arith.constant 0 : index
    %10 = vector.load %arg6[%c0_1, %c0_2] : memref<342x128xbf16, #tpu.memory_space<vmem>>, vector<19x128xbf16>
    tpu.vector_store %arg6[%c0_1, %c0_2], %9 {strides = array<i32>} : memref<342x128xbf16, #tpu.memory_space<vmem>>, vector<19x128xbf16>,
    %cst_3 = arith.constant 0.000000e+00 : bf16
    %11 = vector.broadcast %cst_3 : bf16 to vector<35x128xbf16>
    %c307 = arith.constant 307 : index
    %c0_4 = arith.constant 0 : index
    %12 = vector.load %arg6[%c307, %c0_4] : memref<342x128xbf16, #tpu.memory_space<vmem>>, vector<35x128xbf16>
    tpu.vector_store %arg6[%c307, %c0_4], %11 {strides = array<i32>} : memref<342x128xbf16, #tpu.memory_space<vmem>>, vector<35x128xbf16>,
    %c0_5 = arith.constant 0 : index
    %c0_6 = arith.constant 0 : index
    %c0_7 = arith.constant 0 : index
    %13 = vector.load %arg1[%c0_5, %c0_6, %c0_7] : memref<1x342x128xbf16, #tpu.memory_space<vmem>>, vector<1x144x128xbf16>
    %14 = vector.shape_cast %13 : vector<1x144x128xbf16> to vector<144x128xbf16>
    %c0_8 = arith.constant 0 : index
    %c0_9 = arith.constant 0 : index
    %c0_10 = arith.constant 0 : index
    %15 = vector.load %arg2[%c0_8, %c0_9, %c0_10] : memref<9x128x128xbf16, #tpu.memory_space<vmem>>, vector<1x128x128xbf16>
    %16 = vector.shape_cast %15 : vector<1x128x128xbf16> to vector<128x128xbf16>
    %cst_11 = arith.constant dense<0.000000e+00> : vector<144x128xf32>
    %17 = tpu.matmul %14, %16, %cst_11 {dimension_numbers = #tpu.dot_dimension_numbers<[1], [0], [0], [1], [0, 0, 1, 1], [], []>} : vector<144x128xbf16>, vector<128x128xbf16>, vector<144x128xf32> -> vector<144x128xf32>
    %c0_12 = arith.constant 0 : index
    %c1 = arith.constant 1 : index
    %c0_13 = arith.constant 0 : index
    %18 = vector.load %arg1[%c0_12, %c1, %c0_13] : memref<1x342x128xbf16, #tpu.memory_space<vmem>>, vector<1x144x128xbf16>
    %19 = vector.shape_cast %18 : vector<1x144x128xbf16> to vector<144x128xbf16>
    %c1_14 = arith.constant 1 : index
    %c0_15 = arith.constant 0 : index
    %c0_16 = arith.constant 0 : index
    %20 = vector.load %arg2[%c1_14, %c0_15, %c0_16] : memref<9x128x128xbf16, #tpu.memory_space<vmem>>, vector<1x128x128xbf16>
    %21 = vector.shape_cast %20 : vector<1x128x128xbf16> to vector<128x128xbf16>
    %cst_17 = arith.constant dense<0.000000e+00> : vector<144x128xf32>
    %22 = tpu.matmul %19, %21, %cst_17 {dimension_numbers = #tpu.dot_dimension_numbers<[1], [0], [0], [1], [0, 0, 1, 1], [], []>} : vector<144x128xbf16>, vector<128x128xbf16>, vector<144x128xf32> -> vector<144x128xf32>
    %23 = arith.addf %17, %22 : vector<144x128xf32>
    %c0_18 = arith.constant 0 : index
    %c2 = arith.constant 2 : index
    %c0_19 = arith.constant 0 : index
    %24 = vector.load %arg1[%c0_18, %c2, %c0_19] : memref<1x342x128xbf16, #tpu.memory_space<vmem>>, vector<1x144x128xbf16>
    %25 = vector.shape_cast %24 : vector<1x144x128xbf16> to vector<144x128xbf16>
    %c2_20 = arith.constant 2 : index
    %c0_21 = arith.constant 0 : index
    %c0_22 = arith.constant 0 : index
    %26 = vector.load %arg2[%c2_20, %c0_21, %c0_22] : memref<9x128x128xbf16, #tpu.memory_space<vmem>>, vector<1x128x128xbf16>
    %27 = vector.shape_cast %26 : vector<1x128x128xbf16> to vector<128x128xbf16>
    %cst_23 = arith.constant dense<0.000000e+00> : vector<144x128xf32>
    %28 = tpu.matmul %25, %27, %cst_23 {dimension_numbers = #tpu.dot_dimension_numbers<[1], [0], [0], [1], [0, 0, 1, 1], [], []>} : vector<144x128xbf16>, vector<128x128xbf16>, vector<144x128xf32> -> vector<144x128xf32>
    %29 = arith.addf %23, %28 : vector<144x128xf32>
    %c0_24 = arith.constant 0 : index
    %c18 = arith.constant 18 : index
    %c0_25 = arith.constant 0 : index
    %30 = vector.load %arg1[%c0_24, %c18, %c0_25] : memref<1x342x128xbf16, #tpu.memory_space<vmem>>, vector<1x144x128xbf16>
    %31 = vector.shape_cast %30 : vector<1x144x128xbf16> to vector<144x128xbf16>
    %c3 = arith.constant 3 : index
    %c0_26 = arith.constant 0 : index
    %c0_27 = arith.constant 0 : index
    %32 = vector.load %arg2[%c3, %c0_26, %c0_27] : memref<9x128x128xbf16, #tpu.memory_space<vmem>>, vector<1x128x128xbf16>
    %33 = vector.shape_cast %32 : vector<1x128x128xbf16> to vector<128x128xbf16>
    %cst_28 = arith.constant dense<0.000000e+00> : vector<144x128xf32>
    %34 = tpu.matmul %31, %33, %cst_28 {dimension_numbers = #tpu.dot_dimension_numbers<[1], [0], [0], [1], [0, 0, 1, 1], [], []>} : vector<144x128xbf16>, vector<128x128xbf16>, vector<144x128xf32> -> vector<144x128xf32>
    %35 = arith.addf %29, %34 : vector<144x128xf32>
    %c0_29 = arith.constant 0 : index
    %c19 = arith.constant 19 : index
    %c0_30 = arith.constant 0 : index
    %36 = vector.load %arg1[%c0_29, %c19, %c0_30] : memref<1x342x128xbf16, #tpu.memory_space<vmem>>, vector<1x144x128xbf16>
    %37 = vector.shape_cast %36 : vector<1x144x128xbf16> to vector<144x128xbf16>
    %c4 = arith.constant 4 : index
    %c0_31 = arith.constant 0 : index
    %c0_32 = arith.constant 0 : index
    %38 = vector.load %arg2[%c4, %c0_31, %c0_32] : memref<9x128x128xbf16, #tpu.memory_space<vmem>>, vector<1x128x128xbf16>
    %39 = vector.shape_cast %38 : vector<1x128x128xbf16> to vector<128x128xbf16>
    %cst_33 = arith.constant dense<0.000000e+00> : vector<144x128xf32>
    %40 = tpu.matmul %37, %39, %cst_33 {dimension_numbers = #tpu.dot_dimension_numbers<[1], [0], [0], [1], [0, 0, 1, 1], [], []>} : vector<144x128xbf16>, vector<128x128xbf16>, vector<144x128xf32> -> vector<144x128xf32>
    %41 = arith.addf %35, %40 : vector<144x128xf32>
    %c0_34 = arith.constant 0 : index
    %c20 = arith.constant 20 : index
    %c0_35 = arith.constant 0 : index
    %42 = vector.load %arg1[%c0_34, %c20, %c0_35] : memref<1x342x128xbf16, #tpu.memory_space<vmem>>, vector<1x144x128xbf16>
    %43 = vector.shape_cast %42 : vector<1x144x128xbf16> to vector<144x128xbf16>
    %c5 = arith.constant 5 : index
    %c0_36 = arith.constant 0 : index
    %c0_37 = arith.constant 0 : index
    %44 = vector.load %arg2[%c5, %c0_36, %c0_37] : memref<9x128x128xbf16, #tpu.memory_space<vmem>>, vector<1x128x128xbf16>
    %45 = vector.shape_cast %44 : vector<1x128x128xbf16> to vector<128x128xbf16>
    %cst_38 = arith.constant dense<0.000000e+00> : vector<144x128xf32>
    %46 = tpu.matmul %43, %45, %cst_38 {dimension_numbers = #tpu.dot_dimension_numbers<[1], [0], [0], [1], [0, 0, 1, 1], [], []>} : vector<144x128xbf16>, vector<128x128xbf16>, vector<144x128xf32> -> vector<144x128xf32>
    %47 = arith.addf %41, %46 : vector<144x128xf32>
    %c0_39 = arith.constant 0 : index
    %c36 = arith.constant 36 : index
    %c0_40 = arith.constant 0 : index
    %48 = vector.load %arg1[%c0_39, %c36, %c0_40] : memref<1x342x128xbf16, #tpu.memory_space<vmem>>, vector<1x144x128xbf16>
    %49 = vector.shape_cast %48 : vector<1x144x128xbf16> to vector<144x128xbf16>
    %c6 = arith.constant 6 : index
    %c0_41 = arith.constant 0 : index
    %c0_42 = arith.constant 0 : index
    %50 = vector.load %arg2[%c6, %c0_41, %c0_42] : memref<9x128x128xbf16, #tpu.memory_space<vmem>>, vector<1x128x128xbf16>
    %51 = vector.shape_cast %50 : vector<1x128x128xbf16> to vector<128x128xbf16>
    %cst_43 = arith.constant dense<0.000000e+00> : vector<144x128xf32>
    %52 = tpu.matmul %49, %51, %cst_43 {dimension_numbers = #tpu.dot_dimension_numbers<[1], [0], [0], [1], [0, 0, 1, 1], [], []>} : vector<144x128xbf16>, vector<128x128xbf16>, vector<144x128xf32> -> vector<144x128xf32>
    %53 = arith.addf %47, %52 : vector<144x128xf32>
    %c0_44 = arith.constant 0 : index
    %c37 = arith.constant 37 : index
    %c0_45 = arith.constant 0 : index
    %54 = vector.load %arg1[%c0_44, %c37, %c0_45] : memref<1x342x128xbf16, #tpu.memory_space<vmem>>, vector<1x144x128xbf16>
    %55 = vector.shape_cast %54 : vector<1x144x128xbf16> to vector<144x128xbf16>
    %c7 = arith.constant 7 : index
    %c0_46 = arith.constant 0 : index
    %c0_47 = arith.constant 0 : index
    %56 = vector.load %arg2[%c7, %c0_46, %c0_47] : memref<9x128x128xbf16, #tpu.memory_space<vmem>>, vector<1x128x128xbf16>
    %57 = vector.shape_cast %56 : vector<1x128x128xbf16> to vector<128x128xbf16>
    %cst_48 = arith.constant dense<0.000000e+00> : vector<144x128xf32>
    %58 = tpu.matmul %55, %57, %cst_48 {dimension_numbers = #tpu.dot_dimension_numbers<[1], [0], [0], [1], [0, 0, 1, 1], [], []>} : vector<144x128xbf16>, vector<128x128xbf16>, vector<144x128xf32> -> vector<144x128xf32>
    %59 = arith.addf %53, %58 : vector<144x128xf32>
    %c0_49 = arith.constant 0 : index
    %c38 = arith.constant 38 : index
    %c0_50 = arith.constant 0 : index
    %60 = vector.load %arg1[%c0_49, %c38, %c0_50] : memref<1x342x128xbf16, #tpu.memory_space<vmem>>, vector<1x144x128xbf16>
    %61 = vector.shape_cast %60 : vector<1x144x128xbf16> to vector<144x128xbf16>
    %c8 = arith.constant 8 : index
    %c0_51 = arith.constant 0 : index
    %c0_52 = arith.constant 0 : index
    %62 = vector.load %arg2[%c8, %c0_51, %c0_52] : memref<9x128x128xbf16, #tpu.memory_space<vmem>>, vector<1x128x128xbf16>
    %63 = vector.shape_cast %62 : vector<1x128x128xbf16> to vector<128x128xbf16>
    %cst_53 = arith.constant dense<0.000000e+00> : vector<144x128xf32>
    %64 = tpu.matmul %61, %63, %cst_53 {dimension_numbers = #tpu.dot_dimension_numbers<[1], [0], [0], [1], [0, 0, 1, 1], [], []>} : vector<144x128xbf16>, vector<128x128xbf16>, vector<144x128xf32> -> vector<144x128xf32>
    %65 = arith.addf %59, %64 : vector<144x128xf32>
    %66 = vector.broadcast %1 : vector<1x128xf32> to vector<144x128xf32>
    %67 = arith.mulf %65, %66 : vector<144x128xf32>
    %68 = vector.broadcast %2 : vector<1x128xf32> to vector<144x128xf32>
    %69 = arith.addf %67, %68 : vector<144x128xf32>
    %cst_54 = arith.constant 0.000000e+00 : f32
    %70 = vector.broadcast %cst_54 : f32 to vector<144x128xf32>
    %71 = arith.cmpf oge, %69, %70 : vector<144x128xf32>
    %cst_55 = arith.constant 0.00999999977 : f32
    %72 = vector.broadcast %cst_55 : f32 to vector<144x128xf32>
    %73 = arith.mulf %72, %69 : vector<144x128xf32>
    %74 = arith.select %71, %69, %73 : vector<144x128xi1>, vector<144x128xf32>
    %cst_56 = arith.constant 0.000000e+00 : f32
    %75 = vector.broadcast %cst_56 : f32 to vector<144x128xf32>
    %76 = arith.select %8, %74, %75 : vector<144x128xi1>, vector<144x128xf32>
    %77 = arith.truncf %76 : vector<144x128xf32> to vector<144x128xbf16>
    %c19_57 = arith.constant 19 : index
    %c0_58 = arith.constant 0 : index
    %78 = vector.load %arg6[%c19_57, %c0_58] : memref<342x128xbf16, #tpu.memory_space<vmem>>, vector<144x128xbf16>
    tpu.vector_store %arg6[%c19_57, %c0_58], %77 {strides = array<i32>} : memref<342x128xbf16, #tpu.memory_space<vmem>>, vector<144x128xbf16>,
    %c0_59 = arith.constant 0 : index
    %c144 = arith.constant 144 : index
    %c0_60 = arith.constant 0 : index
    %79 = vector.load %arg1[%c0_59, %c144, %c0_60] : memref<1x342x128xbf16, #tpu.memory_space<vmem>>, vector<1x144x128xbf16>
    %80 = vector.shape_cast %79 : vector<1x144x128xbf16> to vector<144x128xbf16>
    %c0_61 = arith.constant 0 : index
    %c0_62 = arith.constant 0 : index
    %c0_63 = arith.constant 0 : index
    %81 = vector.load %arg2[%c0_61, %c0_62, %c0_63] : memref<9x128x128xbf16, #tpu.memory_space<vmem>>, vector<1x128x128xbf16>
    %82 = vector.shape_cast %81 : vector<1x128x128xbf16> to vector<128x128xbf16>
    %cst_64 = arith.constant dense<0.000000e+00> : vector<144x128xf32>
    %83 = tpu.matmul %80, %82, %cst_64 {dimension_numbers = #tpu.dot_dimension_numbers<[1], [0], [0], [1], [0, 0, 1, 1], [], []>} : vector<144x128xbf16>, vector<128x128xbf16>, vector<144x128xf32> -> vector<144x128xf32>
    %c0_65 = arith.constant 0 : index
    %c145 = arith.constant 145 : index
    %c0_66 = arith.constant 0 : index
    %84 = vector.load %arg1[%c0_65, %c145, %c0_66] : memref<1x342x128xbf16, #tpu.memory_space<vmem>>, vector<1x144x128xbf16>
    %85 = vector.shape_cast %84 : vector<1x144x128xbf16> to vector<144x128xbf16>
    %c1_67 = arith.constant 1 : index
    %c0_68 = arith.constant 0 : index
    %c0_69 = arith.constant 0 : index
    %86 = vector.load %arg2[%c1_67, %c0_68, %c0_69] : memref<9x128x128xbf16, #tpu.memory_space<vmem>>, vector<1x128x128xbf16>
    %87 = vector.shape_cast %86 : vector<1x128x128xbf16> to vector<128x128xbf16>
    %cst_70 = arith.constant dense<0.000000e+00> : vector<144x128xf32>
    %88 = tpu.matmul %85, %87, %cst_70 {dimension_numbers = #tpu.dot_dimension_numbers<[1], [0], [0], [1], [0, 0, 1, 1], [], []>} : vector<144x128xbf16>, vector<128x128xbf16>, vector<144x128xf32> -> vector<144x128xf32>
    %89 = arith.addf %83, %88 : vector<144x128xf32>
    %c0_71 = arith.constant 0 : index
    %c146 = arith.constant 146 : index
    %c0_72 = arith.constant 0 : index
    %90 = vector.load %arg1[%c0_71, %c146, %c0_72] : memref<1x342x128xbf16, #tpu.memory_space<vmem>>, vector<1x144x128xbf16>
    %91 = vector.shape_cast %90 : vector<1x144x128xbf16> to vector<144x128xbf16>
    %c2_73 = arith.constant 2 : index
    %c0_74 = arith.constant 0 : index
    %c0_75 = arith.constant 0 : index
    %92 = vector.load %arg2[%c2_73, %c0_74, %c0_75] : memref<9x128x128xbf16, #tpu.memory_space<vmem>>, vector<1x128x128xbf16>
    %93 = vector.shape_cast %92 : vector<1x128x128xbf16> to vector<128x128xbf16>
    %cst_76 = arith.constant dense<0.000000e+00> : vector<144x128xf32>
    %94 = tpu.matmul %91, %93, %cst_76 {dimension_numbers = #tpu.dot_dimension_numbers<[1], [0], [0], [1], [0, 0, 1, 1], [], []>} : vector<144x128xbf16>, vector<128x128xbf16>, vector<144x128xf32> -> vector<144x128xf32>
    %95 = arith.addf %89, %94 : vector<144x128xf32>
    %c0_77 = arith.constant 0 : index
    %c162 = arith.constant 162 : index
    %c0_78 = arith.constant 0 : index
    %96 = vector.load %arg1[%c0_77, %c162, %c0_78] : memref<1x342x128xbf16, #tpu.memory_space<vmem>>, vector<1x144x128xbf16>
    %97 = vector.shape_cast %96 : vector<1x144x128xbf16> to vector<144x128xbf16>
    %c3_79 = arith.constant 3 : index
    %c0_80 = arith.constant 0 : index
    %c0_81 = arith.constant 0 : index
    %98 = vector.load %arg2[%c3_79, %c0_80, %c0_81] : memref<9x128x128xbf16, #tpu.memory_space<vmem>>, vector<1x128x128xbf16>
    %99 = vector.shape_cast %98 : vector<1x128x128xbf16> to vector<128x128xbf16>
    %cst_82 = arith.constant dense<0.000000e+00> : vector<144x128xf32>
    %100 = tpu.matmul %97, %99, %cst_82 {dimension_numbers = #tpu.dot_dimension_numbers<[1], [0], [0], [1], [0, 0, 1, 1], [], []>} : vector<144x128xbf16>, vector<128x128xbf16>, vector<144x128xf32> -> vector<144x128xf32>
    %101 = arith.addf %95, %100 : vector<144x128xf32>
    %c0_83 = arith.constant 0 : index
    %c163 = arith.constant 163 : index
    %c0_84 = arith.constant 0 : index
    %102 = vector.load %arg1[%c0_83, %c163, %c0_84] : memref<1x342x128xbf16, #tpu.memory_space<vmem>>, vector<1x144x128xbf16>
    %103 = vector.shape_cast %102 : vector<1x144x128xbf16> to vector<144x128xbf16>
    %c4_85 = arith.constant 4 : index
    %c0_86 = arith.constant 0 : index
    %c0_87 = arith.constant 0 : index
    %104 = vector.load %arg2[%c4_85, %c0_86, %c0_87] : memref<9x128x128xbf16, #tpu.memory_space<vmem>>, vector<1x128x128xbf16>
    %105 = vector.shape_cast %104 : vector<1x128x128xbf16> to vector<128x128xbf16>
    %cst_88 = arith.constant dense<0.000000e+00> : vector<144x128xf32>
    %106 = tpu.matmul %103, %105, %cst_88 {dimension_numbers = #tpu.dot_dimension_numbers<[1], [0], [0], [1], [0, 0, 1, 1], [], []>} : vector<144x128xbf16>, vector<128x128xbf16>, vector<144x128xf32> -> vector<144x128xf32>
    %107 = arith.addf %101, %106 : vector<144x128xf32>
    %c0_89 = arith.constant 0 : index
    %c164 = arith.constant 164 : index
    %c0_90 = arith.constant 0 : index
    %108 = vector.load %arg1[%c0_89, %c164, %c0_90] : memref<1x342x128xbf16, #tpu.memory_space<vmem>>, vector<1x144x128xbf16>
    %109 = vector.shape_cast %108 : vector<1x144x128xbf16> to vector<144x128xbf16>
    %c5_91 = arith.constant 5 : index
    %c0_92 = arith.constant 0 : index
    %c0_93 = arith.constant 0 : index
    %110 = vector.load %arg2[%c5_91, %c0_92, %c0_93] : memref<9x128x128xbf16, #tpu.memory_space<vmem>>, vector<1x128x128xbf16>
    %111 = vector.shape_cast %110 : vector<1x128x128xbf16> to vector<128x128xbf16>
    %cst_94 = arith.constant dense<0.000000e+00> : vector<144x128xf32>
    %112 = tpu.matmul %109, %111, %cst_94 {dimension_numbers = #tpu.dot_dimension_numbers<[1], [0], [0], [1], [0, 0, 1, 1], [], []>} : vector<144x128xbf16>, vector<128x128xbf16>, vector<144x128xf32> -> vector<144x128xf32>
    %113 = arith.addf %107, %112 : vector<144x128xf32>
    %c0_95 = arith.constant 0 : index
    %c180 = arith.constant 180 : index
    %c0_96 = arith.constant 0 : index
    %114 = vector.load %arg1[%c0_95, %c180, %c0_96] : memref<1x342x128xbf16, #tpu.memory_space<vmem>>, vector<1x144x128xbf16>
    %115 = vector.shape_cast %114 : vector<1x144x128xbf16> to vector<144x128xbf16>
    %c6_97 = arith.constant 6 : index
    %c0_98 = arith.constant 0 : index
    %c0_99 = arith.constant 0 : index
    %116 = vector.load %arg2[%c6_97, %c0_98, %c0_99] : memref<9x128x128xbf16, #tpu.memory_space<vmem>>, vector<1x128x128xbf16>
    %117 = vector.shape_cast %116 : vector<1x128x128xbf16> to vector<128x128xbf16>
    %cst_100 = arith.constant dense<0.000000e+00> : vector<144x128xf32>
    %118 = tpu.matmul %115, %117, %cst_100 {dimension_numbers = #tpu.dot_dimension_numbers<[1], [0], [0], [1], [0, 0, 1, 1], [], []>} : vector<144x128xbf16>, vector<128x128xbf16>, vector<144x128xf32> -> vector<144x128xf32>
    %119 = arith.addf %113, %118 : vector<144x128xf32>
    %c0_101 = arith.constant 0 : index
    %c181 = arith.constant 181 : index
    %c0_102 = arith.constant 0 : index
    %120 = vector.load %arg1[%c0_101, %c181, %c0_102] : memref<1x342x128xbf16, #tpu.memory_space<vmem>>, vector<1x144x128xbf16>
    %121 = vector.shape_cast %120 : vector<1x144x128xbf16> to vector<144x128xbf16>
    %c7_103 = arith.constant 7 : index
    %c0_104 = arith.constant 0 : index
    %c0_105 = arith.constant 0 : index
    %122 = vector.load %arg2[%c7_103, %c0_104, %c0_105] : memref<9x128x128xbf16, #tpu.memory_space<vmem>>, vector<1x128x128xbf16>
    %123 = vector.shape_cast %122 : vector<1x128x128xbf16> to vector<128x128xbf16>
    %cst_106 = arith.constant dense<0.000000e+00> : vector<144x128xf32>
    %124 = tpu.matmul %121, %123, %cst_106 {dimension_numbers = #tpu.dot_dimension_numbers<[1], [0], [0], [1], [0, 0, 1, 1], [], []>} : vector<144x128xbf16>, vector<128x128xbf16>, vector<144x128xf32> -> vector<144x128xf32>
    %125 = arith.addf %119, %124 : vector<144x128xf32>
    %c0_107 = arith.constant 0 : index
    %c182 = arith.constant 182 : index
    %c0_108 = arith.constant 0 : index
    %126 = vector.load %arg1[%c0_107, %c182, %c0_108] : memref<1x342x128xbf16, #tpu.memory_space<vmem>>, vector<1x144x128xbf16>
    %127 = vector.shape_cast %126 : vector<1x144x128xbf16> to vector<144x128xbf16>
    %c8_109 = arith.constant 8 : index
    %c0_110 = arith.constant 0 : index
    %c0_111 = arith.constant 0 : index
    %128 = vector.load %arg2[%c8_109, %c0_110, %c0_111] : memref<9x128x128xbf16, #tpu.memory_space<vmem>>, vector<1x128x128xbf16>
    %129 = vector.shape_cast %128 : vector<1x128x128xbf16> to vector<128x128xbf16>
    %cst_112 = arith.constant dense<0.000000e+00> : vector<144x128xf32>
    %130 = tpu.matmul %127, %129, %cst_112 {dimension_numbers = #tpu.dot_dimension_numbers<[1], [0], [0], [1], [0, 0, 1, 1], [], []>} : vector<144x128xbf16>, vector<128x128xbf16>, vector<144x128xf32> -> vector<144x128xf32>
    %131 = arith.addf %125, %130 : vector<144x128xf32>
    %132 = vector.broadcast %1 : vector<1x128xf32> to vector<144x128xf32>
    %133 = arith.mulf %131, %132 : vector<144x128xf32>
    %134 = vector.broadcast %2 : vector<1x128xf32> to vector<144x128xf32>
    %135 = arith.addf %133, %134 : vector<144x128xf32>
    %cst_113 = arith.constant 0.000000e+00 : f32
    %136 = vector.broadcast %cst_113 : f32 to vector<144x128xf32>
    %137 = arith.cmpf oge, %135, %136 : vector<144x128xf32>
    %cst_114 = arith.constant 0.00999999977 : f32
    %138 = vector.broadcast %cst_114 : f32 to vector<144x128xf32>
    %139 = arith.mulf %138, %135 : vector<144x128xf32>
    %140 = arith.select %137, %135, %139 : vector<144x128xi1>, vector<144x128xf32>
    %cst_115 = arith.constant 0.000000e+00 : f32
    %141 = vector.broadcast %cst_115 : f32 to vector<144x128xf32>
    %142 = arith.select %8, %140, %141 : vector<144x128xi1>, vector<144x128xf32>
    %143 = arith.truncf %142 : vector<144x128xf32> to vector<144x128xbf16>
    %c163_116 = arith.constant 163 : index
    %c0_117 = arith.constant 0 : index
    %144 = vector.load %arg6[%c163_116, %c0_117] : memref<342x128xbf16, #tpu.memory_space<vmem>>, vector<144x128xbf16>
    tpu.vector_store %arg6[%c163_116, %c0_117], %143 {strides = array<i32>} : memref<342x128xbf16, #tpu.memory_space<vmem>>, vector<144x128xbf16>,
    %c0_118 = arith.constant 0 : index
    %c0_119 = arith.constant 0 : index
    %145 = vector.load %arg6[%c0_118, %c0_119] : memref<342x128xbf16, #tpu.memory_space<vmem>>, vector<144x128xbf16>
    %c0_120 = arith.constant 0 : index
    %c0_121 = arith.constant 0 : index
    %c0_122 = arith.constant 0 : index
    %146 = vector.load %arg3[%c0_120, %c0_121, %c0_122] : memref<9x128x128xbf16, #tpu.memory_space<vmem>>, vector<1x128x128xbf16>
    %147 = vector.shape_cast %146 : vector<1x128x128xbf16> to vector<128x128xbf16>
    %cst_123 = arith.constant dense<0.000000e+00> : vector<144x128xf32>
    %148 = tpu.matmul %145, %147, %cst_123 {dimension_numbers = #tpu.dot_dimension_numbers<[1], [0], [0], [1], [0, 0, 1, 1], [], []>} : vector<144x128xbf16>, vector<128x128xbf16>, vector<144x128xf32> -> vector<144x128xf32>
    %c1_124 = arith.constant 1 : index
    %c0_125 = arith.constant 0 : index
    %149 = vector.load %arg6[%c1_124, %c0_125] : memref<342x128xbf16, #tpu.memory_space<vmem>>, vector<144x128xbf16>
    %c1_126 = arith.constant 1 : index
    %c0_127 = arith.constant 0 : index
    %c0_128 = arith.constant 0 : index
    %150 = vector.load %arg3[%c1_126, %c0_127, %c0_128] : memref<9x128x128xbf16, #tpu.memory_space<vmem>>, vector<1x128x128xbf16>
    %151 = vector.shape_cast %150 : vector<1x128x128xbf16> to vector<128x128xbf16>
    %cst_129 = arith.constant dense<0.000000e+00> : vector<144x128xf32>
    %152 = tpu.matmul %149, %151, %cst_129 {dimension_numbers = #tpu.dot_dimension_numbers<[1], [0], [0], [1], [0, 0, 1, 1], [], []>} : vector<144x128xbf16>, vector<128x128xbf16>, vector<144x128xf32> -> vector<144x128xf32>
    %153 = arith.addf %148, %152 : vector<144x128xf32>
    %c2_130 = arith.constant 2 : index
    %c0_131 = arith.constant 0 : index
    %154 = vector.load %arg6[%c2_130, %c0_131] : memref<342x128xbf16, #tpu.memory_space<vmem>>, vector<144x128xbf16>
    %c2_132 = arith.constant 2 : index
    %c0_133 = arith.constant 0 : index
    %c0_134 = arith.constant 0 : index
    %155 = vector.load %arg3[%c2_132, %c0_133, %c0_134] : memref<9x128x128xbf16, #tpu.memory_space<vmem>>, vector<1x128x128xbf16>
    %156 = vector.shape_cast %155 : vector<1x128x128xbf16> to vector<128x128xbf16>
    %cst_135 = arith.constant dense<0.000000e+00> : vector<144x128xf32>
    %157 = tpu.matmul %154, %156, %cst_135 {dimension_numbers = #tpu.dot_dimension_numbers<[1], [0], [0], [1], [0, 0, 1, 1], [], []>} : vector<144x128xbf16>, vector<128x128xbf16>, vector<144x128xf32> -> vector<144x128xf32>
    %158 = arith.addf %153, %157 : vector<144x128xf32>
    %c18_136 = arith.constant 18 : index
    %c0_137 = arith.constant 0 : index
    %159 = vector.load %arg6[%c18_136, %c0_137] : memref<342x128xbf16, #tpu.memory_space<vmem>>, vector<144x128xbf16>
    %c3_138 = arith.constant 3 : index
    %c0_139 = arith.constant 0 : index
    %c0_140 = arith.constant 0 : index
    %160 = vector.load %arg3[%c3_138, %c0_139, %c0_140] : memref<9x128x128xbf16, #tpu.memory_space<vmem>>, vector<1x128x128xbf16>
    %161 = vector.shape_cast %160 : vector<1x128x128xbf16> to vector<128x128xbf16>
    %cst_141 = arith.constant dense<0.000000e+00> : vector<144x128xf32>
    %162 = tpu.matmul %159, %161, %cst_141 {dimension_numbers = #tpu.dot_dimension_numbers<[1], [0], [0], [1], [0, 0, 1, 1], [], []>} : vector<144x128xbf16>, vector<128x128xbf16>, vector<144x128xf32> -> vector<144x128xf32>
    %163 = arith.addf %158, %162 : vector<144x128xf32>
    %c19_142 = arith.constant 19 : index
    %c0_143 = arith.constant 0 : index
    %164 = vector.load %arg6[%c19_142, %c0_143] : memref<342x128xbf16, #tpu.memory_space<vmem>>, vector<144x128xbf16>
    %c4_144 = arith.constant 4 : index
    %c0_145 = arith.constant 0 : index
    %c0_146 = arith.constant 0 : index
    %165 = vector.load %arg3[%c4_144, %c0_145, %c0_146] : memref<9x128x128xbf16, #tpu.memory_space<vmem>>, vector<1x128x128xbf16>
    %166 = vector.shape_cast %165 : vector<1x128x128xbf16> to vector<128x128xbf16>
    %cst_147 = arith.constant dense<0.000000e+00> : vector<144x128xf32>
    %167 = tpu.matmul %164, %166, %cst_147 {dimension_numbers = #tpu.dot_dimension_numbers<[1], [0], [0], [1], [0, 0, 1, 1], [], []>} : vector<144x128xbf16>, vector<128x128xbf16>, vector<144x128xf32> -> vector<144x128xf32>
    %168 = arith.addf %163, %167 : vector<144x128xf32>
    %c20_148 = arith.constant 20 : index
    %c0_149 = arith.constant 0 : index
    %169 = vector.load %arg6[%c20_148, %c0_149] : memref<342x128xbf16, #tpu.memory_space<vmem>>, vector<144x128xbf16>
    %c5_150 = arith.constant 5 : index
    %c0_151 = arith.constant 0 : index
    %c0_152 = arith.constant 0 : index
    %170 = vector.load %arg3[%c5_150, %c0_151, %c0_152] : memref<9x128x128xbf16, #tpu.memory_space<vmem>>, vector<1x128x128xbf16>
    %171 = vector.shape_cast %170 : vector<1x128x128xbf16> to vector<128x128xbf16>
    %cst_153 = arith.constant dense<0.000000e+00> : vector<144x128xf32>
    %172 = tpu.matmul %169, %171, %cst_153 {dimension_numbers = #tpu.dot_dimension_numbers<[1], [0], [0], [1], [0, 0, 1, 1], [], []>} : vector<144x128xbf16>, vector<128x128xbf16>, vector<144x128xf32> -> vector<144x128xf32>
    %173 = arith.addf %168, %172 : vector<144x128xf32>
    %c36_154 = arith.constant 36 : index
    %c0_155 = arith.constant 0 : index
    %174 = vector.load %arg6[%c36_154, %c0_155] : memref<342x128xbf16, #tpu.memory_space<vmem>>, vector<144x128xbf16>
    %c6_156 = arith.constant 6 : index
    %c0_157 = arith.constant 0 : index
    %c0_158 = arith.constant 0 : index
    %175 = vector.load %arg3[%c6_156, %c0_157, %c0_158] : memref<9x128x128xbf16, #tpu.memory_space<vmem>>, vector<1x128x128xbf16>
    %176 = vector.shape_cast %175 : vector<1x128x128xbf16> to vector<128x128xbf16>
    %cst_159 = arith.constant dense<0.000000e+00> : vector<144x128xf32>
    %177 = tpu.matmul %174, %176, %cst_159 {dimension_numbers = #tpu.dot_dimension_numbers<[1], [0], [0], [1], [0, 0, 1, 1], [], []>} : vector<144x128xbf16>, vector<128x128xbf16>, vector<144x128xf32> -> vector<144x128xf32>
    %178 = arith.addf %173, %177 : vector<144x128xf32>
    %c37_160 = arith.constant 37 : index
    %c0_161 = arith.constant 0 : index
    %179 = vector.load %arg6[%c37_160, %c0_161] : memref<342x128xbf16, #tpu.memory_space<vmem>>, vector<144x128xbf16>
    %c7_162 = arith.constant 7 : index
    %c0_163 = arith.constant 0 : index
    %c0_164 = arith.constant 0 : index
    %180 = vector.load %arg3[%c7_162, %c0_163, %c0_164] : memref<9x128x128xbf16, #tpu.memory_space<vmem>>, vector<1x128x128xbf16>
    %181 = vector.shape_cast %180 : vector<1x128x128xbf16> to vector<128x128xbf16>
    %cst_165 = arith.constant dense<0.000000e+00> : vector<144x128xf32>
    %182 = tpu.matmul %179, %181, %cst_165 {dimension_numbers = #tpu.dot_dimension_numbers<[1], [0], [0], [1], [0, 0, 1, 1], [], []>} : vector<144x128xbf16>, vector<128x128xbf16>, vector<144x128xf32> -> vector<144x128xf32>
    %183 = arith.addf %178, %182 : vector<144x128xf32>
    %c38_166 = arith.constant 38 : index
    %c0_167 = arith.constant 0 : index
    %184 = vector.load %arg6[%c38_166, %c0_167] : memref<342x128xbf16, #tpu.memory_space<vmem>>, vector<144x128xbf16>
    %c8_168 = arith.constant 8 : index
    %c0_169 = arith.constant 0 : index
    %c0_170 = arith.constant 0 : index
    %185 = vector.load %arg3[%c8_168, %c0_169, %c0_170] : memref<9x128x128xbf16, #tpu.memory_space<vmem>>, vector<1x128x128xbf16>
    %186 = vector.shape_cast %185 : vector<1x128x128xbf16> to vector<128x128xbf16>
    %cst_171 = arith.constant dense<0.000000e+00> : vector<144x128xf32>
    %187 = tpu.matmul %184, %186, %cst_171 {dimension_numbers = #tpu.dot_dimension_numbers<[1], [0], [0], [1], [0, 0, 1, 1], [], []>} : vector<144x128xbf16>, vector<128x128xbf16>, vector<144x128xf32> -> vector<144x128xf32>
    %188 = arith.addf %183, %187 : vector<144x128xf32>
    %189 = vector.broadcast %3 : vector<1x128xf32> to vector<144x128xf32>
    %190 = arith.mulf %188, %189 : vector<144x128xf32>
    %191 = vector.broadcast %4 : vector<1x128xf32> to vector<144x128xf32>
    %192 = arith.addf %190, %191 : vector<144x128xf32>
    %cst_172 = arith.constant 0.000000e+00 : f32
    %193 = vector.broadcast %cst_172 : f32 to vector<144x128xf32>
    %194 = arith.cmpf oge, %192, %193 : vector<144x128xf32>
    %cst_173 = arith.constant 0.00999999977 : f32
    %195 = vector.broadcast %cst_173 : f32 to vector<144x128xf32>
    %196 = arith.mulf %195, %192 : vector<144x128xf32>
    %197 = arith.select %194, %192, %196 : vector<144x128xi1>, vector<144x128xf32>
    %c0_174 = arith.constant 0 : index
    %c19_175 = arith.constant 19 : index
    %c0_176 = arith.constant 0 : index
    %198 = vector.load %arg1[%c0_174, %c19_175, %c0_176] : memref<1x342x128xbf16, #tpu.memory_space<vmem>>, vector<1x144x128xbf16>
    %199 = vector.shape_cast %198 : vector<1x144x128xbf16> to vector<144x128xbf16>
    %200 = arith.extf %199 : vector<144x128xbf16> to vector<144x128xf32>
    %201 = arith.addf %197, %200 : vector<144x128xf32>
    %c0_177 = arith.constant 0 : index
    %c0_178 = arith.constant 0 : index
    %c0_179 = arith.constant 0 : index
    %202 = vector.load %arg5[%c0_177, %c0_178, %c0_179] : memref<1x288x128xf32, #tpu.memory_space<vmem>>, vector<1x144x128xf32>
    %203 = vector.shape_cast %202 : vector<1x144x128xf32> to vector<144x128xf32>
    %204 = vector.shape_cast %201 : vector<144x128xf32> to vector<1x144x128xf32>
    tpu.vector_store %arg5[%c0_177, %c0_178, %c0_179], %204 {strides = array<i32>} : memref<1x288x128xf32, #tpu.memory_space<vmem>>, vector<1x144x128xf32>,
    %c144_180 = arith.constant 144 : index
    %c0_181 = arith.constant 0 : index
    %205 = vector.load %arg6[%c144_180, %c0_181] : memref<342x128xbf16, #tpu.memory_space<vmem>>, vector<144x128xbf16>
    %c0_182 = arith.constant 0 : index
    %c0_183 = arith.constant 0 : index
    %c0_184 = arith.constant 0 : index
    %206 = vector.load %arg3[%c0_182, %c0_183, %c0_184] : memref<9x128x128xbf16, #tpu.memory_space<vmem>>, vector<1x128x128xbf16>
    %207 = vector.shape_cast %206 : vector<1x128x128xbf16> to vector<128x128xbf16>
    %cst_185 = arith.constant dense<0.000000e+00> : vector<144x128xf32>
    %208 = tpu.matmul %205, %207, %cst_185 {dimension_numbers = #tpu.dot_dimension_numbers<[1], [0], [0], [1], [0, 0, 1, 1], [], []>} : vector<144x128xbf16>, vector<128x128xbf16>, vector<144x128xf32> -> vector<144x128xf32>
    %c145_186 = arith.constant 145 : index
    %c0_187 = arith.constant 0 : index
    %209 = vector.load %arg6[%c145_186, %c0_187] : memref<342x128xbf16, #tpu.memory_space<vmem>>, vector<144x128xbf16>
    %c1_188 = arith.constant 1 : index
    %c0_189 = arith.constant 0 : index
    %c0_190 = arith.constant 0 : index
    %210 = vector.load %arg3[%c1_188, %c0_189, %c0_190] : memref<9x128x128xbf16, #tpu.memory_space<vmem>>, vector<1x128x128xbf16>
    %211 = vector.shape_cast %210 : vector<1x128x128xbf16> to vector<128x128xbf16>
    %cst_191 = arith.constant dense<0.000000e+00> : vector<144x128xf32>
    %212 = tpu.matmul %209, %211, %cst_191 {dimension_numbers = #tpu.dot_dimension_numbers<[1], [0], [0], [1], [0, 0, 1, 1], [], []>} : vector<144x128xbf16>, vector<128x128xbf16>, vector<144x128xf32> -> vector<144x128xf32>
    %213 = arith.addf %208, %212 : vector<144x128xf32>
    %c146_192 = arith.constant 146 : index
    %c0_193 = arith.constant 0 : index
    %214 = vector.load %arg6[%c146_192, %c0_193] : memref<342x128xbf16, #tpu.memory_space<vmem>>, vector<144x128xbf16>
    %c2_194 = arith.constant 2 : index
    %c0_195 = arith.constant 0 : index
    %c0_196 = arith.constant 0 : index
    %215 = vector.load %arg3[%c2_194, %c0_195, %c0_196] : memref<9x128x128xbf16, #tpu.memory_space<vmem>>, vector<1x128x128xbf16>
    %216 = vector.shape_cast %215 : vector<1x128x128xbf16> to vector<128x128xbf16>
    %cst_197 = arith.constant dense<0.000000e+00> : vector<144x128xf32>
    %217 = tpu.matmul %214, %216, %cst_197 {dimension_numbers = #tpu.dot_dimension_numbers<[1], [0], [0], [1], [0, 0, 1, 1], [], []>} : vector<144x128xbf16>, vector<128x128xbf16>, vector<144x128xf32> -> vector<144x128xf32>
    %218 = arith.addf %213, %217 : vector<144x128xf32>
    %c162_198 = arith.constant 162 : index
    %c0_199 = arith.constant 0 : index
    %219 = vector.load %arg6[%c162_198, %c0_199] : memref<342x128xbf16, #tpu.memory_space<vmem>>, vector<144x128xbf16>
    %c3_200 = arith.constant 3 : index
    %c0_201 = arith.constant 0 : index
    %c0_202 = arith.constant 0 : index
    %220 = vector.load %arg3[%c3_200, %c0_201, %c0_202] : memref<9x128x128xbf16, #tpu.memory_space<vmem>>, vector<1x128x128xbf16>
    %221 = vector.shape_cast %220 : vector<1x128x128xbf16> to vector<128x128xbf16>
    %cst_203 = arith.constant dense<0.000000e+00> : vector<144x128xf32>
    %222 = tpu.matmul %219, %221, %cst_203 {dimension_numbers = #tpu.dot_dimension_numbers<[1], [0], [0], [1], [0, 0, 1, 1], [], []>} : vector<144x128xbf16>, vector<128x128xbf16>, vector<144x128xf32> -> vector<144x128xf32>
    %223 = arith.addf %218, %222 : vector<144x128xf32>
    %c163_204 = arith.constant 163 : index
    %c0_205 = arith.constant 0 : index
    %224 = vector.load %arg6[%c163_204, %c0_205] : memref<342x128xbf16, #tpu.memory_space<vmem>>, vector<144x128xbf16>
    %c4_206 = arith.constant 4 : index
    %c0_207 = arith.constant 0 : index
    %c0_208 = arith.constant 0 : index
    %225 = vector.load %arg3[%c4_206, %c0_207, %c0_208] : memref<9x128x128xbf16, #tpu.memory_space<vmem>>, vector<1x128x128xbf16>
    %226 = vector.shape_cast %225 : vector<1x128x128xbf16> to vector<128x128xbf16>
    %cst_209 = arith.constant dense<0.000000e+00> : vector<144x128xf32>
    %227 = tpu.matmul %224, %226, %cst_209 {dimension_numbers = #tpu.dot_dimension_numbers<[1], [0], [0], [1], [0, 0, 1, 1], [], []>} : vector<144x128xbf16>, vector<128x128xbf16>, vector<144x128xf32> -> vector<144x128xf32>
    %228 = arith.addf %223, %227 : vector<144x128xf32>
    %c164_210 = arith.constant 164 : index
    %c0_211 = arith.constant 0 : index
    %229 = vector.load %arg6[%c164_210, %c0_211] : memref<342x128xbf16, #tpu.memory_space<vmem>>, vector<144x128xbf16>
    %c5_212 = arith.constant 5 : index
    %c0_213 = arith.constant 0 : index
    %c0_214 = arith.constant 0 : index
    %230 = vector.load %arg3[%c5_212, %c0_213, %c0_214] : memref<9x128x128xbf16, #tpu.memory_space<vmem>>, vector<1x128x128xbf16>
    %231 = vector.shape_cast %230 : vector<1x128x128xbf16> to vector<128x128xbf16>
    %cst_215 = arith.constant dense<0.000000e+00> : vector<144x128xf32>
    %232 = tpu.matmul %229, %231, %cst_215 {dimension_numbers = #tpu.dot_dimension_numbers<[1], [0], [0], [1], [0, 0, 1, 1], [], []>} : vector<144x128xbf16>, vector<128x128xbf16>, vector<144x128xf32> -> vector<144x128xf32>
    %233 = arith.addf %228, %232 : vector<144x128xf32>
    %c180_216 = arith.constant 180 : index
    %c0_217 = arith.constant 0 : index
    %234 = vector.load %arg6[%c180_216, %c0_217] : memref<342x128xbf16, #tpu.memory_space<vmem>>, vector<144x128xbf16>
    %c6_218 = arith.constant 6 : index
    %c0_219 = arith.constant 0 : index
    %c0_220 = arith.constant 0 : index
    %235 = vector.load %arg3[%c6_218, %c0_219, %c0_220] : memref<9x128x128xbf16, #tpu.memory_space<vmem>>, vector<1x128x128xbf16>
    %236 = vector.shape_cast %235 : vector<1x128x128xbf16> to vector<128x128xbf16>
    %cst_221 = arith.constant dense<0.000000e+00> : vector<144x128xf32>
    %237 = tpu.matmul %234, %236, %cst_221 {dimension_numbers = #tpu.dot_dimension_numbers<[1], [0], [0], [1], [0, 0, 1, 1], [], []>} : vector<144x128xbf16>, vector<128x128xbf16>, vector<144x128xf32> -> vector<144x128xf32>
    %238 = arith.addf %233, %237 : vector<144x128xf32>
    %c181_222 = arith.constant 181 : index
    %c0_223 = arith.constant 0 : index
    %239 = vector.load %arg6[%c181_222, %c0_223] : memref<342x128xbf16, #tpu.memory_space<vmem>>, vector<144x128xbf16>
    %c7_224 = arith.constant 7 : index
    %c0_225 = arith.constant 0 : index
    %c0_226 = arith.constant 0 : index
    %240 = vector.load %arg3[%c7_224, %c0_225, %c0_226] : memref<9x128x128xbf16, #tpu.memory_space<vmem>>, vector<1x128x128xbf16>
    %241 = vector.shape_cast %240 : vector<1x128x128xbf16> to vector<128x128xbf16>
    %cst_227 = arith.constant dense<0.000000e+00> : vector<144x128xf32>
    %242 = tpu.matmul %239, %241, %cst_227 {dimension_numbers = #tpu.dot_dimension_numbers<[1], [0], [0], [1], [0, 0, 1, 1], [], []>} : vector<144x128xbf16>, vector<128x128xbf16>, vector<144x128xf32> -> vector<144x128xf32>
    %243 = arith.addf %238, %242 : vector<144x128xf32>
    %c182_228 = arith.constant 182 : index
    %c0_229 = arith.constant 0 : index
    %244 = vector.load %arg6[%c182_228, %c0_229] : memref<342x128xbf16, #tpu.memory_space<vmem>>, vector<144x128xbf16>
    %c8_230 = arith.constant 8 : index
    %c0_231 = arith.constant 0 : index
    %c0_232 = arith.constant 0 : index
    %245 = vector.load %arg3[%c8_230, %c0_231, %c0_232] : memref<9x128x128xbf16, #tpu.memory_space<vmem>>, vector<1x128x128xbf16>
    %246 = vector.shape_cast %245 : vector<1x128x128xbf16> to vector<128x128xbf16>
    %cst_233 = arith.constant dense<0.000000e+00> : vector<144x128xf32>
    %247 = tpu.matmul %244, %246, %cst_233 {dimension_numbers = #tpu.dot_dimension_numbers<[1], [0], [0], [1], [0, 0, 1, 1], [], []>} : vector<144x128xbf16>, vector<128x128xbf16>, vector<144x128xf32> -> vector<144x128xf32>
    %248 = arith.addf %243, %247 : vector<144x128xf32>
    %249 = vector.broadcast %3 : vector<1x128xf32> to vector<144x128xf32>
    %250 = arith.mulf %248, %249 : vector<144x128xf32>
    %251 = vector.broadcast %4 : vector<1x128xf32> to vector<144x128xf32>
    %252 = arith.addf %250, %251 : vector<144x128xf32>
    %cst_234 = arith.constant 0.000000e+00 : f32
    %253 = vector.broadcast %cst_234 : f32 to vector<144x128xf32>
    %254 = arith.cmpf oge, %252, %253 : vector<144x128xf32>
    %cst_235 = arith.constant 0.00999999977 : f32
    %255 = vector.broadcast %cst_235 : f32 to vector<144x128xf32>
    %256 = arith.mulf %255, %252 : vector<144x128xf32>
    %257 = arith.select %254, %252, %256 : vector<144x128xi1>, vector<144x128xf32>
    %c0_236 = arith.constant 0 : index
    %c163_237 = arith.constant 163 : index
    %c0_238 = arith.constant 0 : index
    %258 = vector.load %arg1[%c0_236, %c163_237, %c0_238] : memref<1x342x128xbf16, #tpu.memory_space<vmem>>, vector<1x144x128xbf16>
    %259 = vector.shape_cast %258 : vector<1x144x128xbf16> to vector<144x128xbf16>
    %260 = arith.extf %259 : vector<144x128xbf16> to vector<144x128xf32>
    %261 = arith.addf %257, %260 : vector<144x128xf32>
    %c0_239 = arith.constant 0 : index
    %c144_240 = arith.constant 144 : index
    %c0_241 = arith.constant 0 : index
    %262 = vector.load %arg5[%c0_239, %c144_240, %c0_241] : memref<1x288x128xf32, #tpu.memory_space<vmem>>, vector<1x144x128xf32>
    %263 = vector.shape_cast %262 : vector<1x144x128xf32> to vector<144x128xf32>
    %264 = vector.shape_cast %261 : vector<144x128xf32> to vector<1x144x128xf32>
    tpu.vector_store %arg5[%c0_239, %c144_240, %c0_241], %264 {strides = array<i32>} : memref<1x288x128xf32, #tpu.memory_space<vmem>>, vector<1x144x128xf32>,
    return
  }
  func.func @transform_0(%arg0: i32) -> (i32, i32, i32) {
    %c0_i32 = arith.constant 0 : i32
    %c0_i32_0 = arith.constant 0 : i32
    %c0_i32_1 = arith.constant 0 : i32
    return %arg0, %c0_i32, %c0_i32_0 : i32, i32, i32
  }
  func.func @transform_1(%arg0: i32) -> (i32, i32, i32) {
    %c0_i32 = arith.constant 0 : i32
    %c0_i32_0 = arith.constant 0 : i32
    %c0_i32_1 = arith.constant 0 : i32
    %c0_i32_2 = arith.constant 0 : i32
    return %c0_i32, %c0_i32_0, %c0_i32_1 : i32, i32, i32
  }
  func.func @transform_2(%arg0: i32) -> (i32, i32, i32) {
    %c0_i32 = arith.constant 0 : i32
    %c0_i32_0 = arith.constant 0 : i32
    %c0_i32_1 = arith.constant 0 : i32
    %c0_i32_2 = arith.constant 0 : i32
    return %c0_i32, %c0_i32_0, %c0_i32_1 : i32, i32, i32
  }
  func.func @transform_3(%arg0: i32) -> (i32, i32) {
    %c0_i32 = arith.constant 0 : i32
    %c0_i32_0 = arith.constant 0 : i32
    %c0_i32_1 = arith.constant 0 : i32
    return %c0_i32, %c0_i32_0 : i32, i32
  }
  func.func @transform_4(%arg0: i32) -> (i32, i32, i32) {
    %c0_i32 = arith.constant 0 : i32
    %c0_i32_0 = arith.constant 0 : i32
    %c0_i32_1 = arith.constant 0 : i32
    return %arg0, %c0_i32, %c0_i32_0 : i32, i32, i32
  }
}

</mosaic_0001>

<bundles_post_ra>
// kernel: residual_block.1
= control target key start
LH: loop header
LB: loop body
LE: loop exit
PB: predicated region body
PF: predicated region fallthrough
CT: control target
= control target key end

     0   :  { %s17821_s15 = smov 0   ;;  %s22002_s0 = inlined_call_operand.vmem [shape: bf16[2,342,128], index: 0, kind: input, shape index: {}]   ;;  %s22003_s1 = inlined_call_operand.vmem [shape: bf16[9,128,128], index: 1, kind: input, shape index: {}]   ;;  %s22004_s2 = inlined_call_operand.vmem [shape: bf16[9,128,128], index: 2, kind: input, shape index: {}]   ;;  %s22005_s3 = inlined_call_operand.vmem [shape: f32[8,128], index: 3, kind: input, shape index: {}]   ;;  %s22006_s4 = inlined_call_operand.vmem [shape: f32[2,288,128], index: 4, kind: output, shape index: {}]  }
   0x1 LB: > { %s12516_s16 = sadd.s32 4294967295, %s17786_s15   ;;  %p12520_p0 = scmp.ge.s32.totalorder %s17786_s15, 1  ;;  %s17786_s15 = sphi %s17821_s15, %s14_s15  }
   0x2   : > { %p162_p1 = scmp.lt.s32.totalorder %s17786_s15, 3 }
   0x4   : > { %p163_p2 = pnand %p12520_p0, %p162_p1 }
   0x6   : > { %166 = sbr.rel (%p163_p2) target bundleno = 1981 (0x7bd), region = 36 }
   0xd   : > { %v17271_v0 = vld [vmem:[%s22003_s1 + $0x40] sm:$0xff]   ;;  %v22017_v1 = vmov 0.0   ;;  %v17273_v3 = vld [vmem:[%s22003_s1 + $0x48] sm:$0xff]   ;;  %vm22012_vm0 = vmmov 0   ;;  %p188_p3 = scmp.lt.s32.totalorder %s12516_s16, 1  ;;  %v17275_v5 = vld [vmem:[%s22003_s1 + $0x50] sm:$0xff]  }
   0xe   : > { %14229 = vmatprep.subr.bf16.mxu0 %v22017_v1  ;;  %14697 = vmatprep.subr.bf16.mxu1 %v22017_v1  ;;  %v17272_v2 = vld [vmem:[%s22003_s1 + $0x40] sm:$0xff]   ;;  %v17274_v4 = vld [vmem:[%s22003_s1 + $0x48] sm:$0xff]   ;;  %v17276_v6 = vld [vmem:[%s22003_s1 + $0x50] sm:$0xff]   ;;  %vm22014_vm1 = vsmask.f32 7424  ;;  %vm22008_vm2 = vcmask 1046528  }
   0xf   : > { %14230 = vmatpush3.bf16.msra.mxu0 %v17271_v0  ;;  %14245 = vmatprep.mubr.msk.bf16.mxu0 %vm22012_vm0, %v22017_v1  ;;  %s22305_s16 = smov (!%p188_p3, %s12516_s16), 1  ;;  %v17277_v7 = vld [vmem:[%s22003_s1 + $0x58] sm:$0xff]   ;;  %v17279_v9 = vld [vmem:[%s22003_s1 + $0x60] sm:$0xff]   ;;  %v17281_v11 = vld [vmem:[%s22003_s1 + $0x68] sm:$0xff]   ;;  %vm22011_vm3 = vsmask.f32 6400 }
  0x10   : > { %14698 = vmatpush3.bf16.msra.mxu1 %v17272_v2  ;;  %14231 = vmatprep.subr.bf16.mxu0 %v22017_v1  ;;  %s17253_s29 = smul.u32 172, %s22305_s16  ;;  %v17278_v8 = vld [vmem:[%s22003_s1 + $0x58] sm:$0xff]   ;;  %v17280_v10 = vld [vmem:[%s22003_s1 + $0x60] sm:$0xff]   ;;  %v17282_v19 = vld [vmem:[%s22003_s1 + $0x68] sm:$0xff]   ;;  %vm22010_vm4 = vcmask 1045504   ;;  %vm278_vm6 = vcmask 1041408  }
  0x11   : > { %14699 = vmatprep.subr.bf16.mxu1 %v22017_v1  ;;  %14713 = vmatprep.mubr.msk.bf16.mxu1 %vm22012_vm0, %v22017_v1  ;;  %v17283_v22 = vld [vmem:[%s22003_s1 + $0x70] sm:$0xff]   ;;  %v17285_v31 = vld [vmem:[%s22003_s1 + $0x78] sm:$0xff]   ;;  %v17291_v39 = vld [vmem:[%s22003_s1] sm:$0xff]   ;;  %vm22009_vm5 = vsmask.f32 5376  ;;  %vm284_vm9 = vcmask 1043457  }
  0x12   : > { %s17871_s10 = scalar_lea.vmem %s22002_s0, %s17253_s29  ;;  %v17284_v23 = vld [vmem:[%s22003_s1 + $0x70] sm:$0xff]   ;;  %v17286_v36 = vld [vmem:[%s22003_s1 + $0x78] sm:$0xff]   ;;  %v17294_v46 = vld [vmem:[%s22003_s1 + $0x8] sm:$0xff]   ;;  %vm279_vm7 = vsmask.f32 1280  ;;  %vm22007_vm12 = vcmask 1044480  }
  0x13   : > { %14232 = vmatpush3.bf16.msra.mxu0 %v17273_v3  ;;  %v294_v12 = vld [vmem:[%s17871_s10] sm:$0xf]  ;;  %v295_v13 = vld [vmem:[%s17871_s10 + $0x4] sm:$0xf]  ;;  %v17889_v15 = vld [vmem:[%s17871_s10 + $0x8] sm:$0xff]   ;;  %s17254_s25 = smul.u32 288, %s22305_s16 }
  0x14   : > { %14700 = vmatpush3.bf16.msra.mxu1 %v17274_v4  ;;  %14233 = vmatprep.subr.bf16.mxu0 %v22017_v1  ;;  %v17886_v14 = vcombine.low %v294_v12, %v295_v13  ;;  %v17892_v16 = vld [vmem:[%s17871_s10 + $0x50] sm:$0xff]   ;;  %v3845_v17 = vld [vmem:[%s17871_s10 + $0x48] sm:$0xf]  ;;  %v3846_v18 = vld [vmem:[%s17871_s10 + $0x4c] sm:$0xf]  ;;  %v403_v27 = vshll.u32 %v17889_v15, 16 }
  0x15   : > { %14701 = vmatprep.subr.bf16.mxu1 %v22017_v1  ;;  %v17901_v21 = vcombine.low %v3845_v17, %v3846_v18  ;;  %v3952_v28 = vshll.u32 %v17892_v16, 16  ;;  %v17921_v32 = vld [vmem:[%s17871_s10 + $0x10] sm:$0xff]   ;;  %v17924_v35 = vld [vmem:[%s17871_s10 + $0x58] sm:$0xff]   ;;  %v407_v40 = vshrl.u32 %v17889_v15, 16  ;;  %v3956_v45 = vshrl.u32 %v17892_v16, 16  ;;  %v17949_v51 = vld [vmem:[%s17871_s10 + $0x60] sm:$0xff]   ;;  %s21836_s28 = scalar_lea.vmem %s22006_s4, %s17254_s25 }
  0x16   : > { %v398_v20 = vshll.u32 %v17886_v14, 16  ;;  %v396_v25 = vshrl.u32 %v17886_v14, 16  ;;  %v405_v34 = vrot.slane %v403_v27, 1  ;;  %v411_v42 = vshll.u32 %v17921_v32, 16  ;;  %v17946_v50 = vld [vmem:[%s17871_s10 + $0x18] sm:$0xff]   ;;  %v17306_v57 = vld [vmem:[%s22003_s1] sm:$0xff]   ;;  %vm19138_vm8 = vmand %vm278_vm6, %vm279_vm7 }
  0x17   : > { %14234 = vmatpush3.bf16.msra.mxu0 %v17275_v5  ;;  %v3947_v24 = vshll.u32 %v17901_v21, 16  ;;  %v3945_v29 = vshrl.u32 %v17901_v21, 16  ;;  %v3954_v38 = vrot.slane %v3952_v28, 1  ;;  %v3960_v43 = vshll.u32 %v17924_v35, 16  ;;  %v17297_v60 = vld [vmem:[%s22003_s1 + $0x10] sm:$0xff]   ;;  %v17307_v61 = vld [vmem:[%s22003_s1 + $0x8] sm:$0xff]  }
  0x18   : > { %14702 = vmatpush3.bf16.msra.mxu1 %v17276_v6  ;;  %14235 = vmatprep.subr.bf16.mxu0 %v22017_v1  ;;  %v400_v26 = vrot.slane %v398_v20, 1  ;;  %v409_v47 = vor.u32 %v407_v40, %v405_v34  ;;  %v413_v48 = vrot.slane %v411_v42, 1  ;;  %v415_v54 = vshrl.u32 %v17921_v32, 16  ;;  %v17973_v62 = vld [vmem:[%s17871_s10 + $0x20] sm:$0xff]   ;;  %v17979_v2 = vld [vmem:[%s17871_s10 + $0x68] sm:$0xff]   ;;  %v17300_v5 = vld [vmem:[%s22003_s1 + $0x18] sm:$0xff]  }
  0x19   : > { %14703 = vmatprep.subr.bf16.mxu1 %v22017_v1  ;;  %v3949_v30 = vrot.slane %v3947_v24, 1  ;;  %v3962_v49 = vrot.slane %v3960_v43, 1  ;;  %v3958_v52 = vor.u32 %v3956_v45, %v3954_v38  ;;  %v419_v55 = vshll.u32 %v17946_v50, 16  ;;  %v17311_v6 = vld [vmem:[%s22003_s1 + $0x10] sm:$0xff]   ;;  %v17303_v13 = vld [vmem:[%s22003_s1 + $0x20] sm:$0xff]   ;;  %v17312_v17 = vld [vmem:[%s22003_s1 + $0x18] sm:$0xff]  }
  0x1a   : > { %v401_v33 = vor.u32 %v400_v26, %v396_v25  ;;  %v414_v53 = vsel %vm22014_vm1, %v409_v47, %v413_v48  ;;  %v3964_v56 = vshrl.u32 %v17924_v35, 16  ;;  %v3968_v59 = vshll.u32 %v17949_v51, 16  ;;  %v18008_v20 = vld [vmem:[%s17871_s10 + $0x28] sm:$0xff]   ;;  %v18013_v24 = vld [vmem:[%s17871_s10 + $0x70] sm:$0xff]   ;;  %v17316_v26 = vld [vmem:[%s22003_s1 + $0x20] sm:$0xff]  }
  0x1b   : > { %14236 = vmatpush3.bf16.msra.mxu0 %v17277_v7  ;;  %v3950_v37 = vor.u32 %v3949_v30, %v3945_v29  ;;  %v3963_v58 = vsel %vm22014_vm1, %v3958_v52, %v3962_v49  ;;  %v417_v63 = vor.u32 %v415_v54, %v413_v48  ;;  %v421_v0 = vrot.slane %v419_v55, 1  ;;  %v17308_v25 = vld [vmem:[%s22003_s1 + $0x28] sm:$0xff]   ;;  %v18043_v40 = vld [vmem:[%s17871_s10 + $0x78] sm:$0xff]  }
  0x1c   : > { %14704 = vmatpush3.bf16.msra.mxu1 %v17278_v8  ;;  %14237 = vmatprep.subr.bf16.mxu0 %v22017_v1  ;;  %v406_v41 = vsel %vm22014_vm1, %v401_v33, %v405_v34  ;;  %v3966_v3 = vor.u32 %v3964_v56, %v3962_v49  ;;  %v3970_v4 = vrot.slane %v3968_v59, 1  ;;  %v423_v7 = vshrl.u32 %v17946_v50, 16  ;;  %v17313_v34 = vld [vmem:[%s22003_s1 + $0x30] sm:$0xff]   ;;  %v17319_v43 = vld [vmem:[%s22003_s1 + $0x38] sm:$0xff]   ;;  %v18074_v59 = vld [vmem:[%s17871_s10 + $0x80] sm:$0xff]  }
  0x1d   : > { %14705 = vmatprep.subr.bf16.mxu1 %v22017_v1  ;;  %v3955_v44 = vsel %vm22014_vm1, %v3950_v37, %v3954_v38  ;;  %v422_v8 = vsel %vm22014_vm1, %v417_v63, %v421_v0  ;;  %v3976_v12 = vshll.u32 %v17979_v2, 16  ;;  %v431_v28 = vshrl.u32 %v17973_v62, 16  ;;  %v18037_v37 = vld [vmem:[%s17871_s10 + $0x30] sm:$0xff]   ;;  %v18069_v56 = vld [vmem:[%s17871_s10 + $0x38] sm:$0xff]  }
  0x1e   : > { %v425_v18 = vor.u32 %v423_v7, %v421_v0  ;;  %v435_v29 = vshll.u32 %v18008_v20, 16  ;;  %v3984_v33 = vshll.u32 %v18013_v24, 16  ;;  %v443_v47 = vshll.u32 %v18037_v37, 16 }
  0x1f   : > { %14238 = vmatpush3.bf16.msra.mxu0 %v17279_v9  ;;  %v427_v9 = vshll.u32 %v17973_v62, 16  ;;  %v3988_v49 = vshrl.u32 %v18013_v24, 16  ;;  %v3992_v52 = vshll.u32 %v18043_v40, 16  ;;  %v451_v63 = vshll.u32 %v18069_v56, 16 }
  0x20   : > { %14706 = vmatpush3.bf16.msra.mxu1 %v17280_v10  ;;  %14239 = vmatprep.subr.bf16.mxu0 %v22017_v1  ;;  %v3972_v10 = vshrl.u32 %v17949_v51, 16  ;;  %v3986_v42 = vrot.slane %v3984_v33, 1  ;;  %v445_v55 = vrot.slane %v443_v47, 1  ;;  %v17324_v47 = vld [vmem:[%s22003_s1 + $0x88] sm:$0xff]   ;;  %vm285_vm10 = vsmask.f32 7942 }
  0x21   : > { %14707 = vmatprep.subr.bf16.mxu1 %v22017_v1  ;;  %v453_v7 = vrot.slane %v451_v63, 1  ;;  %vm19145_vm11 = vmand %vm284_vm9, %vm285_vm10 }
  0x23   : > { %14240 = vmatpush3.bf16.msra.mxu0 %v17281_v11  ;;  %v3971_v11 = vsel %vm22014_vm1, %v3966_v3, %v3970_v4  ;;  %v3996_v3 = vshrl.u32 %v18043_v40, 16 }
  0x24   : > { %14708 = vmatpush3.bf16.msra.mxu1 %v17282_v19  ;;  %14241 = vmatprep.subr.bf16.mxu0 %v22017_v1  ;;  %v429_v19 = vrot.slane %v427_v9, 1 }
  0x25   : > { %14709 = vmatprep.subr.bf16.mxu1 %v22017_v1 }
  0x26   : > { %v430_v27 = vsel %vm22014_vm1, %v425_v18, %v429_v19  ;;  %v433_v38 = vor.u32 %v431_v28, %v429_v19  ;;  %v4004_v19 = vshrl.u32 %v18074_v59, 16 }
  0x27   : > { %14242 = vmatpush3.bf16.msra.mxu0 %v17283_v22  ;;  %v3974_v22 = vor.u32 %v3972_v10, %v3970_v4  ;;  %v4000_v4 = vshll.u32 %v18074_v59, 16  ;;  %v18091_v10 = vld [vmem:[%s17871_s10 + $0x88] sm:$0xff]  }
  0x28   : > { %14710 = vmatpush3.bf16.msra.mxu1 %v17284_v23  ;;  %14243 = vmatprep.subr.bf16.mxu0 %v22017_v1  ;;  %v3978_v23 = vrot.slane %v3976_v12, 1 }
  0x29   : > { %14711 = vmatprep.subr.bf16.mxu1 %v22017_v1  ;;  %v4002_v9 = vrot.slane %v4000_v4, 1  ;;  %v17703_v4 = vld [vmem:[%s17871_s10 + $0x10] sm:$0xff]  }
  0x2a   : > { %v3979_v30 = vsel %vm22014_vm1, %v3974_v22, %v3978_v23  ;;  %v4008_v22 = vshll.u32 %v18091_v10, 16 }
  0x2b   : > { %14244 = vmatpush3.bf16.msra.mxu0 %v17285_v31  ;;  %v3980_v31 = vshrl.u32 %v17979_v2, 16  ;;  %v4006_v28 = vor.u32 %v4004_v19, %v4002_v9  ;;  %v17706_v19 = vld [vmem:[%s17871_s10 + $0x60] sm:$0xff]  }
  0x2c   : > { %14712 = vmatpush3.bf16.msra.mxu1 %v17286_v36  ;;  %14281 = vmatprep.subr.bf16.mxu0 %v22017_v1  ;;  %v17317_v36 = vld [vmem:[%s22003_s1 + $0x28] sm:$0xff]  }
  0x2d   : > { %14749 = vmatprep.subr.bf16.mxu1 %v22017_v1 }
  0x2e   : > { %14246 = vmatmul.mubr.bf16.vlgmr.msra.gmra.mrb[0].mxu0 %v406_v41  ;;  %v3982_v41 = vor.u32 %v3980_v31, %v3978_v23  ;;  %v17320_v23 = vld [vmem:[%s17871_s10 + $0x90] ss:$0 sps:$4 sm:$0x11]  }
  0x2f   : > { %14714 = vmatmul.mubr.bf16.vlgmr.msra.gmra.mrb[0].mxu1 %v3955_v44  ;;  %14282 = vmatpush3.bf16.msra.mxu0 %v17291_v39  ;;  %v437_v39 = vrot.slane %v435_v29, 1  ;;  %v17321_v44 = vld [vmem:[%s22003_s1 + $0x30] sm:$0xff]   ;;  %v4010_v29 = vrot.slane %v4008_v22, 1  ;;  %v4369_v22 = vrot.slane %v17706_v19, 1  ;;  %v18399_v19 = vld [vmem:[%s17871_s10 + $0x18] sm:$0xff]  }
  0x30   : > { %14249 = vmatprep.mubr.msk.bf16.mxu0 %vm22012_vm0, %v22017_v1  ;;  %14717 = vmatprep.mubr.msk.bf16.mxu1 %vm22012_vm0, %v22017_v1  ;;  %v3987_v48 = vsel %vm22014_vm1, %v3982_v41, %v3986_v42 }
  0x31   : > { %14283 = vmatprep.subr.bf16.mxu0 %v22017_v1  ;;  %14750 = vmatpush3.bf16.msra.mxu1 %v17306_v57  ;;  %v438_v45 = vsel %vm22014_vm1, %v433_v38, %v437_v39  ;;  %v3990_v57 = vor.u32 %v3988_v49, %v3986_v42  ;;  %v4011_v33 = vsel %vm22014_vm1, %v4006_v28, %v4010_v29  ;;  %v17326_v49 = vld [vmem:[%s22003_s1 + $0x98] sm:$0xff]  }
  0x32   : > { %14751 = vmatprep.subr.bf16.mxu1 %v22017_v1 }
  0x33   : > { %14284 = vmatpush3.bf16.msra.mxu0 %v17294_v46  ;;  %v439_v46 = vshrl.u32 %v18008_v20, 16 }
  0x34   : > { %14285 = vmatprep.subr.bf16.mxu0 %v22017_v1 }
  0x35   : > { %14752 = vmatpush3.bf16.msra.mxu1 %v17307_v61  ;;  %v441_v54 = vor.u32 %v439_v46, %v437_v39  ;;  %v447_v61 = vshrl.u32 %v18037_v37, 16  ;;  %v17328_v46 = vld [vmem:[%s22003_s1 + $0x80] sm:$0xff]  }
  0x36   : > { %14250 = vmatmul.mubr.bf16.gmra.mrb[4].mxu0 %v414_v53  ;;  %14753 = vmatprep.subr.bf16.mxu1 %v22017_v1  ;;  %v17322_v53 = vld [vmem:[%s22003_s1 + $0x38] sm:$0xff]  }
  0x37   : > { %14718 = vmatmul.mubr.bf16.gmra.mrb[4].mxu1 %v3963_v58  ;;  %14253 = vmatprep.mubr.msk.bf16.mxu0 %vm22012_vm0, %v22017_v1  ;;  %v3994_v58 = vrot.slane %v3992_v52, 1  ;;  %v17334_v52 = vld [vmem:[%s22003_s1 + $0xa0] sm:$0xff]  }
  0x38   : > { %14721 = vmatprep.mubr.msk.bf16.mxu1 %vm22012_vm0, %v22017_v1  ;;  %14286 = vmatpush3.bf16.msra.mxu0 %v17297_v60  ;;  %v446_v60 = vsel %vm22014_vm1, %v441_v54, %v445_v55  ;;  %v17335_v54 = vld [vmem:[%s22003_s1 + $0xa8] sm:$0xff]  }
  0x39   : > { %14287 = vmatprep.subr.bf16.mxu0 %v22017_v1  ;;  %14754 = vmatpush3.bf16.msra.mxu1 %v17311_v6  ;;  %v3995_v0 = vsel %vm22014_vm1, %v3990_v57, %v3994_v58  ;;  %v449_v6 = vor.u32 %v447_v61, %v445_v55  ;;  %v17336_v55 = vld [vmem:[%s22003_s1 + $0xb8] sm:$0xff]   ;;  %v17341_v61 = vld [vmem:[%s22003_s1 + $0xc0] sm:$0xff]  }
  0x3a   : > { %14755 = vmatprep.subr.bf16.mxu1 %v22017_v1  ;;  %v17338_v57 = vld [vmem:[%s22003_s1 + $0xb8] sm:$0xff]  }
  0x3c   : > { %14288 = vmatpush3.bf16.msra.mxu0 %v17300_v5  ;;  %v18084_v5 = vld [vmem:[%s17871_s10 + $0x40] sm:$0xff]  }
  0x3d   : > { %14289 = vmatprep.subr.bf16.mxu0 %v22017_v1  ;;  %14756 = vmatpush3.bf16.msra.mxu1 %v17312_v17  ;;  %v459_v12 = vshll.u32 %v18084_v5, 16  ;;  %v454_v17 = vsel %vm22014_vm1, %v449_v6, %v453_v7  ;;  %v17342_v6 = vld [vmem:[%s22003_s1 + $0xc8] sm:$0xff]  }
  0x3e   : > { %14254 = vmatmul.mubr.bf16.gmra.mrb[8].mxu0 %v422_v8  ;;  %14757 = vmatprep.subr.bf16.mxu1 %v22017_v1  ;;  %v3998_v8 = vor.u32 %v3996_v3, %v3994_v58  ;;  %v17346_v3 = vld [vmem:[%s22003_s1 + $0xc0] sm:$0xff]  }
  0x3f   : > { %14722 = vmatmul.mubr.bf16.gmra.mrb[8].mxu1 %v3971_v11  ;;  %14257 = vmatprep.mubr.msk.bf16.mxu0 %vm22012_vm0, %v22017_v1  ;;  %v455_v11 = vshrl.u32 %v18069_v56, 16 }
  0x40   : > { %14725 = vmatprep.mubr.msk.bf16.mxu1 %vm22012_vm0, %v22017_v1  ;;  %14290 = vmatpush3.bf16.msra.mxu0 %v17303_v13  ;;  %v17318_v13 = vld [vmem:[%s17871_s10 + $0x48] ss:$0 sps:$4 sm:$0x11]   ;;  %v4003_v18 = vsel %vm22014_vm1, %v3998_v8, %v4002_v9 }
  0x41   : > { %14291 = vmatprep.subr.bf16.mxu0 %v22017_v1  ;;  %14758 = vmatpush3.bf16.msra.mxu1 %v17316_v26  ;;  %v461_v26 = vrot.slane %v459_v12, 1  ;;  %v17347_v9 = vld [vmem:[%s22003_s1 + $0xc8] sm:$0xff]  }
  0x42   : > { %14759 = vmatprep.subr.bf16.mxu1 %v22017_v1 }
  0x44   : > { %14292 = vmatpush3.bf16.msra.mxu0 %v17308_v25  ;;  %v457_v25 = vor.u32 %v455_v11, %v453_v7  ;;  %v17704_v7 = vld [vmem:[%s17871_s10 + $0x58] sm:$0xff]  }
  0x45   : > { %14293 = vmatprep.subr.bf16.mxu0 %v22017_v1  ;;  %14760 = vmatpush3.bf16.msra.mxu1 %v17317_v36  ;;  %v4016_v36 = vshll.u32 %v17320_v23, 16  ;;  %v4367_v8 = vrot.slane %v17704_v7, 1  ;;  %v17344_v23 = vld [vmem:[%s22003_s1 + $0xd8] sm:$0xff]  }
  0x46   : > { %14258 = vmatmul.mubr.bf16.gmra.mrb[12].mxu0 %v430_v27  ;;  %14761 = vmatprep.subr.bf16.mxu1 %v22017_v1  ;;  %v463_v27 = vshrl.u32 %v18084_v5, 16  ;;  %v462_v31 = vsel %vm22014_vm1, %v457_v25, %v461_v26  ;;  %v17350_v25 = vld [vmem:[%s22003_s1 + $0xd8] sm:$0xff]  }
  0x47   : > { %14726 = vmatmul.mubr.bf16.gmra.mrb[12].mxu1 %v3979_v30  ;;  %14261 = vmatprep.mubr.msk.bf16.mxu0 %vm22012_vm0, %v22017_v1  ;;  %v467_v30 = vshll.u32 %v17318_v13, 16  ;;  %v4018_v42 = vrot.slane %v4016_v36, 1  ;;  %v17349_v13 = vld [vmem:[%s22003_s1 + $0xd0] sm:$0xff]   ;;  %v4370_v28 = vsel %vm22008_vm2, %v4367_v8, %v4369_v22  ;;  %v17348_v36 = vld [vmem:[%s22003_s1 + $0xe8] sm:$0xff]  }
  0x48   : > { %14729 = vmatprep.mubr.msk.bf16.mxu1 %vm22012_vm0, %v22017_v1  ;;  %14294 = vmatpush3.bf16.msra.mxu0 %v17313_v34  ;;  %v4012_v34 = vshrl.u32 %v18091_v10, 16  ;;  %v465_v38 = vor.u32 %v463_v27, %v461_v26  ;;  %v17345_v27 = vld [vmem:[%s22003_s1 + $0xe0] sm:$0xff]  }
  0x49   : > { %14295 = vmatprep.subr.bf16.mxu0 %v22017_v1  ;;  %14762 = vmatpush3.bf16.msra.mxu1 %v17321_v44  ;;  %v469_v39 = vrot.slane %v467_v30, 1  ;;  %v17707_v30 = vld [vmem:[%s17871_s10 + $0x20] sm:$0xff]  }
  0x4a   : > { %14763 = vmatprep.subr.bf16.mxu1 %v22017_v1  ;;  %v4014_v41 = vor.u32 %v4012_v34, %v4010_v29  ;;  %v17352_v29 = vld [vmem:[%s22003_s1 + $0xe0] sm:$0xff]  }
  0x4c   : > { %14296 = vmatpush3.bf16.msra.mxu0 %v17319_v43  ;;  %v470_v43 = vsel %vm22014_vm1, %v465_v38, %v469_v39  ;;  %v4019_v44 = vsel %vm22014_vm1, %v4014_v41, %v4018_v42  ;;  %v17353_v38 = vld [vmem:[%s22003_s1 + $0xe8] sm:$0xff]   ;;  %v17351_v39 = vld [vmem:[%s22003_s1 + $0xf0] sm:$0xff]  }
  0x4d   : > { %14333 = vmatprep.subr.bf16.mxu0 %v22017_v1  ;;  %14764 = vmatpush3.bf16.msra.mxu1 %v17322_v53  ;;  %v17330_v53 = vld [vmem:[%s22003_s1 + $0xa8] sm:$0xff]   ;;  %v17355_v42 = vld [vmem:[%s22003_s1 + $0xf0] sm:$0xff]  }
  0x4e   : > { %14262 = vmatmul.mubr.bf16.gmra.mrb[16].mxu0 %v438_v45  ;;  %14801 = vmatprep.subr.bf16.mxu1 %v22017_v1  ;;  %v17323_v45 = vld [vmem:[%s22003_s1 + $0x80] sm:$0xff]  }
  0x4f   : > { %14730 = vmatmul.mubr.bf16.gmra.mrb[16].mxu1 %v3987_v48  ;;  %14265 = vmatprep.mubr.msk.bf16.mxu0 %vm22012_vm0, %v22017_v1  ;;  %v17329_v48 = vld [vmem:[%s22003_s1 + $0x88] sm:$0xff]  }
  0x50   : > { %14733 = vmatprep.mubr.msk.bf16.mxu1 %vm22012_vm0, %v22017_v1 }
  0x56   : > { %14266 = vmatmul.mubr.bf16.gmra.mrb[20].mxu0 %v446_v60 }
  0x57   : > { %14734 = vmatmul.mubr.bf16.gmra.mrb[20].mxu1 %v3995_v0  ;;  %14269 = vmatprep.mubr.msk.bf16.mxu0 %vm22012_vm0, %v22017_v1 }
  0x58   : > { %14737 = vmatprep.mubr.msk.bf16.mxu1 %vm22012_vm0, %v22017_v1 }
  0x5e   : > { %14270 = vmatmul.mubr.bf16.gmra.mrb[24].mxu0 %v454_v17  ;;  %v17705_v17 = vld [vmem:[%s17871_s10 + $0x18] sm:$0xff]  }
  0x5f   : > { %14738 = vmatmul.mubr.bf16.gmra.mrb[24].mxu1 %v4003_v18  ;;  %14273 = vmatprep.mubr.msk.bf16.mxu0 %vm22012_vm0, %v22017_v1  ;;  %v822_v18 = vrot.slane %v17705_v17, 1 }
  0x60   : > { %14741 = vmatprep.mubr.msk.bf16.mxu1 %vm22012_vm0, %v22017_v1 }
  0x66   : > { %14274 = vmatmul.mubr.bf16.gmra.mrb[28].mxu0 %v462_v31  ;;  %v824_v31 = vrot.slane %v17707_v30, 1  ;;  %v18420_v30 = vld [vmem:[%s17871_s10 + $0x20] sm:$0xff]  }
  0x67   : > { %14742 = vmatmul.mubr.bf16.gmra.mrb[28].mxu1 %v4011_v33  ;;  %14277 = vmatprep.mubr.msk.bf16.mxu0 %vm22012_vm0, %v22017_v1  ;;  %v17708_v33 = vld [vmem:[%s17871_s10 + $0x68] sm:$0xff]  }
  0x68   : > { %14745 = vmatprep.mubr.msk.bf16.mxu1 %vm22012_vm0, %v22017_v1  ;;  %v4371_v34 = vrot.slane %v17708_v33, 1  ;;  %v825_v41 = vsel %vm22008_vm2, %v822_v18, %v824_v31  ;;  %v18426_v33 = vld [vmem:[%s17871_s10 + $0x68] sm:$0xff]  }
  0x6e   : > { %14278 = vmatmul.mubr.bf16.gmra.mrb[32].mxu0 %v470_v43  ;;  %v4372_v43 = vsel %vm22008_vm2, %v4369_v22, %v4371_v34  ;;  %v18402_v22 = vld [vmem:[%s17871_s10 + $0x60] sm:$0xff]  }
  0x6f   : > { %14746 = vmatmul.mubr.bf16.gmra.mrb[32].mxu1 %v4019_v44  ;;  %14297 = vmatprep.mubr.msk.bf16.mxu0 %vm22012_vm0, %v22017_v1  ;;  %v17709_v44 = vld [vmem:[%s17871_s10 + $0x28] sm:$0xff]  }
  0x70   : > { %14765 = vmatprep.mubr.msk.bf16.mxu1 %vm22012_vm0, %v22017_v1 }
  0x76   : > { %14298 = vmatmul.mubr.bf16.vlgmr.msra.gmra.mrb[0].mxu0 %v17886_v14  ;;  %v17325_v14 = vld [vmem:[%s22003_s1 + $0x90] sm:$0xff]  }
  0x77   : > { %14766 = vmatmul.mubr.bf16.vlgmr.msra.gmra.mrb[0].mxu1 %v17901_v21  ;;  %14334 = vmatpush3.bf16.msra.mxu0 %v17323_v45  ;;  %v17331_v21 = vld [vmem:[%s22003_s1 + $0x90] sm:$0xff]   ;;  %v826_v45 = vrot.slane %v17709_v44, 1  ;;  %v18449_v44 = vld [vmem:[%s17871_s10 + $0x28] sm:$0xff]  }
  0x78   : > { %14301 = vmatprep.mubr.msk.bf16.mxu0 %vm22012_vm0, %v22017_v1  ;;  %14769 = vmatprep.mubr.msk.bf16.mxu1 %vm22012_vm0, %v22017_v1 }
  0x79   : > { %14335 = vmatprep.subr.bf16.mxu0 %v22017_v1  ;;  %14802 = vmatpush3.bf16.msra.mxu1 %v17328_v46  ;;  %v17710_v46 = vld [vmem:[%s17871_s10 + $0x70] sm:$0xff]  }
  0x7a   : > { %14803 = vmatprep.subr.bf16.mxu1 %v22017_v1 }
  0x7b   : > { %14336 = vmatpush3.bf16.msra.mxu0 %v17324_v47  ;;  %v4373_v47 = vrot.slane %v17710_v46, 1  ;;  %v18456_v46 = vld [vmem:[%s17871_s10 + $0x70] sm:$0xff]  }
  0x7c   : > { %14337 = vmatprep.subr.bf16.mxu0 %v22017_v1 }
  0x7d   : > { %14804 = vmatpush3.bf16.msra.mxu1 %v17329_v48  ;;  %v17354_v48 = vld [vmem:[%s22003_s1 + $0xf8] sm:$0xff]  }
  0x7e   : > { %14302 = vmatmul.mubr.bf16.gmra.mrb[4].mxu0 %v17889_v15  ;;  %14805 = vmatprep.subr.bf16.mxu1 %v22017_v1  ;;  %v17332_v15 = vld [vmem:[%s22003_s1 + $0x98] sm:$0xff]  }
  0x7f   : > { %14770 = vmatmul.mubr.bf16.gmra.mrb[4].mxu1 %v17892_v16  ;;  %14305 = vmatprep.mubr.msk.bf16.mxu0 %vm22012_vm0, %v22017_v1  ;;  %v17327_v16 = vld [vmem:[%s22003_s1 + $0xa0] sm:$0xff]  }
  0x80   : > { %14773 = vmatprep.mubr.msk.bf16.mxu1 %vm22012_vm0, %v22017_v1  ;;  %14338 = vmatpush3.bf16.msra.mxu0 %v17325_v14  ;;  %v17356_v14 = vld [vmem:[%s22003_s1 + $0xf8] sm:$0xff]  }
  0x81   : > { %14339 = vmatprep.subr.bf16.mxu0 %v22017_v1  ;;  %14806 = vmatpush3.bf16.msra.mxu1 %v17331_v21  ;;  %v827_v21 = vsel %vm22008_vm2, %v824_v31, %v826_v45  ;;  %v17377_v31 = vld [vmem:[%s22003_s1 + $0x108] sm:$0xff]  }
  0x82   : > { %14807 = vmatprep.subr.bf16.mxu1 %v22017_v1 }
  0x84   : > { %14340 = vmatpush3.bf16.msra.mxu0 %v17326_v49  ;;  %v4374_v49 = vsel %vm22008_vm2, %v4371_v34, %v4373_v47  ;;  %v17367_v34 = vld [vmem:[%s22003_s1 + $0x110] sm:$0xff]  }
  0x85   : > { %14341 = vmatprep.subr.bf16.mxu0 %v22017_v1  ;;  %14808 = vmatpush3.bf16.msra.mxu1 %v17332_v15  ;;  %v17711_v15 = vld [vmem:[%s17871_s10 + $0x30] sm:$0xff]  }
  0x86   : > { %14306 = vmatmul.mubr.bf16.gmra.mrb[8].mxu0 %v17921_v32  ;;  %14809 = vmatprep.subr.bf16.mxu1 %v22017_v1  ;;  %v17333_v32 = vld [vmem:[%s22003_s1 + $0xb0] sm:$0xff]  }
  0x87   : > { %14774 = vmatmul.mubr.bf16.gmra.mrb[8].mxu1 %v17924_v35  ;;  %14309 = vmatprep.mubr.msk.bf16.mxu0 %vm22012_vm0, %v22017_v1  ;;  %v17337_v35 = vld [vmem:[%s22003_s1 + $0xb0] sm:$0xff]  }
  0x88   : > { %14777 = vmatprep.mubr.msk.bf16.mxu1 %vm22012_vm0, %v22017_v1  ;;  %14342 = vmatpush3.bf16.msra.mxu0 %v17327_v16  ;;  %v828_v16 = vrot.slane %v17711_v15, 1  ;;  %v17378_v15 = vld [vmem:[%s22003_s1 + $0x128] sm:$0xff]  }
  0x89   : > { %14343 = vmatprep.subr.bf16.mxu0 %v22017_v1  ;;  %14810 = vmatpush3.bf16.msra.mxu1 %v17334_v52  ;;  %v17712_v52 = vld [vmem:[%s17871_s10 + $0x78] sm:$0xff]  }
  0x8a   : > { %14811 = vmatprep.subr.bf16.mxu1 %v22017_v1 }
  0x8c   : > { %14344 = vmatpush3.bf16.msra.mxu0 %v17330_v53  ;;  %v4375_v53 = vrot.slane %v17712_v52, 1  ;;  %v17387_v52 = vld [vmem:[%s22003_s1 + $0x128] sm:$0xff]  }
  0x8d   : > { %14345 = vmatprep.subr.bf16.mxu0 %v22017_v1  ;;  %14812 = vmatpush3.bf16.msra.mxu1 %v17335_v54  ;;  %v829_v54 = vsel %vm22008_vm2, %v826_v45, %v828_v16  ;;  %v17382_v45 = vld [vmem:[%s22003_s1 + $0x118] sm:$0xff]  }
  0x8e   : > { %14310 = vmatmul.mubr.bf16.gmra.mrb[12].mxu0 %v17946_v50  ;;  %14813 = vmatprep.subr.bf16.mxu1 %v22017_v1  ;;  %v795_v50 = vld [vmem:[%s17871_s10] sm:$0xe] }
  0x8f   : > { %14778 = vmatmul.mubr.bf16.gmra.mrb[12].mxu1 %v17949_v51  ;;  %14313 = vmatprep.mubr.msk.bf16.mxu0 %vm22012_vm0, %v22017_v1  ;;  %v4344_v51 = vld [vmem:[%s17871_s10 + $0x48] sm:$0xe] }
  0x90   : > { %14781 = vmatprep.mubr.msk.bf16.mxu1 %vm22012_vm0, %v22017_v1  ;;  %14346 = vmatpush3.bf16.msra.mxu0 %v17333_v32  ;;  %v4376_v32 = vsel %vm22008_vm2, %v4373_v47, %v4375_v53 }
  0x91   : > { %14347 = vmatprep.subr.bf16.mxu0 %v22017_v1  ;;  %14814 = vmatpush3.bf16.msra.mxu1 %v17337_v35  ;;  %v17713_v35 = vld [vmem:[%s17871_s10 + $0x38] sm:$0xff]  }
  0x92   : > { %14815 = vmatprep.subr.bf16.mxu1 %v22017_v1 }
  0x94   : > { %14348 = vmatpush3.bf16.msra.mxu0 %v17336_v55  ;;  %v830_v55 = vrot.slane %v17713_v35, 1 }
  0x95   : > { %14816 = vmatpush3.bf16.msra.mxu1 %v17338_v57  ;;  %14385 = vmatprep.subr.bf16.mxu0 %v22017_v1  ;;  %v17714_v57 = vld [vmem:[%s17871_s10 + $0x80] sm:$0xff]  }
  0x96   : > { %14314 = vmatmul.mubr.bf16.gmra.mrb[16].mxu0 %v17973_v62  ;;  %14853 = vmatprep.subr.bf16.mxu1 %v22017_v1  ;;  %v17699_v62 = vld [vmem:[%s17871_s10 + $0x4] sm:$0xf] }
  0x97   : > { %14782 = vmatmul.mubr.bf16.gmra.mrb[16].mxu1 %v17979_v2  ;;  %14317 = vmatprep.mubr.msk.bf16.mxu0 %vm22012_vm0, %v22017_v1  ;;  %v12581_v2 = vcombine.low %v795_v50, %v17699_v62  ;;  %v4377_v50 = vrot.slane %v17714_v57, 1  ;;  %v17391_v57 = vld [vmem:[%s22003_s1 + $0x130] sm:$0xff]  }
  0x98   : > { %14785 = vmatprep.mubr.msk.bf16.mxu1 %vm22012_vm0, %v22017_v1 }
  0x99   : > { %v4378_v62 = vsel %vm22008_vm2, %v4375_v53, %v4377_v50  ;;  %v18482_v53 = vld [vmem:[%s17871_s10 + $0x30] sm:$0xff]  }
  0x9e   : > { %14318 = vmatmul.mubr.bf16.gmra.mrb[20].mxu0 %v18008_v20  ;;  %v17700_v20 = vld [vmem:[%s17871_s10 + $0x4c] sm:$0xf] }
  0x9f   : > { %14786 = vmatmul.mubr.bf16.gmra.mrb[20].mxu1 %v18013_v24  ;;  %14321 = vmatprep.mubr.msk.bf16.mxu0 %vm22012_vm0, %v22017_v1  ;;  %v12834_v24 = vcombine.low %v4344_v51, %v17700_v20  ;;  %v831_v51 = vsel %vm22008_vm2, %v828_v16, %v830_v55  ;;  %v4653_v16 = vrot.slane %v18456_v46, 1 }
  0xa0   : > { %14789 = vmatprep.mubr.msk.bf16.mxu1 %vm22012_vm0, %v22017_v1 }
  0xa1   : > { %v4364_v58 = vrot.slane %v12834_v24, 1  ;;  %v17716_v24 = vld [vmem:[%s17871_s10 + $0x88] sm:$0xff]  }
  0xa6   : > { %14322 = vmatmul.mubr.bf16.gmra.mrb[24].mxu0 %v18037_v37  ;;  %v817_v37 = vrot.slane %v12581_v2, 1  ;;  %v17715_v2 = vld [vmem:[%s17871_s10 + $0x40] sm:$0xff]  }
  0xa7   : > { %14790 = vmatmul.mubr.bf16.gmra.mrb[24].mxu1 %v18043_v40  ;;  %14325 = vmatprep.mubr.msk.bf16.mxu0 %vm22012_vm0, %v22017_v1  ;;  %v17701_v40 = vld [vmem:[%s17871_s10 + $0x8] sm:$0xff]   ;;  %v832_v20 = vrot.slane %v17715_v2, 1  ;;  %v17392_v2 = vld [vmem:[%s22003_s1 + $0x138] sm:$0xff]  }
  0xa8   : > { %14793 = vmatprep.mubr.msk.bf16.mxu1 %vm22012_vm0, %v22017_v1 }
  0xae   : > { %14326 = vmatmul.mubr.bf16.gmra.mrb[28].mxu0 %v18069_v56  ;;  %v818_v56 = vrot.slane %v17701_v40, 1  ;;  %v833_v40 = vsel %vm22008_vm2, %v830_v55, %v832_v20 }
  0xaf   : > { %14794 = vmatmul.mubr.bf16.gmra.mrb[28].mxu1 %v18074_v59  ;;  %14329 = vmatprep.mubr.msk.bf16.mxu0 %vm22012_vm0, %v22017_v1  ;;  %v17702_v59 = vld [vmem:[%s17871_s10 + $0x50] sm:$0xff]  }
  0xb0   : > { %14797 = vmatprep.mubr.msk.bf16.mxu1 %vm22012_vm0, %v22017_v1  ;;  %v4365_v60 = vrot.slane %v17702_v59, 1  ;;  %v819_v63 = vsel %vm22008_vm2, %v817_v37, %v818_v56  ;;  %v4379_v37 = vrot.slane %v17716_v24, 1 }
  0xb2   : > { %v4366_v0 = vsel %vm22008_vm2, %v4364_v58, %v4365_v60  ;;  %v4368_v12 = vsel %vm22008_vm2, %v4365_v60, %v4367_v8  ;;  %v17717_v58 = vld [vmem:[%s17871_s10 + $0x48] ss:$0 sps:$4 sm:$0x11]   ;;  %v17718_v60 = vld [vmem:[%s17871_s10 + $0x90] ss:$0 sps:$4 sm:$0x11]  }
  0xb3   : > { %v834_v59 = vrot.slane %v17717_v58, 1 }
  0xb5   : > { %v835_v7 = vsel %vm22008_vm2, %v832_v20, %v834_v59  ;;  %v18512_v20 = vld [vmem:[%s17871_s10 + $0x38] sm:$0xff]   ;;  %v18530_v59 = vld [vmem:[%s17871_s10 + $0x40] sm:$0xff]  }
  0xb6   : > { %14330 = vmatmul.mubr.bf16.gmra.mrb[32].mxu0 %v18084_v5  ;;  %v820_v5 = vrot.slane %v17703_v4, 1  ;;  %v4564_v4 = vld [vmem:[%s17871_s10 + $0x54] sm:$0xf] }
  0xb7   : > { %14798 = vmatmul.mubr.bf16.gmra.mrb[32].mxu1 %v18091_v10  ;;  %14349 = vmatprep.mubr.msk.bf16.mxu0 %vm22012_vm0, %v22017_v1  ;;  %v17343_v10 = vld [vmem:[%s22003_s1 + $0xd0] sm:$0xff]  }
  0xb8   : > { %14817 = vmatprep.mubr.msk.bf16.mxu1 %vm22012_vm0, %v22017_v1  ;;  %v821_v11 = vsel %vm22008_vm2, %v818_v56, %v820_v5  ;;  %v823_v26 = vsel %vm22008_vm2, %v820_v5, %v822_v18  ;;  %v4380_v56 = vsel %vm22008_vm2, %v4377_v50, %v4379_v37  ;;  %v18376_v5 = vld [vmem:[%s17871_s10 + $0x10] sm:$0xff]   ;;  %v17361_v18 = vld [vmem:[%s22003_s1 + $0x100] sm:$0xff]   ;;  %v1109_v50 = vrot.slane %v18482_v53, 1 }
  0xbe   : > { %14350 = vmatmul.mubr.bf16.vlgmr.msra.gmra.mrb[0].mxu0 %v819_v63  ;;  %v1016_v63 = vld [vmem:[%s17871_s10 + $0x8] sm:$0xe] }
  0xbf   : > { %14818 = vmatmul.mubr.bf16.vlgmr.msra.gmra.mrb[0].mxu1 %v4366_v0  ;;  %14386 = vmatpush3.bf16.msra.mxu0 %v17341_v61  ;;  %v4381_v61 = vrot.slane %v17718_v60, 1  ;;  %v1017_v0 = vld [vmem:[%s17871_s10 + $0xc] sm:$0xf] }
  0xc0   : > { %14353 = vmatprep.mubr.msk.bf16.mxu0 %vm22012_vm0, %v22017_v1  ;;  %14821 = vmatprep.mubr.msk.bf16.mxu1 %vm22012_vm0, %v22017_v1  ;;  %v18382_v8 = vcombine.low %v1016_v63, %v1017_v0  ;;  %v18535_v63 = vld [vmem:[%s17871_s10 + $0x88] sm:$0xff]   ;;  %v1113_v0 = vrot.slane %v18530_v59, 1 }
  0xc1   : > { %14387 = vmatprep.subr.bf16.mxu0 %v22017_v1  ;;  %14854 = vmatpush3.bf16.msra.mxu1 %v17346_v3  ;;  %v4563_v3 = vld [vmem:[%s17871_s10 + $0x50] sm:$0xe] }
  0xc2   : > { %14855 = vmatprep.subr.bf16.mxu1 %v22017_v1 }
  0xc3   : > { %14388 = vmatpush3.bf16.msra.mxu0 %v17342_v6  ;;  %v18379_v6 = vld [vmem:[%s17871_s10 + $0x58] sm:$0xff]  }
  0xc4   : > { %14389 = vmatprep.subr.bf16.mxu0 %v22017_v1  ;;  %v4647_v17 = vrot.slane %v18379_v6, 1 }
  0xc5   : > { %14856 = vmatpush3.bf16.msra.mxu1 %v17347_v9  ;;  %v4382_v9 = vsel %vm22008_vm2, %v4379_v37, %v4381_v61 }
  0xc6   : > { %14354 = vmatmul.mubr.bf16.gmra.mrb[4].mxu0 %v821_v11  ;;  %14857 = vmatprep.subr.bf16.mxu1 %v22017_v1  ;;  %v1100_v11 = vrot.slane %v18382_v8, 1 }
  0xc7   : > { %14822 = vmatmul.mubr.bf16.gmra.mrb[4].mxu1 %v4368_v12  ;;  %14357 = vmatprep.mubr.msk.bf16.mxu0 %vm22012_vm0, %v22017_v1  ;;  %v1101_v12 = vrot.slane %v18376_v5, 1 }
  0xc8   : > { %14825 = vmatprep.mubr.msk.bf16.mxu1 %vm22012_vm0, %v22017_v1  ;;  %14390 = vmatpush3.bf16.msra.mxu0 %v17343_v10  ;;  %v18385_v10 = vcombine.low %v4563_v3, %v4564_v4  ;;  %v4659_v3 = vrot.slane %v18535_v63, 1  ;;  %v18544_v4 = vld [vmem:[%s17871_s10 + $0x48] sm:$0xff]  }
  0xc9   : > { %14391 = vmatprep.subr.bf16.mxu0 %v22017_v1  ;;  %14858 = vmatpush3.bf16.msra.mxu1 %v17349_v13 }
  0xca   : > { %14859 = vmatprep.subr.bf16.mxu1 %v22017_v1  ;;  %v4646_v13 = vrot.slane %v18385_v10, 1 }
  0xcc   : > { %14392 = vmatpush3.bf16.msra.mxu0 %v17344_v23  ;;  %v1102_v23 = vsel %vm22008_vm2, %v1100_v11, %v1101_v12  ;;  %v18549_v11 = vld [vmem:[%s17871_s10 + $0x90] sm:$0xff]  }
  0xcd   : > { %14393 = vmatprep.subr.bf16.mxu0 %v22017_v1  ;;  %14860 = vmatpush3.bf16.msra.mxu1 %v17350_v25  ;;  %v17376_v25 = vld [vmem:[%s22003_s1 + $0x100] sm:$0xff]  }
  0xce   : > { %14358 = vmatmul.mubr.bf16.gmra.mrb[8].mxu0 %v823_v26  ;;  %14861 = vmatprep.subr.bf16.mxu1 %v22017_v1  ;;  %v4648_v26 = vsel %vm22008_vm2, %v4646_v13, %v4647_v17  ;;  %v17390_v13 = vld [vmem:[%s17871_s10 + $0x98] ss:$0 sps:$4 sm:$0x11]  }
  0xcf   : > { %14826 = vmatmul.mubr.bf16.gmra.mrb[8].mxu1 %v4370_v28  ;;  %14361 = vmatprep.mubr.msk.bf16.mxu0 %vm22012_vm0, %v22017_v1  ;;  %v17364_v28 = vld [vmem:[%s22003_s1 + $0x108] sm:$0xff]  }
  0xd0   : > { %14829 = vmatprep.mubr.msk.bf16.mxu1 %vm22012_vm0, %v22017_v1  ;;  %14394 = vmatpush3.bf16.msra.mxu0 %v17345_v27  ;;  %v1103_v27 = vrot.slane %v18399_v19, 1 }
  0xd1   : > { %14395 = vmatprep.subr.bf16.mxu0 %v22017_v1  ;;  %14862 = vmatpush3.bf16.msra.mxu1 %v17352_v29  ;;  %v4649_v29 = vrot.slane %v18402_v22, 1 }
  0xd2   : > { %14863 = vmatprep.subr.bf16.mxu1 %v22017_v1 }
  0xd4   : > { %14396 = vmatpush3.bf16.msra.mxu0 %v17348_v36  ;;  %v1104_v36 = vsel %vm22008_vm2, %v1101_v12, %v1103_v27  ;;  %v17388_v12 = vld [vmem:[%s17871_s10 + $0x50] ss:$0 sps:$4 sm:$0x11]  }
  0xd5   : > { %14397 = vmatprep.subr.bf16.mxu0 %v22017_v1  ;;  %14864 = vmatpush3.bf16.msra.mxu1 %v17353_v38  ;;  %v17381_v38 = vld [vmem:[%s22003_s1 + $0x110] sm:$0xff]  }
  0xd6   : > { %14362 = vmatmul.mubr.bf16.gmra.mrb[12].mxu0 %v825_v41  ;;  %14865 = vmatprep.subr.bf16.mxu1 %v22017_v1  ;;  %v1105_v41 = vrot.slane %v18420_v30, 1 }
  0xd7   : > { %14830 = vmatmul.mubr.bf16.gmra.mrb[12].mxu1 %v4372_v43  ;;  %14365 = vmatprep.mubr.msk.bf16.mxu0 %vm22012_vm0, %v22017_v1  ;;  %v17370_v43 = vld [vmem:[%s22003_s1 + $0x118] sm:$0xff]  }
  0xd8   : > { %14833 = vmatprep.mubr.msk.bf16.mxu1 %vm22012_vm0, %v22017_v1  ;;  %14398 = vmatpush3.bf16.msra.mxu0 %v17351_v39  ;;  %v4650_v39 = vsel %vm22008_vm2, %v4647_v17, %v4649_v29  ;;  %v1106_v47 = vsel %vm22008_vm2, %v1103_v27, %v1105_v41  ;;  %v1115_v17 = vrot.slane %v18544_v4, 1  ;;  %v4663_v27 = vrot.slane %v17390_v13, 1 }
  0xd9   : > { %14399 = vmatprep.subr.bf16.mxu0 %v22017_v1  ;;  %14866 = vmatpush3.bf16.msra.mxu1 %v17355_v42  ;;  %v4651_v42 = vrot.slane %v18426_v33, 1 }
  0xda   : > { %14867 = vmatprep.subr.bf16.mxu1 %v22017_v1 }
  0xdb   : > { %v4654_v55 = vsel %vm22008_vm2, %v4651_v42, %v4653_v16 }
  0xdc   : > { %14400 = vmatpush3.bf16.msra.mxu0 %v17354_v48  ;;  %v17373_v48 = vld [vmem:[%s22003_s1 + $0x120] sm:$0xff]  }
  0xdd   : > { %14868 = vmatpush3.bf16.msra.mxu1 %v17356_v14  ;;  %14437 = vmatprep.subr.bf16.mxu0 %v22017_v1  ;;  %v4652_v14 = vsel %vm22008_vm2, %v4649_v29, %v4651_v42  ;;  %v1325_v29 = vshll.u32 %v18382_v8, 16 }
  0xde   : > { %14366 = vmatmul.mubr.bf16.gmra.mrb[16].mxu0 %v827_v21  ;;  %14905 = vmatprep.subr.bf16.mxu1 %v22017_v1  ;;  %v17386_v21 = vld [vmem:[%s22003_s1 + $0x120] sm:$0xff]  }
  0xdf   : > { %14834 = vmatmul.mubr.bf16.gmra.mrb[16].mxu1 %v4374_v49  ;;  %14369 = vmatprep.mubr.msk.bf16.mxu0 %vm22012_vm0, %v22017_v1  ;;  %v1107_v49 = vrot.slane %v18449_v44, 1 }
  0xe0   : > { %14837 = vmatprep.mubr.msk.bf16.mxu1 %vm22012_vm0, %v22017_v1 }
  0xe1   : > { %v1108_v35 = vsel %vm22008_vm2, %v1105_v41, %v1107_v49  ;;  %v1110_v24 = vsel %vm22008_vm2, %v1107_v49, %v1109_v50  ;;  %v4877_v41 = vshll.u32 %v18379_v6, 16 }
  0xe3   : > { %v4879_v49 = vrot.slane %v4877_v41, 2 }
  0xe6   : > { %14370 = vmatmul.mubr.bf16.gmra.mrb[20].mxu0 %v829_v54  ;;  %v18486_v54 = vld [vmem:[%s17871_s10 + $0x78] sm:$0xff]  }
  0xe7   : > { %14838 = vmatmul.mubr.bf16.gmra.mrb[20].mxu1 %v4376_v32  ;;  %14373 = vmatprep.mubr.msk.bf16.mxu0 %vm22012_vm0, %v22017_v1  ;;  %v17383_v32 = vld [vmem:[%s22003_s1 + $0x130] sm:$0xff]  }
  0xe8   : > { %14841 = vmatprep.mubr.msk.bf16.mxu1 %vm22012_vm0, %v22017_v1 }
  0xee   : > { %14374 = vmatmul.mubr.bf16.gmra.mrb[24].mxu0 %v831_v51  ;;  %v17389_v51 = vld [vmem:[%s22003_s1 + $0x138] sm:$0xff]  }
  0xef   : > { %14842 = vmatmul.mubr.bf16.gmra.mrb[24].mxu1 %v4378_v62  ;;  %14377 = vmatprep.mubr.msk.bf16.mxu0 %vm22012_vm0, %v22017_v1  ;;  %v4655_v62 = vrot.slane %v18486_v54, 1 }
  0xf0   : > { %14845 = vmatprep.mubr.msk.bf16.mxu1 %vm22012_vm0, %v22017_v1 }
  0xf1   : > { %v4656_v37 = vsel %vm22008_vm2, %v4653_v16, %v4655_v62  ;;  %v1342_v16 = vshll.u32 %v18399_v19, 16 }
  0xf6   : > { %14378 = vmatmul.mubr.bf16.gmra.mrb[28].mxu0 %v833_v40  ;;  %v18519_v40 = vld [vmem:[%s17871_s10 + $0x80] sm:$0xff]  }
  0xf7   : > { %14846 = vmatmul.mubr.bf16.gmra.mrb[28].mxu1 %v4380_v56  ;;  %14381 = vmatprep.mubr.msk.bf16.mxu0 %vm22012_vm0, %v22017_v1  ;;  %v1111_v56 = vrot.slane %v18512_v20, 1  ;;  %v4657_v58 = vrot.slane %v18519_v40, 1 }
  0xf8   : > { %14849 = vmatprep.mubr.msk.bf16.mxu1 %vm22012_vm0, %v22017_v1 }
  0xf9   : > { %v1112_v60 = vsel %vm22008_vm2, %v1109_v50, %v1111_v56  ;;  %v4658_v61 = vsel %vm22008_vm2, %v4655_v62, %v4657_v58  ;;  %v17393_v50 = vld [vmem:[%s22003_s1 + $0x140] sm:$0xff]   ;;  %v1344_v62 = vrot.slane %v1342_v16, 2  ;;  %v17400_v16 = vld [vmem:[%s22003_s1 + $0x168] sm:$0xff]  }
  0xfe   : > { %14382 = vmatmul.mubr.bf16.gmra.mrb[32].mxu0 %v835_v7  ;;  %v1114_v7 = vsel %vm22008_vm2, %v1111_v56, %v1113_v0  ;;  %v17394_v56 = vld [vmem:[%s22003_s1 + $0x148] sm:$0xff]  }
  0xff   : > { %14850 = vmatmul.mubr.bf16.gmra.mrb[32].mxu1 %v4382_v9  ;;  %14401 = vmatprep.mubr.msk.bf16.mxu0 %vm22012_vm0, %v22017_v1  ;;  %v4660_v9 = vsel %vm22008_vm2, %v4657_v58, %v4659_v3  ;;  %v1348_v58 = vshrl.u32 %v18420_v30, 16 }
 0x100   : > { %14869 = vmatprep.mubr.msk.bf16.mxu1 %vm22012_vm0, %v22017_v1 }
 0x106   : > { %14402 = vmatmul.mubr.bf16.vlgmr.msra.gmra.mrb[0].mxu0 %v1102_v23  ;;  %v1116_v23 = vsel %vm22008_vm2, %v1113_v0, %v1115_v17  ;;  %v4892_v0 = vshrl.u32 %v18426_v33, 16 }
 0x107   : > { %14870 = vmatmul.mubr.bf16.vlgmr.msra.gmra.mrb[0].mxu1 %v4648_v26  ;;  %14438 = vmatpush3.bf16.msra.mxu0 %v17361_v18  ;;  %v4661_v18 = vrot.slane %v18549_v11, 1  ;;  %v1117_v26 = vrot.slane %v17388_v12, 1  ;;  %v1350_v12 = vrot.slane %v1348_v58, 1  ;;  %v4922_v58 = vshll.u32 %v18519_v40, 16 }
 0x108   : > { %14405 = vmatprep.mubr.msk.bf16.mxu0 %vm22012_vm0, %v22017_v1  ;;  %14873 = vmatprep.mubr.msk.bf16.mxu1 %vm22012_vm0, %v22017_v1 }
 0x109   : > { %14439 = vmatprep.subr.bf16.mxu0 %v22017_v1  ;;  %14906 = vmatpush3.bf16.msra.mxu1 %v17376_v25  ;;  %v4662_v25 = vsel %vm22008_vm2, %v4659_v3, %v4661_v18  ;;  %v4664_v42 = vsel %vm22008_vm2, %v4661_v18, %v4663_v27  ;;  %v4895_v3 = vshll.u32 %v18426_v33, 16  ;;  %v4894_v18 = vrot.slane %v4892_v0, 1 }
 0x10a   : > { %14907 = vmatprep.subr.bf16.mxu1 %v22017_v1 }
 0x10b   : > { %14440 = vmatpush3.bf16.msra.mxu0 %v17364_v28  ;;  %v1322_v28 = vshrl.u32 %v18382_v8, 16  ;;  %v1118_v8 = vsel %vm22008_vm2, %v1115_v17, %v1117_v26  ;;  %v17401_v26 = vld [vmem:[%s22003_s1 + $0x150] sm:$0xff]  }
 0x10c   : > { %14441 = vmatprep.subr.bf16.mxu0 %v22017_v1 }
 0x10d   : > { %14908 = vmatpush3.bf16.msra.mxu1 %v17377_v31  ;;  %v1330_v31 = vshrl.u32 %v18376_v5, 16 }
 0x10e   : > { %14406 = vmatmul.mubr.bf16.gmra.mrb[4].mxu0 %v1104_v36  ;;  %14909 = vmatprep.subr.bf16.mxu1 %v22017_v1  ;;  %v4866_v36 = vshrl.u32 %v18385_v10, 16 }
 0x10f   : > { %14874 = vmatmul.mubr.bf16.gmra.mrb[4].mxu1 %v4650_v39  ;;  %14409 = vmatprep.mubr.msk.bf16.mxu0 %vm22012_vm0, %v22017_v1  ;;  %v4874_v39 = vshrl.u32 %v18379_v6, 16 }
 0x110   : > { %14877 = vmatprep.mubr.msk.bf16.mxu1 %vm22012_vm0, %v22017_v1  ;;  %14442 = vmatpush3.bf16.msra.mxu0 %v17367_v34  ;;  %v1333_v34 = vshll.u32 %v18376_v5, 16  ;;  %v4868_v5 = vrot.slane %v4866_v36, 1  ;;  %v4904_v36 = vshll.u32 %v18456_v46, 16 }
 0x111   : > { %14443 = vmatprep.subr.bf16.mxu0 %v22017_v1  ;;  %14910 = vmatpush3.bf16.msra.mxu1 %v17381_v38  ;;  %v4869_v38 = vshll.u32 %v18385_v10, 16 }
 0x112   : > { %14911 = vmatprep.subr.bf16.mxu1 %v22017_v1 }
 0x114   : > { %14444 = vmatpush3.bf16.msra.mxu0 %v17370_v43  ;;  %v1324_v43 = vrot.slane %v1322_v28, 1  ;;  %v1357_v28 = vshrl.u32 %v18449_v44, 16 }
 0x115   : > { %14445 = vmatprep.subr.bf16.mxu0 %v22017_v1  ;;  %14912 = vmatpush3.bf16.msra.mxu1 %v17382_v45  ;;  %v1327_v45 = vrot.slane %v1325_v29, 2  ;;  %v1360_v29 = vshll.u32 %v18449_v44, 16 }
 0x116   : > { %14410 = vmatmul.mubr.bf16.gmra.mrb[8].mxu0 %v1106_v47  ;;  %14913 = vmatprep.subr.bf16.mxu1 %v22017_v1  ;;  %v1332_v47 = vrot.slane %v1330_v31, 1 }
 0x117   : > { %14878 = vmatmul.mubr.bf16.gmra.mrb[8].mxu1 %v4652_v14  ;;  %14413 = vmatprep.mubr.msk.bf16.mxu0 %vm22012_vm0, %v22017_v1  ;;  %v4871_v14 = vrot.slane %v4869_v38, 2  ;;  %v1328_v10 = vor.u32 %v1327_v45, %v1324_v43  ;;  %v17396_v38 = vld [vmem:[%s22003_s1 + $0x158] sm:$0xff]  }
 0x118   : > { %14881 = vmatprep.mubr.msk.bf16.mxu1 %vm22012_vm0, %v22017_v1  ;;  %14446 = vmatpush3.bf16.msra.mxu0 %v17373_v48  ;;  %v1335_v48 = vrot.slane %v1333_v34, 2  ;;  %v4901_v34 = vshrl.u32 %v18456_v46, 16 }
 0x119   : > { %14447 = vmatprep.subr.bf16.mxu0 %v22017_v1  ;;  %14914 = vmatpush3.bf16.msra.mxu1 %v17386_v21  ;;  %v4876_v21 = vrot.slane %v4874_v39, 1  ;;  %v17402_v39 = vld [vmem:[%s22003_s1 + $0x158] sm:$0xff]  }
 0x11a   : > { %14915 = vmatprep.subr.bf16.mxu1 %v22017_v1  ;;  %v1336_v6 = vor.u32 %v1335_v48, %v1332_v47  ;;  %v4903_v45 = vrot.slane %v4901_v34, 1  ;;  %v4906_v47 = vrot.slane %v4904_v36, 2  ;;  %v17397_v48 = vld [vmem:[%s22003_s1 + $0x160] sm:$0xff]  }
 0x11c   : > { %14448 = vmatpush3.bf16.msra.mxu0 %v17378_v15  ;;  %v1339_v15 = vshrl.u32 %v18399_v19, 16 }
 0x11d   : > { %14449 = vmatprep.subr.bf16.mxu0 %v22017_v1  ;;  %14916 = vmatpush3.bf16.msra.mxu1 %v17387_v52  ;;  %v4872_v52 = vor.u32 %v4871_v14, %v4868_v5  ;;  %v17404_v5 = vld [vmem:[%s22003_s1 + $0x160] sm:$0xff]  }
 0x11e   : > { %14414 = vmatmul.mubr.bf16.gmra.mrb[12].mxu0 %v1108_v35  ;;  %14917 = vmatprep.subr.bf16.mxu1 %v22017_v1  ;;  %v4883_v35 = vshrl.u32 %v18402_v22, 16 }
 0x11f   : > { %14882 = vmatmul.mubr.bf16.gmra.mrb[12].mxu1 %v4654_v55  ;;  %14417 = vmatprep.mubr.msk.bf16.mxu0 %vm22012_vm0, %v22017_v1  ;;  %v4886_v55 = vshll.u32 %v18402_v22, 16 }
 0x120   : > { %14885 = vmatprep.mubr.msk.bf16.mxu1 %vm22012_vm0, %v22017_v1  ;;  %14450 = vmatpush3.bf16.msra.mxu0 %v17383_v32  ;;  %v4880_v32 = vor.u32 %v4879_v49, %v4876_v21  ;;  %v4885_v19 = vrot.slane %v4883_v35, 1  ;;  %v1366_v21 = vshrl.u32 %v18482_v53, 16  ;;  %v1369_v49 = vshll.u32 %v18482_v53, 16 }
 0x121   : > { %14451 = vmatprep.subr.bf16.mxu0 %v22017_v1  ;;  %14918 = vmatpush3.bf16.msra.mxu1 %v17391_v57  ;;  %v1337_v57 = vsel %vm22011_vm3, %v1328_v10, %v1336_v6  ;;  %v4907_v10 = vor.u32 %v4906_v47, %v4903_v45  ;;  %v4940_v45 = vshll.u32 %v18549_v11, 16 }
 0x122   : > { %14919 = vmatprep.subr.bf16.mxu1 %v22017_v1  ;;  %v1368_v35 = vrot.slane %v1366_v21, 1 }
 0x124   : > { %14452 = vmatpush3.bf16.msra.mxu0 %v17389_v51  ;;  %v1341_v51 = vrot.slane %v1339_v15, 1  ;;  %v4913_v15 = vshll.u32 %v18486_v54, 16 }
 0x125   : > { %14920 = vmatpush3.bf16.msra.mxu1 %v17392_v2  ;;  %14489 = vmatprep.subr.bf16.mxu0 %v22017_v1  ;;  %v4881_v2 = vsel %vm22011_vm3, %v4872_v52, %v4880_v32  ;;  %v17405_v52 = vld [vmem:[%s22003_s1 + $0x168] sm:$0xff]  }
 0x126   : > { %14418 = vmatmul.mubr.bf16.gmra.mrb[16].mxu0 %v1110_v24  ;;  %14957 = vmatprep.subr.bf16.mxu1 %v22017_v1  ;;  %v4888_v24 = vrot.slane %v4886_v55, 2  ;;  %v1345_v22 = vor.u32 %v1344_v62, %v1341_v51  ;;  %v1371_v55 = vrot.slane %v1369_v49, 2  ;;  %v4915_v51 = vrot.slane %v4913_v15, 2  ;;  %v17403_v62 = vld [vmem:[%s22003_s1 + $0x170] sm:$0xff]  }
 0x127   : > { %14886 = vmatmul.mubr.bf16.gmra.mrb[16].mxu1 %v4656_v37  ;;  %14421 = vmatprep.mubr.msk.bf16.mxu0 %vm22012_vm0, %v22017_v1  ;;  %v17398_v37 = vld [vmem:[%s22003_s1 + $0x140] sm:$0xff]  }
 0x128   : > { %14889 = vmatprep.mubr.msk.bf16.mxu1 %vm22012_vm0, %v22017_v1 }
 0x12e   : > { %14422 = vmatmul.mubr.bf16.gmra.mrb[20].mxu0 %v1112_v60  ;;  %v1351_v60 = vshll.u32 %v18420_v30, 16 }
 0x12f   : > { %14890 = vmatmul.mubr.bf16.gmra.mrb[20].mxu1 %v4658_v61  ;;  %14425 = vmatprep.mubr.msk.bf16.mxu0 %vm22012_vm0, %v22017_v1  ;;  %v4889_v61 = vor.u32 %v4888_v24, %v4885_v19  ;;  %v1372_v19 = vor.u32 %v1371_v55, %v1368_v35  ;;  %v1375_v24 = vshrl.u32 %v18512_v20, 16 }
 0x130   : > { %14893 = vmatprep.mubr.msk.bf16.mxu1 %vm22012_vm0, %v22017_v1  ;;  %v1353_v13 = vrot.slane %v1351_v60, 2  ;;  %v17407_v60 = vld [vmem:[%s22003_s1 + $0x178] sm:$0xff]  }
 0x131   : > { %v4890_v17 = vsel %vm22011_vm3, %v4880_v32, %v4889_v61 }
 0x132   : > { %v1354_v27 = vor.u32 %v1353_v13, %v1350_v12  ;;  %v4924_v13 = vrot.slane %v4922_v58, 2 }
 0x134   : > { %v1355_v41 = vsel %vm22011_vm3, %v1345_v22, %v1354_v27 }
 0x136   : > { %14426 = vmatmul.mubr.bf16.gmra.mrb[24].mxu0 %v1114_v7  ;;  %v17399_v7 = vld [vmem:[%s22003_s1 + $0x148] sm:$0xff]  }
 0x137   : > { %14894 = vmatmul.mubr.bf16.gmra.mrb[24].mxu1 %v4660_v9  ;;  %14429 = vmatprep.mubr.msk.bf16.mxu0 %vm22012_vm0, %v22017_v1  ;;  %v1346_v9 = vsel %vm22011_vm3, %v1336_v6, %v1345_v22  ;;  %v4910_v6 = vshrl.u32 %v18486_v54, 16 }
 0x138   : > { %14897 = vmatprep.mubr.msk.bf16.mxu1 %vm22012_vm0, %v22017_v1 }
 0x13e   : > { %14430 = vmatmul.mubr.bf16.gmra.mrb[28].mxu0 %v1116_v23  ;;  %v4897_v23 = vrot.slane %v4895_v3, 2  ;;  %v1377_v3 = vrot.slane %v1375_v24, 1 }
 0x13f   : > { %14898 = vmatmul.mubr.bf16.gmra.mrb[28].mxu1 %v4662_v25  ;;  %14433 = vmatprep.mubr.msk.bf16.mxu0 %vm22012_vm0, %v22017_v1  ;;  %v17395_v25 = vld [vmem:[%s22003_s1 + $0x150] sm:$0xff]  }
 0x140   : > { %14901 = vmatprep.mubr.msk.bf16.mxu1 %vm22012_vm0, %v22017_v1  ;;  %v4898_v31 = vor.u32 %v4897_v23, %v4894_v18  ;;  %v1384_v18 = vshrl.u32 %v18530_v59, 16  ;;  %v1387_v23 = vshll.u32 %v18530_v59, 16 }
 0x142   : > { %v4899_v43 = vsel %vm22011_vm3, %v4889_v61, %v4898_v31  ;;  %v17410_v61 = vld [vmem:[%s22003_s1 + $0x178] sm:$0xff]  }
 0x146   : > { %14434 = vmatmul.mubr.bf16.gmra.mrb[32].mxu0 %v1118_v8  ;;  %v1359_v8 = vrot.slane %v1357_v28, 1 }
 0x147   : > { %14902 = vmatmul.mubr.bf16.gmra.mrb[32].mxu1 %v4664_v42  ;;  %14453 = vmatprep.mubr.msk.bf16.mxu0 %vm22012_vm0, %v22017_v1  ;;  %v1362_v42 = vrot.slane %v1360_v29, 2  ;;  %v1386_v29 = vrot.slane %v1384_v18, 1  ;;  %v17722_v18 = vld [vmem:[%s17871_s10 + $0x58] sm:$0xff]  }
 0x148   : > { %14921 = vmatprep.mubr.msk.bf16.mxu1 %vm22012_vm0, %v22017_v1 }
 0x149   : > { %v1363_v14 = vor.u32 %v1362_v42, %v1359_v8  ;;  %v1396_v8 = vshll.u32 %v18544_v4, 16 }
 0x14b   : > { %v1364_v32 = vsel %vm22011_vm3, %v1354_v27, %v1363_v14  ;;  %v1373_v0 = vsel %vm22011_vm3, %v1363_v14, %v1372_v19  ;;  %v4931_v27 = vshll.u32 %v18535_v63, 16  ;;  %v18709_v14 = vld [vmem:[%s17871_s10 + $0x50] ss:$0 sps:$4 sm:$0x33]  }
 0x14e   : > { %14454 = vmatmul.mubr.bf16.vlgmr.msra.gmra.mrb[0].mxu0 %v1337_v57  ;;  %v4908_v57 = vsel %vm22011_vm3, %v4898_v31, %v4907_v10  ;;  %v1389_v31 = vrot.slane %v1387_v23, 2  ;;  %v5155_v23 = vrot.slane %v17722_v18, 2 }
 0x14f   : > { %14922 = vmatmul.mubr.bf16.vlgmr.msra.gmra.mrb[0].mxu1 %v4881_v2  ;;  %14490 = vmatpush3.bf16.msra.mxu0 %v17393_v50  ;;  %v4912_v50 = vrot.slane %v4910_v6, 1  ;;  %v17409_v2 = vld [vmem:[%s22003_s1 + $0x170] sm:$0xff]   ;;  %v18713_v6 = vld [vmem:[%s17871_s10 + $0x98] ss:$0 sps:$4 sm:$0x33]  }
 0x150   : > { %14457 = vmatprep.mubr.msk.bf16.mxu0 %vm22012_vm0, %v22017_v1  ;;  %14925 = vmatprep.mubr.msk.bf16.mxu1 %vm22012_vm0, %v22017_v1  ;;  %v4946_v35 = vshrl.u32 %v18713_v6, 16  ;;  %v4949_v55 = vshll.u32 %v18713_v6, 16 }
 0x151   : > { %14491 = vmatprep.subr.bf16.mxu0 %v22017_v1  ;;  %14958 = vmatpush3.bf16.msra.mxu1 %v17398_v37  ;;  %v1378_v37 = vshll.u32 %v18512_v20, 16  ;;  %v4916_v22 = vor.u32 %v4915_v51, %v4912_v50 }
 0x152   : > { %14959 = vmatprep.subr.bf16.mxu1 %v22017_v1 }
 0x153   : > { %14492 = vmatpush3.bf16.msra.mxu0 %v17394_v56  ;;  %v4919_v56 = vshrl.u32 %v18519_v40, 16 }
 0x154   : > { %14493 = vmatprep.subr.bf16.mxu0 %v22017_v1 }
 0x155   : > { %14960 = vmatpush3.bf16.msra.mxu1 %v17399_v7  ;;  %v1380_v7 = vrot.slane %v1378_v37, 2  ;;  %v4921_v12 = vrot.slane %v4919_v56, 1  ;;  %v5134_v56 = vld [vmem:[%s17871_s10 + $0x50] sm:$0xc] }
 0x156   : > { %14458 = vmatmul.mubr.bf16.gmra.mrb[4].mxu0 %v1346_v9  ;;  %14961 = vmatprep.subr.bf16.mxu1 %v22017_v1  ;;  %v4917_v9 = vsel %vm22011_vm3, %v4907_v10, %v4916_v22  ;;  %v4942_v10 = vrot.slane %v4940_v45, 2  ;;  %v1617_v45 = vrot.slane %v18420_v30, 2 }
 0x157   : > { %14926 = vmatmul.mubr.bf16.gmra.mrb[4].mxu1 %v4890_v17  ;;  %14461 = vmatprep.mubr.msk.bf16.mxu0 %vm22012_vm0, %v22017_v1  ;;  %v1381_v17 = vor.u32 %v1380_v7, %v1377_v3  ;;  %v17720_v3 = vld [vmem:[%s17871_s10 + $0x54] sm:$0xf] }
 0x158   : > { %14929 = vmatprep.mubr.msk.bf16.mxu1 %vm22012_vm0, %v22017_v1  ;;  %14494 = vmatpush3.bf16.msra.mxu0 %v17395_v25  ;;  %v4925_v25 = vor.u32 %v4924_v13, %v4921_v12  ;;  %v12918_v7 = vcombine.low %v5134_v56, %v17720_v3  ;;  %v17721_v12 = vld [vmem:[%s17871_s10 + $0x10] sm:$0xff]   ;;  %v18875_v3 = vld [vmem:[%s17871_s10 + $0x5c] sm:$0xf] }
 0x159   : > { %14495 = vmatprep.subr.bf16.mxu0 %v22017_v1  ;;  %14962 = vmatpush3.bf16.msra.mxu1 %v17401_v26  ;;  %v4928_v26 = vshrl.u32 %v18535_v63, 16  ;;  %v1382_v28 = vsel %vm22011_vm3, %v1372_v19, %v1381_v17  ;;  %v4951_v19 = vrot.slane %v4949_v55, 2  ;;  %v1613_v13 = vrot.slane %v17721_v12, 2  ;;  %v18882_v12 = vld [vmem:[%s17871_s10 + $0x18] sm:$0xff]  }
 0x15a   : > { %14963 = vmatprep.subr.bf16.mxu1 %v22017_v1  ;;  %v4926_v34 = vsel %vm22011_vm3, %v4916_v22, %v4925_v25  ;;  %v1590_v22 = vld [vmem:[%s17871_s10 + $0x8] sm:$0xc]  ;;  %v1621_v55 = vrot.slane %v18482_v53, 2  ;;  %v1896_v18 = vrot.slane %v18882_v12, 2 }
 0x15b   : > { %v4930_v36 = vrot.slane %v4928_v26, 1  ;;  %v17413_v26 = vld [vmem:[%s22003_s1 + $0x180] sm:$0xff]  }
 0x15c   : > { %14496 = vmatpush3.bf16.msra.mxu0 %v17396_v38  ;;  %v4933_v38 = vrot.slane %v4931_v27, 2 }
 0x15d   : > { %14497 = vmatprep.subr.bf16.mxu0 %v22017_v1  ;;  %14964 = vmatpush3.bf16.msra.mxu1 %v17402_v39  ;;  %v1390_v39 = vor.u32 %v1389_v31, %v1386_v29  ;;  %v17723_v29 = vld [vmem:[%s17871_s10 + $0x18] sm:$0xff]  }
 0x15e   : > { %14462 = vmatmul.mubr.bf16.gmra.mrb[8].mxu0 %v1355_v41  ;;  %14965 = vmatprep.subr.bf16.mxu1 %v22017_v1  ;;  %v1393_v41 = vshrl.u32 %v18544_v4, 16  ;;  %v4934_v42 = vor.u32 %v4933_v38, %v4930_v36  ;;  %v1615_v31 = vrot.slane %v17723_v29, 2  ;;  %v17724_v36 = vld [vmem:[%s17871_s10 + $0x60] sm:$0xff]  }
 0x15f   : > { %14930 = vmatmul.mubr.bf16.gmra.mrb[8].mxu1 %v4899_v43  ;;  %14465 = vmatprep.mubr.msk.bf16.mxu0 %vm22012_vm0, %v22017_v1  ;;  %v4937_v43 = vshrl.u32 %v18549_v11, 16  ;;  %v1391_v47 = vsel %vm22011_vm3, %v1381_v17, %v1390_v39  ;;  %v5154_v17 = vrot.slane %v12918_v7, 2  ;;  %v5157_v38 = vrot.slane %v17724_v36, 2 }
 0x160   : > { %14933 = vmatprep.mubr.msk.bf16.mxu1 %vm22012_vm0, %v22017_v1  ;;  %14498 = vmatpush3.bf16.msra.mxu0 %v17397_v48  ;;  %v1395_v48 = vrot.slane %v1393_v41, 1  ;;  %v4935_v21 = vsel %vm22011_vm3, %v4925_v25, %v4934_v42  ;;  %v1616_v41 = vsel %vm22010_vm4, %v1613_v13, %v1615_v31  ;;  %v1618_v30 = vsel %vm22010_vm4, %v1615_v31, %v1617_v45  ;;  %v18908_v31 = vld [vmem:[%s17871_s10 + $0x68] sm:$0xff]  }
 0x161   : > { %14499 = vmatprep.subr.bf16.mxu0 %v22017_v1  ;;  %14966 = vmatpush3.bf16.msra.mxu1 %v17404_v5  ;;  %v1398_v5 = vrot.slane %v1396_v8, 2  ;;  %v4939_v49 = vrot.slane %v4937_v43, 1  ;;  %v5156_v27 = vsel %vm22010_vm4, %v5154_v17, %v5155_v23  ;;  %v5158_v8 = vsel %vm22010_vm4, %v5155_v23, %v5157_v38  ;;  %v17421_v43 = vld [vmem:[%s22003_s1 + $0x190] sm:$0xff]  }
 0x162   : > { %14967 = vmatprep.subr.bf16.mxu1 %v22017_v1 }
 0x163   : > { %v1399_v15 = vor.u32 %v1398_v5, %v1395_v48  ;;  %v17416_v48 = vld [vmem:[%s22003_s1 + $0x198] sm:$0xff]  }
 0x164   : > { %14500 = vmatpush3.bf16.msra.mxu0 %v17400_v16  ;;  %v1402_v16 = vshrl.u32 %v18709_v14, 16  ;;  %v17422_v5 = vld [vmem:[%s22003_s1 + $0x198] sm:$0xff]  }
 0x165   : > { %14501 = vmatprep.subr.bf16.mxu0 %v22017_v1  ;;  %14968 = vmatpush3.bf16.msra.mxu1 %v17405_v52  ;;  %v1405_v52 = vshll.u32 %v18709_v14, 16 }
 0x166   : > { %14466 = vmatmul.mubr.bf16.gmra.mrb[12].mxu0 %v1364_v32  ;;  %14969 = vmatprep.subr.bf16.mxu1 %v22017_v1  ;;  %v4943_v32 = vor.u32 %v4942_v10, %v4939_v49  ;;  %v1404_v50 = vrot.slane %v1402_v16, 1  ;;  %v17424_v49 = vld [vmem:[%s22003_s1 + $0x1a0] sm:$0xff]   ;;  %v1619_v10 = vrot.slane %v18449_v44, 2  ;;  %v17420_v16 = vld [vmem:[%s22003_s1 + $0x1a8] sm:$0xff]  }
 0x167   : > { %14934 = vmatmul.mubr.bf16.gmra.mrb[12].mxu1 %v4908_v57  ;;  %14469 = vmatprep.mubr.msk.bf16.mxu0 %vm22012_vm0, %v22017_v1  ;;  %v1400_v57 = vsel %vm22011_vm3, %v1390_v39, %v1399_v15  ;;  %v1407_v51 = vrot.slane %v1405_v52, 2  ;;  %v17419_v39 = vld [vmem:[%s22003_s1 + $0x188] sm:$0xff]  }
 0x168   : > { %14937 = vmatprep.mubr.msk.bf16.mxu1 %vm22012_vm0, %v22017_v1  ;;  %14502 = vmatpush3.bf16.msra.mxu0 %v17403_v62  ;;  %v4944_v62 = vsel %vm22011_vm3, %v4934_v42, %v4943_v32  ;;  %v17415_v42 = vld [vmem:[%s22003_s1 + $0x190] sm:$0xff]   ;;  %v17425_v52 = vld [vmem:[%s22003_s1 + $0x1a8] sm:$0xff]   ;;  %v1620_v44 = vsel %vm22010_vm4, %v1617_v45, %v1619_v10  ;;  %v1622_v53 = vsel %vm22010_vm4, %v1619_v10, %v1621_v55 }
 0x169   : > { %14503 = vmatprep.subr.bf16.mxu0 %v22017_v1  ;;  %14970 = vmatpush3.bf16.msra.mxu1 %v17409_v2  ;;  %v4948_v2 = vrot.slane %v4946_v35, 1  ;;  %v1408_v24 = vor.u32 %v1407_v51, %v1404_v50  ;;  %v17427_v35 = vld [vmem:[%s22003_s1 + $0x1b0] sm:$0xff]   ;;  %v17426_v50 = vld [vmem:[%s22003_s1 + $0x1b8] sm:$0xff]  }
 0x16a   : > { %14971 = vmatprep.subr.bf16.mxu1 %v22017_v1  ;;  %v17428_v51 = vld [vmem:[%s22003_s1 + $0x1b8] sm:$0xff]   ;;  %v18933_v45 = vld [vmem:[%s17871_s10 + $0x70] sm:$0xff]  }
 0x16b   : > { %v4952_v37 = vor.u32 %v4951_v19, %v4948_v2  ;;  %v1409_v58 = vsel %vm22011_vm3, %v1399_v15, %v1408_v24  ;;  %v5161_v15 = vrot.slane %v18456_v46, 2  ;;  %v17423_v46 = vld [vmem:[%s22003_s1 + $0x1b0] sm:$0xff]   ;;  %v5165_v2 = vrot.slane %v18519_v40, 2 }
 0x16c   : > { %14504 = vmatpush3.bf16.msra.mxu0 %v17407_v60  ;;  %v17719_v60 = vld [vmem:[%s17871_s10 + $0xc] sm:$0xf]  ;;  %v18959_v10 = vld [vmem:[%s17871_s10 + $0x30] sm:$0xff]  }
 0x16d   : > { %14972 = vmatpush3.bf16.msra.mxu1 %v17410_v61  ;;  %14541 = vmatprep.subr.bf16.mxu0 %v22017_v1  ;;  %v12665_v61 = vcombine.low %v1590_v22, %v17719_v60  ;;  %v1629_v60 = vrot.slane %v18709_v14, 2 }
 0x16e   : > { %14470 = vmatmul.mubr.bf16.gmra.mrb[16].mxu0 %v1373_v0  ;;  %15009 = vmatprep.subr.bf16.mxu1 %v22017_v1  ;;  %v4953_v0 = vsel %vm22011_vm3, %v4943_v32, %v4952_v37  ;;  %v1625_v37 = vrot.slane %v18530_v59, 2  ;;  %v1627_v59 = vrot.slane %v18544_v4, 2  ;;  %v5171_v4 = vrot.slane %v18713_v6, 2  ;;  %v18889_v6 = vld [vmem:[%s17871_s10 + $0x60] sm:$0xff]  }
 0x16f   : > { %14938 = vmatmul.mubr.bf16.gmra.mrb[16].mxu1 %v4917_v9  ;;  %14473 = vmatprep.mubr.msk.bf16.mxu0 %vm22012_vm0, %v22017_v1  ;;  %v1612_v9 = vrot.slane %v12665_v61, 2  ;;  %v1811_v61 = vld [vmem:[%s17871_s10 + $0x10] sm:$0xc] }
 0x170   : > { %14941 = vmatprep.mubr.msk.bf16.mxu1 %vm22012_vm0, %v22017_v1  ;;  %v1628_v56 = vsel %vm22010_vm4, %v1625_v37, %v1627_v59  ;;  %v1630_v7 = vsel %vm22010_vm4, %v1627_v59, %v1629_v60  ;;  %v19023_v59 = vld [vmem:[%s17871_s10 + $0x88] sm:$0xff]  }
 0x171   : > { %v1614_v25 = vsel %vm22010_vm4, %v1612_v9, %v1613_v13  ;;  %v19035_v60 = vld [vmem:[%s17871_s10 + $0x48] sm:$0xff]  }
 0x176   : > { %14474 = vmatmul.mubr.bf16.gmra.mrb[20].mxu0 %v1382_v28  ;;  %v17418_v28 = vld [vmem:[%s22003_s1 + $0x180] sm:$0xff]  }
 0x177   : > { %14942 = vmatmul.mubr.bf16.gmra.mrb[20].mxu1 %v4926_v34  ;;  %14477 = vmatprep.mubr.msk.bf16.mxu0 %vm22012_vm0, %v22017_v1  ;;  %v17414_v34 = vld [vmem:[%s22003_s1 + $0x188] sm:$0xff]  }
 0x178   : > { %14945 = vmatprep.mubr.msk.bf16.mxu1 %vm22012_vm0, %v22017_v1 }
 0x17e   : > { %14478 = vmatmul.mubr.bf16.gmra.mrb[24].mxu0 %v1391_v47  ;;  %v5159_v47 = vrot.slane %v18426_v33, 2  ;;  %v17417_v33 = vld [vmem:[%s22003_s1 + $0x1a0] sm:$0xff]  }
 0x17f   : > { %14946 = vmatmul.mubr.bf16.gmra.mrb[24].mxu1 %v4935_v21  ;;  %14481 = vmatprep.mubr.msk.bf16.mxu0 %vm22012_vm0, %v22017_v1 }
 0x180   : > { %14949 = vmatprep.mubr.msk.bf16.mxu1 %vm22012_vm0, %v22017_v1  ;;  %v5160_v21 = vsel %vm22010_vm4, %v5157_v38, %v5159_v47  ;;  %v5162_v32 = vsel %vm22010_vm4, %v5159_v47, %v5161_v15  ;;  %v17436_v38 = vld [vmem:[%s22003_s1 + $0x1c8] sm:$0xff]   ;;  %v17439_v47 = vld [vmem:[%s22003_s1 + $0x1d0] sm:$0xff]  }
 0x186   : > { %14482 = vmatmul.mubr.bf16.gmra.mrb[28].mxu0 %v1400_v57  ;;  %v5163_v57 = vrot.slane %v18486_v54, 2  ;;  %v1623_v54 = vrot.slane %v18512_v20, 2  ;;  %v5167_v20 = vrot.slane %v18535_v63, 2  ;;  %v5169_v63 = vrot.slane %v18549_v11, 2  ;;  %v5353_v11 = vld [vmem:[%s17871_s10 + $0x58] sm:$0xc] }
 0x187   : > { %14950 = vmatmul.mubr.bf16.gmra.mrb[28].mxu1 %v4944_v62  ;;  %14485 = vmatprep.mubr.msk.bf16.mxu0 %vm22012_vm0, %v22017_v1  ;;  %v18886_v13 = vcombine.low %v5353_v11, %v18875_v3  ;;  %v1908_v11 = vrot.slane %v19035_v60, 2 }
 0x188   : > { %14953 = vmatprep.mubr.msk.bf16.mxu1 %vm22012_vm0, %v22017_v1  ;;  %v5164_v62 = vsel %vm22010_vm4, %v5161_v15, %v5163_v57  ;;  %v1624_v19 = vsel %vm22010_vm4, %v1621_v55, %v1623_v54  ;;  %v5166_v24 = vsel %vm22010_vm4, %v5163_v57, %v5165_v2  ;;  %v1626_v22 = vsel %vm22010_vm4, %v1623_v54, %v1625_v37  ;;  %v17459_v55 = vld [vmem:[%s22003_s1 + $0x1e8] sm:$0xff]   ;;  %v17463_v54 = vld [vmem:[%s22003_s1 + $0x1f0] sm:$0xff]   ;;  %v17464_v37 = vld [vmem:[%s22003_s1 + $0x1f8] sm:$0xff]  }
 0x189   : > { %v5168_v40 = vsel %vm22010_vm4, %v5165_v2, %v5167_v20  ;;  %v5172_v14 = vsel %vm22010_vm4, %v5169_v63, %v5171_v4  ;;  %v5436_v23 = vrot.slane %v18886_v13, 2 }
 0x18e   : > { %14486 = vmatmul.mubr.bf16.gmra.mrb[32].mxu0 %v1409_v58  ;;  %v5170_v58 = vsel %vm22010_vm4, %v5167_v20, %v5169_v63 }
 0x18f   : > { %14954 = vmatmul.mubr.bf16.gmra.mrb[32].mxu1 %v4953_v0  ;;  %14505 = vmatprep.mubr.msk.bf16.mxu0 %vm22012_vm0, %v22017_v1  ;;  %v18871_v0 = vld [vmem:[%s17871_s10 + $0x14] sm:$0xf] }
 0x190   : > { %14973 = vmatprep.mubr.msk.bf16.mxu1 %vm22012_vm0, %v22017_v1  ;;  %v18879_v9 = vcombine.low %v1811_v61, %v18871_v0  ;;  %v19039_v61 = vld [vmem:[%s17871_s10 + $0x90] sm:$0xff]  }
 0x192   : > { %v1895_v17 = vrot.slane %v18879_v9, 2 }
 0x196   : > { %14506 = vmatmul.mubr.bf16.vlgmr.msra.gmra.mrb[0].mxu0 %v1614_v25  ;;  %v5437_v25 = vrot.slane %v18889_v6, 2 }
 0x197   : > { %14974 = vmatmul.mubr.bf16.vlgmr.msra.gmra.mrb[0].mxu1 %v5156_v27  ;;  %14542 = vmatpush3.bf16.msra.mxu0 %v17413_v26  ;;  %v1897_v26 = vsel %vm22010_vm4, %v1895_v17, %v1896_v18  ;;  %v17433_v27 = vld [vmem:[%s22003_s1 + $0x1c0] sm:$0xff]   ;;  %v19049_v17 = vld [vmem:[%s17871_s10 + $0x50] sm:$0xff]  }
 0x198   : > { %14509 = vmatprep.mubr.msk.bf16.mxu0 %vm22012_vm0, %v22017_v1  ;;  %14977 = vmatprep.mubr.msk.bf16.mxu1 %vm22012_vm0, %v22017_v1  ;;  %v5438_v29 = vsel %vm22010_vm4, %v5436_v23, %v5437_v25  ;;  %v19053_v23 = vld [vmem:[%s17871_s10 + $0x98] sm:$0xff]  }
 0x199   : > { %14543 = vmatprep.subr.bf16.mxu0 %v22017_v1  ;;  %15010 = vmatpush3.bf16.msra.mxu1 %v17418_v28  ;;  %v18904_v28 = vld [vmem:[%s17871_s10 + $0x20] sm:$0xff]  }
 0x19a   : > { %15011 = vmatprep.subr.bf16.mxu1 %v22017_v1  ;;  %v1898_v36 = vrot.slane %v18904_v28, 2 }
 0x19b   : > { %14544 = vmatpush3.bf16.msra.mxu0 %v17414_v34  ;;  %v17448_v34 = vld [vmem:[%s22003_s1 + $0x1c0] sm:$0xff]  }
 0x19c   : > { %14545 = vmatprep.subr.bf16.mxu0 %v22017_v1 }
 0x19d   : > { %15012 = vmatpush3.bf16.msra.mxu1 %v17419_v39  ;;  %v5439_v39 = vrot.slane %v18908_v31, 2 }
 0x19e   : > { %14510 = vmatmul.mubr.bf16.gmra.mrb[4].mxu0 %v1616_v41  ;;  %15013 = vmatprep.subr.bf16.mxu1 %v22017_v1  ;;  %v17449_v41 = vld [vmem:[%s22003_s1 + $0x1c8] sm:$0xff]  }
 0x19f   : > { %14978 = vmatmul.mubr.bf16.gmra.mrb[4].mxu1 %v5158_v8  ;;  %14513 = vmatprep.mubr.msk.bf16.mxu0 %vm22012_vm0, %v22017_v1  ;;  %v1899_v8 = vsel %vm22010_vm4, %v1896_v18, %v1898_v36 }
 0x1a0   : > { %14981 = vmatprep.mubr.msk.bf16.mxu1 %vm22012_vm0, %v22017_v1  ;;  %14546 = vmatpush3.bf16.msra.mxu0 %v17415_v42  ;;  %v18929_v42 = vld [vmem:[%s17871_s10 + $0x28] sm:$0xff]  }
 0x1a1   : > { %14547 = vmatprep.subr.bf16.mxu0 %v22017_v1  ;;  %15014 = vmatpush3.bf16.msra.mxu1 %v17421_v43  ;;  %v5440_v43 = vsel %vm22010_vm4, %v5437_v25, %v5439_v39  ;;  %v1910_v25 = vrot.slane %v19049_v17, 2 }
 0x1a2   : > { %15015 = vmatprep.subr.bf16.mxu1 %v22017_v1 }
 0x1a4   : > { %14548 = vmatpush3.bf16.msra.mxu0 %v17416_v48  ;;  %v17453_v48 = vld [vmem:[%s22003_s1 + $0x1d0] sm:$0xff]  }
 0x1a5   : > { %14549 = vmatprep.subr.bf16.mxu0 %v22017_v1  ;;  %15016 = vmatpush3.bf16.msra.mxu1 %v17422_v5  ;;  %v1900_v5 = vrot.slane %v18929_v42, 2 }
 0x1a6   : > { %14514 = vmatmul.mubr.bf16.gmra.mrb[8].mxu0 %v1618_v30  ;;  %15017 = vmatprep.subr.bf16.mxu1 %v22017_v1  ;;  %v5441_v30 = vrot.slane %v18933_v45, 2 }
 0x1a7   : > { %14982 = vmatmul.mubr.bf16.gmra.mrb[8].mxu1 %v5160_v21  ;;  %14517 = vmatprep.mubr.msk.bf16.mxu0 %vm22012_vm0, %v22017_v1  ;;  %v17442_v21 = vld [vmem:[%s22003_s1 + $0x1d8] sm:$0xff]  }
 0x1a8   : > { %14985 = vmatprep.mubr.msk.bf16.mxu1 %vm22012_vm0, %v22017_v1  ;;  %14550 = vmatpush3.bf16.msra.mxu0 %v17417_v33  ;;  %v17454_v33 = vld [vmem:[%s22003_s1 + $0x1d8] sm:$0xff]   ;;  %v5442_v15 = vsel %vm22010_vm4, %v5439_v39, %v5441_v30 }
 0x1a9   : > { %14551 = vmatprep.subr.bf16.mxu0 %v22017_v1  ;;  %15018 = vmatpush3.bf16.msra.mxu1 %v17424_v49  ;;  %v1901_v49 = vsel %vm22010_vm4, %v1898_v36, %v1900_v5 }
 0x1aa   : > { %15019 = vmatprep.subr.bf16.mxu1 %v22017_v1 }
 0x1ac   : > { %14552 = vmatpush3.bf16.msra.mxu0 %v17420_v16  ;;  %v18963_v16 = vld [vmem:[%s17871_s10 + $0x78] sm:$0xff]  }
 0x1ad   : > { %14553 = vmatprep.subr.bf16.mxu0 %v22017_v1  ;;  %15020 = vmatpush3.bf16.msra.mxu1 %v17425_v52  ;;  %v17445_v52 = vld [vmem:[%s22003_s1 + $0x1e0] sm:$0xff]  }
 0x1ae   : > { %14518 = vmatmul.mubr.bf16.gmra.mrb[12].mxu0 %v1620_v44  ;;  %15021 = vmatprep.subr.bf16.mxu1 %v22017_v1  ;;  %v17458_v44 = vld [vmem:[%s22003_s1 + $0x1e0] sm:$0xff]  }
 0x1af   : > { %14986 = vmatmul.mubr.bf16.gmra.mrb[12].mxu1 %v5162_v32  ;;  %14521 = vmatprep.mubr.msk.bf16.mxu0 %vm22012_vm0, %v22017_v1  ;;  %v1902_v32 = vrot.slane %v18959_v10, 2 }
 0x1b0   : > { %14989 = vmatprep.mubr.msk.bf16.mxu1 %vm22012_vm0, %v22017_v1  ;;  %14554 = vmatpush3.bf16.msra.mxu0 %v17423_v46  ;;  %v5443_v46 = vrot.slane %v18963_v16, 2 }
 0x1b1   : > { %14555 = vmatprep.subr.bf16.mxu0 %v22017_v1  ;;  %15022 = vmatpush3.bf16.msra.mxu1 %v17427_v35  ;;  %v17450_v35 = vld [vmem:[%s22003_s1 + $0x1e8] sm:$0xff]   ;;  %v1903_v57 = vsel %vm22010_vm4, %v1900_v5, %v1902_v32  ;;  %v5659_v5 = vshll.u32 %v18886_v13, 16 }
 0x1b2   : > { %15023 = vmatprep.subr.bf16.mxu1 %v22017_v1 }
 0x1b4   : > { %14556 = vmatpush3.bf16.msra.mxu0 %v17426_v50  ;;  %v18989_v50 = vld [vmem:[%s17871_s10 + $0x38] sm:$0xff]  }
 0x1b5   : > { %15024 = vmatpush3.bf16.msra.mxu1 %v17428_v51  ;;  %14593 = vmatprep.subr.bf16.mxu0 %v22017_v1  ;;  %v5444_v51 = vsel %vm22010_vm4, %v5441_v30, %v5443_v46  ;;  %v1904_v2 = vrot.slane %v18989_v50, 2  ;;  %v5664_v30 = vshrl.u32 %v18889_v6, 16 }
 0x1b6   : > { %14522 = vmatmul.mubr.bf16.gmra.mrb[16].mxu0 %v1622_v53  ;;  %15061 = vmatprep.subr.bf16.mxu1 %v22017_v1  ;;  %v18993_v53 = vld [vmem:[%s17871_s10 + $0x80] sm:$0xff]  }
 0x1b7   : > { %14990 = vmatmul.mubr.bf16.gmra.mrb[16].mxu1 %v5164_v62  ;;  %14525 = vmatprep.mubr.msk.bf16.mxu0 %vm22012_vm0, %v22017_v1  ;;  %v17455_v62 = vld [vmem:[%s22003_s1 + $0x1f0] sm:$0xff]   ;;  %v1905_v20 = vsel %vm22010_vm4, %v1902_v32, %v1904_v2 }
 0x1b8   : > { %14993 = vmatprep.mubr.msk.bf16.mxu1 %vm22012_vm0, %v22017_v1 }
 0x1be   : > { %14526 = vmatmul.mubr.bf16.gmra.mrb[20].mxu0 %v1624_v19  ;;  %v5445_v19 = vrot.slane %v18993_v53, 2 }
 0x1bf   : > { %14994 = vmatmul.mubr.bf16.gmra.mrb[20].mxu1 %v5166_v24  ;;  %14529 = vmatprep.mubr.msk.bf16.mxu0 %vm22012_vm0, %v22017_v1  ;;  %v17461_v24 = vld [vmem:[%s22003_s1 + $0x1f8] sm:$0xff]  }
 0x1c0   : > { %14997 = vmatprep.mubr.msk.bf16.mxu1 %vm22012_vm0, %v22017_v1 }
 0x1c6   : > { %14530 = vmatmul.mubr.bf16.gmra.mrb[24].mxu0 %v1626_v22  ;;  %v19019_v22 = vld [vmem:[%s17871_s10 + $0x40] sm:$0xff]  }
 0x1c7   : > { %14998 = vmatmul.mubr.bf16.gmra.mrb[24].mxu1 %v5168_v40  ;;  %14533 = vmatprep.mubr.msk.bf16.mxu0 %vm22012_vm0, %v22017_v1  ;;  %v5446_v40 = vsel %vm22010_vm4, %v5443_v46, %v5445_v19  ;;  %v1906_v63 = vrot.slane %v19019_v22, 2  ;;  %v5661_v46 = vrot.slane %v5659_v5, 3 }
 0x1c8   : > { %15001 = vmatprep.mubr.msk.bf16.mxu1 %vm22012_vm0, %v22017_v1 }
 0x1ce   : > { %14534 = vmatmul.mubr.bf16.gmra.mrb[28].mxu0 %v1628_v56  ;;  %v5447_v56 = vrot.slane %v19023_v59, 2 }
 0x1cf   : > { %15002 = vmatmul.mubr.bf16.gmra.mrb[28].mxu1 %v5170_v58  ;;  %14537 = vmatprep.mubr.msk.bf16.mxu0 %vm22012_vm0, %v22017_v1  ;;  %v1907_v58 = vsel %vm22010_vm4, %v1904_v2, %v1906_v63 }
 0x1d0   : > { %15005 = vmatprep.mubr.msk.bf16.mxu1 %vm22012_vm0, %v22017_v1  ;;  %v5448_v4 = vsel %vm22010_vm4, %v5445_v19, %v5447_v56  ;;  %v5673_v19 = vshrl.u32 %v18908_v31, 16 }
 0x1d6   : > { %14538 = vmatmul.mubr.bf16.gmra.mrb[32].mxu0 %v1630_v7  ;;  %v5449_v7 = vrot.slane %v19039_v61, 2 }
 0x1d7   : > { %15006 = vmatmul.mubr.bf16.gmra.mrb[32].mxu1 %v5172_v14  ;;  %14557 = vmatprep.mubr.msk.bf16.mxu0 %vm22012_vm0, %v22017_v1  ;;  %v1909_v14 = vsel %vm22010_vm4, %v1906_v63, %v1908_v11 }
 0x1d8   : > { %15025 = vmatprep.mubr.msk.bf16.mxu1 %vm22012_vm0, %v22017_v1  ;;  %v5450_v18 = vsel %vm22010_vm4, %v5447_v56, %v5449_v7 }
 0x1de   : > { %14558 = vmatmul.mubr.bf16.vlgmr.msra.gmra.mrb[0].mxu0 %v1897_v26  ;;  %v5451_v26 = vrot.slane %v19053_v23, 2 }
 0x1df   : > { %15026 = vmatmul.mubr.bf16.vlgmr.msra.gmra.mrb[0].mxu1 %v5438_v29  ;;  %14594 = vmatpush3.bf16.msra.mxu0 %v17433_v27  ;;  %v17460_v27 = vld [vmem:[%s17871_s10 + $0x58] ss:$0 sps:$4 sm:$0x33]   ;;  %v17462_v29 = vld [vmem:[%s17871_s10 + $0xa0] ss:$0 sps:$4 sm:$0x33]  }
 0x1e0   : > { %14561 = vmatprep.mubr.msk.bf16.mxu0 %vm22012_vm0, %v22017_v1  ;;  %15029 = vmatprep.mubr.msk.bf16.mxu1 %vm22012_vm0, %v22017_v1  ;;  %v5452_v36 = vsel %vm22010_vm4, %v5449_v7, %v5451_v26  ;;  %v5453_v39 = vrot.slane %v17462_v29, 2  ;;  %v5685_v29 = vshll.u32 %v18933_v45, 16 }
 0x1e1   : > { %14595 = vmatprep.subr.bf16.mxu0 %v22017_v1  ;;  %15062 = vmatpush3.bf16.msra.mxu1 %v17448_v34  ;;  %v1911_v34 = vsel %vm22010_vm4, %v1908_v11, %v1910_v25  ;;  %v17470_v11 = vld [vmem:[%s22003_s1 + $0x200] sm:$0xff]  }
 0x1e2   : > { %15063 = vmatprep.subr.bf16.mxu1 %v22017_v1 }
 0x1e3   : > { %14596 = vmatpush3.bf16.msra.mxu0 %v17436_v38  ;;  %v1912_v38 = vrot.slane %v17460_v27, 2  ;;  %v5682_v27 = vshrl.u32 %v18933_v45, 16 }
 0x1e4   : > { %14597 = vmatprep.subr.bf16.mxu0 %v22017_v1 }
 0x1e5   : > { %15064 = vmatpush3.bf16.msra.mxu1 %v17449_v41  ;;  %v2117_v41 = vshrl.u32 %v18879_v9, 16 }
 0x1e6   : > { %14562 = vmatmul.mubr.bf16.gmra.mrb[4].mxu0 %v1899_v8  ;;  %15065 = vmatprep.subr.bf16.mxu1 %v22017_v1  ;;  %v2120_v8 = vshll.u32 %v18879_v9, 16 }
 0x1e7   : > { %15030 = vmatmul.mubr.bf16.gmra.mrb[4].mxu1 %v5440_v43  ;;  %14565 = vmatprep.mubr.msk.bf16.mxu0 %vm22012_vm0, %v22017_v1  ;;  %v2125_v43 = vshrl.u32 %v18882_v12, 16  ;;  %v2119_v9 = vrot.slane %v2117_v41, 2 }
 0x1e8   : > { %15033 = vmatprep.mubr.msk.bf16.mxu1 %vm22012_vm0, %v22017_v1  ;;  %14598 = vmatpush3.bf16.msra.mxu0 %v17439_v47  ;;  %v2128_v47 = vshll.u32 %v18882_v12, 16 }
 0x1e9   : > { %14599 = vmatprep.subr.bf16.mxu0 %v22017_v1  ;;  %15066 = vmatpush3.bf16.msra.mxu1 %v17453_v48  ;;  %v5656_v48 = vshrl.u32 %v18886_v13, 16 }
 0x1ea   : > { %15067 = vmatprep.subr.bf16.mxu1 %v22017_v1 }
 0x1eb   : > { %v5658_v32 = vrot.slane %v5656_v48, 2  ;;  %v17473_v48 = vld [vmem:[%s22003_s1 + $0x210] sm:$0xff]  }
 0x1ec   : > { %14600 = vmatpush3.bf16.msra.mxu0 %v17442_v21  ;;  %v5667_v21 = vshll.u32 %v18889_v6, 16 }
 0x1ed   : > { %14601 = vmatprep.subr.bf16.mxu0 %v22017_v1  ;;  %15068 = vmatpush3.bf16.msra.mxu1 %v17454_v33  ;;  %v1913_v33 = vsel %vm22010_vm4, %v1910_v25, %v1912_v38  ;;  %v2146_v25 = vshll.u32 %v18929_v42, 16 }
 0x1ee   : > { %14566 = vmatmul.mubr.bf16.gmra.mrb[8].mxu0 %v1901_v49  ;;  %15069 = vmatprep.subr.bf16.mxu1 %v22017_v1  ;;  %v5454_v49 = vsel %vm22010_vm4, %v5451_v26, %v5453_v39 }
 0x1ef   : > { %15034 = vmatmul.mubr.bf16.gmra.mrb[8].mxu1 %v5442_v15  ;;  %14569 = vmatprep.mubr.msk.bf16.mxu0 %vm22012_vm0, %v22017_v1  ;;  %v2122_v15 = vrot.slane %v2120_v8, 3  ;;  %v2148_v39 = vrot.slane %v2146_v25, 3  ;;  %v5684_v8 = vrot.slane %v5682_v27, 2 }
 0x1f0   : > { %15037 = vmatprep.mubr.msk.bf16.mxu1 %vm22012_vm0, %v22017_v1  ;;  %14602 = vmatpush3.bf16.msra.mxu0 %v17445_v52  ;;  %v2127_v52 = vrot.slane %v2125_v43, 2  ;;  %v5687_v43 = vrot.slane %v5685_v29, 3 }
 0x1f1   : > { %14603 = vmatprep.subr.bf16.mxu0 %v22017_v1  ;;  %15070 = vmatpush3.bf16.msra.mxu1 %v17458_v44  ;;  %v2130_v44 = vrot.slane %v2128_v47, 3  ;;  %v2123_v13 = vor.u32 %v2122_v15, %v2119_v9  ;;  %v17467_v47 = vld [vmem:[%s22003_s1 + $0x210] sm:$0xff]   ;;  %v5694_v9 = vshll.u32 %v18963_v16, 16  ;;  %v17468_v15 = vld [vmem:[%s22003_s1 + $0x218] sm:$0xff]  }
 0x1f2   : > { %15071 = vmatprep.subr.bf16.mxu1 %v22017_v1 }
 0x1f4   : > { %14604 = vmatpush3.bf16.msra.mxu0 %v17450_v35  ;;  %v5666_v35 = vrot.slane %v5664_v30, 2  ;;  %v2152_v30 = vshrl.u32 %v18959_v10, 16 }
 0x1f5   : > { %14605 = vmatprep.subr.bf16.mxu0 %v22017_v1  ;;  %15072 = vmatpush3.bf16.msra.mxu1 %v17459_v55  ;;  %v5669_v55 = vrot.slane %v5667_v21, 3  ;;  %v2155_v21 = vshll.u32 %v18959_v10, 16 }
 0x1f6   : > { %14570 = vmatmul.mubr.bf16.gmra.mrb[12].mxu0 %v1903_v57  ;;  %15073 = vmatprep.subr.bf16.mxu1 %v22017_v1  ;;  %v2131_v57 = vor.u32 %v2130_v44, %v2127_v52  ;;  %v281_v52 = vld [vmem:[#allocation2 + $0x8] sm:$0x3]  ;;  %v17474_v44 = vld [vmem:[%s22003_s1 + $0x218] sm:$0xff]  }
 0x1f7   : > { %15038 = vmatmul.mubr.bf16.gmra.mrb[12].mxu1 %v5444_v51  ;;  %14573 = vmatprep.mubr.msk.bf16.mxu0 %vm22012_vm0, %v22017_v1  ;;  %v2134_v51 = vshrl.u32 %v18904_v28, 16  ;;  %v5670_v2 = vor.u32 %v5669_v55, %v5666_v35  ;;  %v2154_v55 = vrot.slane %v2152_v30, 2 }
 0x1f8   : > { %15041 = vmatprep.mubr.msk.bf16.mxu1 %vm22012_vm0, %v22017_v1  ;;  %14606 = vmatpush3.bf16.msra.mxu0 %v17455_v62  ;;  %v2137_v62 = vshll.u32 %v18904_v28, 16 }
 0x1f9   : > { %14607 = vmatprep.subr.bf16.mxu0 %v22017_v1  ;;  %15074 = vmatpush3.bf16.msra.mxu1 %v17463_v54  ;;  %v5662_v54 = vor.u32 %v5661_v46, %v5658_v32  ;;  %v287_v32 = vld [vmem:[#allocation2 + $0x98] sm:$0xe] }
 0x1fa   : > { %15075 = vmatprep.subr.bf16.mxu1 %v22017_v1  ;;  %v2139_v63 = vrot.slane %v2137_v62, 3 }
 0x1fb   : > { %v5671_v56 = vsel %vm22009_vm5, %v5662_v54, %v5670_v2 }
 0x1fc   : > { %14608 = vmatpush3.bf16.msra.mxu0 %v17461_v24  ;;  %v5676_v24 = vshll.u32 %v18908_v31, 16 }
 0x1fd   : > { %15076 = vmatpush3.bf16.msra.mxu1 %v17464_v37  ;;  %14645 = vmatprep.subr.bf16.mxu0 %v22017_v1  ;;  %v2132_v37 = vsel %vm22009_vm5, %v2123_v13, %v2131_v57  ;;  %v2157_v13 = vrot.slane %v2155_v21, 3 }
 0x1fe   : > { %14574 = vmatmul.mubr.bf16.gmra.mrb[16].mxu0 %v1905_v20  ;;  %15113 = vmatprep.subr.bf16.mxu1 %v22017_v1  ;;  %v17465_v20 = vld [vmem:[%s22003_s1 + $0x200] sm:$0xff]  }
 0x1ff   : > { %15042 = vmatmul.mubr.bf16.gmra.mrb[16].mxu1 %v5446_v40  ;;  %14577 = vmatprep.mubr.msk.bf16.mxu0 %vm22012_vm0, %v22017_v1  ;;  %v2136_v40 = vrot.slane %v2134_v51, 2 }
 0x200   : > { %15045 = vmatprep.mubr.msk.bf16.mxu1 %vm22012_vm0, %v22017_v1 }
 0x201   : > { %v2140_v7 = vor.u32 %v2139_v63, %v2136_v40  ;;  %v2161_v40 = vshrl.u32 %v18989_v50, 16  ;;  %v2164_v63 = vshll.u32 %v18989_v50, 16 }
 0x203   : > { %v2166_v25 = vrot.slane %v2164_v63, 3 }
 0x206   : > { %14578 = vmatmul.mubr.bf16.gmra.mrb[20].mxu0 %v1907_v58  ;;  %v5675_v58 = vrot.slane %v5673_v19, 2  ;;  %v17469_v19 = vld [vmem:[%s22003_s1 + $0x220] sm:$0xff]  }
 0x207   : > { %15046 = vmatmul.mubr.bf16.gmra.mrb[20].mxu1 %v5448_v4  ;;  %14581 = vmatprep.mubr.msk.bf16.mxu0 %vm22012_vm0, %v22017_v1  ;;  %v5678_v4 = vrot.slane %v5676_v24, 3  ;;  %v288_v24 = vsel %vm19145_vm11, 0, %v287_v32  ;;  %v2182_v32 = vshll.u32 %v19035_v60, 16 }
 0x208   : > { %15049 = vmatprep.mubr.msk.bf16.mxu1 %vm22012_vm0, %v22017_v1  ;;  %289 = vst [vmem:[#allocation2 + $0x98] sm:$0xe] %v288_v24 }
 0x209   : > { %v5679_v26 = vor.u32 %v5678_v4, %v5675_v58  ;;  %v5700_v58 = vshrl.u32 %v18993_v53, 16  ;;  %v5703_v4 = vshll.u32 %v18993_v53, 16 }
 0x20b   : > { %v5680_v41 = vsel %vm22009_vm5, %v5670_v2, %v5679_v26  ;;  %v5696_v2 = vrot.slane %v5694_v9, 3  ;;  %v5702_v27 = vrot.slane %v5700_v58, 2  ;;  %v5705_v29 = vrot.slane %v5703_v4, 3 }
 0x20c   : > { %v5730_v58 = vshll.u32 %v19053_v23, 16 }
 0x20e   : > { %14582 = vmatmul.mubr.bf16.gmra.mrb[24].mxu0 %v1909_v14  ;;  %v17466_v14 = vld [vmem:[%s22003_s1 + $0x208] sm:$0xff]  }
 0x20f   : > { %15050 = vmatmul.mubr.bf16.gmra.mrb[24].mxu1 %v5450_v18  ;;  %14585 = vmatprep.mubr.msk.bf16.mxu0 %vm22012_vm0, %v22017_v1  ;;  %v2143_v18 = vshrl.u32 %v18929_v42, 16 }
 0x210   : > { %15053 = vmatprep.mubr.msk.bf16.mxu1 %vm22012_vm0, %v22017_v1 }
 0x211   : > { %v2145_v38 = vrot.slane %v2143_v18, 2  ;;  %v2163_v18 = vrot.slane %v2161_v40, 2  ;;  %v2191_v40 = vshll.u32 %v19049_v17, 16 }
 0x213   : > { %v2149_v5 = vor.u32 %v2148_v39, %v2145_v38  ;;  %v2167_v38 = vor.u32 %v2166_v25, %v2163_v18  ;;  %v2170_v39 = vshrl.u32 %v19019_v22, 16 }
 0x215   : > { %v2150_v35 = vsel %vm22009_vm5, %v2140_v7, %v2149_v5  ;;  %v2172_v21 = vrot.slane %v2170_v39, 2 }
 0x216   : > { %14586 = vmatmul.mubr.bf16.gmra.mrb[28].mxu0 %v1911_v34  ;;  %v17471_v34 = vld [vmem:[%s22003_s1 + $0x208] sm:$0xff]  }
 0x217   : > { %15054 = vmatmul.mubr.bf16.gmra.mrb[28].mxu1 %v5452_v36  ;;  %14589 = vmatprep.mubr.msk.bf16.mxu0 %vm22012_vm0, %v22017_v1  ;;  %v2141_v36 = vsel %vm22009_vm5, %v2131_v57, %v2140_v7  ;;  %v282_v57 = vsel %vm19138_vm8, 0, %v281_v52  ;;  %v17477_v7 = vld [vmem:[%s22003_s1 + $0x228] sm:$0xff]  }
 0x218   : > { %15057 = vmatprep.mubr.msk.bf16.mxu1 %vm22012_vm0, %v22017_v1  ;;  %283 = vst [vmem:[#allocation2 + $0x8] sm:$0x3] %v282_v57 }
 0x21e   : > { %14590 = vmatmul.mubr.bf16.gmra.mrb[32].mxu0 %v1913_v33  ;;  %v5688_v33 = vor.u32 %v5687_v43, %v5684_v8  ;;  %v5706_v8 = vor.u32 %v5705_v29, %v5702_v27  ;;  %v5709_v43 = vshrl.u32 %v19023_v59, 16  ;;  %v19230_v27 = vld [vmem:[%s17871_s10 + $0xa0] ss:$0 sps:$4 sm:$0x77]  }
 0x21f   : > { %15058 = vmatmul.mubr.bf16.gmra.mrb[32].mxu1 %v5454_v49  ;;  %14609 = vmatprep.mubr.msk.bf16.mxu0 %vm22012_vm0, %v22017_v1  ;;  %v5691_v49 = vshrl.u32 %v18963_v16, 16  ;;  %v5736_v39 = vshrl.u32 %v19230_v27, 16 }
 0x220   : > { %15077 = vmatprep.mubr.msk.bf16.mxu1 %vm22012_vm0, %v22017_v1  ;;  %v5689_v62 = vsel %vm22009_vm5, %v5679_v26, %v5688_v33  ;;  %v5711_v9 = vrot.slane %v5709_v43, 2 }
 0x221   : > { %v5693_v54 = vrot.slane %v5691_v49, 2 }
 0x226   : > { %14610 = vmatmul.mubr.bf16.vlgmr.msra.gmra.mrb[0].mxu0 %v2132_v37  ;;  %v17476_v37 = vld [vmem:[%s22003_s1 + $0x220] sm:$0xff]  }
 0x227   : > { %15078 = vmatmul.mubr.bf16.vlgmr.msra.gmra.mrb[0].mxu1 %v5671_v56  ;;  %14646 = vmatpush3.bf16.msra.mxu0 %v17465_v20  ;;  %v2158_v20 = vor.u32 %v2157_v13, %v2154_v55  ;;  %v5697_v56 = vor.u32 %v5696_v2, %v5693_v54  ;;  %v5718_v55 = vshrl.u32 %v19039_v61, 16  ;;  %v5721_v13 = vshll.u32 %v19039_v61, 16 }
 0x228   : > { %14613 = vmatprep.mubr.msk.bf16.mxu0 %vm22012_vm0, %v22017_v1  ;;  %15081 = vmatprep.mubr.msk.bf16.mxu1 %vm22012_vm0, %v22017_v1  ;;  %v2184_v54 = vrot.slane %v2182_v32, 3 }
 0x229   : > { %14647 = vmatprep.subr.bf16.mxu0 %v22017_v1  ;;  %15114 = vmatpush3.bf16.msra.mxu1 %v17470_v11  ;;  %v17472_v11 = vld [vmem:[%s22003_s1 + $0x228] sm:$0xff]   ;;  %v5698_v26 = vsel %vm22009_vm5, %v5688_v33, %v5697_v56  ;;  %v2168_v30 = vsel %vm22009_vm5, %v2158_v20, %v2167_v38  ;;  %v5707_v49 = vsel %vm22009_vm5, %v5697_v56, %v5706_v8  ;;  %v5723_v24 = vrot.slane %v5721_v13, 3 }
 0x22a   : > { %15115 = vmatprep.subr.bf16.mxu1 %v22017_v1  ;;  %v5727_v56 = vshrl.u32 %v19053_v23, 16 }
 0x22b   : > { %14648 = vmatpush3.bf16.msra.mxu0 %v17466_v14  ;;  %v2159_v14 = vsel %vm22009_vm5, %v2149_v5, %v2158_v20  ;;  %v17482_v5 = vld [vmem:[%s22003_s1 + $0x238] sm:$0xff]   ;;  %v2188_v20 = vshrl.u32 %v19049_v17, 16 }
 0x22c   : > { %14649 = vmatprep.subr.bf16.mxu0 %v22017_v1  ;;  %v5729_v25 = vrot.slane %v5727_v56, 2 }
 0x22d   : > { %15116 = vmatpush3.bf16.msra.mxu1 %v17471_v34  ;;  %v17475_v34 = vld [vmem:[%s22003_s1 + $0x230] sm:$0xff]  }
 0x22e   : > { %14614 = vmatmul.mubr.bf16.gmra.mrb[4].mxu0 %v2141_v36  ;;  %15117 = vmatprep.subr.bf16.mxu1 %v22017_v1  ;;  %v17481_v36 = vld [vmem:[%s22003_s1 + $0x230] sm:$0xff]  }
 0x22f   : > { %15082 = vmatmul.mubr.bf16.gmra.mrb[4].mxu1 %v5680_v41  ;;  %14617 = vmatprep.mubr.msk.bf16.mxu0 %vm22012_vm0, %v22017_v1  ;;  %v2173_v41 = vshll.u32 %v19019_v22, 16 }
 0x230   : > { %15085 = vmatprep.mubr.msk.bf16.mxu1 %vm22012_vm0, %v22017_v1  ;;  %14650 = vmatpush3.bf16.msra.mxu0 %v17467_v47  ;;  %v5712_v47 = vshll.u32 %v19023_v59, 16 }
 0x231   : > { %14651 = vmatprep.subr.bf16.mxu0 %v22017_v1  ;;  %15118 = vmatpush3.bf16.msra.mxu1 %v17473_v48  ;;  %v17479_v48 = vld [vmem:[%s22003_s1 + $0x238] sm:$0xff]   ;;  %v2175_v33 = vrot.slane %v2173_v41, 3  ;;  %v5739_v41 = vshll.u32 %v19230_v27, 16 }
 0x232   : > { %15119 = vmatprep.subr.bf16.mxu1 %v22017_v1 }
 0x233   : > { %v2176_v52 = vor.u32 %v2175_v33, %v2172_v21 }
 0x234   : > { %14652 = vmatpush3.bf16.msra.mxu0 %v17468_v15  ;;  %v5714_v15 = vrot.slane %v5712_v47, 3 }
 0x235   : > { %14653 = vmatprep.subr.bf16.mxu0 %v22017_v1  ;;  %15120 = vmatpush3.bf16.msra.mxu1 %v17474_v44  ;;  %v2179_v44 = vshrl.u32 %v19035_v60, 16  ;;  %v2177_v57 = vsel %vm22009_vm5, %v2167_v38, %v2176_v52 }
 0x236   : > { %14618 = vmatmul.mubr.bf16.gmra.mrb[8].mxu0 %v2150_v35  ;;  %15121 = vmatprep.subr.bf16.mxu1 %v22017_v1  ;;  %v5715_v35 = vor.u32 %v5714_v15, %v5711_v9  ;;  %v5924_v9 = vld [vmem:[%s17871_s10 + $0x58] sm:$0x8] }
 0x237   : > { %15086 = vmatmul.mubr.bf16.gmra.mrb[8].mxu1 %v5689_v62  ;;  %14621 = vmatprep.mubr.msk.bf16.mxu0 %vm22012_vm0, %v22017_v1  ;;  %v2181_v62 = vrot.slane %v2179_v44, 2  ;;  %v13002_v32 = vcombine.low %v5924_v9, %v18875_v3  ;;  %v2410_v3 = vrot.slane %v18904_v28, 3  ;;  %v5949_v28 = vrot.slane %v18933_v45, 3 }
 0x238   : > { %15089 = vmatprep.mubr.msk.bf16.mxu1 %vm22012_vm0, %v22017_v1  ;;  %14654 = vmatpush3.bf16.msra.mxu0 %v17469_v19  ;;  %v5716_v2 = vsel %vm22009_vm5, %v5706_v8, %v5715_v35  ;;  %v5720_v19 = vrot.slane %v5718_v55, 2  ;;  %v2408_v55 = vrot.slane %v18882_v12, 3  ;;  %v5947_v12 = vrot.slane %v18908_v31, 3 }
 0x239   : > { %14655 = vmatprep.subr.bf16.mxu0 %v22017_v1  ;;  %15122 = vmatpush3.bf16.msra.mxu1 %v17476_v37  ;;  %v2185_v37 = vor.u32 %v2184_v54, %v2181_v62  ;;  %v5944_v13 = vrot.slane %v13002_v32, 3  ;;  %v199_v32 = vld [vmem:[%s22005_s3] sm:$0xff] }
 0x23a   : > { %15123 = vmatprep.subr.bf16.mxu1 %v22017_v1  ;;  %v5724_v63 = vor.u32 %v5723_v24, %v5720_v19  ;;  %v2411_v54 = vsel %vm22007_vm12, %v2408_v55, %v2410_v3  ;;  %v5950_v31 = vsel %vm22007_vm12, %v5947_v12, %v5949_v28  ;;  %v2414_v24 = vrot.slane %v18959_v10, 3 }
 0x23b   : > { %v2186_v4 = vsel %vm22009_vm5, %v2176_v52, %v2185_v37  ;;  %v5953_v10 = vrot.slane %v18993_v53, 3 }
 0x23c   : > { %14656 = vmatpush3.bf16.msra.mxu0 %v17472_v11  ;;  %v2190_v11 = vrot.slane %v2188_v20, 2  ;;  %v5725_v18 = vsel %vm22009_vm5, %v5715_v35, %v5724_v63  ;;  %v2416_v20 = vrot.slane %v18989_v50, 3  ;;  %v5955_v50 = vrot.slane %v19023_v59, 3 }
 0x23d   : > { %14657 = vmatprep.subr.bf16.mxu0 %v22017_v1  ;;  %15124 = vmatpush3.bf16.msra.mxu1 %v17477_v7  ;;  %v2193_v7 = vrot.slane %v2191_v40, 3 }
 0x23e   : > { %14622 = vmatmul.mubr.bf16.gmra.mrb[12].mxu0 %v2159_v14  ;;  %15125 = vmatprep.subr.bf16.mxu1 %v22017_v1  ;;  %v19226_v14 = vld [vmem:[%s17871_s10 + $0x58] ss:$0 sps:$4 sm:$0x77]   ;;  %v2417_v40 = vsel %vm22007_vm12, %v2414_v24, %v2416_v20  ;;  %v5956_v53 = vsel %vm22007_vm12, %v5953_v10, %v5955_v50 }
 0x23f   : > { %15090 = vmatmul.mubr.bf16.gmra.mrb[12].mxu1 %v5698_v26  ;;  %14625 = vmatprep.mubr.msk.bf16.mxu0 %vm22012_vm0, %v22017_v1  ;;  %v5732_v26 = vrot.slane %v5730_v58, 3  ;;  %v2194_v29 = vor.u32 %v2193_v7, %v2190_v11  ;;  %v2420_v58 = vrot.slane %v19035_v60, 3  ;;  %v2422_v11 = vrot.slane %v19049_v17, 3 }
 0x240   : > { %15093 = vmatprep.mubr.msk.bf16.mxu1 %vm22012_vm0, %v22017_v1  ;;  %14658 = vmatpush3.bf16.msra.mxu0 %v17475_v34  ;;  %v2197_v34 = vshrl.u32 %v19226_v14, 16  ;;  %v5959_v60 = vrot.slane %v19053_v23, 3  ;;  %v5961_v17 = vrot.slane %v19230_v27, 3  ;;  %v17487_v27 = vld [vmem:[%s22004_s2 + $0x50] sm:$0xff]  }
 0x241   : > { %14659 = vmatprep.subr.bf16.mxu0 %v22017_v1  ;;  %15126 = vmatpush3.bf16.msra.mxu1 %v17481_v36  ;;  %v2200_v36 = vshll.u32 %v19226_v14, 16  ;;  %v5733_v38 = vor.u32 %v5732_v26, %v5729_v25  ;;  %v2195_v8 = vsel %vm22009_vm5, %v2185_v37, %v2194_v29  ;;  %v2423_v7 = vsel %vm22007_vm12, %v2420_v58, %v2422_v11  ;;  %v17486_v26 = vld [vmem:[%s22004_s2 + $0x48] sm:$0xff]  }
 0x242   : > { %15127 = vmatprep.subr.bf16.mxu1 %v22017_v1  ;;  %v2199_v43 = vrot.slane %v2197_v34, 2  ;;  %v5962_v23 = vsel %vm22007_vm12, %v5959_v60, %v5961_v17  ;;  %v17489_v34 = vld [vmem:[%s22004_s2 + $0x60] sm:$0xff]  }
 0x243   : > { %v2202_v47 = vrot.slane %v2200_v36, 3  ;;  %v200_v36 = vlaneseq }
 0x244   : > { %14660 = vmatpush3.bf16.msra.mxu0 %v17479_v48  ;;  %v5734_v48 = vsel %vm22009_vm5, %v5724_v63, %v5733_v38  ;;  %v2418_v63 = vrot.slane %v19019_v22, 3  ;;  %v5957_v22 = vrot.slane %v19039_v61, 3 }
 0x245   : > { %15128 = vmatpush3.bf16.msra.mxu1 %v17482_v5  ;;  %15165 = vmatprep.subr.bf16.mxu0 %v22017_v1  ;;  %v5738_v5 = vrot.slane %v5736_v39, 2  ;;  %v2203_v21 = vor.u32 %v2202_v47, %v2199_v43  ;;  %v17792_v43 = vmov 1414812756  }
 0x246   : > { %14626 = vmatmul.mubr.bf16.gmra.mrb[16].mxu0 %v2168_v30  ;;  %15633 = vmatprep.subr.bf16.mxu1 %v22017_v1  ;;  %v5741_v30 = vrot.slane %v5739_v41, 3  ;;  %v2419_v56 = vsel %vm22007_vm12, %v2416_v20, %v2418_v63  ;;  %v5958_v59 = vsel %vm22007_vm12, %v5955_v50, %v5957_v22  ;;  %v5960_v61 = vsel %vm22007_vm12, %v5957_v22, %v5959_v60 }
 0x247   : > { %15094 = vmatmul.mubr.bf16.gmra.mrb[16].mxu1 %v5707_v49  ;;  %14629 = vmatprep.mubr.msk.bf16.mxu0 %vm22012_vm0, %v22017_v1  ;;  %v2385_v49 = vld [vmem:[%s17871_s10 + $0x10] sm:$0x8]  ;;  %v2204_v15 = vsel %vm22009_vm5, %v2194_v29, %v2203_v21  ;;  %v17488_v29 = vld [vmem:[%s22004_s2 + $0x58] sm:$0xff]   ;;  %v17791_v41 = vmov 842150450   ;;  %v219_v47 = vunpack.c.l.s4 %v17792_v43 }
 0x248   : > { %15097 = vmatprep.mubr.msk.bf16.mxu1 %vm22012_vm0, %v22017_v1  ;;  %v5742_v33 = vor.u32 %v5741_v30, %v5738_v5  ;;  %v12749_v52 = vcombine.low %v2385_v49, %v18871_v0  ;;  %v19348_v30 = vshrl.u32 %v200_v36, 7  ;;  %v17491_v36 = vld [vmem:[%s22004_s2 + $0x70] sm:$0xff]  }
 0x249   : > { %v220_v49 = vunpack.c.0.s8 %v219_v47 }
 0x24a   : > { %v5743_v44 = vsel %vm22009_vm5, %v5733_v38, %v5742_v33  ;;  %v2407_v35 = vrot.slane %v12749_v52, 3  ;;  %v17790_v38 = vmov 269488144   ;;  %22027 = vst [vmem:[#allocation3_spill] sm:$0xff] %v19348_v30  ;;  %v2608_v52 = vsub.s32 0, %v19348_v30 }
 0x24b   : > { %v205_v39 = vunpack.c.l.s4 %v17790_v38  ;;  %v19387_v22 = vadd.s32 16, %v19348_v30 }
 0x24c   : > { %v2409_v0 = vsel %vm22007_vm12, %v2407_v35, %v2408_v55  ;;  %v223_v55 = vsub.s32 %v220_v49, %v19348_v30  ;;  %v17795_v49 = vmov 0  }
 0x24d   : > { %v206_v21 = vunpack.c.0.s8 %v205_v39  ;;  %276 = vst [vmem:[#allocation2] sm:$0xf] %v17795_v49  ;;  %277 = vst [vmem:[#allocation2 + $0x4] sm:$0xf] %v17795_v49 }
 0x24e   : > { %14630 = vmatmul.mubr.bf16.gmra.mrb[20].mxu0 %v2177_v57  ;;  %v5945_v57 = vrot.slane %v18889_v6, 3  ;;  %290 = vst [vmem:[#allocation2 + $0x9c] sm:$0xf] %v17795_v49  ;;  %291 = vst [vmem:[#allocation2 + $0xa0] sm:$0xf] %v17795_v49 }
 0x24f   : > { %15098 = vmatmul.mubr.bf16.gmra.mrb[20].mxu1 %v5716_v2  ;;  %14633 = vmatprep.mubr.msk.bf16.mxu0 %vm22012_vm0, %v22017_v1  ;;  %v2412_v2 = vrot.slane %v18929_v42, 3  ;;  %v5951_v42 = vrot.slane %v18963_v16, 3 }
 0x250   : > { %15101 = vmatprep.mubr.msk.bf16.mxu1 %vm22012_vm0, %v22017_v1  ;;  %v5946_v62 = vsel %vm22007_vm12, %v5944_v13, %v5945_v57  ;;  %v5948_v6 = vsel %vm22007_vm12, %v5945_v57, %v5947_v12  ;;  %v2630_v57 = vsub.s32 1, %v19348_v30 }
 0x251   : > { %v2413_v19 = vsel %vm22007_vm12, %v2410_v3, %v2412_v2  ;;  %v2415_v37 = vsel %vm22007_vm12, %v2412_v2, %v2414_v24  ;;  %v5952_v45 = vsel %vm22007_vm12, %v5949_v28, %v5951_v42  ;;  %v5954_v16 = vsel %vm22007_vm12, %v5951_v42, %v5953_v10 }
 0x252   : > { %v202_v3 = vadd.s32 8, %v19348_v30  ;;  %v224_v2 = vrot.slane %v19348_v30, %v223_v55 }
 0x254   : > { %vm19389_vm15 = vcmp.lt.s32.totalorder %v224_v2, 16 }
 0x256   : > { %14634 = vmatmul.mubr.bf16.gmra.mrb[24].mxu0 %v2186_v4  ;;  %v2421_v4 = vsel %vm22007_vm12, %v2418_v63, %v2420_v58 }
 0x257   : > { %15102 = vmatmul.mubr.bf16.gmra.mrb[24].mxu1 %v5725_v18  ;;  %14637 = vmatprep.mubr.msk.bf16.mxu0 %vm22012_vm0, %v22017_v1  ;;  %v2424_v18 = vrot.slane %v19226_v14, 3  ;;  %v17485_v14 = vld [vmem:[%s22004_s2 + $0x40] sm:$0xff]  }
 0x258   : > { %15105 = vmatprep.mubr.msk.bf16.mxu1 %vm22012_vm0, %v22017_v1 }
 0x259   : > { %v2425_v25 = vsel %vm22007_vm12, %v2422_v11, %v2424_v18 }
 0x25e   : > { %14638 = vmatmul.mubr.bf16.gmra.mrb[28].mxu0 %v2195_v8  ;;  %v212_v8 = vunpack.c.l.s4 %v17791_v41 }
 0x25f   : > { %15106 = vmatmul.mubr.bf16.gmra.mrb[28].mxu1 %v5734_v48  ;;  %14641 = vmatprep.mubr.msk.bf16.mxu0 %vm22012_vm0, %v22017_v1  ;;  %v17793_v48 = vmov 1987475062  }
 0x260   : > { %15109 = vmatprep.mubr.msk.bf16.mxu1 %vm22012_vm0, %v22017_v1  ;;  %v226_v5 = vunpack.c.l.s4 %v17793_v48  ;;  %v213_v33 = vunpack.c.0.s8 %v212_v8 }
 0x262   : > { %v227_v9 = vunpack.c.0.s8 %v226_v5  ;;  %v216_v35 = vsub.s32 %v213_v33, %v19348_v30 }
 0x264   : > { %v230_v13 = vsub.s32 %v227_v9, %v19348_v30 }
 0x266   : > { %14642 = vmatmul.mubr.bf16.gmra.mrb[32].mxu0 %v2204_v15  ;;  %v19351_v15 = vsub.s32 %v206_v21, %v19348_v30  ;;  %v231_v28 = vrot.slane %v19348_v30, %v230_v13 }
 0x267   : > { %15110 = vmatmul.mubr.bf16.gmra.mrb[32].mxu1 %v5743_v44  ;;  %14661 = vmatprep.mubr.msk.bf16.mxu0 %vm22012_vm0, %v22017_v1  ;;  %v17490_v44 = vld [vmem:[%s22004_s2 + $0x68] sm:$0xff]  }
 0x268   : > { %15129 = vmatprep.mubr.msk.bf16.mxu1 %vm22012_vm0, %v22017_v1  ;;  %v210_v12 = vrot.slane %v19348_v30, %v19351_v15  ;;  %v238_v42 = vrot.slane %v202_v3, %v19351_v15  ;;  %vm19393_vm6 = vcmp.lt.s32.totalorder %v231_v28, 16  ;;  %v266_v8 = vrot.slane %v19387_v22, %v19351_v15 }
 0x26a   : > { %vm19376_vm13 = vcmp.lt.s32.totalorder %v210_v12, 16  ;;  %vm19403_vm9 = vcmp.lt.s32.totalorder %v238_v42, 16 }
 0x26e   : > { %14662 = vmatmul.mubr.bf16.vlgmr.msra.gmra.mrb[0].mxu0 %v2409_v0  ;;  %v17794_v0 = vmov 1983009808  }
 0x26f   : > { %15130 = vmatmul.mubr.bf16.vlgmr.msra.gmra.mrb[0].mxu1 %v5946_v62  ;;  %14665 = vmatprep.mubr.msk.bf16.mxu0 %vm22012_vm0, %v22017_v1  ;;  %v2724_v62 = vunpack.c.l.s4 %v17794_v0 }
 0x270   : > { %15133 = vmatprep.mubr.msk.bf16.mxu1 %vm22012_vm0, %v22017_v1  ;;  %15166 = vmatpush3.bf16.msra.mxu0 %v17485_v14 }
 0x271   : > { %15167 = vmatprep.subr.bf16.mxu0 %v22017_v1  ;;  %v2725_v24 = vunpack.c.0.s8 %v2724_v62 }
 0x273   : > { %v19400_v18 = vsub.s32 %v2725_v24, %v19348_v30 }
 0x274   : > { %15168 = vmatpush3.bf16.msra.mxu0 %v17486_v26 }
 0x275   : > { %15169 = vmatprep.subr.bf16.mxu0 %v22017_v1 }
 0x276   : > { %14666 = vmatmul.mubr.bf16.gmra.mrb[4].mxu0 %v2411_v54  ;;  %v19368_v54 = vrot.slane %v199_v32, %v2608_v52 }
 0x277   : > { %15134 = vmatmul.mubr.bf16.gmra.mrb[4].mxu1 %v5948_v6  ;;  %14669 = vmatprep.mubr.msk.bf16.mxu0 %vm22012_vm0, %v22017_v1  ;;  %v217_v6 = vrot.slane %v19348_v30, %v216_v35 }
 0x278   : > { %15137 = vmatprep.mubr.msk.bf16.mxu1 %vm22012_vm0, %v22017_v1  ;;  %15170 = vmatpush3.bf16.msra.mxu0 %v17487_v27 }
 0x279   : > { %15171 = vmatprep.subr.bf16.mxu0 %v22017_v1  ;;  %vm19381_vm14 = vcmp.lt.s32.totalorder %v217_v6, 16 }
 0x27c   : > { %15172 = vmatpush3.bf16.msra.mxu0 %v17488_v29 }
 0x27d   : > { %15173 = vmatprep.subr.bf16.mxu0 %v22017_v1 }
 0x27e   : > { %14670 = vmatmul.mubr.bf16.gmra.mrb[8].mxu0 %v2413_v19  ;;  %v19373_v19 = vrot.slane %v199_v32, %v2630_v57 }
 0x27f   : > { %15138 = vmatmul.mubr.bf16.gmra.mrb[8].mxu1 %v5950_v31  ;;  %14673 = vmatprep.mubr.msk.bf16.mxu0 %vm22012_vm0, %v22017_v1 }
 0x280   : > { %15141 = vmatprep.mubr.msk.bf16.mxu1 %vm22012_vm0, %v22017_v1  ;;  %15174 = vmatpush3.bf16.msra.mxu0 %v17489_v34 }
 0x281   : > { %15175 = vmatprep.subr.bf16.mxu0 %v22017_v1 }
 0x284   : > { %15176 = vmatpush3.bf16.msra.mxu0 %v17490_v44 }
 0x285   : > { %15177 = vmatprep.subr.bf16.mxu0 %v22017_v1 }
 0x286   : > { %14674 = vmatmul.mubr.bf16.gmra.mrb[12].mxu0 %v2415_v37 }
 0x287   : > { %15142 = vmatmul.mubr.bf16.gmra.mrb[12].mxu1 %v5952_v45  ;;  %14677 = vmatprep.mubr.msk.bf16.mxu0 %vm22012_vm0, %v22017_v1 }
 0x288   : > { %15145 = vmatprep.mubr.msk.bf16.mxu1 %vm22012_vm0, %v22017_v1  ;;  %15178 = vmatpush3.bf16.msra.mxu0 %v17491_v36 }
 0x289   : > { %15179 = vmatprep.subr.bf16.mxu0 %v22017_v1 }
 0x28e   : > { %14678 = vmatmul.mubr.bf16.gmra.mrb[16].mxu0 %v2417_v40  ;;  %v245_v40 = vrot.slane %v202_v3, %v216_v35 }
 0x28f   : > { %15146 = vmatmul.mubr.bf16.gmra.mrb[16].mxu1 %v5954_v16  ;;  %14681 = vmatprep.mubr.msk.bf16.mxu0 %vm22012_vm0, %v22017_v1  ;;  %v252_v16 = vrot.slane %v202_v3, %v223_v55 }
 0x290   : > { %15149 = vmatprep.mubr.msk.bf16.mxu1 %vm22012_vm0, %v22017_v1  ;;  %vm19408_vm12 = vcmp.lt.s32.totalorder %v245_v40, 16 }
 0x291   : > { %vm19412_vm2 = vcmp.lt.s32.totalorder %v252_v16, 16 }
 0x296   : > { %14682 = vmatmul.mubr.bf16.gmra.mrb[20].mxu0 %v2419_v56 }
 0x297   : > { %15150 = vmatmul.mubr.bf16.gmra.mrb[20].mxu1 %v5956_v53  ;;  %14685 = vmatprep.mubr.msk.bf16.mxu0 %vm22012_vm0, %v22017_v1  ;;  %v259_v53 = vrot.slane %v202_v3, %v230_v13 }
 0x298   : > { %15153 = vmatprep.mubr.msk.bf16.mxu1 %vm22012_vm0, %v22017_v1 }
 0x299   : > { %vm19420_vm4 = vcmp.lt.s32.totalorder %v259_v53, 16 }
 0x29e   : > { %14686 = vmatmul.mubr.bf16.gmra.mrb[24].mxu0 %v2421_v4 }
 0x29f   : > { %15154 = vmatmul.mubr.bf16.gmra.mrb[24].mxu1 %v5958_v59  ;;  %14689 = vmatprep.mubr.msk.bf16.mxu0 %vm22012_vm0, %v22017_v1 }
 0x2a0   : > { %15157 = vmatprep.mubr.msk.bf16.mxu1 %vm22012_vm0, %v22017_v1 }
 0x2a6   : > { %14690 = vmatmul.mubr.bf16.gmra.mrb[28].mxu0 %v2423_v7 }
 0x2a7   : > { %15158 = vmatmul.mubr.bf16.gmra.mrb[28].mxu1 %v5960_v61  ;;  %14693 = vmatprep.mubr.msk.bf16.mxu0 %vm22012_vm0, %v22017_v1 }
 0x2a8   : > { %15161 = vmatprep.mubr.msk.bf16.mxu1 %vm22012_vm0, %v22017_v1 }
 0x2ae   : > { %14694 = vmatmul.mubr.bf16.gmra.mrb[32].mxu0 %v2425_v25 }
 0x2af   : > { %15162 = vmatmul.mubr.bf16.gmra.mrb[32].mxu1 %v5962_v23  ;;  %15181 = vmatprep.mubr.msk.bf16.mxu0 %vm22012_vm0, %v22017_v1 }
 0x2b0   : > { %15649 = vmatprep.mubr.msk.bf16.mxu1 %vm22012_vm0, %v22017_v1 }
 0x341   : > { %v2517_v31 = vpop.f32.mrb[0].mxu0 }
 0x342   : > { %v2610_v45 = vmul.f32 %v19368_v54, %v2517_v31  ;;  %v6054_v20 = vpop.f32.mrb[0].mxu1  ;;  %v14663_v10 = vpop.f32.mrb[1].mxu0 }
 0x343   : > { %v6143_v50 = vmul.f32 %v6054_v20, %v19368_v54  ;;  %v15131_v56 = vpop.f32.mrb[1].mxu1  ;;  %v2520_v58 = vpop.f32.mrb[2].mxu0 }
 0x344   : > { %v2632_v11 = vadd.f32 %v19373_v19, %v2610_v45  ;;  %v2611_v60 = vmul.f32 %v19368_v54, %v2520_v58  ;;  %v6057_v7 = vpop.f32.mrb[2].mxu1  ;;  %v14664_v61 = vpop.f32.mrb[3].mxu0 }
 0x345   : > { %v6161_v17 = vadd.f32 %v6143_v50, %v19373_v19  ;;  %v6144_v23 = vmul.f32 %v6057_v7, %v19368_v54  ;;  %v15132_v14 = vpop.f32.mrb[3].mxu1 }
 0x346   : > { %vm2650_vm10 = vcmp.ge.f32.partialorder %v2632_v11, 0.0  ;;  %v2668_v26 = vmul.f32 0.01, %v2632_v11  ;;  %v2633_v34 = vadd.f32 %v19373_v19, %v2611_v60 }
 0x347   : > { %vm6179_vm5 = vcmp.ge.f32.partialorder %v6161_v17, 0.0  ;;  %v6197_v38 = vmul.f32 0.01, %v6161_v17  ;;  %v6162_v41 = vadd.f32 %v6144_v23, %v19373_v19 }
 0x348   : > { %v2686_v43 = vsel %vm2650_vm10, %v2632_v11, %v2668_v26  ;;  %vm2651_vm3 = vcmp.ge.f32.partialorder %v2633_v34, 0.0  ;;  %v2669_v47 = vmul.f32 0.01, %v2633_v34 }
 0x349   : > { %v2722_v48 = vcombine.high %v2686_v43, %v2686_v43  ;;  %v2729_v5 = vrot.slane %v2686_v43, %v19400_v18  ;;  %v6215_v21 = vsel %vm6179_vm5, %v6161_v17, %v6197_v38  ;;  %vm6180_vm0 = vcmp.ge.f32.partialorder %v6162_v41, 0.0  ;;  %v2525_v33 = vpop.f32.mrb[4].mxu0 }
 0x34a   : > { %v6251_v9 = vcombine.high %v6215_v21, %v6215_v21  ;;  %v6258_v52 = vrot.slane %v6215_v21, %v19400_v18  ;;  %v2687_v44 = vsel %vm2651_vm3, %v2633_v34, %v2669_v47  ;;  %v6198_v32 = vmul.f32 0.01, %v6162_v41  ;;  %v6062_v35 = vpop.f32.mrb[4].mxu1  ;;  %v14667_v55 = vpop.f32.mrb[5].mxu0 }
 0x34b   : > { %v2736_v13 = vrot.slane %v2722_v48, %v19400_v18  ;;  %v2737_v57 = vcombine.high %v2729_v5, %v2729_v5  ;;  %v3100_v0 = vsel %vm19376_vm13, %v2729_v5, 0.0  ;;  %v2739_v62 = vcombine.high %v2687_v44, %v2687_v44  ;;  %v15135_v3 = vpop.f32.mrb[5].mxu1  ;;  %v19434_v12 = vpop.f32.mrb[6].mxu0 }
 0x34c   : > { %v6265_v6 = vrot.slane %v6251_v9, %v19400_v18  ;;  %v6266_v2 = vcombine.high %v6258_v52, %v6258_v52  ;;  %v6629_v28 = vsel %vm19376_vm13, %v6258_v52, 0.0  ;;  %v2746_v31 = vrot.slane %v2687_v44, %v19400_v18  ;;  %v19440_v24 = vpop.f32.mrb[6].mxu1  ;;  %v14668_v42 = vpop.f32.mrb[7].mxu0 }
 0x34d   : > { %v2738_v45 = vcombine.high %v2736_v13, %v2736_v13  ;;  %v3101_v20 = vsel %vm19381_vm14, %v2737_v57, 0.0  ;;  %v3102_v10 = vsel %vm19389_vm15, %v2736_v13, 0.0  ;;  %v2753_v40 = vrot.slane %v2739_v62, %v19400_v18  ;;  %v15136_v16 = vpop.f32.mrb[7].mxu1 }
 0x34e   : > { %v3244_v50 = vcombine.low %v3100_v0, %v3101_v20  ;;  %v6267_v56 = vcombine.high %v6265_v6, %v6265_v6  ;;  %v6630_v53 = vsel %vm19381_vm14, %v6266_v2, 0.0  ;;  %v6631_v58 = vsel %vm19389_vm15, %v6265_v6, 0.0 }
 0x34f   : > { %v3103_v11 = vsel %vm19393_vm6, %v2738_v45, 0.0  ;;  %v6773_v60 = vcombine.low %v6629_v28, %v6630_v53  ;;  %v2754_v7 = vcombine.high %v2746_v31, %v2746_v31  ;;  %v2755_v61 = vcombine.high %v2753_v40, %v2753_v40 }
 0x350   : > { %v3245_v17 = vcombine.low %v3102_v10, %v3103_v11  ;;  %v3252_v23 = vrot.slane %v3244_v50, %v19400_v18  ;;  %v6632_v14 = vsel %vm19393_vm6, %v6267_v56, 0.0  ;;  %v3104_v26 = vsel %vm19403_vm9, %v2746_v31, 0.0 }
 0x351   : > { %v6774_v34 = vcombine.low %v6631_v58, %v6632_v14  ;;  %v6781_v36 = vrot.slane %v6773_v60, %v19400_v18  ;;  %v3105_v38 = vsel %vm19408_vm12, %v2754_v7, 0.0  ;;  %v3106_v43 = vsel %vm19412_vm2, %v2753_v40, 0.0  ;;  %v19463_v47 = vpop.f32.mrb[8].mxu0  ;;  %v17492_v40 = vld [vmem:[%s22004_s2 + $0x78] sm:$0xff]  }
 0x352   : > { %v3259_v48 = vrot.slane %v3245_v17, %v19400_v18  ;;  %v3107_v5 = vsel %vm19420_vm4, %v2755_v61, 0.0  ;;  %v3261_v21 = vcombine.low %v3104_v26, %v3105_v38  ;;  %v6216_v49 = vsel %vm6180_vm0, %v6162_v41, %v6198_v32  ;;  %v19469_v9 = vpop.f32.mrb[8].mxu1  ;;  %v14671_v52 = vpop.f32.mrb[9].mxu0  ;;  %15180 = vmatpush3.bf16.msra.mxu0 %v17492_v40 }
 0x353   : > { %vm3622_vm3 = vsmask.f32 5392  ;;  %v6788_v44 = vrot.slane %v6774_v34, %v19400_v18  ;;  %v3262_v55 = vcombine.low %v3106_v43, %v3107_v5  ;;  %v6268_v13 = vcombine.high %v6216_v49, %v6216_v49  ;;  %v15139_v0 = vpop.f32.mrb[9].mxu1  ;;  %v19473_v62 = vpop.f32.mrb[10].mxu0  ;;  %15217 = vmatprep.subr.bf16.mxu0 %v22017_v1 }
 0x354   : > { %v6275_v57 = vrot.slane %v6216_v49, %v19400_v18  ;;  %v3260_v3 = vcombine.low %v3252_v23, %v3259_v48  ;;  %v3269_v6 = vrot.slane %v3261_v21, %v19400_v18  ;;  %v2612_v2 = vmul.f32 %v19368_v54, %v2525_v33  ;;  %v19478_v32 = vpop.f32.mrb[10].mxu1  ;;  %v14672_v28 = vpop.f32.mrb[11].mxu0  ;;  %v3822_v48 = vld [vmem:[#allocation2 + $0x8] sm:$0xe]  ;;  %vm19519_vm10 = vmor %vm279_vm7, %vm3622_vm3 }
 0x355   : > { %v6145_v41 = vmul.f32 %v6062_v35, %v19368_v54  ;;  %v6789_v31 = vcombine.low %v6781_v36, %v6788_v44  ;;  %v3276_v42 = vrot.slane %v3262_v55, %v19400_v18  ;;  %v6282_v45 = vrot.slane %v6268_v13, %v19400_v18  ;;  %v15140_v10 = vpop.f32.mrb[11].mxu1 }
 0x356   : > { %v6283_v20 = vcombine.high %v6275_v57, %v6275_v57  ;;  %v13501_v16 = vpack.c.bf16 %v3260_v3, %v3260_v3  ;;  %v6633_v33 = vsel %vm19403_vm9, %v6275_v57, 0.0  ;;  %v2634_v35 = vadd.f32 %v19373_v19, %v2612_v2 }
 0x357   : > { %v19489_v50 = vadd.f32 %v6145_v41, %v19373_v19  ;;  %v13519_v56 = vpack.c.bf16 %v6789_v31, %v6789_v31  ;;  %v3277_v53 = vcombine.low %v3269_v6, %v3276_v42  ;;  %v6284_v58 = vcombine.high %v6282_v45, %v6282_v45 }
 0x358   : > { %v6634_v11 = vsel %vm19408_vm12, %v6283_v20, 0.0  ;;  %v3625_v60 = vshrl.u32 %v13501_v16, 16  ;;  %v3628_v7 = vshll.u32 %v13501_v16, 16  ;;  %v6635_v61 = vsel %vm19412_vm2, %v6282_v45, 0.0 }
 0x359   : > { %v6790_v17 = vcombine.low %v6633_v33, %v6634_v11  ;;  %v7152_v23 = vshrl.u32 %v13519_v56, 16  ;;  %v7155_v14 = vshll.u32 %v13519_v56, 16  ;;  %v13502_v26 = vpack.c.bf16 %v3277_v53, %v3277_v53  ;;  %v19498_v36 = vpop.f32.mrb[12].mxu0 }
 0x35a   : > { %v6636_v34 = vsel %vm19420_vm4, %v6284_v58, 0.0  ;;  %v3627_v38 = vrot.slane %v3625_v60, 6  ;;  %v3630_v43 = vrot.slane %v3628_v7, 7  ;;  %v19501_v49 = vpop.f32.mrb[12].mxu1  ;;  %v14675_v52 = vpop.f32.mrb[13].mxu0  ;;  %vm2652_vm0 = vcmp.ge.f32.partialorder %v2634_v35, 0.0 }
 0x35b   : > { %v6791_v5 = vcombine.low %v6635_v61, %v6636_v34  ;;  %v6798_v21 = vrot.slane %v6790_v17, %v19400_v18  ;;  %v7154_v44 = vrot.slane %v7152_v23, 6  ;;  %v7157_v55 = vrot.slane %v7155_v14, 7  ;;  %v15143_v0 = vpop.f32.mrb[13].mxu1  ;;  %v19503_v3 = vpop.f32.mrb[14].mxu0 }
 0x35c   : > { %v3634_v13 = vshrl.u32 %v13502_v26, 16  ;;  %v3637_v57 = vshll.u32 %v13502_v26, 16  ;;  %v3631_v6 = vor.u32 %v3630_v43, %v3627_v38  ;;  %v2670_v41 = vmul.f32 0.01, %v2634_v35  ;;  %v19506_v28 = vpop.f32.mrb[14].mxu1  ;;  %v14676_v31 = vpop.f32.mrb[15].mxu0 }
 0x35d   : > { %v6805_v2 = vrot.slane %v6791_v5, %v19400_v18  ;;  %v19508_v42 = vor.u32 %v7157_v55, %v7154_v44  ;;  %vm19513_vm5 = vcmp.lt.s32.totalorder %v266_v8, 16  ;;  %v15144_v40 = vpop.f32.mrb[15].mxu1  ;;  %vm6181_vm1 = vcmp.ge.f32.partialorder %v19489_v50, 0.0 }
 0x35e   : > { %v3636_v45 = vrot.slane %v3634_v13, 6  ;;  %v3639_v20 = vrot.slane %v3637_v57, 7  ;;  %v3632_v33 = vrot.slane %v3631_v6, 4  ;;  %v3823_v56 = vsel %vm19145_vm11, %v3631_v6, %v3822_v48 }
 0x35f   : > { %v6806_v53 = vcombine.low %v6798_v21, %v6805_v2  ;;  %v2688_v58 = vsel %vm2652_vm0, %v2634_v35, %v2670_v41  ;;  %3824 = vst [vmem:[#allocation2 + $0x8] sm:$0xe] %v3823_v56  ;;  %v7159_v8 = vrot.slane %v19508_v42, 4  ;;  %v6199_v7 = vmul.f32 0.01, %v19489_v50 }
 0x360   : > { %v19525_v11 = vor.u32 %v3639_v20, %v3636_v45  ;;  %v2756_v15 = vcombine.high %v2688_v58, %v2688_v58  ;;  %v2763_v22 = vrot.slane %v2688_v58, %v19400_v18  ;;  %v2613_v61 = vmul.f32 %v19368_v54, %v19434_v12 }
 0x361   : > { %v13520_v60 = vpack.c.bf16 %v6806_v53, %v6806_v53  ;;  %v6146_v14 = vmul.f32 %v19440_v24, %v19368_v54  ;;  %v19539_v26 = vpop.f32.mrb[16].mxu0  ;;  %v6217_v12 = vsel %vm6181_vm1, %v19489_v50, %v6199_v7 }
 0x362   : > { %v3641_v35 = vsel %vm19519_vm10, %v3632_v33, %v19525_v11  ;;  %v2770_v17 = vrot.slane %v2756_v15, %v19400_v18  ;;  %v2771_v23 = vcombine.high %v2763_v22, %v2763_v22  ;;  %v3108_v43 = vsel %vm19513_vm5, %v2763_v22, 0.0  ;;  %v19544_v48 = vpop.f32.mrb[16].mxu1  ;;  %v14679_v5 = vpop.f32.mrb[17].mxu0 }
 0x363   : > { %3825 = vst [vmem:[#allocation2 + $0xc] sm:$0xf] %v3641_v35  ;;  %v7161_v34 = vshrl.u32 %v13520_v60, 16  ;;  %v7164_v38 = vshll.u32 %v13520_v60, 16  ;;  %v6285_v44 = vcombine.high %v6217_v12, %v6217_v12  ;;  %v15147_v55 = vpop.f32.mrb[17].mxu1  ;;  %v19550_v13 = vpop.f32.mrb[18].mxu0  ;;  %v6292_v2 = vrot.slane %v6217_v12, %v19400_v18 }
 0x364   : > { %v2772_v21 = vcombine.high %v2770_v17, %v2770_v17  ;;  %v3109_v52 = vsel %vm19376_vm13, %v2771_v23, 0.0  ;;  %v3110_v24 = vsel %vm19381_vm14, %v2770_v17, 0.0  ;;  %v19553_v50 = vpop.f32.mrb[18].mxu1  ;;  %v14680_v41 = vpop.f32.mrb[19].mxu0  ;;  %v2635_v20 = vadd.f32 %v19373_v19, %v2613_v61 }
 0x365   : > { %v7163_v57 = vrot.slane %v7161_v34, 6  ;;  %v7166_v0 = vrot.slane %v7164_v38, 7  ;;  %v3278_v6 = vcombine.low %v3108_v43, %v3109_v52  ;;  %v6299_v45 = vrot.slane %v6285_v44, %v19400_v18  ;;  %v15148_v33 = vpop.f32.mrb[19].mxu1 }
 0x366   : > { %v3111_v31 = vsel %vm19389_vm15, %v2772_v21, 0.0  ;;  %v6164_v40 = vadd.f32 %v6146_v14, %v19373_v19  ;;  %v3642_v56 = vrot.slane %v19525_v11, 4  ;;  %v6300_v15 = vcombine.high %v6292_v2, %v6292_v2 }
 0x367   : > { %v19561_v53 = vor.u32 %v7166_v0, %v7163_v57  ;;  %v3279_v58 = vcombine.low %v3110_v24, %v3111_v31  ;;  %v3286_v22 = vrot.slane %v3278_v6, %v19400_v18  ;;  %v6301_v60 = vcombine.high %v6299_v45, %v6299_v45 }
 0x368   : > { %v6637_v7 = vsel %vm19513_vm5, %v6292_v2, 0.0  ;;  %v6639_v35 = vsel %vm19381_vm14, %v6299_v45, 0.0  ;;  %v6638_v23 = vsel %vm19376_vm13, %v6300_v15, 0.0  ;;  %vm2653_vm1 = vcmp.ge.f32.partialorder %v2635_v20, 0.0 }
 0x369   : > { %v7168_v61 = vsel %vm19519_vm10, %v7159_v8, %v19561_v53  ;;  %v3293_v17 = vrot.slane %v3279_v58, %v19400_v18  ;;  %v6640_v14 = vsel %vm19389_vm15, %v6301_v60, 0.0  ;;  %v6807_v34 = vcombine.low %v6637_v7, %v6638_v23  ;;  %v19576_v43 = vpop.f32.mrb[20].mxu0 }
 0x36a   : > { %7352 = vst [vmem:[#allocation2 + $0x54] sm:$0xf] %v7168_v61  ;;  %v2671_v38 = vmul.f32 0.01, %v2635_v20  ;;  %vm6182_vm7 = vcmp.ge.f32.partialorder %v6164_v40, 0.0  ;;  %v6808_v5 = vcombine.low %v6639_v35, %v6640_v14  ;;  %v2614_v8 = vmul.f32 %v19368_v54, %v19463_v47  ;;  %v19580_v52 = vpop.f32.mrb[20].mxu1 }
 0x36b   : > { %v3294_v12 = vcombine.low %v3286_v22, %v3293_v17  ;;  %v6200_v21 = vmul.f32 0.01, %v6164_v40  ;;  %v14683_v24 = vpop.f32.mrb[21].mxu0  ;;  %v7169_v44 = vrot.slane %v19561_v53, 4  ;;  %v6815_v55 = vrot.slane %v6807_v34, %v19400_v18  ;;  %v15151_v6 = vpop.f32.mrb[21].mxu1 }
 0x36c   : > { %v2689_v57 = vsel %vm2653_vm1, %v2635_v20, %v2671_v38  ;;  %v6147_v0 = vmul.f32 %v19469_v9, %v19368_v54  ;;  %v19586_v2 = vpop.f32.mrb[22].mxu0  ;;  %v6822_v31 = vrot.slane %v6808_v5, %v19400_v18  ;;  %v19590_v33 = vpop.f32.mrb[22].mxu1  ;;  %v2636_v22 = vadd.f32 %v19373_v19, %v2614_v8 }
 0x36d   : > { %v13503_v41 = vpack.c.bf16 %v3294_v12, %v3294_v12  ;;  %v2773_v45 = vcombine.high %v2689_v57, %v2689_v57  ;;  %v2780_v47 = vrot.slane %v2689_v57, %v19400_v18  ;;  %v14684_v58 = vpop.f32.mrb[23].mxu0  ;;  %v6218_v15 = vsel %vm6182_vm7, %v6164_v40, %v6200_v21  ;;  %v15152_v60 = vpop.f32.mrb[23].mxu1 }
 0x36e   : > { %v19595_v20 = vadd.f32 %v6147_v0, %v19373_v19  ;;  %v2615_v9 = vmul.f32 %v19368_v54, %v19473_v62  ;;  %v6823_v61 = vcombine.low %v6815_v55, %v6822_v31  ;;  %v6302_v34 = vcombine.high %v6218_v15, %v6218_v15 }
 0x36f   : > { %v3644_v7 = vshrl.u32 %v13503_v41, 16  ;;  %v3647_v35 = vshll.u32 %v13503_v41, 16  ;;  %v2787_v17 = vrot.slane %v2773_v45, %v19400_v18  ;;  %v2788_v23 = vcombine.high %v2780_v47, %v2780_v47 }
 0x370   : > { %v3112_v14 = vsel %vm19393_vm6, %v2780_v47, 0.0  ;;  %v6309_v40 = vrot.slane %v6218_v15, %v19400_v18  ;;  %v13521_v5 = vpack.c.bf16 %v6823_v61, %v6823_v61  ;;  %v6316_v24 = vrot.slane %v6302_v34, %v19400_v18 }
 0x371   : > { %v3646_v38 = vrot.slane %v3644_v7, 6  ;;  %v3649_v12 = vrot.slane %v3647_v35, 7  ;;  %v2789_v21 = vcombine.high %v2787_v17, %v2787_v17  ;;  %v3113_v62 = vsel %vm19403_vm9, %v2788_v23, 0.0  ;;  %v19608_v57 = vpop.f32.mrb[24].mxu0 }
 0x372   : > { %v3114_v8 = vsel %vm19408_vm12, %v2787_v17, 0.0  ;;  %v6317_v55 = vcombine.high %v6309_v40, %v6309_v40  ;;  %v7171_v6 = vshrl.u32 %v13521_v5, 16  ;;  %v7174_v41 = vshll.u32 %v13521_v5, 16  ;;  %v19614_v45 = vpop.f32.mrb[24].mxu1  ;;  %v14687_v47 = vpop.f32.mrb[25].mxu0 }
 0x373   : > { %v19610_v0 = vor.u32 %v3649_v12, %v3646_v38  ;;  %v3115_v31 = vsel %vm19412_vm2, %v2789_v21, 0.0  ;;  %v3295_v58 = vcombine.low %v3112_v14, %v3113_v62  ;;  %v6318_v60 = vcombine.high %v6316_v24, %v6316_v24  ;;  %v15155_v35 = vpop.f32.mrb[25].mxu1  ;;  %v19619_v61 = vpop.f32.mrb[26].mxu0 }
 0x374   : > { %v3296_v15 = vcombine.low %v3114_v8, %v3115_v31  ;;  %v19617_v7 = vadd.f32 %v19373_v19, %v2615_v9  ;;  %v7173_v23 = vrot.slane %v7171_v6, 6  ;;  %v7176_v34 = vrot.slane %v7174_v41, 7  ;;  %v19628_v14 = vpop.f32.mrb[26].mxu1  ;;  %v14688_v12 = vpop.f32.mrb[27].mxu0 }
 0x375   : > { %v3651_v17 = vsel %vm19519_vm10, %v3642_v56, %v19610_v0  ;;  %v6641_v38 = vsel %vm19393_vm6, %v6309_v40, 0.0  ;;  %v3303_v9 = vrot.slane %v3295_v58, %v19400_v18  ;;  %v6642_v21 = vsel %vm19403_vm9, %v6317_v55, 0.0  ;;  %v15156_v56 = vpop.f32.mrb[27].mxu1 }
 0x376   : > { %3826 = vst [vmem:[#allocation2 + $0x10] sm:$0xf] %v3651_v17  ;;  %v3310_v5 = vrot.slane %v3296_v15, %v19400_v18  ;;  %v6643_v11 = vsel %vm19408_vm12, %v6316_v24, 0.0  ;;  %v19636_v62 = vor.u32 %v7176_v34, %v7173_v23  ;;  %v6644_v40 = vsel %vm19412_vm2, %v6318_v60, 0.0 }
 0x377   : > { %v6824_v8 = vcombine.low %v6641_v38, %v6642_v21  ;;  %vm2654_vm3 = vcmp.ge.f32.partialorder %v2636_v22, 0.0  ;;  %v6825_v41 = vcombine.low %v6643_v11, %v6644_v40  ;;  %v2672_v31 = vmul.f32 0.01, %v2636_v22 }
 0x378   : > { %v3311_v6 = vcombine.low %v3303_v9, %v3310_v5  ;;  %vm6183_vm0 = vcmp.ge.f32.partialorder %v19595_v20, 0.0  ;;  %v3652_v47 = vrot.slane %v19610_v0, 4  ;;  %v7178_v24 = vsel %vm19519_vm10, %v7169_v44, %v19636_v62 }
 0x379   : > { %v7179_v55 = vrot.slane %v19636_v62, 4  ;;  %v6201_v58 = vmul.f32 0.01, %v19595_v20  ;;  %7353 = vst [vmem:[#allocation2 + $0x58] sm:$0xf] %v7178_v24  ;;  %v6832_v60 = vrot.slane %v6824_v8, %v19400_v18  ;;  %v6839_v35 = vrot.slane %v6825_v41, %v19400_v18 }
 0x37a   : > { %v13504_v15 = vpack.c.bf16 %v3311_v6, %v3311_v6  ;;  %v2690_v17 = vsel %vm2654_vm3, %v2636_v22, %v2672_v31  ;;  %vm2655_vm1 = vcmp.ge.f32.partialorder %v19617_v7, 0.0  ;;  %v2673_v11 = vmul.f32 0.01, %v19617_v7 }
 0x37b   : > { %v2790_v23 = vcombine.high %v2690_v17, %v2690_v17  ;;  %v2797_v0 = vrot.slane %v2690_v17, %v19400_v18  ;;  %v6219_v34 = vsel %vm6183_vm0, %v19595_v20, %v6201_v58  ;;  %v6840_v38 = vcombine.low %v6832_v60, %v6839_v35 }
 0x37c   : > { %v3654_v53 = vshrl.u32 %v13504_v15, 16  ;;  %v3657_v44 = vshll.u32 %v13504_v15, 16  ;;  %v6319_v12 = vcombine.high %v6219_v34, %v6219_v34  ;;  %v6326_v21 = vrot.slane %v6219_v34, %v19400_v18 }
 0x37d   : > { %v2804_v9 = vrot.slane %v2790_v23, %v19400_v18  ;;  %v2805_v5 = vcombine.high %v2797_v0, %v2797_v0  ;;  %v13522_v62 = vpack.c.bf16 %v6840_v38, %v6840_v38  ;;  %v3116_v20 = vsel %vm19420_vm4, %v2797_v0, 0.0 }
 0x37e   : > { %v3656_v56 = vrot.slane %v3654_v53, 6  ;;  %v3659_v22 = vrot.slane %v3657_v44, 7  ;;  %v6333_v40 = vrot.slane %v6319_v12, %v19400_v18  ;;  %v6334_v41 = vcombine.high %v6326_v21, %v6326_v21 }
 0x37f   : > { %v2806_v8 = vcombine.high %v2804_v9, %v2804_v9  ;;  %v3117_v6 = vsel %vm19513_vm5, %v2805_v5, 0.0  ;;  %v7181_v24 = vshrl.u32 %v13522_v62, 16  ;;  %v7184_v58 = vshll.u32 %v13522_v62, 16 }
 0x380   : > { %v19662_v31 = vor.u32 %v3659_v22, %v3656_v56  ;;  %v3312_v15 = vcombine.low %v3116_v20, %v3117_v6  ;;  %v3118_v60 = vsel %vm19376_vm13, %v2804_v9, 0.0  ;;  %v6335_v17 = vcombine.high %v6333_v40, %v6333_v40 }
 0x381   : > { %v3119_v35 = vsel %vm19381_vm14, %v2806_v8, 0.0  ;;  %v6646_v23 = vsel %vm19513_vm5, %v6334_v41, 0.0  ;;  %v7183_v34 = vrot.slane %v7181_v24, 6  ;;  %v7186_v53 = vrot.slane %v7184_v58, 7 }
 0x382   : > { %v3661_v0 = vsel %vm19519_vm10, %v3652_v47, %v19662_v31  ;;  %v6645_v44 = vsel %vm19420_vm4, %v6326_v21, 0.0  ;;  %v3313_v38 = vcombine.low %v3118_v60, %v3119_v35  ;;  %v3320_v12 = vrot.slane %v3312_v15, %v19400_v18  ;;  %v19695_v15 = vpop.f32.mrb[28].mxu0 }
 0x383   : > { %3827 = vst [vmem:[#allocation2 + $0x14] sm:$0xf] %v3661_v0  ;;  %v6647_v9 = vsel %vm19376_vm13, %v6333_v40, 0.0  ;;  %v6648_v5 = vsel %vm19381_vm14, %v6335_v17, 0.0  ;;  %v19680_v56 = vor.u32 %v7186_v53, %v7183_v34  ;;  %v6841_v22 = vcombine.low %v6645_v44, %v6646_v23 }
 0x384   : > { %v6842_v62 = vcombine.low %v6647_v9, %v6648_v5  ;;  %v2691_v47 = vsel %vm2655_vm1, %v19617_v7, %v2673_v11  ;;  %v3327_v21 = vrot.slane %v3313_v38, %v19400_v18  ;;  %v6148_v6 = vmul.f32 %v19478_v32, %v19368_v54  ;;  %v19697_v7 = vpop.f32.mrb[28].mxu1 }
 0x385   : > { %v2807_v8 = vcombine.high %v2691_v47, %v2691_v47  ;;  %v2814_v20 = vrot.slane %v2691_v47, %v19400_v18  ;;  %v3662_v40 = vrot.slane %v19662_v31, 4  ;;  %v7188_v41 = vsel %vm19519_vm10, %v7179_v55, %v19680_v56  ;;  %v14691_v31 = vpop.f32.mrb[29].mxu0  ;;  %v15159_v17 = vpop.f32.mrb[29].mxu1 }
 0x386   : > { %v6849_v24 = vrot.slane %v6841_v22, %v19400_v18  ;;  %v6856_v58 = vrot.slane %v6842_v62, %v19400_v18  ;;  %7354 = vst [vmem:[#allocation2 + $0x5c] sm:$0xf] %v7188_v41  ;;  %v3328_v11 = vcombine.low %v3320_v12, %v3327_v21  ;;  %v6166_v55 = vadd.f32 %v6148_v6, %v19373_v19  ;;  %v19707_v53 = vpop.f32.mrb[30].mxu0  ;;  %v19709_v44 = vpop.f32.mrb[30].mxu1 }
 0x387   : > { %v2821_v60 = vrot.slane %v2807_v8, %v19400_v18  ;;  %v2822_v35 = vcombine.high %v2814_v20, %v2814_v20  ;;  %v3120_v32 = vsel %vm19389_vm15, %v2814_v20, 0.0  ;;  %v2616_v0 = vmul.f32 %v19368_v54, %v19498_v36  ;;  %v14692_v22 = vpop.f32.mrb[31].mxu0  ;;  %v15160_v62 = vpop.f32.mrb[31].mxu1 }
 0x388   : > { %v6857_v23 = vcombine.low %v6849_v24, %v6856_v58  ;;  %v6149_v34 = vmul.f32 %v19501_v49, %v19368_v54  ;;  %v13505_v38 = vpack.c.bf16 %v3328_v11, %v3328_v11  ;;  %vm6184_vm7 = vcmp.ge.f32.partialorder %v6166_v55, 0.0 }
 0x389   : > { %v2823_v12 = vcombine.high %v2821_v60, %v2821_v60  ;;  %v3121_v9 = vsel %vm19393_vm6, %v2822_v35, 0.0  ;;  %v3122_v5 = vsel %vm19403_vm9, %v2821_v60, 0.0  ;;  %v6202_v36 = vmul.f32 0.01, %v6166_v55 }
 0x38a   : > { %v13523_v47 = vpack.c.bf16 %v6857_v23, %v6857_v23  ;;  %v3329_v21 = vcombine.low %v3120_v32, %v3121_v9  ;;  %v3664_v8 = vshrl.u32 %v13505_v38, 16  ;;  %v3667_v49 = vshll.u32 %v13505_v38, 16 }
 0x38b   : > { %v3123_v20 = vsel %vm19408_vm12, %v2823_v12, 0.0  ;;  %v2638_v6 = vadd.f32 %v19373_v19, %v2616_v0  ;;  %v7189_v41 = vrot.slane %v19680_v56, 4  ;;  %v6220_v17 = vsel %vm6184_vm7, %v6166_v55, %v6202_v36  ;;  %v17495_v56 = vld [vmem:[%s22004_s2 + $0x40] sm:$0xff]  }
 0x38c   : > { %v7191_v24 = vshrl.u32 %v13523_v47, 16  ;;  %v7194_v58 = vshll.u32 %v13523_v47, 16  ;;  %v3330_v11 = vcombine.low %v3122_v5, %v3123_v20  ;;  %v3666_v35 = vrot.slane %v3664_v8, 6  ;;  %15634 = vmatpush3.bf16.msra.mxu1 %v17495_v56 }
 0x38d   : > { %v3669_v60 = vrot.slane %v3667_v49, 7  ;;  %v3337_v31 = vrot.slane %v3329_v21, %v19400_v18  ;;  %v6336_v38 = vcombine.high %v6220_v17, %v6220_v17  ;;  %v6343_v12 = vrot.slane %v6220_v17, %v19400_v18  ;;  %15635 = vmatprep.subr.bf16.mxu1 %v22017_v1 }
 0x38e   : > { %v7193_v32 = vrot.slane %v7191_v24, 6  ;;  %v7196_v23 = vrot.slane %v7194_v58, 7  ;;  %v3344_v9 = vrot.slane %v3330_v11, %v19400_v18  ;;  %v2674_v62 = vmul.f32 0.01, %v2638_v6 }
 0x38f   : > { %v3670_v22 = vor.u32 %v3669_v60, %v3666_v35  ;;  %v6167_v0 = vadd.f32 %v6149_v34, %v19373_v19  ;;  %v6350_v55 = vrot.slane %v6336_v38, %v19400_v18  ;;  %vm2656_vm3 = vcmp.ge.f32.partialorder %v2638_v6, 0.0 }
 0x390   : > { %v19726_v5 = vor.u32 %v7196_v23, %v7193_v32  ;;  %v3345_v47 = vcombine.low %v3337_v31, %v3344_v9  ;;  %v6351_v8 = vcombine.high %v6343_v12, %v6343_v12  ;;  %v2617_v49 = vmul.f32 %v19368_v54, %v19503_v3 }
 0x391   : > { %v3671_v21 = vsel %vm19519_vm10, %v3662_v40, %v3670_v22  ;;  %v3672_v36 = vrot.slane %v3670_v22, 4  ;;  %v6352_v24 = vcombine.high %v6350_v55, %v6350_v55  ;;  %v6649_v58 = vsel %vm19389_vm15, %v6343_v12, 0.0 }
 0x392   : > { %3828 = vst [vmem:[#allocation2 + $0x18] sm:$0xf] %v3671_v21  ;;  %v7198_v34 = vsel %vm19519_vm10, %v7189_v41, %v19726_v5  ;;  %v13506_v20 = vpack.c.bf16 %v3345_v47, %v3345_v47  ;;  %v6650_v40 = vsel %vm19393_vm6, %v6351_v8, 0.0  ;;  %v6651_v3 = vsel %vm19403_vm9, %v6350_v55, 0.0 }
 0x393   : > { %7355 = vst [vmem:[#allocation2 + $0x60] sm:$0xf] %v7198_v34  ;;  %v2692_v11 = vsel %vm2656_vm3, %v2638_v6, %v2674_v62  ;;  %vm6185_vm0 = vcmp.ge.f32.partialorder %v6167_v0, 0.0  ;;  %v6652_v41 = vsel %vm19408_vm12, %v6352_v24, 0.0  ;;  %v6858_v31 = vcombine.low %v6649_v58, %v6650_v40 }
 0x394   : > { %v3674_v35 = vshrl.u32 %v13506_v20, 16  ;;  %v3677_v60 = vshll.u32 %v13506_v20, 16  ;;  %v6859_v17 = vcombine.low %v6651_v3, %v6652_v41  ;;  %v2824_v32 = vcombine.high %v2692_v11, %v2692_v11 }
 0x395   : > { %v2831_v23 = vrot.slane %v2692_v11, %v19400_v18  ;;  %v6203_v9 = vmul.f32 0.01, %v6167_v0  ;;  %v7199_v38 = vrot.slane %v19726_v5, 4  ;;  %v2639_v56 = vadd.f32 %v19373_v19, %v2617_v49 }
 0x396   : > { %v3676_v22 = vrot.slane %v3674_v35, 6  ;;  %v3679_v12 = vrot.slane %v3677_v60, 7  ;;  %v6866_v6 = vrot.slane %v6858_v31, %v19400_v18  ;;  %v6873_v62 = vrot.slane %v6859_v17, %v19400_v18 }
 0x397   : > { %v2838_v47 = vrot.slane %v2824_v32, %v19400_v18  ;;  %v2839_v55 = vcombine.high %v2831_v23, %v2831_v23  ;;  %v6221_v8 = vsel %vm6185_vm0, %v6167_v0, %v6203_v9  ;;  %vm2657_vm1 = vcmp.ge.f32.partialorder %v2639_v56, 0.0  ;;  %v19770_v9 = vpop.f32.mrb[32].mxu1 }
 0x398   : > { %v19751_v21 = vor.u32 %v3679_v12, %v3676_v22  ;;  %v2675_v34 = vmul.f32 0.01, %v2639_v56  ;;  %v6874_v20 = vcombine.low %v6866_v6, %v6873_v62  ;;  %v3124_v5 = vsel %vm19412_vm2, %v2831_v23, 0.0 }
 0x399   : > { %v2840_v24 = vcombine.high %v2838_v47, %v2838_v47  ;;  %v3125_v49 = vsel %vm19420_vm4, %v2839_v55, 0.0  ;;  %v3126_v40 = vsel %vm19513_vm5, %v2838_v47, 0.0  ;;  %v6353_v11 = vcombine.high %v6221_v8, %v6221_v8  ;;  %v15163_v55 = vpop.f32.mrb[33].mxu1 }
 0x39a   : > { %v3681_v58 = vsel %vm19519_vm10, %v3672_v36, %v19751_v21  ;;  %v3346_v3 = vcombine.low %v3124_v5, %v3125_v49  ;;  %v13524_v0 = vpack.c.bf16 %v6874_v20, %v6874_v20  ;;  %v6360_v60 = vrot.slane %v6221_v8, %v19400_v18  ;;  %v19768_v36 = vpop.f32.mrb[32].mxu0 }
 0x39b   : > { %3829 = vst [vmem:[#allocation2 + $0x1c] sm:$0xf] %v3681_v58  ;;  %v3127_v35 = vsel %vm19376_vm13, %v2840_v24, 0.0  ;;  %v2693_v41 = vsel %vm2657_vm1, %v2639_v56, %v2675_v34  ;;  %v6367_v32 = vrot.slane %v6353_v11, %v19400_v18  ;;  %v14695_v47 = vpop.f32.mrb[33].mxu0 }
 0x39c   : > { %v3347_v31 = vcombine.low %v3126_v40, %v3127_v35  ;;  %v3354_v17 = vrot.slane %v3346_v3, %v19400_v18  ;;  %v2841_v23 = vcombine.high %v2693_v41, %v2693_v41  ;;  %v7201_v22 = vshrl.u32 %v13524_v0, 16 }
 0x39d   : > { %v7204_v12 = vshll.u32 %v13524_v0, 16  ;;  %v6368_v6 = vcombine.high %v6360_v60, %v6360_v60  ;;  %v6653_v62 = vsel %vm19412_vm2, %v6360_v60, 0.0  ;;  %v6369_v8 = vcombine.high %v6367_v32, %v6367_v32 }
 0x39e   : > { %v3361_v56 = vrot.slane %v3347_v31, %v19400_v18  ;;  %v6655_v34 = vsel %vm19513_vm5, %v6367_v32, 0.0  ;;  %v2848_v20 = vrot.slane %v2693_v41, %v19400_v18  ;;  %v7203_v24 = vrot.slane %v7201_v22, 6  ;;  %v19786_v41 = vpop.f32.mrb[34].mxu0 }
 0x39f   : > { %v7206_v5 = vrot.slane %v7204_v12, 7  ;;  %v6654_v49 = vsel %vm19420_vm4, %v6368_v6, 0.0  ;;  %v2855_v58 = vrot.slane %v2841_v23, %v19400_v18  ;;  %v6656_v3 = vsel %vm19376_vm13, %v6369_v8, 0.0  ;;  %v14696_v6 = vpop.f32.mrb[35].mxu0 }
 0x3a0   : > { %v3362_v40 = vcombine.low %v3354_v17, %v3361_v56  ;;  %v6875_v11 = vcombine.low %v6653_v62, %v6654_v49  ;;  %v2856_v0 = vcombine.high %v2848_v20, %v2848_v20  ;;  %v3682_v35 = vrot.slane %v19751_v21, 4 }
 0x3a1   : > { %v19784_v60 = vor.u32 %v7206_v5, %v7203_v24  ;;  %v6876_v31 = vcombine.low %v6655_v34, %v6656_v3  ;;  %v2857_v32 = vcombine.high %v2855_v58, %v2855_v58  ;;  %v3128_v23 = vsel %vm19381_vm14, %v2848_v20, 0.0 }
 0x3a2   : > { %v13507_v22 = vpack.c.bf16 %v3362_v40, %v3362_v40  ;;  %v6883_v12 = vrot.slane %v6875_v11, %v19400_v18  ;;  %v3129_v17 = vsel %vm19389_vm15, %v2856_v0, 0.0  ;;  %v3130_v47 = vsel %vm19393_vm6, %v2855_v58, 0.0  ;;  %v19809_v0 = vpop.f32.mrb[34].mxu1 }
 0x3a3   : > { %v7208_v21 = vsel %vm19519_vm10, %v7199_v38, %v19784_v60  ;;  %v6890_v62 = vrot.slane %v6876_v31, %v19400_v18  ;;  %v3131_v55 = vsel %vm19403_vm9, %v2857_v32, 0.0  ;;  %v3363_v34 = vcombine.low %v3128_v23, %v3129_v17 }
 0x3a4   : > { %7356 = vst [vmem:[#allocation2 + $0x64] sm:$0xf] %v7208_v21  ;;  %v3684_v56 = vshrl.u32 %v13507_v22, 16  ;;  %v3687_v8 = vshll.u32 %v13507_v22, 16  ;;  %v3364_v20 = vcombine.low %v3130_v47, %v3131_v55  ;;  %v6150_v5 = vmul.f32 %v19506_v28, %v19368_v54 }
 0x3a5   : > { %v6891_v24 = vcombine.low %v6883_v12, %v6890_v62  ;;  %v2618_v38 = vmul.f32 %v19368_v54, %v19539_v26  ;;  %v6151_v49 = vmul.f32 %v19544_v48, %v19368_v54  ;;  %v3371_v3 = vrot.slane %v3363_v34, %v19400_v18  ;;  %v15164_v12 = vpop.f32.mrb[35].mxu1 }
 0x3a6   : > { %v3686_v40 = vrot.slane %v3684_v56, 6  ;;  %v3689_v58 = vrot.slane %v3687_v8, 7  ;;  %v3378_v11 = vrot.slane %v3364_v20, %v19400_v18  ;;  %v7209_v31 = vrot.slane %v19784_v60, 4 }
 0x3a7   : > { %v13525_v32 = vpack.c.bf16 %v6891_v24, %v6891_v24  ;;  %v6168_v22 = vadd.f32 %v6150_v5, %v19373_v19  ;;  %v2640_v28 = vadd.f32 %v19373_v19, %v2618_v38  ;;  %v6169_v48 = vadd.f32 %v6151_v49, %v19373_v19 }
 0x3a8   : > { %v3690_v26 = vor.u32 %v3689_v58, %v3686_v40  ;;  %v3379_v23 = vcombine.low %v3371_v3, %v3378_v11  ;;  %v2619_v17 = vmul.f32 %v19368_v54, %v19550_v13 }
 0x3a9   : > { %v7211_v6 = vshrl.u32 %v13525_v32, 16  ;;  %v7214_v21 = vshll.u32 %v13525_v32, 16  ;;  %vm6186_vm7 = vcmp.ge.f32.partialorder %v6168_v22, 0.0  ;;  %v6204_v62 = vmul.f32 0.01, %v6168_v22 }
 0x3aa   : > { %v3691_v60 = vsel %vm19519_vm10, %v3682_v35, %v3690_v26  ;;  %v3692_v47 = vrot.slane %v3690_v26, 4  ;;  %v13508_v55 = vpack.c.bf16 %v3379_v23, %v3379_v23  ;;  %vm2658_vm3 = vcmp.ge.f32.partialorder %v2640_v28, 0.0  ;;  %v17497_v35 = vld [vmem:[%s22004_s2 + $0x48] sm:$0xff]  }
 0x3ab   : > { %3830 = vst [vmem:[#allocation2 + $0x20] sm:$0xf] %v3691_v60  ;;  %v7213_v56 = vrot.slane %v7211_v6, 6  ;;  %v7216_v8 = vrot.slane %v7214_v21, 7  ;;  %v6222_v34 = vsel %vm6186_vm7, %v6168_v22, %v6204_v62  ;;  %v2676_v20 = vmul.f32 0.01, %v2640_v28  ;;  %15636 = vmatpush3.bf16.msra.mxu1 %v17497_v35 }
 0x3ac   : > { %v3694_v24 = vshrl.u32 %v13508_v55, 16  ;;  %v3697_v5 = vshll.u32 %v13508_v55, 16  ;;  %v6370_v38 = vcombine.high %v6222_v34, %v6222_v34  ;;  %v6377_v13 = vrot.slane %v6222_v34, %v19400_v18  ;;  %15637 = vmatprep.subr.bf16.mxu1 %v22017_v1 }
 0x3ad   : > { %v19820_v49 = vor.u32 %v7216_v8, %v7213_v56  ;;  %v2694_v40 = vsel %vm2658_vm3, %v2640_v28, %v2676_v20  ;;  %vm6187_vm0 = vcmp.ge.f32.partialorder %v6169_v48, 0.0  ;;  %v6205_v58 = vmul.f32 0.01, %v6169_v48 }
 0x3ae   : > { %v3696_v3 = vrot.slane %v3694_v24, 6  ;;  %v3699_v11 = vrot.slane %v3697_v5, 7  ;;  %v6384_v32 = vrot.slane %v6370_v38, %v19400_v18  ;;  %v6385_v22 = vcombine.high %v6377_v13, %v6377_v13 }
 0x3af   : > { %v7218_v12 = vsel %vm19519_vm10, %v7209_v31, %v19820_v49  ;;  %v7219_v26 = vrot.slane %v19820_v49, 4  ;;  %v2858_v23 = vcombine.high %v2694_v40, %v2694_v40  ;;  %v6152_v28 = vmul.f32 %v19553_v50, %v19368_v54 }
 0x3b0   : > { %7357 = vst [vmem:[#allocation2 + $0x68] sm:$0xf] %v7218_v12  ;;  %v19832_v6 = vor.u32 %v3699_v11, %v3696_v3  ;;  %v6386_v21 = vcombine.high %v6384_v32, %v6384_v32  ;;  %v6657_v62 = vsel %vm19381_vm14, %v6377_v13, 0.0  ;;  %v6658_v60 = vsel %vm19389_vm15, %v6385_v22, 0.0 }
 0x3b1   : > { %v6892_v31 = vcombine.low %v6657_v62, %v6658_v60  ;;  %v2865_v55 = vrot.slane %v2694_v40, %v19400_v18  ;;  %v2872_v56 = vrot.slane %v2858_v23, %v19400_v18  ;;  %v6223_v50 = vsel %vm6187_vm0, %v6169_v48, %v6205_v58 }
 0x3b2   : > { %v3701_v8 = vsel %vm19519_vm10, %v3692_v47, %v19832_v6  ;;  %v6659_v34 = vsel %vm19393_vm6, %v6384_v32, 0.0  ;;  %v6660_v20 = vsel %vm19403_vm9, %v6386_v21, 0.0  ;;  %v6387_v24 = vcombine.high %v6223_v50, %v6223_v50 }
 0x3b3   : > { %3831 = vst [vmem:[#allocation2 + $0x24] sm:$0xf] %v3701_v8  ;;  %v6893_v5 = vcombine.low %v6659_v34, %v6660_v20  ;;  %v6900_v38 = vrot.slane %v6892_v31, %v19400_v18  ;;  %v2873_v13 = vcombine.high %v2865_v55, %v2865_v55  ;;  %v2874_v40 = vcombine.high %v2872_v56, %v2872_v56 }
 0x3b4   : > { %v3132_v48 = vsel %vm19408_vm12, %v2865_v55, 0.0  ;;  %v3134_v58 = vsel %vm19420_vm4, %v2872_v56, 0.0  ;;  %v6394_v47 = vrot.slane %v6223_v50, %v19400_v18  ;;  %v6401_v35 = vrot.slane %v6387_v24, %v19400_v18 }
 0x3b5   : > { %v6907_v3 = vrot.slane %v6893_v5, %v19400_v18  ;;  %v3133_v11 = vsel %vm19412_vm2, %v2873_v13, 0.0  ;;  %v3135_v32 = vsel %vm19513_vm5, %v2874_v40, 0.0  ;;  %v2641_v22 = vadd.f32 %v19373_v19, %v2619_v17 }
 0x3b6   : > { %v3380_v12 = vcombine.low %v3132_v48, %v3133_v11  ;;  %v3381_v23 = vcombine.low %v3134_v58, %v3135_v32  ;;  %v6402_v21 = vcombine.high %v6394_v47, %v6394_v47  ;;  %v6403_v62 = vcombine.high %v6401_v35, %v6401_v35 }
 0x3b7   : > { %v6908_v60 = vcombine.low %v6900_v38, %v6907_v3  ;;  %v6661_v31 = vsel %vm19408_vm12, %v6394_v47, 0.0  ;;  %v6663_v55 = vsel %vm19420_vm4, %v6401_v35, 0.0  ;;  %vm2659_vm1 = vcmp.ge.f32.partialorder %v2641_v22, 0.0 }
 0x3b8   : > { %v3388_v56 = vrot.slane %v3380_v12, %v19400_v18  ;;  %v3395_v50 = vrot.slane %v3381_v23, %v19400_v18  ;;  %v6662_v8 = vsel %vm19412_vm2, %v6402_v21, 0.0  ;;  %v6664_v17 = vsel %vm19513_vm5, %v6403_v62, 0.0 }
 0x3b9   : > { %v13526_v34 = vpack.c.bf16 %v6908_v60, %v6908_v60  ;;  %v6909_v20 = vcombine.low %v6661_v31, %v6662_v8  ;;  %v6910_v24 = vcombine.low %v6663_v55, %v6664_v17  ;;  %v2677_v5 = vmul.f32 0.01, %v2641_v22 }
 0x3ba   : > { %v3702_v38 = vrot.slane %v19832_v6, 4  ;;  %v3396_v13 = vcombine.low %v3388_v56, %v3395_v50  ;;  %v6170_v40 = vadd.f32 %v6152_v28, %v19373_v19  ;;  %v2620_v48 = vmul.f32 %v19368_v54, %v19576_v43 }
 0x3bb   : > { %v7221_v58 = vshrl.u32 %v13526_v34, 16  ;;  %v7224_v47 = vshll.u32 %v13526_v34, 16  ;;  %v6917_v35 = vrot.slane %v6909_v20, %v19400_v18  ;;  %v6924_v3 = vrot.slane %v6910_v24, %v19400_v18 }
 0x3bc   : > { %v13509_v11 = vpack.c.bf16 %v3396_v13, %v3396_v13  ;;  %v2695_v32 = vsel %vm2659_vm1, %v2641_v22, %v2677_v5  ;;  %vm6188_vm7 = vcmp.ge.f32.partialorder %v6170_v40, 0.0  ;;  %v6206_v12 = vmul.f32 0.01, %v6170_v40 }
 0x3bd   : > { %v7223_v23 = vrot.slane %v7221_v58, 6  ;;  %v7226_v21 = vrot.slane %v7224_v47, 7  ;;  %v6925_v6 = vcombine.low %v6917_v35, %v6924_v3  ;;  %v2875_v62 = vcombine.high %v2695_v32, %v2695_v32 }
 0x3be   : > { %v3704_v60 = vshrl.u32 %v13509_v11, 16  ;;  %v3707_v28 = vshll.u32 %v13509_v11, 16  ;;  %v2882_v31 = vrot.slane %v2695_v32, %v19400_v18  ;;  %v6224_v43 = vsel %vm6188_vm7, %v6170_v40, %v6206_v12 }
 0x3bf   : > { %v7227_v55 = vor.u32 %v7226_v21, %v7223_v23  ;;  %v13527_v56 = vpack.c.bf16 %v6925_v6, %v6925_v6  ;;  %v2889_v50 = vrot.slane %v2875_v62, %v19400_v18  ;;  %v6153_v8 = vmul.f32 %v19580_v52, %v19368_v54 }
 0x3c0   : > { %v3706_v17 = vrot.slane %v3704_v60, 6  ;;  %v3709_v22 = vrot.slane %v3707_v28, 7  ;;  %v2890_v34 = vcombine.high %v2882_v31, %v2882_v31  ;;  %v6404_v20 = vcombine.high %v6224_v43, %v6224_v43 }
 0x3c1   : > { %v7228_v24 = vsel %vm19519_vm10, %v7219_v26, %v7227_v55  ;;  %v7231_v5 = vshrl.u32 %v13527_v56, 16  ;;  %v7234_v13 = vshll.u32 %v13527_v56, 16  ;;  %v3136_v40 = vsel %vm19376_vm13, %v2882_v31, 0.0 }
 0x3c2   : > { %v7229_v58 = vrot.slane %v7227_v55, 4  ;;  %7358 = vst [vmem:[#allocation2 + $0x6c] sm:$0xf] %v7228_v24  ;;  %v19889_v47 = vor.u32 %v3709_v22, %v3706_v17  ;;  %v2891_v35 = vcombine.high %v2889_v50, %v2889_v50  ;;  %v3137_v52 = vsel %vm19381_vm14, %v2890_v34, 0.0 }
 0x3c3   : > { %v7233_v3 = vrot.slane %v7231_v5, 6  ;;  %v7236_v11 = vrot.slane %v7234_v13, 7  ;;  %v3397_v32 = vcombine.low %v3136_v40, %v3137_v52  ;;  %v6411_v49 = vrot.slane %v6224_v43, %v19400_v18  ;;  %v17499_v52 = vld [vmem:[%s22004_s2 + $0x50] sm:$0xff]  }
 0x3c4   : > { %v3711_v26 = vsel %vm19519_vm10, %v3702_v38, %v19889_v47  ;;  %v3138_v12 = vsel %vm19389_vm15, %v2889_v50, 0.0  ;;  %v3139_v23 = vsel %vm19393_vm6, %v2891_v35, 0.0  ;;  %v6418_v21 = vrot.slane %v6404_v20, %v19400_v18  ;;  %v7373_v35 = vld [vmem:[#allocation2 + $0x4] sm:$0xf]  ;;  %15638 = vmatpush3.bf16.msra.mxu1 %v17499_v52 }
 0x3c5   : > { %v3712_v6 = vrot.slane %v19889_v47, 4  ;;  %3832 = vst [vmem:[#allocation2 + $0x28] sm:$0xf] %v3711_v26  ;;  %v19903_v62 = vor.u32 %v7236_v11, %v7233_v3  ;;  %v3398_v60 = vcombine.low %v3138_v12, %v3139_v23  ;;  %v6419_v28 = vcombine.high %v6411_v49, %v6411_v49  ;;  %15639 = vmatprep.subr.bf16.mxu1 %v22017_v1 }
 0x3c6   : > { %v3405_v31 = vrot.slane %v3397_v32, %v19400_v18  ;;  %v6420_v43 = vcombine.high %v6418_v21, %v6418_v21  ;;  %v6665_v38 = vsel %vm19376_vm13, %v6411_v49, 0.0  ;;  %v2642_v55 = vadd.f32 %v19373_v19, %v2620_v48  ;;  %v7372_v48 = vld [vmem:[#allocation2] sm:$0xf] }
 0x3c7   : > { %v7238_v56 = vsel %vm19519_vm10, %v7229_v58, %v19903_v62  ;;  %v3412_v50 = vrot.slane %v3398_v60, %v19400_v18  ;;  %v6666_v17 = vsel %vm19381_vm14, %v6419_v28, 0.0  ;;  %v6667_v22 = vsel %vm19389_vm15, %v6418_v21, 0.0 }
 0x3c8   : > { %7359 = vst [vmem:[#allocation2 + $0x70] sm:$0xf] %v7238_v56  ;;  %v6668_v34 = vsel %vm19393_vm6, %v6420_v43, 0.0  ;;  %v6926_v20 = vcombine.low %v6665_v38, %v6666_v17  ;;  %vm2660_vm3 = vcmp.ge.f32.partialorder %v2642_v55, 0.0  ;;  %v2678_v24 = vmul.f32 0.01, %v2642_v55 }
 0x3c9   : > { %v3413_v5 = vcombine.low %v3405_v31, %v3412_v50  ;;  %v6927_v13 = vcombine.low %v6667_v22, %v6668_v34  ;;  %v6171_v40 = vadd.f32 %v6153_v8, %v19373_v19  ;;  %v2621_v58 = vmul.f32 %v19368_v54, %v19586_v2 }
 0x3ca   : > { %v7239_v3 = vrot.slane %v19903_v62, 4  ;;  %v6934_v11 = vrot.slane %v6926_v20, %v19400_v18  ;;  %v2696_v32 = vsel %vm2660_vm3, %v2642_v55, %v2678_v24  ;;  %v6154_v49 = vmul.f32 %v19590_v33, %v19368_v54  ;;  %v17501_v24 = vld [vmem:[%s22004_s2 + $0x58] sm:$0xff]  }
 0x3cb   : > { %v13510_v26 = vpack.c.bf16 %v3413_v5, %v3413_v5  ;;  %v6941_v12 = vrot.slane %v6927_v13, %v19400_v18  ;;  %v2892_v8 = vcombine.high %v2696_v32, %v2696_v32  ;;  %v2899_v23 = vrot.slane %v2696_v32, %v19400_v18  ;;  %15640 = vmatpush3.bf16.msra.mxu1 %v17501_v24  ;;  %v17504_v32 = vld [vmem:[%s22004_s2 + $0x60] sm:$0xff]  }
 0x3cc   : > { %vm6189_vm0 = vcmp.ge.f32.partialorder %v6171_v40, 0.0  ;;  %v6207_v2 = vmul.f32 0.01, %v6171_v40  ;;  %v2643_v21 = vadd.f32 %v19373_v19, %v2621_v58  ;;  %v19932_v60 = vcombine.low %v7372_v48, %v7373_v35  ;;  %15641 = vmatprep.subr.bf16.mxu1 %v22017_v1 }
 0x3cd   : > { %v3714_v28 = vshrl.u32 %v13510_v26, 16  ;;  %v3717_v31 = vshll.u32 %v13510_v26, 16  ;;  %v6942_v43 = vcombine.low %v6934_v11, %v6941_v12  ;;  %v2906_v33 = vrot.slane %v2892_v8, %v19400_v18 }
 0x3ce   : > { %v2907_v38 = vcombine.high %v2899_v23, %v2899_v23  ;;  %v3140_v55 = vsel %vm19403_vm9, %v2899_v23, 0.0  ;;  %v6225_v56 = vsel %vm6189_vm0, %v6171_v40, %v6207_v2  ;;  %v19939_v50 = vadd.f32 %v6154_v49, %v19373_v19 }
 0x3cf   : > { %v3716_v17 = vrot.slane %v3714_v28, 6  ;;  %v3719_v22 = vrot.slane %v3717_v31, 7  ;;  %v13528_v34 = vpack.c.bf16 %v6942_v43, %v6942_v43  ;;  %v2908_v20 = vcombine.high %v2906_v33, %v2906_v33  ;;  %15642 = vmatpush3.bf16.msra.mxu1 %v17504_v32 }
 0x3d0   : > { %v3141_v48 = vsel %vm19408_vm12, %v2907_v38, 0.0  ;;  %v3142_v5 = vsel %vm19412_vm2, %v2906_v33, 0.0  ;;  %v6421_v13 = vcombine.high %v6225_v56, %v6225_v56  ;;  %v6428_v40 = vrot.slane %v6225_v56, %v19400_v18  ;;  %15643 = vmatprep.subr.bf16.mxu1 %v22017_v1 }
 0x3d1   : > { %v19949_v58 = vor.u32 %v3719_v22, %v3716_v17  ;;  %v7241_v35 = vshrl.u32 %v13528_v34, 16  ;;  %v7244_v52 = vshll.u32 %v13528_v34, 16  ;;  %v3143_v11 = vsel %vm19420_vm4, %v2908_v20, 0.0  ;;  %v17509_v17 = vld [vmem:[%s22004_s2 + $0x68] sm:$0xff]  }
 0x3d2   : > { %v3414_v49 = vcombine.low %v3140_v55, %v3141_v48  ;;  %v3415_v26 = vcombine.low %v3142_v5, %v3143_v11  ;;  %v6435_v12 = vrot.slane %v6421_v13, %v19400_v18  ;;  %v6436_v8 = vcombine.high %v6428_v40, %v6428_v40 }
 0x3d3   : > { %v3721_v23 = vsel %vm19519_vm10, %v3712_v6, %v19949_v58  ;;  %v7243_v2 = vrot.slane %v7241_v35, 6  ;;  %v7246_v28 = vrot.slane %v7244_v52, 7  ;;  %vm2661_vm1 = vcmp.ge.f32.partialorder %v2643_v21, 0.0  ;;  %15644 = vmatpush3.bf16.msra.mxu1 %v17509_v17 }
 0x3d4   : > { %v3722_v31 = vrot.slane %v19949_v58, 4  ;;  %3833 = vst [vmem:[#allocation2 + $0x2c] sm:$0xf] %v3721_v23  ;;  %v3422_v43 = vrot.slane %v3414_v49, %v19400_v18  ;;  %v3429_v33 = vrot.slane %v3415_v26, %v19400_v18  ;;  %v6437_v38 = vcombine.high %v6435_v12, %v6435_v12  ;;  %15645 = vmatprep.subr.bf16.mxu1 %v22017_v1 }
 0x3d5   : > { %v19966_v55 = vor.u32 %v7246_v28, %v7243_v2  ;;  %v6669_v56 = vsel %vm19403_vm9, %v6428_v40, 0.0  ;;  %v6670_v47 = vsel %vm19408_vm12, %v6436_v8, 0.0  ;;  %v2679_v6 = vmul.f32 0.01, %v2643_v21 }
 0x3d6   : > { %v3430_v22 = vcombine.low %v3422_v43, %v3429_v33  ;;  %v6671_v34 = vsel %vm19412_vm2, %v6435_v12, 0.0  ;;  %v6672_v20 = vsel %vm19420_vm4, %v6437_v38, 0.0  ;;  %v6943_v24 = vcombine.low %v6669_v56, %v6670_v47 }
 0x3d7   : > { %v7248_v48 = vsel %vm19519_vm10, %v7239_v3, %v19966_v55  ;;  %v6944_v5 = vcombine.low %v6671_v34, %v6672_v20  ;;  %v2697_v13 = vsel %vm2661_vm1, %v2643_v21, %v2679_v6  ;;  %vm6190_vm7 = vcmp.ge.f32.partialorder %v19939_v50, 0.0  ;;  %v17513_v21 = vld [vmem:[%s22004_s2 + $0x70] sm:$0xff]  }
 0x3d8   : > { %7360 = vst [vmem:[#allocation2 + $0x74] sm:$0xf] %v7248_v48  ;;  %v13511_v40 = vpack.c.bf16 %v3430_v22, %v3430_v22  ;;  %v6951_v58 = vrot.slane %v6943_v24, %v19400_v18  ;;  %v2909_v35 = vcombine.high %v2697_v13, %v2697_v13  ;;  %v2916_v52 = vrot.slane %v2697_v13, %v19400_v18 }
 0x3d9   : > { %v6958_v11 = vrot.slane %v6944_v5, %v19400_v18  ;;  %v6208_v32 = vmul.f32 0.01, %v19939_v50  ;;  %v7473_v62 = vshrl.u32 %v19932_v60, 16  ;;  %v7475_v3 = vshll.u32 %v19932_v60, 16  ;;  %15646 = vmatpush3.bf16.msra.mxu1 %v17513_v21  ;;  %v20013_v5 = vld [vmem:[#allocation2 + $0x8] sm:$0xff]  }
 0x3da   : > { %v3724_v49 = vshrl.u32 %v13511_v40, 16  ;;  %v3727_v26 = vshll.u32 %v13511_v40, 16  ;;  %v2923_v12 = vrot.slane %v2909_v35, %v19400_v18  ;;  %v2924_v8 = vcombine.high %v2916_v52, %v2916_v52  ;;  %15647 = vmatprep.subr.bf16.mxu1 %v22017_v1 }
 0x3db   : > { %v6959_v23 = vcombine.low %v6951_v58, %v6958_v11  ;;  %v3144_v2 = vsel %vm19513_vm5, %v2916_v52, 0.0  ;;  %v6226_v28 = vsel %vm6190_vm7, %v19939_v50, %v6208_v32  ;;  %v7477_v43 = vrot.slane %v7475_v3, 1  ;;  %v17517_v3 = vld [vmem:[%s22004_s2 + $0x78] sm:$0xff]  }
 0x3dc   : > { %v3726_v33 = vrot.slane %v3724_v49, 6  ;;  %v3729_v38 = vrot.slane %v3727_v26, 7  ;;  %v2925_v56 = vcombine.high %v2923_v12, %v2923_v12  ;;  %v3145_v47 = vsel %vm19376_vm13, %v2924_v8, 0.0 }
 0x3dd   : > { %v7249_v6 = vrot.slane %v19966_v55, 4  ;;  %v13529_v17 = vpack.c.bf16 %v6959_v23, %v6959_v23  ;;  %v3431_v22 = vcombine.low %v3144_v2, %v3145_v47  ;;  %v6438_v34 = vcombine.high %v6226_v28, %v6226_v28  ;;  %15648 = vmatpush3.bf16.msra.mxu1 %v17517_v3 }
 0x3de   : > { %v20006_v20 = vor.u32 %v3729_v38, %v3726_v33  ;;  %v3146_v24 = vsel %vm19381_vm14, %v2923_v12, 0.0  ;;  %v3147_v50 = vsel %vm19389_vm15, %v2925_v56, 0.0  ;;  %v6445_v48 = vrot.slane %v6226_v28, %v19400_v18  ;;  %15685 = vmatprep.subr.bf16.mxu1 %v22017_v1 }
 0x3df   : > { %v7251_v13 = vshrl.u32 %v13529_v17, 16  ;;  %v7254_v55 = vshll.u32 %v13529_v17, 16  ;;  %v3432_v40 = vcombine.low %v3146_v24, %v3147_v50  ;;  %v7478_v58 = vor.u32 %v7477_v43, %v7473_v62 }
 0x3e0   : > { %v3731_v35 = vsel %vm19519_vm10, %v3722_v31, %v20006_v20  ;;  %v3439_v52 = vrot.slane %v3431_v22, %v19400_v18  ;;  %v6452_v11 = vrot.slane %v6438_v34, %v19400_v18  ;;  %v6453_v32 = vcombine.high %v6445_v48, %v6445_v48  ;;  %v17505_v22 = vld [vmem:[%s22004_s2] sm:$0xff]  }
 0x3e1   : > { %3834 = vst [vmem:[#allocation2 + $0x30] sm:$0xf] %v3731_v35  ;;  %v7253_v21 = vrot.slane %v7251_v13, 6  ;;  %v7256_v49 = vrot.slane %v7254_v55, 7  ;;  %v3446_v26 = vrot.slane %v3432_v40, %v19400_v18  ;;  %v6673_v62 = vsel %vm19513_vm5, %v6445_v48, 0.0 }
 0x3e2   : > { %v6454_v12 = vcombine.high %v6452_v11, %v6452_v11  ;;  %v6674_v31 = vsel %vm19376_vm13, %v6453_v32, 0.0  ;;  %v6675_v8 = vsel %vm19381_vm14, %v6452_v11, 0.0  ;;  %v7480_v23 = vshll.u32 %v20013_v5, 16 }
 0x3e3   : > { %v20032_v2 = vor.u32 %v7256_v49, %v7253_v21  ;;  %v3447_v28 = vcombine.low %v3439_v52, %v3446_v26  ;;  %v6960_v43 = vcombine.low %v6673_v62, %v6674_v31  ;;  %v2622_v33 = vmul.f32 %v19368_v54, %v19608_v57 }
 0x3e4   : > { %v6676_v38 = vsel %vm19389_vm15, %v6454_v12, 0.0  ;;  %v20039_v56 = vrot.slane %v7480_v23, 1  ;;  %v6155_v47 = vmul.f32 %v19614_v45, %v19368_v54  ;;  %v2623_v17 = vmul.f32 %v19368_v54, %v19619_v61 }
 0x3e5   : > { %v3732_v34 = vrot.slane %v20006_v20, 4  ;;  %v7258_v57 = vsel %vm19519_vm10, %v7249_v6, %v20032_v2  ;;  %v13512_v24 = vpack.c.bf16 %v3447_v28, %v3447_v28  ;;  %v6961_v50 = vcombine.low %v6675_v8, %v6676_v38  ;;  %v17506_v6 = vld [vmem:[%s22004_s2 + $0x8] sm:$0xff]  }
 0x3e6   : > { %7361 = vst [vmem:[#allocation2 + $0x78] sm:$0xf] %v7258_v57  ;;  %v6968_v48 = vrot.slane %v6960_v43, %v19400_v18  ;;  %vm22048_vm3 = vsmask.f32 7424  ;;  %v2644_v61 = vadd.f32 %v19373_v19, %v2622_v33  ;;  %v6173_v13 = vadd.f32 %v6155_v47, %v19373_v19  ;;  %v17508_v47 = vld [vmem:[%s22004_s2 + $0x10] sm:$0xff]  }
 0x3e7   : > { %v7483_v45 = vsel %vm22048_vm3, %v7478_v58, %v20039_v56  ;;  %v3734_v55 = vshrl.u32 %v13512_v24, 16  ;;  %v3737_v40 = vshll.u32 %v13512_v24, 16  ;;  %v6975_v20 = vrot.slane %v6961_v50, %v19400_v18 }
 0x3e8   : > { %15182 = vmatmul.mubr.bf16.vlgmr.msra.gmra.mrb[36].mxu0 %v7483_v45  ;;  %v2645_v35 = vadd.f32 %v19373_v19, %v2623_v17  ;;  %vm2662_vm0 = vcmp.ge.f32.partialorder %v2644_v61, 0.0  ;;  %v2680_v52 = vmul.f32 0.01, %v2644_v61  ;;  %vm6191_vm1 = vcmp.ge.f32.partialorder %v6173_v13, 0.0 }
 0x3e9   : > { %v6209_v11 = vmul.f32 0.01, %v6173_v13  ;;  %vm22049_vm7 = vmmov 0   ;;  %15218 = vmatpush3.bf16.msra.mxu0 %v17505_v22  ;;  %v3736_v58 = vrot.slane %v3734_v55, 6  ;;  %v3739_v32 = vrot.slane %v3737_v40, 7 }
 0x3ea   : > { %15185 = vmatprep.mubr.msk.bf16.mxu0 %vm22049_vm7, %v22017_v1  ;;  %v6976_v3 = vcombine.low %v6968_v48, %v6975_v20  ;;  %vm2663_vm3 = vcmp.ge.f32.partialorder %v2645_v35, 0.0  ;;  %15219 = vmatprep.subr.bf16.mxu0 %v22017_v1  ;;  %v2698_v21 = vsel %vm2662_vm0, %v2644_v61, %v2680_v52  ;;  %v2681_v26 = vmul.f32 0.01, %v2645_v35 }
 0x3eb   : > { %v6227_v49 = vsel %vm6191_vm1, %v6173_v13, %v6209_v11  ;;  %v6156_v62 = vmul.f32 %v19628_v14, %v19368_v54  ;;  %v20067_v12 = vor.u32 %v3739_v32, %v3736_v58  ;;  %v2926_v8 = vcombine.high %v2698_v21, %v2698_v21 }
 0x3ec   : > { %v13530_v31 = vpack.c.bf16 %v6976_v3, %v6976_v3  ;;  %v2933_v23 = vrot.slane %v2698_v21, %v19400_v18  ;;  %v7259_v28 = vrot.slane %v20032_v2, 4  ;;  %v6455_v43 = vcombine.high %v6227_v49, %v6227_v49 }
 0x3ed   : > { %v6462_v33 = vrot.slane %v6227_v49, %v19400_v18  ;;  %v2699_v38 = vsel %vm2663_vm3, %v2645_v35, %v2681_v26  ;;  %15220 = vmatpush3.bf16.msra.mxu0 %v17506_v6  ;;  %v3741_v14 = vsel %vm19519_vm10, %v3732_v34, %v20067_v12  ;;  %v6174_v57 = vadd.f32 %v6156_v62, %v19373_v19  ;;  %v17510_v6 = vld [vmem:[%s22004_s2 + $0x18] sm:$0xff]  }
 0x3ee   : > { %v7261_v17 = vshrl.u32 %v13530_v31, 16  ;;  %v7264_v22 = vshll.u32 %v13530_v31, 16  ;;  %15221 = vmatprep.subr.bf16.mxu0 %v22017_v1  ;;  %v3742_v2 = vrot.slane %v20067_v12, 4  ;;  %3835 = vst [vmem:[#allocation2 + $0x34] sm:$0xf] %v3741_v14  ;;  %v2940_v24 = vrot.slane %v2926_v8, %v19400_v18 }
 0x3ef   : > { %v2941_v50 = vcombine.high %v2933_v23, %v2933_v23  ;;  %v6469_v48 = vrot.slane %v6455_v43, %v19400_v18  ;;  %v3148_v13 = vsel %vm19393_vm6, %v2933_v23, 0.0  ;;  %v6470_v34 = vcombine.high %v6462_v33, %v6462_v33 }
 0x3f0   : > { %v7263_v45 = vrot.slane %v7261_v17, 6  ;;  %v7266_v61 = vrot.slane %v7264_v22, 7  ;;  %v2942_v55 = vcombine.high %v2940_v24, %v2940_v24  ;;  %v6677_v35 = vsel %vm19393_vm6, %v6462_v33, 0.0  ;;  %v17512_v17 = vld [vmem:[%s22004_s2 + $0x20] sm:$0xff]  }
 0x3f1   : > { %v3149_v40 = vsel %vm19403_vm9, %v2941_v50, 0.0  ;;  %v6471_v20 = vcombine.high %v6469_v48, %v6469_v48  ;;  %15222 = vmatpush3.bf16.msra.mxu0 %v17508_v47  ;;  %v3150_v11 = vsel %vm19408_vm12, %v2940_v24, 0.0  ;;  %v6678_v32 = vsel %vm19403_vm9, %v6470_v34, 0.0 }
 0x3f2   : > { %v20092_v52 = vor.u32 %v7266_v61, %v7263_v45  ;;  %v3448_v58 = vcombine.low %v3148_v13, %v3149_v40  ;;  %15223 = vmatprep.subr.bf16.mxu0 %v22017_v1  ;;  %v3151_v3 = vsel %vm19412_vm2, %v2942_v55, 0.0  ;;  %v6977_v49 = vcombine.low %v6677_v35, %v6678_v32 }
 0x3f3   : > { %v6680_v21 = vsel %vm19412_vm2, %v6471_v20, 0.0  ;;  %v2943_v26 = vcombine.high %v2699_v38, %v2699_v38  ;;  %v3449_v8 = vcombine.low %v3150_v11, %v3151_v3  ;;  %v6679_v23 = vsel %vm19408_vm12, %v6469_v48, 0.0 }
 0x3f4   : > { %v7268_v62 = vsel %vm19519_vm10, %v7259_v28, %v20092_v52  ;;  %v7269_v31 = vrot.slane %v20092_v52, 4  ;;  %v3456_v43 = vrot.slane %v3448_v58, %v19400_v18  ;;  %v6978_v33 = vcombine.low %v6679_v23, %v6680_v21 }
 0x3f5   : > { %7362 = vst [vmem:[#allocation2 + $0x7c] sm:$0xf] %v7268_v62  ;;  %v2950_v47 = vrot.slane %v2699_v38, %v19400_v18  ;;  %v2957_v14 = vrot.slane %v2943_v26, %v19400_v18  ;;  %15224 = vmatpush3.bf16.msra.mxu0 %v17510_v6  ;;  %v3463_v28 = vrot.slane %v3449_v8, %v19400_v18  ;;  %vm6192_vm0 = vcmp.ge.f32.partialorder %v6174_v57, 0.0  ;;  %v20119_v38 = vld [vmem:[#allocation2 + $0x10] sm:$0xff]  }
 0x3f6   : > { %v6985_v22 = vrot.slane %v6977_v49, %v19400_v18  ;;  %v6210_v24 = vmul.f32 0.01, %v6174_v57  ;;  %15225 = vmatprep.subr.bf16.mxu0 %v22017_v1  ;;  %v6992_v50 = vrot.slane %v6978_v33, %v19400_v18  ;;  %v7484_v61 = vshrl.u32 %v20013_v5, 16  ;;  %v17514_v5 = vld [vmem:[%s22004_s2 + $0x28] sm:$0xff]   ;;  %v20349_v29 = vld [vmem:[#allocation2 + $0x30] sm:$0xff]  }
 0x3f7   : > { %v2958_v48 = vcombine.high %v2950_v47, %v2950_v47  ;;  %v2959_v45 = vcombine.high %v2957_v14, %v2957_v14  ;;  %v3464_v13 = vcombine.low %v3456_v43, %v3463_v28  ;;  %v3152_v34 = vsel %vm19420_vm4, %v2950_v47, 0.0  ;;  %v17516_v47 = vld [vmem:[%s22004_s2 + $0x30] sm:$0xff]  }
 0x3f8   : > { %v3154_v55 = vsel %vm19376_vm13, %v2957_v14, 0.0  ;;  %v6228_v40 = vsel %vm6192_vm0, %v6174_v57, %v6210_v24  ;;  %v6993_v20 = vcombine.low %v6985_v22, %v6992_v50  ;;  %v7488_v26 = vshll.u32 %v20119_v38, 16 }
 0x3f9   : > { %v3153_v35 = vsel %vm19513_vm5, %v2958_v48, 0.0  ;;  %v3155_v6 = vsel %vm19381_vm14, %v2959_v45, 0.0  ;;  %v6472_v11 = vcombine.high %v6228_v40, %v6228_v40  ;;  %15226 = vmatpush3.bf16.msra.mxu0 %v17512_v17  ;;  %v13513_v58 = vpack.c.bf16 %v3464_v13, %v3464_v13 }
 0x3fa   : > { %v3465_v32 = vcombine.low %v3152_v34, %v3153_v35  ;;  %v3466_v3 = vcombine.low %v3154_v55, %v3155_v6  ;;  %v6479_v21 = vrot.slane %v6228_v40, %v19400_v18  ;;  %15227 = vmatprep.subr.bf16.mxu0 %v22017_v1  ;;  %v13531_v57 = vpack.c.bf16 %v6993_v20, %v6993_v20 }
 0x3fb   : > { %v6486_v49 = vrot.slane %v6472_v11, %v19400_v18  ;;  %v2624_v62 = vmul.f32 %v19368_v54, %v19695_v15  ;;  %v3744_v8 = vshrl.u32 %v13513_v58, 16  ;;  %v3747_v23 = vshll.u32 %v13513_v58, 16 }
 0x3fc   : > { %v3473_v43 = vrot.slane %v3465_v32, %v19400_v18  ;;  %v3480_v33 = vrot.slane %v3466_v3, %v19400_v18  ;;  %v7271_v14 = vshrl.u32 %v13531_v57, 16  ;;  %v7274_v17 = vshll.u32 %v13531_v57, 16 }
 0x3fd   : > { %v6487_v28 = vcombine.high %v6479_v21, %v6479_v21  ;;  %v6488_v22 = vcombine.high %v6486_v49, %v6486_v49  ;;  %15228 = vmatpush3.bf16.msra.mxu0 %v17514_v5  ;;  %v3746_v24 = vrot.slane %v3744_v8, 6  ;;  %v3749_v50 = vrot.slane %v3747_v23, 7  ;;  %v17518_v8 = vld [vmem:[%s22004_s2 + $0x38] sm:$0xff]  }
 0x3fe   : > { %v3481_v48 = vcombine.low %v3473_v43, %v3480_v33  ;;  %v6681_v15 = vsel %vm19420_vm4, %v6479_v21, 0.0  ;;  %15229 = vmatprep.subr.bf16.mxu0 %v22017_v1  ;;  %v7273_v45 = vrot.slane %v7271_v14, 6  ;;  %v7276_v13 = vrot.slane %v7274_v17, 7  ;;  %v20176_v43 = vld [vmem:[#allocation2 + $0x18] sm:$0xff]  }
 0x3ff   : > { %v6682_v34 = vsel %vm19513_vm5, %v6487_v28, 0.0  ;;  %v6683_v55 = vsel %vm19376_vm13, %v6486_v49, 0.0  ;;  %v3750_v40 = vor.u32 %v3749_v50, %v3746_v24  ;;  %v6684_v35 = vsel %vm19381_vm14, %v6488_v22, 0.0 }
 0x400   : > { %v13514_v20 = vpack.c.bf16 %v3481_v48, %v3481_v48  ;;  %v6994_v6 = vcombine.low %v6681_v15, %v6682_v34  ;;  %v20153_v11 = vor.u32 %v7276_v13, %v7273_v45  ;;  %v6995_v5 = vcombine.low %v6683_v55, %v6684_v35 }
 0x401   : > { %v20155_v58 = vrot.slane %v7488_v26, 1  ;;  %v2646_v32 = vadd.f32 %v19373_v19, %v2624_v62  ;;  %15230 = vmatpush3.bf16.msra.mxu0 %v17516_v47  ;;  %v3751_v3 = vsel %vm19519_vm10, %v3742_v2, %v3750_v40  ;;  %v7486_v49 = vor.u32 %v7484_v61, %v20039_v56 }
 0x402   : > { %v3754_v21 = vshrl.u32 %v13514_v20, 16  ;;  %v3757_v57 = vshll.u32 %v13514_v20, 16  ;;  %15231 = vmatprep.subr.bf16.mxu0 %v22017_v1  ;;  %v3752_v26 = vrot.slane %v3750_v40, 4  ;;  %3836 = vst [vmem:[#allocation2 + $0x38] sm:$0xf] %v3751_v3  ;;  %v7278_v12 = vsel %vm19519_vm10, %v7269_v31, %v20153_v11 }
 0x403   : > { %v7002_v2 = vrot.slane %v6994_v6, %v19400_v18  ;;  %v7009_v62 = vrot.slane %v6995_v5, %v19400_v18  ;;  %7363 = vst [vmem:[#allocation2 + $0x80] sm:$0xf] %v7278_v12  ;;  %vm22050_vm1 = vsmask.f32 7424  ;;  %vm2664_vm3 = vcmp.ge.f32.partialorder %v2646_v32, 0.0 }
 0x404   : > { %v3756_v56 = vrot.slane %v3754_v21, 6  ;;  %v3759_v61 = vrot.slane %v3757_v57, 7  ;;  %v7491_v23 = vsel %vm22050_vm1, %v7486_v49, %v20155_v58  ;;  %v2682_v47 = vmul.f32 0.01, %v2646_v32 }
 0x405   : > { %v7010_v33 = vcombine.low %v7002_v2, %v7009_v62  ;;  %15186 = vmatmul.mubr.bf16.gmra.mrb[40].mxu0 %v7491_v23  ;;  %v6157_v52 = vmul.f32 %v19697_v7, %v19368_v54  ;;  %v2625_v31 = vmul.f32 %v19368_v54, %v19707_v53  ;;  %v7279_v14 = vrot.slane %v20153_v11, 4 }
 0x406   : > { %v20183_v17 = vor.u32 %v3759_v61, %v3756_v56  ;;  %v6158_v28 = vmul.f32 %v19709_v44, %v19368_v54  ;;  %15189 = vmatprep.mubr.msk.bf16.mxu0 %vm22049_vm7, %v22017_v1  ;;  %v7492_v22 = vshrl.u32 %v20119_v38, 16  ;;  %15232 = vmatpush3.bf16.msra.mxu0 %v17518_v8  ;;  %v2700_v50 = vsel %vm2664_vm3, %v2646_v32, %v2682_v47 }
 0x407   : > { %v13532_v24 = vpack.c.bf16 %v7010_v33, %v7010_v33  ;;  %v6175_v7 = vadd.f32 %v6157_v52, %v19373_v19  ;;  %v2647_v48 = vadd.f32 %v19373_v19, %v2625_v31  ;;  %15269 = vmatprep.subr.bf16.mxu0 %v22017_v1  ;;  %v2960_v15 = vcombine.high %v2700_v50, %v2700_v50 }
 0x408   : > { %v3761_v53 = vsel %vm19519_vm10, %v3752_v26, %v20183_v17  ;;  %v2967_v44 = vrot.slane %v2700_v50, %v19400_v18  ;;  %v7496_v45 = vshll.u32 %v20176_v43, 16  ;;  %v3762_v23 = vrot.slane %v20183_v17, 4 }
 0x409   : > { %3837 = vst [vmem:[#allocation2 + $0x3c] sm:$0xf] %v3761_v53  ;;  %v7281_v38 = vshrl.u32 %v13532_v24, 16  ;;  %v7284_v13 = vshll.u32 %v13532_v24, 16  ;;  %vm6193_vm0 = vcmp.ge.f32.partialorder %v6175_v7, 0.0  ;;  %v2974_v55 = vrot.slane %v2960_v15, %v19400_v18 }
 0x40a   : > { %v6211_v34 = vmul.f32 0.01, %v6175_v7  ;;  %v2975_v40 = vcombine.high %v2967_v44, %v2967_v44  ;;  %v3156_v20 = vsel %vm19389_vm15, %v2967_v44, 0.0  ;;  %vm2665_vm1 = vcmp.ge.f32.partialorder %v2647_v48, 0.0 }
 0x40b   : > { %v7283_v35 = vrot.slane %v7281_v38, 6  ;;  %v7286_v6 = vrot.slane %v7284_v13, 7  ;;  %v2683_v5 = vmul.f32 0.01, %v2647_v48  ;;  %v2976_v32 = vcombine.high %v2974_v55, %v2974_v55 }
 0x40c   : > { %v6229_v11 = vsel %vm6193_vm0, %v6175_v7, %v6211_v34  ;;  %v3157_v3 = vsel %vm19393_vm6, %v2975_v40, 0.0  ;;  %v3158_v21 = vsel %vm19403_vm9, %v2974_v55, 0.0  ;;  %v6176_v38 = vadd.f32 %v6158_v28, %v19373_v19 }
 0x40d   : > { %v6489_v57 = vcombine.high %v6229_v11, %v6229_v11  ;;  %v20205_v49 = vor.u32 %v7286_v6, %v7283_v35  ;;  %v3482_v8 = vcombine.low %v3156_v20, %v3157_v3  ;;  %v6496_v26 = vrot.slane %v6229_v11, %v19400_v18 }
 0x40e   : > { %v2701_v12 = vsel %vm2665_vm1, %v2647_v48, %v2683_v5  ;;  %v3159_v2 = vsel %vm19408_vm12, %v2976_v32, 0.0  ;;  %v7494_v13 = vor.u32 %v7492_v22, %v20155_v58  ;;  %vm6194_vm3 = vcmp.ge.f32.partialorder %v6176_v38, 0.0 }
 0x40f   : > { %v6503_v62 = vrot.slane %v6489_v57, %v19400_v18  ;;  %v2977_v56 = vcombine.high %v2701_v12, %v2701_v12  ;;  %v2984_v61 = vrot.slane %v2701_v12, %v19400_v18  ;;  %v7288_v33 = vsel %vm19519_vm10, %v7279_v14, %v20205_v49 }
 0x410   : > { %v3483_v47 = vcombine.low %v3158_v21, %v3159_v2  ;;  %v3490_v52 = vrot.slane %v3482_v8, %v19400_v18  ;;  %7364 = vst [vmem:[#allocation2 + $0x84] sm:$0xf] %v7288_v33  ;;  %v6504_v31 = vcombine.high %v6496_v26, %v6496_v26  ;;  %v6685_v50 = vsel %vm19389_vm15, %v6496_v26, 0.0 }
 0x411   : > { %v6505_v24 = vcombine.high %v6503_v62, %v6503_v62  ;;  %v6687_v7 = vsel %vm19403_vm9, %v6503_v62, 0.0  ;;  %v2991_v17 = vrot.slane %v2977_v56, %v19400_v18  ;;  %v2992_v53 = vcombine.high %v2984_v61, %v2984_v61 }
 0x412   : > { %v3497_v48 = vrot.slane %v3483_v47, %v19400_v18  ;;  %v3160_v14 = vsel %vm19412_vm2, %v2984_v61, 0.0  ;;  %v6686_v15 = vsel %vm19393_vm6, %v6504_v31, 0.0  ;;  %v6212_v11 = vmul.f32 0.01, %v6176_v38 }
 0x413   : > { %v6688_v44 = vsel %vm19408_vm12, %v6505_v24, 0.0  ;;  %v7011_v55 = vcombine.low %v6685_v50, %v6686_v15  ;;  %v2993_v20 = vcombine.high %v2991_v17, %v2991_v17  ;;  %v3161_v35 = vsel %vm19420_vm4, %v2992_v53, 0.0 }
 0x414   : > { %v3498_v34 = vcombine.low %v3490_v52, %v3497_v48  ;;  %v7012_v40 = vcombine.low %v6687_v7, %v6688_v44  ;;  %v3162_v6 = vsel %vm19513_vm5, %v2991_v17, 0.0  ;;  %v3499_v28 = vcombine.low %v3160_v14, %v3161_v35 }
 0x415   : > { %v7019_v32 = vrot.slane %v7011_v55, %v19400_v18  ;;  %v3163_v58 = vsel %vm19376_vm13, %v2993_v20, 0.0  ;;  %v6230_v21 = vsel %vm6194_vm3, %v6176_v38, %v6212_v11  ;;  %v20239_v57 = vrot.slane %v7496_v45, 1 }
 0x416   : > { %v13515_v5 = vpack.c.bf16 %v3498_v34, %v3498_v34  ;;  %v7026_v3 = vrot.slane %v7012_v40, %v19400_v18  ;;  %v3500_v22 = vcombine.low %v3162_v6, %v3163_v58  ;;  %v6506_v2 = vcombine.high %v6230_v21, %v6230_v21 }
 0x417   : > { %v3507_v62 = vrot.slane %v3499_v28, %v19400_v18  ;;  %v6513_v61 = vrot.slane %v6230_v21, %v19400_v18  ;;  %vm22051_vm0 = vsmask.f32 7424  ;;  %v7289_v45 = vrot.slane %v20205_v49, 4 }
 0x418   : > { %v3764_v8 = vshrl.u32 %v13515_v5, 16  ;;  %v3767_v26 = vshll.u32 %v13515_v5, 16  ;;  %v7027_v12 = vcombine.low %v7019_v32, %v7026_v3  ;;  %v3514_v56 = vrot.slane %v3500_v22, %v19400_v18 }
 0x419   : > { %v7499_v33 = vsel %vm22051_vm0, %v7494_v13, %v20239_v57  ;;  %v6520_v24 = vrot.slane %v6506_v2, %v19400_v18  ;;  %v6521_v7 = vcombine.high %v6513_v61, %v6513_v61  ;;  %v2626_v48 = vmul.f32 %v19368_v54, %v19768_v36 }
 0x41a   : > { %v3766_v47 = vrot.slane %v3764_v8, 6  ;;  %v3769_v52 = vrot.slane %v3767_v26, 7  ;;  %v13533_v31 = vpack.c.bf16 %v7027_v12, %v7027_v12  ;;  %15190 = vmatmul.mubr.bf16.gmra.mrb[44].mxu0 %v7499_v33  ;;  %v3515_v50 = vcombine.low %v3507_v62, %v3514_v56 }
 0x41b   : > { %15193 = vmatprep.mubr.msk.bf16.mxu0 %vm22049_vm7, %v22017_v1  ;;  %v6522_v15 = vcombine.high %v6520_v24, %v6520_v24  ;;  %v6689_v38 = vsel %vm19412_vm2, %v6513_v61, 0.0  ;;  %v6690_v13 = vsel %vm19420_vm4, %v6521_v7, 0.0  ;;  %v2648_v49 = vadd.f32 %v19373_v19, %v2626_v48 }
 0x41c   : > { %v3770_v17 = vor.u32 %v3769_v52, %v3766_v47  ;;  %v7291_v53 = vshrl.u32 %v13533_v31, 16  ;;  %v7294_v14 = vshll.u32 %v13533_v31, 16  ;;  %v13516_v44 = vpack.c.bf16 %v3515_v50, %v3515_v50 }
 0x41d   : > { %v6691_v40 = vsel %vm19513_vm5, %v6520_v24, 0.0  ;;  %v6692_v6 = vsel %vm19376_vm13, %v6522_v15, 0.0  ;;  %v7028_v11 = vcombine.low %v6689_v38, %v6690_v13  ;;  %vm2666_vm1 = vcmp.ge.f32.partialorder %v2648_v49, 0.0 }
 0x41e   : > { %v3771_v34 = vsel %vm19519_vm10, %v3762_v23, %v3770_v17  ;;  %v7293_v36 = vrot.slane %v7291_v53, 6  ;;  %v7296_v55 = vrot.slane %v7294_v14, 7  ;;  %v3774_v20 = vshrl.u32 %v13516_v44, 16 }
 0x41f   : > { %3838 = vst [vmem:[#allocation2 + $0x40] sm:$0xf] %v3771_v34  ;;  %v3777_v35 = vshll.u32 %v13516_v44, 16  ;;  %v7029_v32 = vcombine.low %v6691_v40, %v6692_v6  ;;  %v2684_v3 = vmul.f32 0.01, %v2648_v49  ;;  %v3772_v58 = vrot.slane %v3770_v17, 4 }
 0x420   : > { %v7297_v5 = vor.u32 %v7296_v55, %v7293_v36  ;;  %v3776_v28 = vrot.slane %v3774_v20, 6  ;;  %v6159_v23 = vmul.f32 %v19770_v9, %v19368_v54  ;;  %v7036_v8 = vrot.slane %v7028_v11, %v19400_v18 }
 0x421   : > { %v3779_v22 = vrot.slane %v3777_v35, 7  ;;  %v7043_v26 = vrot.slane %v7029_v32, %v19400_v18  ;;  %v2702_v37 = vsel %vm2666_vm1, %v2648_v49, %v2684_v3  ;;  %v2627_v9 = vmul.f32 %v19368_v54, %v19786_v41 }
 0x422   : > { %v7298_v21 = vsel %vm19519_vm10, %v7289_v45, %v7297_v5  ;;  %v2994_v2 = vcombine.high %v2702_v37, %v2702_v37  ;;  %v3001_v62 = vrot.slane %v2702_v37, %v19400_v18  ;;  %v6177_v56 = vadd.f32 %v6159_v23, %v19373_v19 }
 0x423   : > { %7365 = vst [vmem:[#allocation2 + $0x88] sm:$0xf] %v7298_v21  ;;  %v20269_v12 = vor.u32 %v3779_v22, %v3776_v28  ;;  %v7299_v61 = vrot.slane %v7297_v5, 4  ;;  %v7044_v33 = vcombine.low %v7036_v8, %v7043_v26  ;;  %v6160_v24 = vmul.f32 %v19809_v0, %v19368_v54  ;;  %v20303_v21 = vld [vmem:[#allocation2 + $0x20] sm:$0xff]  }
 0x424   : > { %v3008_v52 = vrot.slane %v2994_v2, %v19400_v18  ;;  %v3009_v31 = vcombine.high %v3001_v62, %v3001_v62  ;;  %vm6195_vm13 = vcmp.ge.f32.partialorder %v6177_v56, 0.0  ;;  %v6213_v50 = vmul.f32 0.01, %v6177_v56 }
 0x425   : > { %v3781_v47 = vsel %vm19519_vm10, %v3772_v58, %v20269_v12  ;;  %v13534_v45 = vpack.c.bf16 %v7044_v33, %v7044_v33  ;;  %v7500_v7 = vshrl.u32 %v20176_v43, 16  ;;  %v3164_v41 = vsel %vm19381_vm14, %v3001_v62, 0.0 }
 0x426   : > { %3839 = vst [vmem:[#allocation2 + $0x44] sm:$0xf] %v3781_v47  ;;  %v3010_v48 = vcombine.high %v3008_v52, %v3008_v52  ;;  %v3165_v17 = vsel %vm19389_vm15, %v3009_v31, 0.0  ;;  %v2649_v53 = vadd.f32 %v19373_v19, %v2627_v9  ;;  %v6231_v38 = vsel %vm6195_vm13, %v6177_v56, %v6213_v50 }
 0x427   : > { %v7301_v14 = vshrl.u32 %v13534_v45, 16  ;;  %v7304_v15 = vshll.u32 %v13534_v45, 16  ;;  %v3516_v44 = vcombine.low %v3164_v41, %v3165_v17  ;;  %v3166_v54 = vsel %vm19393_vm6, %v3008_v52, 0.0 }
 0x428   : > { %v3167_v0 = vsel %vm19403_vm9, %v3010_v48, 0.0  ;;  %v6523_v13 = vcombine.high %v6231_v38, %v6231_v38  ;;  %v6530_v49 = vrot.slane %v6231_v38, %v19400_v18  ;;  %vm2667_vm3 = vcmp.ge.f32.partialorder %v2649_v53, 0.0 }
 0x429   : > { %v7303_v34 = vrot.slane %v7301_v14, 6  ;;  %v7306_v36 = vrot.slane %v7304_v15, 7  ;;  %v3517_v55 = vcombine.low %v3166_v54, %v3167_v0  ;;  %v3782_v40 = vrot.slane %v20269_v12, 4 }
 0x42a   : > { %v6537_v20 = vrot.slane %v6523_v13, %v19400_v18  ;;  %v6538_v35 = vcombine.high %v6530_v49, %v6530_v49  ;;  %v2685_v6 = vmul.f32 0.01, %v2649_v53  ;;  %v3524_v5 = vrot.slane %v3516_v44, %v19400_v18 }
 0x42b   : > { %v20294_v11 = vor.u32 %v7306_v36, %v7303_v34  ;;  %v3531_v32 = vrot.slane %v3517_v55, %v19400_v18  ;;  %v6178_v3 = vadd.f32 %v6160_v24, %v19373_v19  ;;  %v6693_v28 = vsel %vm19381_vm14, %v6530_v49, 0.0 }
 0x42c   : > { %v6539_v58 = vcombine.high %v6537_v20, %v6537_v20  ;;  %v6694_v22 = vsel %vm19389_vm15, %v6538_v35, 0.0  ;;  %v2703_v23 = vsel %vm2667_vm3, %v2649_v53, %v2685_v6  ;;  %v6695_v37 = vsel %vm19393_vm6, %v6537_v20, 0.0  ;;  %vm22055_vm15 = vmmov %vm22051_vm0 }
 0x42d   : > { %v7308_v8 = vsel %vm19519_vm10, %v7299_v61, %v20294_v11  ;;  %v3532_v26 = vcombine.low %v3524_v5, %v3531_v32  ;;  %v7045_v12 = vcombine.low %v6693_v28, %v6694_v22  ;;  %v3011_v63 = vcombine.high %v2703_v23, %v2703_v23  ;;  %v20333_v5 = vld [vmem:[#allocation2 + $0x28] sm:$0xff]   ;;  %vm22058_vm6 = vmmov %vm22051_vm0 }
 0x42e   : > { %7366 = vst [vmem:[#allocation2 + $0x8c] sm:$0xf] %v7308_v8  ;;  %v6696_v19 = vsel %vm19403_vm9, %v6539_v58, 0.0  ;;  %v3018_v4 = vrot.slane %v2703_v23, %v19400_v18  ;;  %vm6196_vm14 = vcmp.ge.f32.partialorder %v6178_v3, 0.0  ;;  %v6214_v33 = vmul.f32 0.01, %v6178_v3  ;;  %vm22059_vm9 = vmmov %vm22051_vm0 }
 0x42f   : > { %v13517_v2 = vpack.c.bf16 %v3532_v26, %v3532_v26  ;;  %v7046_v62 = vcombine.low %v6695_v37, %v6696_v19  ;;  %v7053_v56 = vrot.slane %v7045_v12, %v19400_v18  ;;  %v3025_v61 = vrot.slane %v3011_v63, %v19400_v18 }
 0x430   : > { %v3026_v9 = vcombine.high %v3018_v4, %v3018_v4  ;;  %v3168_v59 = vsel %vm19408_vm12, %v3018_v4, 0.0  ;;  %v7504_v47 = vshll.u32 %v20303_v21, 16  ;;  %v6232_v24 = vsel %vm6196_vm14, %v6178_v3, %v6214_v33 }
 0x431   : > { %v3784_v52 = vshrl.u32 %v13517_v2, 16  ;;  %v3787_v25 = vshll.u32 %v13517_v2, 16  ;;  %v7060_v31 = vrot.slane %v7046_v62, %v19400_v18  ;;  %v3027_v45 = vcombine.high %v3025_v61, %v3025_v61 }
 0x432   : > { %v3169_v50 = vsel %vm19412_vm2, %v3026_v9, 0.0  ;;  %v3170_v48 = vsel %vm19420_vm4, %v3025_v61, 0.0  ;;  %v6540_v41 = vcombine.high %v6232_v24, %v6232_v24  ;;  %v6547_v38 = vrot.slane %v6232_v24, %v19400_v18 }
 0x433   : > { %v3786_v17 = vrot.slane %v3784_v52, 6  ;;  %v3789_v53 = vrot.slane %v3787_v25, 7  ;;  %v7061_v14 = vcombine.low %v7053_v56, %v7060_v31  ;;  %v3533_v15 = vcombine.low %v3168_v59, %v3169_v50 }
 0x434   : > { %v3171_v44 = vsel %vm19513_vm5, %v3027_v45, 0.0  ;;  %v6554_v54 = vrot.slane %v6540_v41, %v19400_v18  ;;  %v7506_v0 = vrot.slane %v7504_v47, 1  ;;  %v7502_v36 = vor.u32 %v7500_v7, %v20239_v57 }
 0x435   : > { %v3790_v13 = vor.u32 %v3789_v53, %v3786_v17  ;;  %v13535_v49 = vpack.c.bf16 %v7061_v14, %v7061_v14  ;;  %v3534_v34 = vcombine.low %v3170_v48, %v3171_v44  ;;  %v3541_v55 = vrot.slane %v3533_v15, %v19400_v18  ;;  %v3842_v48 = vld [vmem:[#allocation2 + $0x50] sm:$0x3]  ;;  %v20361_v53 = vld [vmem:[#allocation2 + $0x38] sm:$0xff]  }
 0x436   : > { %v6555_v20 = vcombine.high %v6547_v38, %v6547_v38  ;;  %v6556_v35 = vcombine.high %v6554_v54, %v6554_v54  ;;  %v6697_v6 = vsel %vm19408_vm12, %v6547_v38, 0.0  ;;  %v6699_v28 = vsel %vm19420_vm4, %v6554_v54, 0.0  ;;  %vm22052_vm12 = vmmov %vm22051_vm0 }
 0x437   : > { %v3791_v32 = vsel %vm19519_vm10, %v3782_v40, %v3790_v13  ;;  %v7311_v3 = vshrl.u32 %v13535_v49, 16  ;;  %v7314_v58 = vshll.u32 %v13535_v49, 16  ;;  %v3548_v43 = vrot.slane %v3534_v34, %v19400_v18  ;;  %v7369_v49 = vld [vmem:[#allocation2 + $0x98] sm:$0x3]  ;;  %vm22054_vm4 = vmmov %vm22051_vm0 }
 0x438   : > { %3840 = vst [vmem:[#allocation2 + $0x48] sm:$0xf] %v3791_v32  ;;  %v6698_v57 = vsel %vm19412_vm2, %v6555_v20, 0.0  ;;  %v6700_v27 = vsel %vm19513_vm5, %v6556_v35, 0.0  ;;  %v7507_v7 = vsel %vm22052_vm12, %v7502_v36, %v7506_v0  ;;  %v7508_v39 = vshrl.u32 %v20303_v21, 16  ;;  %vm22053_vm2 = vmmov %vm22051_vm0 }
 0x439   : > { %v7313_v22 = vrot.slane %v7311_v3, 6  ;;  %v7316_v23 = vrot.slane %v7314_v58, 7  ;;  %v7062_v8 = vcombine.low %v6697_v6, %v6698_v57  ;;  %v7063_v40 = vcombine.low %v6699_v28, %v6700_v27  ;;  %15194 = vmatmul.mubr.bf16.gmra.mrb[48].mxu0 %v7507_v7  ;;  %v20376_v3 = vld [vmem:[#allocation2 + $0x40] sm:$0xff]   ;;  %vm22063_vm1 = vmmov %vm22053_vm2 }
 0x43a   : > { %v3549_v26 = vcombine.low %v3541_v55, %v3548_v43  ;;  %15197 = vmatprep.mubr.msk.bf16.mxu0 %vm22049_vm7, %v22017_v1  ;;  %v7512_v37 = vshll.u32 %v20333_v5, 16  ;;  %v7309_v10 = vrot.slane %v20294_v11, 4  ;;  %v7510_v2 = vor.u32 %v7508_v39, %v7506_v0 }
 0x43b   : > { %v7317_v12 = vor.u32 %v7316_v23, %v7313_v22  ;;  %v7070_v19 = vrot.slane %v7062_v8, %v19400_v18  ;;  %v7077_v63 = vrot.slane %v7063_v40, %v19400_v18  ;;  %v7520_v47 = vshll.u32 %v20349_v29, 16 }
 0x43c   : > { %v13518_v4 = vpack.c.bf16 %v3549_v26, %v3549_v26  ;;  %v7514_v62 = vrot.slane %v7512_v37, 1  ;;  %v3792_v52 = vrot.slane %v3790_v13, 4  ;;  %v7516_v41 = vshrl.u32 %v20333_v5, 16 }
 0x43d   : > { %v7318_v56 = vsel %vm19519_vm10, %v7309_v10, %v7317_v12  ;;  %v7078_v33 = vcombine.low %v7070_v19, %v7077_v63  ;;  %v7319_v45 = vrot.slane %v7317_v12, 4  ;;  %v7522_v17 = vrot.slane %v7520_v47, 1  ;;  %v20394_v19 = vld [vmem:[#allocation2 + $0xc] sm:$0xf]  ;;  %v20398_v63 = vld [vmem:[#allocation2 + $0x58] sm:$0xff]   ;;  %v20408_v47 = vld [vmem:[#allocation2 + $0x10] sm:$0xff]  }
 0x43e   : > { %7367 = vst [vmem:[#allocation2 + $0x90] sm:$0xf] %v7318_v56  ;;  %v3794_v61 = vshrl.u32 %v13518_v4, 16  ;;  %v3797_v9 = vshll.u32 %v13518_v4, 16  ;;  %v7515_v59 = vsel %vm22053_vm2, %v7510_v2, %v7514_v62  ;;  %v7518_v54 = vor.u32 %v7516_v41, %v7514_v62  ;;  %v17521_v62 = vld [vmem:[%s22004_s2] sm:$0xff]   ;;  %vm22068_vm2 = vmmov %vm22063_vm1 }
 0x43f   : > { %v13536_v11 = vpack.c.bf16 %v7078_v33, %v7078_v33  ;;  %v7528_v36 = vshll.u32 %v20361_v53, 16  ;;  %v7524_v6 = vshrl.u32 %v20349_v29, 16  ;;  %v9925_v43 = vld [vmem:[#allocation2 + $0x48] sm:$0xf]  ;;  %v7536_v27 = vshll.u32 %v20376_v3, 16  ;;  %v20424_v41 = vld [vmem:[#allocation2 + $0x20] sm:$0xff]  }
 0x440   : > { %v3796_v25 = vrot.slane %v3794_v61, 6  ;;  %v3799_v31 = vrot.slane %v3797_v9, 7  ;;  %v7523_v34 = vsel %vm22054_vm4, %v7518_v54, %v7522_v17  ;;  %v7532_v22 = vshrl.u32 %v20361_v53, 16  ;;  %v17515_v26 = vld [vmem:[#allocation2 + $0x48] ss:$0 sps:$4 sm:$0x11]   ;;  %vm22069_vm4 = vmmov %vm22063_vm1 }
 0x441   : > { %v7321_v24 = vshrl.u32 %v13536_v11, 16  ;;  %v7324_v18 = vshll.u32 %v13536_v11, 16  ;;  %15198 = vmatmul.mubr.bf16.gmra.mrb[52].mxu0 %v7515_v59  ;;  %v7530_v32 = vrot.slane %v7528_v36, 1  ;;  %v7526_v58 = vor.u32 %v7524_v6, %v7522_v17  ;;  %v8092_v56 = vld [vmem:[#allocation2 + $0x8] sm:$0xe]  ;;  %v17525_v54 = vld [vmem:[%s22004_s2 + $0x10] sm:$0xff]  }
 0x442   : > { %v3800_v50 = vor.u32 %v3799_v31, %v3796_v25  ;;  %15201 = vmatprep.mubr.msk.bf16.mxu0 %vm22049_vm7, %v22017_v1  ;;  %v7538_v23 = vrot.slane %v7536_v27, 1  ;;  %v7540_v33 = vshrl.u32 %v20376_v3, 16  ;;  %v20405_v9 = vcombine.low %v8092_v56, %v20394_v19  ;;  %v17523_v31 = vld [vmem:[%s22004_s2 + $0x8] sm:$0xff]   ;;  %v20441_v6 = vld [vmem:[#allocation2 + $0x30] sm:$0xff]   ;;  %v20468_v56 = vld [vmem:[#allocation2 + $0x40] sm:$0xff]  }
 0x443   : > { %v7323_v14 = vrot.slane %v7321_v24, 6  ;;  %v7326_v15 = vrot.slane %v7324_v18, 7  ;;  %v7531_v57 = vsel %vm22055_vm15, %v7526_v58, %v7530_v32  ;;  %v7534_v40 = vor.u32 %v7532_v22, %v7530_v32  ;;  %v20419_v18 = vld [vmem:[#allocation2 + $0x18] sm:$0xff]   ;;  %v20451_v22 = vld [vmem:[#allocation2 + $0x68] sm:$0xff]  }
 0x444   : > { %v3801_v44 = vsel %vm19519_vm10, %v3792_v52, %v3800_v50  ;;  %v3802_v38 = vrot.slane %v3800_v50, 4  ;;  %v7542_v11 = vor.u32 %v7540_v33, %v7538_v23  ;;  %v10040_v25 = vshll.u32 %v20398_v63, 16 }
 0x445   : > { %3841 = vst [vmem:[#allocation2 + $0x4c] sm:$0xf] %v3801_v44  ;;  %v7327_v0 = vor.u32 %v7326_v15, %v7323_v14  ;;  %v8400_v17 = vshll.u32 %v20405_v9, 16  ;;  %v8405_v14 = vshrl.u32 %v20408_v47, 16  ;;  %v8408_v44 = vshll.u32 %v20408_v47, 16 }
 0x446   : > { %v3843_v13 = vsel %vm19138_vm8, %v3802_v38, %v3842_v48  ;;  %v20422_v48 = vld [vmem:[#allocation2 + $0x60] sm:$0xff]   ;;  %v10042_v38 = vrot.slane %v10040_v25, 1  ;;  %v8414_v36 = vshrl.u32 %v20419_v18, 16  ;;  %v8423_v32 = vshrl.u32 %v20424_v41, 16 }
 0x447   : > { %3844 = vst [vmem:[#allocation2 + $0x50] sm:$0x3] %v3843_v13  ;;  %v7328_v55 = vsel %vm19519_vm10, %v7319_v45, %v7327_v0  ;;  %v7329_v20 = vrot.slane %v7327_v0, 4  ;;  %v8397_v45 = vshrl.u32 %v20405_v9, 16  ;;  %v8402_v0 = vrot.slane %v8400_v17, 2 }
 0x448   : > { %7368 = vst [vmem:[#allocation2 + $0x94] sm:$0xf] %v7328_v55  ;;  %v8407_v13 = vrot.slane %v8405_v14, 1  ;;  %v8417_v55 = vshll.u32 %v20419_v18, 16  ;;  %v8426_v58 = vshll.u32 %v20424_v41, 16  ;;  %v8444_v25 = vshll.u32 %v20441_v6, 16 }
 0x449   : > { %v7370_v35 = vsel %vm19138_vm8, %v7329_v20, %v7369_v49  ;;  %15202 = vmatmul.mubr.bf16.gmra.mrb[56].mxu0 %v7523_v34  ;;  %vm22056_vm8 = vmmov %vm22051_vm0  ;;  %v8399_v15 = vrot.slane %v8397_v45, 1  ;;  %v20435_v49 = vld [vmem:[#allocation2 + $0x28] sm:$0xff]   ;;  %v8410_v34 = vrot.slane %v8408_v44, 2  ;;  %vm22060_vm5 = vsmask.f32 6400  ;;  %v17529_v45 = vld [vmem:[%s22004_s2 + $0x20] sm:$0xff]  }
 0x44a   : > { %7371 = vst [vmem:[#allocation2 + $0x98] sm:$0x3] %v7370_v35  ;;  %15205 = vmatprep.mubr.msk.bf16.mxu0 %vm22049_vm7, %v22017_v1  ;;  %v7539_v39 = vsel %vm22056_vm8, %v7534_v40, %v7538_v23  ;;  %v10048_v35 = vshll.u32 %v20422_v48, 16  ;;  %v8419_v27 = vrot.slane %v8417_v55, 2  ;;  %v10052_v23 = vshrl.u32 %v20422_v48, 16  ;;  %vm22061_vm10 = vmmov %vm22060_vm5 }
 0x44b   : > { %v8425_v40 = vrot.slane %v8423_v32, 1  ;;  %v8462_v55 = vshll.u32 %v20468_v56, 16  ;;  %vm22071_vm8 = vmmov %vm22063_vm1  ;;  %v8695_v30 = vrot.slane %v20441_v6, 2 }
 0x44c   : > { %v9926_v28 = vld [vmem:[#allocation2 + $0x4c] sm:$0xf] }
 0x44d   : > { %v20383_v7 = vcombine.low %v9925_v43, %v9926_v28  ;;  %v17530_v28 = vld [vmem:[%s22004_s2 + $0x80] sm:$0xff]   ;;  %v8403_v43 = vor.u32 %v8402_v0, %v8399_v15  ;;  %v20492_v15 = vld [vmem:[#allocation2 + $0x48] sm:$0xff]  }
 0x44e   : > { %v7349_v16 = vld [vmem:[#allocation2 + $0x50] sm:$0xe] }
 0x44f   : > { %v7350_v46 = vsel %vm19145_vm11, %v19508_v42, %v7349_v16  ;;  %v10027_v8 = vshll.u32 %v20383_v7, 16  ;;  %v7544_v42 = vshll.u32 %v17515_v26, 16  ;;  %v10025_v10 = vshrl.u32 %v20383_v7, 16  ;;  %vm22057_vm11 = vmmov %vm22051_vm0 }
 0x450   : > { %7351 = vst [vmem:[#allocation2 + $0x50] sm:$0xe] %v7350_v46  ;;  %v8411_v16 = vor.u32 %v8410_v34, %v8407_v13  ;;  %v10044_v46 = vshrl.u32 %v20398_v63, 16  ;;  %v8428_v26 = vrot.slane %v8426_v58, 2  ;;  %vm22062_vm0 = vmmov %vm22060_vm5 }
 0x451   : > { %15206 = vmatmul.mubr.bf16.gmra.mrb[60].mxu0 %v7531_v57  ;;  %v10029_v51 = vrot.slane %v10027_v8, 1  ;;  %v7546_v61 = vrot.slane %v7544_v42, 1  ;;  %v8416_v57 = vrot.slane %v8414_v36, 1  ;;  %v17527_v8 = vld [vmem:[%s22004_s2 + $0x18] sm:$0xff]   ;;  %v8459_v36 = vshrl.u32 %v20468_v56, 16  ;;  %vm22064_vm13 = vmmov %vm22062_vm0 }
 0x452   : > { %15209 = vmatprep.mubr.msk.bf16.mxu0 %vm22049_vm7, %v22017_v1  ;;  %v8429_v33 = vor.u32 %v8428_v26, %v8425_v40  ;;  %v8464_v40 = vrot.slane %v8462_v55, 2  ;;  %v20516_v26 = vld [vmem:[#allocation2 + $0x54] sm:$0xf]  ;;  %vm22065_vm3 = vmmov %vm22062_vm0 }
 0x453   : > { %v10030_v4 = vor.u32 %v10029_v51, %v10025_v10  ;;  %v7547_v24 = vsel %vm22058_vm6, %v7542_v11, %v7546_v61  ;;  %v20461_v51 = vsel %vm22060_vm5, %v8403_v43, %v8411_v16  ;;  %v8420_v42 = vor.u32 %v8419_v27, %v8416_v57  ;;  %v17534_v27 = vld [vmem:[%s22004_s2 + $0x28] sm:$0xff]   ;;  %vm22066_vm14 = vmmov %vm22062_vm0 }
 0x454   : > { %v8432_v10 = vshrl.u32 %v20435_v49, 16  ;;  %v8441_v61 = vshrl.u32 %v20441_v6, 16  ;;  %vm22067_vm12 = vmmov %vm22062_vm0  ;;  %v20636_v6 = vld [vmem:[#allocation2 + $0x90] sm:$0xff]  }
 0x455   : > { %v20477_v11 = vsel %vm22061_vm10, %v8411_v16, %v8420_v42  ;;  %v20489_v17 = vsel %vm22062_vm0, %v8420_v42, %v8429_v33  ;;  %vm22070_vm15 = vmmov %vm22062_vm0 }
 0x456   : > { %v8443_v14 = vrot.slane %v8441_v61, 1  ;;  %vm22077_vm5 = vmmov %vm22062_vm0 }
 0x457   : > { %v20390_v37 = vld [vmem:[#allocation2 + $0x50] sm:$0xff]  }
 0x458   : > { %v10032_v12 = vshll.u32 %v20390_v37, 16  ;;  %v10036_v52 = vshrl.u32 %v20390_v37, 16 }
 0x459   : > { %15210 = vmatmul.mubr.bf16.gmra.mrb[64].mxu0 %v7539_v39  ;;  %v20458_v39 = vld [vmem:[#allocation2 + $0x38] sm:$0xff]  }
 0x45a   : > { %15213 = vmatprep.mubr.msk.bf16.mxu0 %vm22049_vm7, %v22017_v1  ;;  %v10034_v2 = vrot.slane %v10032_v12, 1  ;;  %v8435_v12 = vshll.u32 %v20435_v49, 16  ;;  %v8453_v0 = vshll.u32 %v20458_v39, 16 }
 0x45c   : > { %v10035_v59 = vsel %vm22057_vm11, %v10030_v4, %v10034_v2  ;;  %v10038_v50 = vor.u32 %v10036_v52, %v10034_v2  ;;  %v10046_v4 = vor.u32 %v10044_v46, %v10042_v38  ;;  %v10050_v2 = vrot.slane %v10048_v35, 1  ;;  %v10643_v35 = vld [vmem:[#allocation2 + $0x50] sm:$0xe]  ;;  %v20512_v46 = vld [vmem:[#allocation2 + $0x80] sm:$0xff]  }
 0x45d   : > { %15650 = vmatmul.mubr.bf16.vlgmr.msra.gmra.mrb[36].mxu1 %v10035_v59  ;;  %v17532_v59 = vld [vmem:[%s22004_s2 + $0x88] sm:$0xff]   ;;  %v8437_v52 = vrot.slane %v8435_v12, 2  ;;  %v8455_v43 = vrot.slane %v8453_v0, 2  ;;  %v8468_v12 = vshrl.u32 %v20492_v15, 16  ;;  %vm22072_vm11 = vcmask 1045504  }
 0x45e   : > { %15686 = vmatpush3.bf16.msra.mxu1 %v17521_v62  ;;  %15653 = vmatprep.mubr.msk.bf16.mxu1 %vm22049_vm7, %v22017_v1  ;;  %v10043_v20 = vsel %vm22059_vm9, %v10038_v50, %v10042_v38  ;;  %v20466_v62 = vld [vmem:[#allocation2 + $0x70] sm:$0xff]   ;;  %v20485_v50 = vld [vmem:[#allocation2 + $0x78] sm:$0xff]   ;;  %v8446_v38 = vrot.slane %v8444_v25, 2  ;;  %v10051_v13 = vsel %vm22063_vm1, %v10046_v4, %v10050_v2  ;;  %v8471_v4 = vshll.u32 %v20492_v15, 16  ;;  %vm22073_vm6 = vmmov %vm22072_vm11 }
 0x45f   : > { %15687 = vmatprep.subr.bf16.mxu1 %v22017_v1  ;;  %v10064_v34 = vshll.u32 %v20466_v62, 16  ;;  %v10072_v57 = vshll.u32 %v20485_v50, 16  ;;  %vm22075_vm9 = vmmov %vm22073_vm6 }
 0x460   : > { %v8447_v58 = vor.u32 %v8446_v38, %v8443_v14  ;;  %v8473_v38 = vrot.slane %v8471_v4, 2  ;;  %vm22078_vm10 = vmmov %vm22073_vm6 }
 0x461   : > { %15214 = vmatmul.mubr.bf16.gmra.mrb[68].mxu0 %v7547_v24  ;;  %v10060_v24 = vshrl.u32 %v20451_v22, 16  ;;  %v10066_v61 = vrot.slane %v10064_v34, 1  ;;  %v20542_v0 = vrot.slane %v10072_v57, 1  ;;  %vm22080_vm1 = vmmov %vm22073_vm6 }
 0x462   : > { %15233 = vmatprep.mubr.msk.bf16.mxu0 %vm22049_vm7, %v22017_v1  ;;  %15688 = vmatpush3.bf16.msra.mxu1 %v17523_v31  ;;  %v10056_v31 = vshll.u32 %v20451_v22, 16 }
 0x463   : > { %15689 = vmatprep.subr.bf16.mxu1 %v22017_v1 }
 0x464   : > { %v10058_v16 = vrot.slane %v10056_v31, 1  ;;  %v10054_v31 = vor.u32 %v10052_v23, %v10050_v2  ;;  %v8665_v2 = vld [vmem:[#allocation2 + $0x8] sm:$0xc] }
 0x465   : > { %15654 = vmatmul.mubr.bf16.gmra.mrb[40].mxu1 %v10043_v20  ;;  %v17533_v20 = vld [vmem:[%s22004_s2 + $0x90] sm:$0xff]  }
 0x466   : > { %15657 = vmatprep.mubr.msk.bf16.mxu1 %vm22049_vm7, %v22017_v1  ;;  %15690 = vmatpush3.bf16.msra.mxu1 %v17525_v54  ;;  %v8450_v54 = vshrl.u32 %v20458_v39, 16  ;;  %v10059_v34 = vsel %vm22068_vm2, %v10054_v31, %v10058_v16  ;;  %vm22091_vm2 = vmmov %vm22062_vm0 }
 0x467   : > { %15691 = vmatprep.subr.bf16.mxu1 %v22017_v1 }
 0x469   : > { %15234 = vmatmul.mubr.bf16.vlgmr.msra.gmra.mrb[36].mxu0 %v19932_v60  ;;  %v8434_v60 = vrot.slane %v8432_v10, 1 }
 0x46a   : > { %15237 = vmatprep.mubr.msk.bf16.mxu0 %vm22049_vm7, %v22017_v1  ;;  %15270 = vmatpush3.bf16.msra.mxu0 %v17530_v28  ;;  %v8452_v28 = vrot.slane %v8450_v54, 1  ;;  %v10062_v54 = vor.u32 %v10060_v24, %v10058_v16  ;;  %v20554_v24 = vld [vmem:[#allocation2 + $0x60] sm:$0xff]  }
 0x46b   : > { %15692 = vmatpush3.bf16.msra.mxu1 %v17527_v8  ;;  %15271 = vmatprep.subr.bf16.mxu0 %v22017_v1  ;;  %v8438_v44 = vor.u32 %v8437_v52, %v8434_v60  ;;  %v8461_v8 = vrot.slane %v8459_v36, 1  ;;  %v20528_v60 = vcombine.low %v10643_v35, %v20516_v26  ;;  %v20530_v52 = vld [vmem:[#allocation2 + $0x58] sm:$0xff]   ;;  %v17538_v36 = vld [vmem:[%s22004_s2 + $0x30] sm:$0xff]   ;;  %v8687_v35 = vrot.slane %v20408_v47, 2 }
 0x46c   : > { %15693 = vmatprep.subr.bf16.mxu1 %v22017_v1  ;;  %v8456_v10 = vor.u32 %v8455_v43, %v8452_v28  ;;  %v10954_v16 = vshrl.u32 %v20530_v52, 16  ;;  %v10067_v57 = vsel %vm22069_vm4, %v10062_v54, %v10066_v61  ;;  %v20591_v54 = vld [vmem:[#allocation2 + $0x10] sm:$0xff]   ;;  %vm22092_vm4 = vmmov %vm22080_vm1 }
 0x46d   : > { %15658 = vmatmul.mubr.bf16.gmra.mrb[44].mxu1 %v10051_v13  ;;  %v20504_v32 = vsel %vm22064_vm13, %v8429_v33, %v8438_v44  ;;  %v20519_v42 = vsel %vm22065_vm3, %v8438_v44, %v8447_v58  ;;  %v20523_v33 = vld [vmem:[#allocation2 + $0x8] sm:$0xff]   ;;  %v8465_v25 = vor.u32 %v8464_v40, %v8461_v8  ;;  %v8470_v44 = vrot.slane %v8468_v12, 1  ;;  %vm22082_vm13 = vmmov %vm22062_vm0 }
 0x46e   : > { %15272 = vmatpush3.bf16.msra.mxu0 %v17532_v59  ;;  %15661 = vmatprep.mubr.msk.bf16.mxu1 %vm22049_vm7, %v22017_v1  ;;  %v10068_v59 = vshrl.u32 %v20466_v62, 16  ;;  %v20540_v14 = vsel %vm22066_vm14, %v8447_v58, %v8456_v10  ;;  %v10946_v28 = vshrl.u32 %v20528_v60, 16  ;;  %v10949_v43 = vshll.u32 %v20528_v60, 16  ;;  %v20567_v8 = vld [vmem:[#allocation2 + $0x68] sm:$0xff]   ;;  %vm22084_vm3 = vmmov %vm22080_vm1 }
 0x46f   : > { %15694 = vmatpush3.bf16.msra.mxu1 %v17529_v45  ;;  %15273 = vmatprep.subr.bf16.mxu0 %v22017_v1  ;;  %v17536_v45 = vld [vmem:[%s22004_s2 + $0x98] sm:$0xff]   ;;  %v20547_v23 = vsel %vm22067_vm12, %v8456_v10, %v8465_v25  ;;  %v20556_v55 = vor.u32 %v8473_v38, %v8470_v44  ;;  %v10957_v40 = vshll.u32 %v20530_v52, 16  ;;  %v20577_v10 = vld [vmem:[#allocation2 + $0x70] sm:$0xff]   ;;  %v10963_v38 = vshrl.u32 %v20554_v24, 16  ;;  %vm22087_vm14 = vmmov %vm22062_vm0 }
 0x470   : > { %15695 = vmatprep.subr.bf16.mxu1 %v22017_v1  ;;  %v10070_v58 = vor.u32 %v10068_v59, %v10066_v61  ;;  %v10948_v12 = vrot.slane %v10946_v28, 1  ;;  %v10951_v4 = vrot.slane %v10949_v43, 2  ;;  %v10956_v61 = vrot.slane %v10954_v16, 1  ;;  %vm22089_vm12 = vmmov %vm22080_vm1 }
 0x471   : > { %15238 = vmatmul.mubr.bf16.gmra.mrb[40].mxu0 %v20523_v33  ;;  %v8689_v59 = vrot.slane %v20419_v18, 2  ;;  %v10959_v44 = vrot.slane %v10957_v40, 2  ;;  %v10965_v43 = vrot.slane %v10963_v38, 1  ;;  %v10972_v16 = vshrl.u32 %v20567_v8, 16 }
 0x472   : > { %15241 = vmatprep.mubr.msk.bf16.mxu0 %vm22049_vm7, %v22017_v1  ;;  %15274 = vmatpush3.bf16.msra.mxu0 %v17533_v20  ;;  %v13171_v20 = vcombine.low %v8665_v2, %v20394_v19  ;;  %v20571_v19 = vsel %vm22070_vm15, %v8465_v25, %v20556_v55  ;;  %v20582_v31 = vsel %vm22071_vm8, %v10070_v58, %v20542_v0  ;;  %v17543_v25 = vld [vmem:[%s22004_s2 + $0x38] sm:$0xff]   ;;  %v10984_v38 = vshll.u32 %v20577_v10, 16  ;;  %vm22094_vm15 = vmmov %vm22062_vm0 }
 0x473   : > { %15696 = vmatpush3.bf16.msra.mxu1 %v17534_v27  ;;  %15275 = vmatprep.subr.bf16.mxu0 %v22017_v1  ;;  %v17537_v27 = vld [vmem:[%s22004_s2 + $0xa0] sm:$0xff]   ;;  %v10952_v18 = vor.u32 %v10951_v4, %v10948_v12  ;;  %v20596_v2 = vsel %vm22073_vm6, %v8687_v35, %v8689_v59  ;;  %v20605_v58 = vld [vmem:[#allocation2 + $0x78] sm:$0xff]   ;;  %v10960_v28 = vor.u32 %v10959_v44, %v10956_v61  ;;  %v10981_v12 = vshrl.u32 %v20577_v10, 16  ;;  %vm22095_vm8 = vmmov %vm22080_vm1 }
 0x474   : > { %15697 = vmatprep.subr.bf16.mxu1 %v22017_v1  ;;  %v8686_v47 = vrot.slane %v13171_v20, 2  ;;  %22074 = vst [vmem:[#allocation4_spill] sm:$0xff] %v20596_v2  ;;  %v17540_v20 = vld [vmem:[%s22004_s2 + $0xa8] sm:$0xff]   ;;  %v10974_v61 = vrot.slane %v10972_v16, 1  ;;  %v10986_v16 = vrot.slane %v10984_v38, 2  ;;  %vm22100_vm6 = vmmov %vm22062_vm0 }
 0x475   : > { %15662 = vmatmul.mubr.bf16.gmra.mrb[48].mxu1 %v10059_v34  ;;  %v10966_v34 = vshll.u32 %v20554_v24, 16  ;;  %v20618_v4 = vsel %vm22077_vm5, %v10952_v18, %v10960_v28  ;;  %vm22103_vm5 = vsmask.f32 7424 }
 0x476   : > { %15276 = vmatpush3.bf16.msra.mxu0 %v17536_v45  ;;  %15665 = vmatprep.mubr.msk.bf16.mxu1 %vm22049_vm7, %v22017_v1  ;;  %v20588_v45 = vsel %vm22072_vm11, %v8686_v47, %v8687_v35  ;;  %v10975_v35 = vshll.u32 %v20567_v8, 16  ;;  %v20610_v47 = vld [vmem:[#allocation2 + $0x80] sm:$0xff]   ;;  %vm22097_vm11 = vmmov %vm22062_vm0 }
 0x477   : > { %15277 = vmatprep.subr.bf16.mxu0 %v22017_v1  ;;  %15698 = vmatpush3.bf16.msra.mxu1 %v17538_v36  ;;  %v8691_v36 = vrot.slane %v20424_v41, 2  ;;  %v10968_v41 = vrot.slane %v10966_v34, 2 }
 0x478   : > { %15699 = vmatprep.subr.bf16.mxu1 %v22017_v1  ;;  %v10977_v44 = vrot.slane %v10975_v35, 2  ;;  %v10990_v35 = vshrl.u32 %v20605_v58, 16 }
 0x479   : > { %15242 = vmatmul.mubr.bf16.gmra.mrb[44].mxu0 %v20591_v54  ;;  %v20613_v40 = vsel %vm22075_vm9, %v8689_v59, %v8691_v36  ;;  %v10969_v13 = vor.u32 %v10968_v41, %v10965_v43  ;;  %v10983_v59 = vrot.slane %v10981_v12, 1  ;;  %v10993_v43 = vshll.u32 %v20605_v58, 16  ;;  %vm22101_vm9 = vmmov %vm22080_vm1 }
 0x47a   : > { %15245 = vmatprep.mubr.msk.bf16.mxu0 %vm22049_vm7, %v22017_v1  ;;  %15278 = vmatpush3.bf16.msra.mxu0 %v17537_v27  ;;  %22076 = vst [vmem:[#allocation5_spill] sm:$0xff] %v20613_v40  ;;  %v8693_v27 = vrot.slane %v20435_v49, 2  ;;  %v17541_v49 = vld [vmem:[%s22004_s2 + $0xb0] sm:$0xff]   ;;  %v10978_v18 = vor.u32 %v10977_v44, %v10974_v61  ;;  %v10999_v41 = vshrl.u32 %v20610_v47, 16  ;;  %v10992_v44 = vrot.slane %v10990_v35, 1 }
 0x47b   : > { %15279 = vmatprep.subr.bf16.mxu0 %v22017_v1  ;;  %15700 = vmatpush3.bf16.msra.mxu1 %v17543_v25  ;;  %v20629_v25 = vld [vmem:[#allocation2 + $0x88] sm:$0xff]   ;;  %v10987_v61 = vor.u32 %v10986_v16, %v10983_v59  ;;  %v10995_v38 = vrot.slane %v10993_v43, 2  ;;  %v22086_v40 = vmov 0.0  }
 0x47c   : > { %15737 = vmatprep.subr.bf16.mxu1 %v22017_v1  ;;  %v20623_v34 = vsel %vm22078_vm10, %v8691_v36, %v8693_v27  ;;  %v20642_v36 = vsel %vm22080_vm1, %v8693_v27, %v8695_v30  ;;  %v20647_v12 = vsel %vm22082_vm13, %v10969_v13, %v10978_v18  ;;  %v11001_v27 = vrot.slane %v10999_v41, 1  ;;  %vm22104_vm10 = vmmov %vm22080_vm1 }
 0x47d   : > { %22079 = vst [vmem:[#allocation6_spill] sm:$0xff] %v20623_v34  ;;  %15666 = vmatmul.mubr.bf16.gmra.mrb[52].mxu1 %v10067_v57  ;;  %v20639_v57 = vsel %vm22062_vm0, %v10960_v28, %v10969_v13  ;;  %22081 = vst [vmem:[#allocation7_spill] sm:$0xff] %v20642_v36  ;;  %v20649_v34 = vld [vmem:[#allocation2 + $0x18] sm:$0xff]   ;;  %v11002_v36 = vshll.u32 %v20610_v47, 16  ;;  %v20663_v59 = vsel %vm22087_vm14, %v10978_v18, %v10987_v61  ;;  %v11011_v35 = vshll.u32 %v20629_v25, 16 }
 0x47e   : > { %15280 = vmatpush3.bf16.msra.mxu0 %v17540_v20  ;;  %15669 = vmatprep.mubr.msk.bf16.mxu1 %vm22049_vm7, %v22017_v1  ;;  %v8697_v20 = vrot.slane %v20458_v39, 2  ;;  %22083 = vst [vmem:[#allocation8_spill] sm:$0xff] %v20647_v12  ;;  %v8699_v39 = vrot.slane %v20468_v56, 2  ;;  %v17544_v13 = vld [vmem:[%s22004_s2 + $0xb8] sm:$0xff]   ;;  %22088 = vst [vmem:[#allocation10_spill] sm:$0xff] %v20663_v59  ;;  %v10996_v16 = vor.u32 %v10995_v38, %v10992_v44  ;;  %v11017_v41 = vshrl.u32 %v20636_v6, 16 }
 0x47f   : > { %15281 = vmatprep.subr.bf16.mxu0 %v22017_v1  ;;  %v17611_v1 = vld [vmem:[#allocation2 + $0x50] ss:$0 sps:$4 sm:$0x33]   ;;  %v11004_v43 = vrot.slane %v11002_v36, 2  ;;  %v11013_v59 = vrot.slane %v11011_v35, 2  ;;  %v11020_v44 = vshll.u32 %v20636_v6, 16  ;;  %vm22106_vm0 = vmmov %vm22080_vm1 }
 0x480   : > { %v20653_v28 = vsel %vm22084_vm3, %v8695_v30, %v8697_v20  ;;  %v11008_v30 = vshrl.u32 %v20629_v25, 16  ;;  %v20669_v56 = vsel %vm22089_vm12, %v8697_v20, %v8699_v39  ;;  %v11019_v12 = vrot.slane %v11017_v41, 1  ;;  %vm22109_vm1 = vmmov %vm22106_vm0 }
 0x481   : > { %15246 = vmatmul.mubr.bf16.gmra.mrb[48].mxu0 %v20649_v34  ;;  %22085 = vst [vmem:[#allocation9_spill] sm:$0xff] %v20653_v28  ;;  %22090 = vst [vmem:[#allocation11_spill] sm:$0xff] %v20669_v56  ;;  %v20674_v28 = vsel %vm22091_vm2, %v10987_v61, %v10996_v16  ;;  %v11005_v38 = vor.u32 %v11004_v43, %v11001_v27  ;;  %v8703_v36 = vrot.slane %v17611_v1, 2  ;;  %v11214_v56 = vld [vmem:[#allocation2 + $0x50] sm:$0xc]  ;;  %v11235_v43 = vrot.slane %v20530_v52, 2 }
 0x482   : > { %15249 = vmatprep.mubr.msk.bf16.mxu0 %vm22049_vm7, %v22086_v40  ;;  %15282 = vmatpush3.bf16.msra.mxu0 %v17541_v49  ;;  %v8701_v49 = vrot.slane %v20492_v15, 2  ;;  %v11010_v18 = vrot.slane %v11008_v30, 1  ;;  %v11022_v15 = vrot.slane %v11020_v44, 2  ;;  %vm22111_vm13 = vmmov %vm22106_vm0 }
 0x483   : > { %15283 = vmatprep.subr.bf16.mxu0 %v22086_v40  ;;  %v20685_v61 = vsel %vm22094_vm15, %v10996_v16, %v11005_v38  ;;  %v13406_v16 = vcombine.low %v11214_v56, %v20516_v26  ;;  %vm22113_vm3 = vmmov %vm22106_vm0  ;;  %vm22122_vm15 = vsmask.f32 5376 }
 0x484   : > { %v20678_v2 = vsel %vm22092_vm4, %v8699_v39, %v8701_v49  ;;  %v11014_v20 = vor.u32 %v11013_v59, %v11010_v18  ;;  %v20688_v27 = vsel %vm22095_vm8, %v8701_v49, %v8703_v36  ;;  %v20690_v39 = vld [vmem:[#allocation2 + $0x88] sm:$0xff]   ;;  %v22099_v59 = vshll.u32 %v20512_v46, 16  ;;  %v20711_v49 = vld [vmem:[#allocation2 + $0x14] sm:$0xf]  ;;  %vm22115_vm14 = vmmov %vm22106_vm0 }
 0x485   : > { %22093 = vst [vmem:[#allocation12_spill] sm:$0xff] %v20678_v2  ;;  %15670 = vmatmul.mubr.bf16.gmra.mrb[56].mxu1 %v20582_v31  ;;  %22096 = vst [vmem:[#allocation13_spill] sm:$0xff] %v20688_v27  ;;  %v20695_v31 = vor.u32 %v11022_v15, %v11019_v12  ;;  %v11237_v12 = vrot.slane %v20554_v24, 2  ;;  %v11234_v41 = vrot.slane %v13406_v16, 2  ;;  %v11239_v18 = vrot.slane %v20567_v8, 2  ;;  %v20800_v2 = vld [vmem:[#allocation2 + $0x50] sm:$0xff]  }
 0x486   : > { %15284 = vmatpush3.bf16.msra.mxu0 %v17544_v13  ;;  %15673 = vmatprep.mubr.msk.bf16.mxu1 %vm22049_vm7, %v22086_v40  ;;  %v20693_v1 = vsel %vm22097_vm11, %v11005_v38, %v11014_v20  ;;  %v10076_v13 = vshrl.u32 %v20485_v50, 16  ;;  %v10082_v30 = vrot.slane %v22099_v59, 1  ;;  %v10088_v26 = vshll.u32 %v20690_v39, 16  ;;  %v8885_v38 = vld [vmem:[#allocation2 + $0x10] sm:$0xc]  ;;  %vm22117_vm12 = vmmov %vm22106_vm0 }
 0x487   : > { %15321 = vmatprep.subr.bf16.mxu0 %v22086_v40  ;;  %22098 = vst [vmem:[#allocation14_spill] sm:$0xff] %v20695_v31  ;;  %v20706_v35 = vsel %vm22100_vm6, %v11014_v20, %v20695_v31  ;;  %v20716_v56 = vsel %vm22101_vm9, %v11235_v43, %v11237_v12  ;;  %v20720_v36 = vsel %vm22104_vm10, %v11234_v41, %v11235_v43  ;;  %v17631_v24 = vld [vmem:[#allocation2 + $0x98] ss:$0 sps:$4 sm:$0x33]   ;;  %v11243_v20 = vrot.slane %v20605_v58, 2  ;;  %vm22119_vm2 = vmmov %vm22106_vm0 }
 0x488   : > { %22102 = vst [vmem:[#allocation15_spill] sm:$0xff] %v20716_v56  ;;  %22105 = vst [vmem:[#allocation16_spill] sm:$0xff] %v20720_v36  ;;  %v20723_v52 = vsel %vm22106_vm0, %v11237_v12, %v11239_v18  ;;  %v20727_v8 = vcombine.low %v8885_v38, %v20711_v49  ;;  %v11245_v15 = vrot.slane %v20610_v47, 2  ;;  %v11247_v16 = vrot.slane %v20629_v25, 2  ;;  %v20777_v56 = vld [vmem:[#allocation2 + $0x38] sm:$0xff]  }
 0x489   : > { %15250 = vmatmul.mubr.bf16.gmra.mrb[52].mxu0 %v20303_v21  ;;  %v10078_v21 = vor.u32 %v10076_v13, %v20542_v0  ;;  %22107 = vst [vmem:[#allocation17_spill] sm:$0xff] %v20723_v52  ;;  %v11241_v0 = vrot.slane %v20577_v10, 2  ;;  %v20733_v13 = vld [vmem:[#allocation2 + $0x18] sm:$0xff]   ;;  %v20739_v10 = vld [vmem:[#allocation2 + $0x90] ss:$0 sps:$4 sm:$0x11]   ;;  %vm22121_vm4 = vmmov %vm22103_vm5 }
 0x48a   : > { %15253 = vmatprep.mubr.msk.bf16.mxu0 %vm22049_vm7, %v22086_v40  ;;  %22108 = vst [vmem:[#allocation18_spill] sm:$0xff] %v20727_v8  ;;  %v20745_v12 = vsel %vm22113_vm3, %v11243_v20, %v11245_v15  ;;  %v10084_v58 = vshrl.u32 %v20512_v46, 16  ;;  %v10090_v47 = vrot.slane %v10088_v26, 1  ;;  %v20752_v41 = vsel %vm22115_vm14, %v11245_v15, %v11247_v16  ;;  %vm22124_vm8 = vmmov %vm22121_vm4  ;;  %v7872_v36 = vld [vmem:[#allocation2] sm:$0xe] }
 0x48b   : > { %v10083_v44 = vsel %vm22103_vm5, %v10078_v21, %v10082_v30  ;;  %v20736_v59 = vsel %vm22109_vm1, %v11239_v18, %v11241_v0  ;;  %v20742_v43 = vsel %vm22111_vm13, %v11241_v0, %v11243_v20  ;;  %22114 = vst [vmem:[#allocation21_spill] sm:$0xff] %v20745_v12  ;;  %v20749_v21 = vld [vmem:[#allocation2 + $0x20] sm:$0xff]   ;;  %22116 = vst [vmem:[#allocation22_spill] sm:$0xff] %v20752_v41  ;;  %v11249_v25 = vrot.slane %v20636_v6, 2 }
 0x48c   : > { %22110 = vst [vmem:[#allocation19_spill] sm:$0xff] %v20736_v59  ;;  %22112 = vst [vmem:[#allocation20_spill] sm:$0xff] %v20742_v43  ;;  %v11251_v18 = vrot.slane %v17631_v24, 2  ;;  %v9193_v38 = vshll.u32 %v20727_v8, 16  ;;  %v10086_v0 = vor.u32 %v10084_v58, %v10082_v30  ;;  %v9198_v20 = vshrl.u32 %v20733_v13, 16  ;;  %v20771_v59 = vld [vmem:[#allocation2 + $0x30] sm:$0xff]  }
 0x48d   : > { %15674 = vmatmul.mubr.bf16.gmra.mrb[60].mxu1 %v10083_v44  ;;  %v9190_v44 = vshrl.u32 %v20727_v8, 16  ;;  %v20762_v26 = vsel %vm22117_vm12, %v11247_v16, %v11249_v25  ;;  %v9201_v15 = vshll.u32 %v20733_v13, 16  ;;  %v10096_v6 = vshll.u32 %v20739_v10, 16  ;;  %vm22125_vm11 = vmmov %vm22122_vm15 }
 0x48e   : > { %15677 = vmatprep.mubr.msk.bf16.mxu1 %vm22049_vm7, %v22086_v40  ;;  %22118 = vst [vmem:[#allocation23_spill] sm:$0xff] %v20762_v26  ;;  %v20768_v41 = vsel %vm22119_vm2, %v11249_v25, %v11251_v18  ;;  %v9195_v12 = vrot.slane %v9193_v38, 3  ;;  %v10091_v43 = vsel %vm22121_vm4, %v10086_v0, %v10090_v47  ;;  %v9200_v30 = vrot.slane %v9198_v20, 2  ;;  %vm22127_vm6 = vmmov %vm22125_vm11 }
 0x48f   : > { %22120 = vst [vmem:[#allocation24_spill] sm:$0xff] %v20768_v41  ;;  %v9192_v24 = vrot.slane %v9190_v44, 2  ;;  %v9203_v58 = vrot.slane %v9201_v15, 3  ;;  %v9207_v16 = vshrl.u32 %v20749_v21, 16  ;;  %v9210_v52 = vshll.u32 %v20749_v21, 16  ;;  %vm22129_vm9 = vmmov %vm22127_vm6 }
 0x490   : > { %v10092_v0 = vshrl.u32 %v20690_v39, 16  ;;  %v10098_v20 = vrot.slane %v10096_v6, 1  ;;  %v9228_v8 = vshll.u32 %v20771_v59, 16  ;;  %v20792_v6 = vld [vmem:[#allocation2 + $0x48] sm:$0xff]   ;;  %v9234_v27 = vshrl.u32 %v20777_v56, 16  ;;  %vm22131_vm5 = vmmov %vm22127_vm6 }
 0x491   : > { %15254 = vmatmul.mubr.bf16.gmra.mrb[56].mxu0 %v20333_v5  ;;  %v20759_v5 = vld [vmem:[#allocation2 + $0x28] sm:$0xff]   ;;  %v9196_v26 = vor.u32 %v9195_v12, %v9192_v24  ;;  %v9204_v25 = vor.u32 %v9203_v58, %v9200_v30  ;;  %v9209_v18 = vrot.slane %v9207_v16, 2  ;;  %v9212_v15 = vrot.slane %v9210_v52, 3  ;;  %vm22133_vm10 = vmmov %vm22131_vm5 }
 0x492   : > { %15257 = vmatprep.mubr.msk.bf16.mxu0 %vm22049_vm7, %v22086_v40  ;;  %v9216_v44 = vshrl.u32 %v20759_v5, 16  ;;  %v9219_v38 = vshll.u32 %v20759_v5, 16  ;;  %v9225_v30 = vshrl.u32 %v20771_v59, 16  ;;  %v10094_v58 = vor.u32 %v10092_v0, %v10090_v47  ;;  %vm22135_vm0 = vmmov %vm22131_vm5 }
 0x493   : > { %v20786_v12 = vsel %vm22122_vm15, %v9196_v26, %v9204_v25  ;;  %v9213_v16 = vor.u32 %v9212_v15, %v9209_v18  ;;  %v9237_v26 = vshll.u32 %v20777_v56, 16  ;;  %v9236_v18 = vrot.slane %v9234_v27, 2  ;;  %vm22138_vm1 = vmmov %vm22135_vm0 }
 0x494   : > { %22123 = vst [vmem:[#allocation25_spill] sm:$0xff] %v20786_v12  ;;  %v9218_v24 = vrot.slane %v9216_v44, 2  ;;  %v9221_v41 = vrot.slane %v9219_v38, 3  ;;  %v10099_v44 = vsel %vm22124_vm8, %v10094_v58, %v10098_v20  ;;  %v9230_v12 = vrot.slane %v9228_v8, 3  ;;  %vm22147_vm2 = vmmov %vm22135_vm0 }
 0x495   : > { %15678 = vmatmul.mubr.bf16.gmra.mrb[64].mxu1 %v10091_v43  ;;  %v20783_v43 = vld [vmem:[#allocation2 + $0x40] sm:$0xff]   ;;  %v20798_v38 = vsel %vm22125_vm11, %v9204_v25, %v9213_v16  ;;  %v9239_v0 = vrot.slane %v9237_v26, 3  ;;  %v20809_v25 = vld [vmem:[#allocation2 + $0x5c] sm:$0xf]  ;;  %v9255_v58 = vshll.u32 %v20792_v6, 16  ;;  %vm22140_vm13 = vcmask 1046528   ;;  %vm22150_vm15 = vmmov %vm22135_vm0 }
 0x496   : > { %15681 = vmatprep.mubr.msk.bf16.mxu1 %vm22049_vm7, %v22086_v40  ;;  %v9222_v52 = vor.u32 %v9221_v41, %v9218_v24  ;;  %22126 = vst [vmem:[#allocation26_spill] sm:$0xff] %v20798_v38  ;;  %v9243_v41 = vshrl.u32 %v20783_v43, 16  ;;  %v9246_v24 = vshll.u32 %v20783_v43, 16  ;;  %vm22141_vm3 = vcmask 1044480   ;;  %vm22152_vm8 = vmmov %vm22135_vm0 }
 0x497   : > { %v9240_v8 = vor.u32 %v9239_v0, %v9236_v18  ;;  %v9257_v38 = vrot.slane %v9255_v58, 3  ;;  %v9261_v18 = vshrl.u32 %v20800_v2, 16  ;;  %vm22143_vm14 = vmmov %vm22141_vm3 }
 0x498   : > { %v20803_v47 = vsel %vm22127_vm6, %v9213_v16, %v9222_v52  ;;  %v9245_v20 = vrot.slane %v9243_v41, 2  ;;  %v17728_v16 = vld [vmem:[#allocation2 + $0x4] sm:$0xf]  ;;  %vm22145_vm12 = vmmov %vm22141_vm3 }
 0x499   : > { %15258 = vmatmul.mubr.bf16.gmra.mrb[60].mxu0 %v20349_v29  ;;  %v9227_v29 = vrot.slane %v9225_v30, 2  ;;  %22128 = vst [vmem:[#allocation27_spill] sm:$0xff] %v20803_v47  ;;  %v9252_v30 = vshrl.u32 %v20792_v6, 16  ;;  %v13087_v27 = vcombine.low %v7872_v36, %v17728_v16  ;;  %v20830_v41 = vld [vmem:[#allocation2 + $0x60] sm:$0xff]   ;;  %v9458_v16 = vld [vmem:[#allocation2 + $0x10] sm:$0x8]  ;;  %vm22148_vm4 = vmmov %vm22141_vm3 }
 0x49a   : > { %15261 = vmatprep.mubr.msk.bf16.mxu0 %vm22049_vm7, %v22086_v40  ;;  %vm22154_vm11 = vmmov %vm22141_vm3 }
 0x49b   : > { %v9231_v15 = vor.u32 %v9230_v12, %v9227_v29  ;;  %v11433_v12 = vld [vmem:[#allocation2 + $0x58] sm:$0xc]  ;;  %v9254_v47 = vrot.slane %v9252_v30, 2  ;;  %vm22156_vm6 = vmmov %vm22141_vm3 }
 0x49c   : > { %v20824_v0 = vcombine.low %v11433_v12, %v20809_v25  ;;  %v22021_v12 = vrot.slane %v20523_v33, 1 }
 0x49d   : > { %15682 = vmatmul.mubr.bf16.gmra.mrb[68].mxu1 %v10099_v44  ;;  %v20814_v26 = vsel %vm22129_vm9, %v9222_v52, %v9231_v15  ;;  %v9248_v44 = vrot.slane %v9246_v24, 3  ;;  %v20818_v29 = vsel %vm22131_vm5, %v9231_v15, %v9240_v8  ;;  %v9264_v52 = vshll.u32 %v20800_v2, 16  ;;  %vm22158_vm9 = vmmov %vm22135_vm0 }
 0x49e   : > { %15701 = vmatprep.mubr.msk.bf16.mxu1 %vm22049_vm7, %v22086_v40  ;;  %22130 = vst [vmem:[#allocation28_spill] sm:$0xff] %v20814_v26  ;;  %22132 = vst [vmem:[#allocation29_spill] sm:$0xff] %v20818_v29  ;;  %v9258_v15 = vor.u32 %v9257_v38, %v9254_v47  ;;  %v9263_v24 = vrot.slane %v9261_v18, 2  ;;  %v7893_v29 = vrot.slane %v13087_v27, 1  ;;  %v20841_v26 = vld [vmem:[#allocation2 + $0x68] sm:$0xff]   ;;  %v9480_v38 = vrot.slane %v20733_v13, 3 }
 0x49f   : > { %v9249_v36 = vor.u32 %v9248_v44, %v9245_v20  ;;  %v9266_v58 = vrot.slane %v9264_v52, 3  ;;  %v13255_v44 = vcombine.low %v9458_v16, %v20711_v49  ;;  %v11736_v47 = vshrl.u32 %v20824_v0, 16  ;;  %v17547_v49 = vld [vmem:[%s22004_s2 + $0x88] sm:$0xff]   ;;  %v20853_v27 = vld [vmem:[#allocation2 + $0x70] sm:$0xff]   ;;  %v20868_v16 = vld [vmem:[#allocation2 + $0x78] sm:$0xff]  }
 0x4a0   : > { %v11739_v18 = vshll.u32 %v20824_v0, 16  ;;  %vm22159_vm5 = vmmov %vm22141_vm3 }
 0x4a1   : > { %15262 = vmatmul.mubr.bf16.gmra.mrb[64].mxu0 %v20361_v53  ;;  %v17546_v53 = vld [vmem:[%s22004_s2 + $0x80] sm:$0xff]   ;;  %v20833_v30 = vsel %vm22133_vm10, %v9240_v8, %v9249_v36  ;;  %v20837_v20 = vsel %vm22135_vm0, %v9249_v36, %v9258_v15  ;;  %v20843_v31 = vor.u32 %v9266_v58, %v9263_v24  ;;  %v11744_v36 = vshrl.u32 %v20830_v41, 16  ;;  %vm22160_vm10 = vmmov %vm22135_vm0 }
 0x4a2   : > { %15265 = vmatprep.mubr.msk.bf16.mxu0 %vm22049_vm7, %v22086_v40  ;;  %22134 = vst [vmem:[#allocation30_spill] sm:$0xff] %v20833_v30  ;;  %22136 = vst [vmem:[#allocation31_spill] sm:$0xff] %v20837_v20  ;;  %v11738_v52 = vrot.slane %v11736_v47, 2  ;;  %v9482_v24 = vrot.slane %v20749_v21, 3  ;;  %v7895_v58 = vsel %vm22140_vm13, %v7893_v29, %v22021_v12  ;;  %v11741_v8 = vrot.slane %v11739_v18, 3  ;;  %v17548_v29 = vld [vmem:[%s22004_s2 + $0x90] sm:$0xff]  }
 0x4a3   : > { %22137 = vst [vmem:[#allocation32_spill] sm:$0xff] %v20843_v31  ;;  %v20860_v13 = vsel %vm22138_vm1, %v9258_v15, %v20843_v31  ;;  %v11746_v20 = vrot.slane %v11744_v36, 2  ;;  %v11756_v21 = vshll.u32 %v20841_v26, 16  ;;  %v9484_v36 = vrot.slane %v20759_v5, 3  ;;  %v20890_v31 = vld [vmem:[#allocation2 + $0x88] sm:$0xff]   ;;  %vm22161_vm0 = vmmov %vm22141_vm3 }
 0x4a4   : > { %22139 = vst [vmem:[#allocation33_spill] sm:$0xff] %v20860_v13  ;;  %v20876_v47 = vsel %vm22143_vm14, %v9480_v38, %v9482_v24  ;;  %v11742_v18 = vor.u32 %v11741_v8, %v11738_v52  ;;  %v11762_v12 = vshrl.u32 %v20853_v27, 16  ;;  %v11771_v5 = vshrl.u32 %v20868_v16, 16  ;;  %v17551_v52 = vld [vmem:[%s22004_s2 + $0xc0] sm:$0xff]   ;;  %vm22164_vm1 = vmmov %vm22140_vm13 }
 0x4a5   : > { %15702 = vmatmul.mubr.bf16.vlgmr.msra.gmra.mrb[36].mxu1 %v20383_v7  ;;  %v9479_v7 = vrot.slane %v13255_v44, 3  ;;  %22144 = vst [vmem:[#allocation35_spill] sm:$0xff] %v20876_v47  ;;  %v20893_v13 = vsel %vm22145_vm12, %v9482_v24, %v9484_v36  ;;  %v11774_v24 = vshll.u32 %v20868_v16, 16  ;;  %vm22165_vm13 = vmmov %vm22147_vm2 }
 0x4a6   : > { %15738 = vmatpush3.bf16.msra.mxu1 %v17546_v53  ;;  %15705 = vmatprep.mubr.msk.bf16.mxu1 %vm22049_vm7, %v22086_v40  ;;  %v11747_v53 = vshll.u32 %v20830_v41, 16  ;;  %22146 = vst [vmem:[#allocation36_spill] sm:$0xff] %v20893_v13  ;;  %v11764_v30 = vrot.slane %v11762_v12, 2  ;;  %v20912_v12 = vld [vmem:[#allocation2 + $0x90] sm:$0xff]   ;;  %vm22167_vm14 = vmmov %vm22161_vm0 }
 0x4a7   : > { %15739 = vmatprep.subr.bf16.mxu1 %v22086_v40  ;;  %v20871_v44 = vsel %vm22141_vm3, %v9479_v7, %v9480_v38  ;;  %v20883_v7 = vld [vmem:[#allocation2 + $0x80] sm:$0xff]   ;;  %v11798_v13 = vshrl.u32 %v20912_v12, 16  ;;  %vm22166_vm3 = vmmov %vm22147_vm2 }
 0x4a8   : > { %22142 = vst [vmem:[#allocation34_spill] sm:$0xff] %v20871_v44  ;;  %v11749_v15 = vrot.slane %v11747_v53, 3  ;;  %v11765_v53 = vshll.u32 %v20853_v27, 16  ;;  %v11758_v44 = vrot.slane %v11756_v21, 3  ;;  %v11773_v21 = vrot.slane %v11771_v5, 2  ;;  %vm22168_vm12 = vmmov %vm22147_vm2 }
 0x4a9   : > { %15266 = vmatmul.mubr.bf16.gmra.mrb[68].mxu0 %v20376_v3  ;;  %v11753_v3 = vshrl.u32 %v20841_v26, 16  ;;  %v11789_v5 = vshrl.u32 %v20890_v31, 16 }
 0x4aa   : > { %15285 = vmatprep.mubr.msk.bf16.mxu0 %vm22049_vm7, %v22086_v40  ;;  %15740 = vmatpush3.bf16.msra.mxu1 %v17547_v49  ;;  %v11750_v38 = vor.u32 %v11749_v15, %v11746_v20  ;;  %v9486_v49 = vrot.slane %v20771_v59, 3  ;;  %v11767_v8 = vrot.slane %v11765_v53, 3  ;;  %v9490_v53 = vrot.slane %v20783_v43, 3  ;;  %v17552_v43 = vld [vmem:[%s22004_s2 + $0xc8] sm:$0xff]  }
 0x4ab   : > { %15741 = vmatprep.subr.bf16.mxu1 %v22086_v40  ;;  %v11755_v47 = vrot.slane %v11753_v3, 2 }
 0x4ac   : > { %v20901_v20 = vsel %vm22147_vm2, %v11742_v18, %v11750_v38  ;;  %v20904_v59 = vsel %vm22148_vm4, %v9484_v36, %v9486_v49  ;;  %v11768_v3 = vor.u32 %v11767_v8, %v11764_v30  ;;  %v9488_v18 = vrot.slane %v20777_v56, 3  ;;  %vm22169_vm2 = vmmov %vm22161_vm0 }
 0x4ad   : > { %15706 = vmatmul.mubr.bf16.gmra.mrb[40].mxu1 %v20390_v37  ;;  %v11759_v15 = vor.u32 %v11758_v44, %v11755_v47  ;;  %22149 = vst [vmem:[#allocation37_spill] sm:$0xff] %v20904_v59  ;;  %v17549_v37 = vld [vmem:[%s22004_s2 + $0x98] sm:$0xff]   ;;  %v11780_v44 = vshrl.u32 %v20883_v7, 16  ;;  %v11776_v36 = vrot.slane %v11774_v24, 3  ;;  %vm22170_vm4 = vmmov %vm22161_vm0 }
 0x4ae   : > { %15709 = vmatprep.mubr.msk.bf16.mxu1 %vm22049_vm7, %v22086_v40  ;;  %15742 = vmatpush3.bf16.msra.mxu1 %v17548_v29  ;;  %v11783_v29 = vshll.u32 %v20883_v7, 16  ;;  %v20922_v59 = vld [vmem:[#allocation2 + $0x98] sm:$0xff]   ;;  %v20928_v56 = vsel %vm22154_vm11, %v9486_v49, %v9488_v18  ;;  %v11792_v49 = vshll.u32 %v20890_v31, 16  ;;  %vm22173_vm11 = vmmov %vm22161_vm0 }
 0x4af   : > { %15743 = vmatprep.subr.bf16.mxu1 %v22086_v40  ;;  %v20918_v47 = vsel %vm22150_vm15, %v11750_v38, %v11759_v15  ;;  %v20925_v30 = vsel %vm22152_vm8, %v11759_v15, %v11768_v3  ;;  %22155 = vst [vmem:[#allocation40_spill] sm:$0xff] %v20928_v56  ;;  %v11782_v8 = vrot.slane %v11780_v44, 2  ;;  %v11777_v38 = vor.u32 %v11776_v36, %v11773_v21  ;;  %v17550_v44 = vld [vmem:[%s22004_s2 + $0xa0] sm:$0xff]   ;;  %vm22171_vm15 = vmmov %vm22161_vm0 }
 0x4b0   : > { %22151 = vst [vmem:[#allocation38_spill] sm:$0xff] %v20918_v47  ;;  %22153 = vst [vmem:[#allocation39_spill] sm:$0xff] %v20925_v30  ;;  %v11785_v24 = vrot.slane %v11783_v29, 3  ;;  %v20937_v15 = vsel %vm22156_vm6, %v9488_v18, %v9490_v53  ;;  %v9492_v56 = vrot.slane %v20792_v6, 3  ;;  %v11801_v21 = vshll.u32 %v20912_v12, 16  ;;  %v17553_v47 = vld [vmem:[%s22004_s2 + $0xd0] sm:$0xff]  }
 0x4b1   : > { %15286 = vmatmul.mubr.bf16.vlgmr.msra.gmra.mrb[36].mxu0 %v7895_v58  ;;  %v17683_v58 = vld [vmem:[#allocation2 + $0x58] ss:$0 sps:$4 sm:$0x77]   ;;  %22157 = vst [vmem:[#allocation41_spill] sm:$0xff] %v20937_v15  ;;  %v20949_v18 = vsel %vm22158_vm9, %v11768_v3, %v11777_v38  ;;  %v9494_v29 = vrot.slane %v20800_v2, 3  ;;  %v11800_v30 = vrot.slane %v11798_v13, 2  ;;  %vm22172_vm8 = vmmov %vm22161_vm0 }
 0x4b2   : > { %15289 = vmatprep.mubr.msk.bf16.mxu0 %vm22049_vm7, %v22086_v40  ;;  %15322 = vmatpush3.bf16.msra.mxu0 %v17551_v52  ;;  %v11791_v52 = vrot.slane %v11789_v5, 2  ;;  %v11786_v36 = vor.u32 %v11785_v24, %v11782_v8  ;;  %v20953_v15 = vsel %vm22159_vm5, %v9490_v53, %v9492_v56  ;;  %v11803_v5 = vrot.slane %v11801_v21, 3  ;;  %vm22174_vm6 = vmmov %vm22161_vm0 }
 0x4b3   : > { %15744 = vmatpush3.bf16.msra.mxu1 %v17549_v37  ;;  %15323 = vmatprep.subr.bf16.mxu0 %v22086_v40  ;;  %v11794_v37 = vrot.slane %v11792_v49, 3  ;;  %v11807_v6 = vshrl.u32 %v20922_v59, 16  ;;  %v20964_v2 = vsel %vm22161_vm0, %v9492_v56, %v9494_v29  ;;  %v11810_v53 = vshll.u32 %v20922_v59, 16  ;;  %v12004_v49 = vld [vmem:[#allocation2 + $0x58] sm:$0x8]  ;;  %vm22176_vm9 = vmmov %vm22164_vm1 }
 0x4b4   : > { %15745 = vmatprep.subr.bf16.mxu1 %v22086_v40  ;;  %v20961_v3 = vsel %vm22160_vm10, %v11777_v38, %v11786_v36  ;;  %v11804_v13 = vor.u32 %v11803_v5, %v11800_v30  ;;  %v9496_v24 = vrot.slane %v17683_v58, 3  ;;  %v22162_v38 = vrot.slane %v20591_v54, 1  ;;  %vm22177_vm5 = vmmov %vm22161_vm0 }
 0x4b5   : > { %15710 = vmatmul.mubr.bf16.gmra.mrb[44].mxu1 %v20398_v63  ;;  %v11795_v8 = vor.u32 %v11794_v37, %v11791_v52  ;;  %v17554_v63 = vld [vmem:[%s22004_s2 + $0xa8] sm:$0xff]   ;;  %v22163_v52 = vrot.slane %v20523_v33, 1  ;;  %v11812_v21 = vrot.slane %v11810_v53, 3  ;;  %v13490_v37 = vcombine.low %v12004_v49, %v20809_v25  ;;  %v17696_v25 = vld [vmem:[#allocation2 + $0xa0] ss:$0 sps:$4 sm:$0x77]   ;;  %vm22178_vm10 = vmmov %vm22161_vm0 }
 0x4b6   : > { %15324 = vmatpush3.bf16.msra.mxu0 %v17552_v43  ;;  %15713 = vmatprep.mubr.msk.bf16.mxu1 %vm22049_vm7, %v22086_v40  ;;  %v11809_v43 = vrot.slane %v11807_v6, 2  ;;  %v20987_v58 = vsel %vm22167_vm14, %v9494_v29, %v9496_v24  ;;  %v12025_v33 = vrot.slane %v20830_v41, 3  ;;  %v12029_v29 = vrot.slane %v20853_v27, 3  ;;  %vm22181_vm14 = vmmov %vm22164_vm1 }
 0x4b7   : > { %15746 = vmatpush3.bf16.msra.mxu1 %v17550_v44  ;;  %v7897_v56 = vsel %vm22164_vm1, %v22163_v52, %v22162_v38  ;;  %15325 = vmatprep.subr.bf16.mxu0 %v22086_v40  ;;  %v20980_v44 = vsel %vm22165_vm13, %v11786_v36, %v11795_v8  ;;  %v20984_v30 = vsel %vm22166_vm3, %v11795_v8, %v11804_v13  ;;  %v17555_v36 = vld [vmem:[%s22004_s2 + $0xd8] sm:$0xff]   ;;  %v12024_v6 = vrot.slane %v13490_v37, 3  ;;  %vm22179_vm13 = vmmov %vm22164_vm1 }
 0x4b8   : > { %15747 = vmatprep.subr.bf16.mxu1 %v22086_v40  ;;  %v20995_v5 = vor.u32 %v11812_v21, %v11809_v43  ;;  %v12027_v8 = vrot.slane %v20841_v26, 3  ;;  %v12031_v41 = vrot.slane %v20868_v16, 3  ;;  %v12033_v53 = vrot.slane %v20883_v7, 3  ;;  %v17557_v43 = vld [vmem:[%s22004_s2 + $0xb0] sm:$0xff]   ;;  %vm22180_vm3 = vmmov %vm22164_vm1 }
 0x4b9   : > { %15290 = vmatmul.mubr.bf16.gmra.mrb[40].mxu0 %v7897_v56  ;;  %v7898_v24 = vrot.slane %v20649_v34, 1  ;;  %v21013_v27 = vsel %vm22169_vm2, %v12024_v6, %v12025_v33  ;;  %v12037_v49 = vrot.slane %v20912_v12, 3  ;;  %v12039_v38 = vrot.slane %v20922_v59, 3  ;;  %vm22183_vm2 = vmmov %vm22164_vm1 }
 0x4ba   : > { %15293 = vmatprep.mubr.msk.bf16.mxu0 %vm22049_vm7, %v22086_v40  ;;  %15326 = vmatpush3.bf16.msra.mxu0 %v17553_v47  ;;  %v12035_v47 = vrot.slane %v20890_v31, 3  ;;  %v21010_v26 = vsel %vm22168_vm12, %v11804_v13, %v20995_v5  ;;  %v21016_v16 = vsel %vm22170_vm4, %v12025_v33, %v12027_v8  ;;  %v21019_v31 = vsel %vm22171_vm15, %v12027_v8, %v12029_v29  ;;  %v17556_v13 = vld [vmem:[%s22004_s2 + $0xe0] sm:$0xff]   ;;  %v17730_v8 = vld [vmem:[#allocation2 + $0x28] sm:$0xff]   ;;  %vm22182_vm12 = vmmov %vm22164_vm1 }
 0x4bb   : > { %15748 = vmatpush3.bf16.msra.mxu1 %v17554_v63  ;;  %15327 = vmatprep.subr.bf16.mxu0 %v22086_v40  ;;  %v21022_v34 = vsel %vm22172_vm8, %v12029_v29, %v12031_v41  ;;  %v21025_v7 = vsel %vm22173_vm11, %v12031_v41, %v12033_v53  ;;  %v12041_v52 = vrot.slane %v17696_v25, 3  ;;  %v22175_v56 = vrot.slane %v20591_v54, 1  ;;  %v17558_v54 = vld [vmem:[%s22004_s2 + $0xe8] sm:$0xff]   ;;  %v17729_v33 = vld [vmem:[#allocation2 + $0x20] sm:$0xff]   ;;  %v17559_v25 = vld [vmem:[%s22004_s2 + $0xf0] sm:$0xff]  }
 0x4bc   : > { %15749 = vmatprep.subr.bf16.mxu1 %v22086_v40  ;;  %v21028_v63 = vsel %vm22174_vm6, %v12033_v53, %v12035_v47  ;;  %v21046_v37 = vsel %vm22177_vm5, %v12035_v47, %v12037_v49  ;;  %v21049_v59 = vsel %vm22178_vm10, %v12037_v49, %v12039_v38  ;;  %v7902_v29 = vrot.slane %v17730_v8, 1  ;;  %v17731_v53 = vld [vmem:[#allocation2 + $0x30] sm:$0xff]   ;;  %vm22184_vm4 = vmmov %vm22164_vm1 }
 0x4bd   : > { %15714 = vmatmul.mubr.bf16.gmra.mrb[48].mxu1 %v20422_v48  ;;  %v7899_v21 = vsel %vm22176_vm9, %v22175_v56, %v7898_v24  ;;  %v17560_v48 = vld [vmem:[%s22004_s2 + $0xb8] sm:$0xff]   ;;  %v21052_v12 = vsel %vm22161_vm0, %v12039_v38, %v12041_v52  ;;  %v7904_v47 = vrot.slane %v17731_v53, 1  ;;  %v10424_v38 = vld [vmem:[#allocation2 + $0x48] sm:$0xe]  ;;  %v17734_v52 = vld [vmem:[#allocation2 + $0x4c] sm:$0xf] }
 0x4be   : > { %15328 = vmatpush3.bf16.msra.mxu0 %v17555_v36  ;;  %15717 = vmatprep.mubr.msk.bf16.mxu1 %vm22049_vm7, %v22086_v40  ;;  %v7900_v36 = vrot.slane %v17729_v33, 1  ;;  %v13322_v56 = vcombine.low %v10424_v38, %v17734_v52  ;;  %v17565_v33 = vld [vmem:[%s22004_s2 + $0xc0] sm:$0xff]   ;;  %v17569_v53 = vld [vmem:[%s22004_s2 + $0xd0] sm:$0xff]   ;;  %vm22185_vm15 = vmmov %vm22164_vm1 }
 0x4bf   : > { %15329 = vmatprep.subr.bf16.mxu0 %v22086_v40  ;;  %15750 = vmatpush3.bf16.msra.mxu1 %v17557_v43  ;;  %vm22186_vm8 = vmmov %vm22164_vm1  ;;  %v17739_v38 = vld [vmem:[#allocation2 + $0x60] sm:$0xff]   ;;  %v17576_v52 = vld [vmem:[%s22004_s2 + $0x108] sm:$0xff]  }
 0x4c0   : > { %15751 = vmatprep.subr.bf16.mxu1 %v22086_v40  ;;  %v7901_v6 = vsel %vm22164_vm1, %v7898_v24, %v7900_v36  ;;  %v7903_v41 = vsel %vm22179_vm13, %v7900_v36, %v7902_v29  ;;  %v17732_v24 = vld [vmem:[#allocation2 + $0x38] sm:$0xff]   ;;  %v17736_v36 = vld [vmem:[#allocation2 + $0x48] ss:$0 sps:$4 sm:$0x11]   ;;  %vm22187_vm11 = vmmov %vm22164_vm1 }
 0x4c1   : > { %15294 = vmatmul.mubr.bf16.gmra.mrb[44].mxu0 %v7899_v21  ;;  %v7906_v43 = vrot.slane %v17732_v24, 1  ;;  %v17735_v21 = vld [vmem:[#allocation2 + $0x50] sm:$0xff]   ;;  %vm22188_vm6 = vmmov %vm22164_vm1 }
 0x4c2   : > { %15297 = vmatprep.mubr.msk.bf16.mxu0 %vm22049_vm7, %v22086_v40  ;;  %15330 = vmatpush3.bf16.msra.mxu0 %v17556_v13  ;;  %vm22189_vm9 = vmmov %vm22164_vm1 }
 0x4c3   : > { %15331 = vmatprep.subr.bf16.mxu0 %v22086_v40  ;;  %15752 = vmatpush3.bf16.msra.mxu1 %v17560_v48  ;;  %v7907_v13 = vsel %vm22181_vm14, %v7904_v47, %v7906_v43  ;;  %v10445_v48 = vrot.slane %v17735_v21, 1  ;;  %vm22190_vm5 = vmmov %vm22164_vm1 }
 0x4c4   : > { %15789 = vmatprep.subr.bf16.mxu1 %v22086_v40  ;;  %vm22191_vm10 = vmmov %vm22164_vm1 }
 0x4c5   : > { %15718 = vmatmul.mubr.bf16.gmra.mrb[52].mxu1 %v20451_v22  ;;  %v17561_v22 = vld [vmem:[%s22004_s2 + $0xf8] sm:$0xff]   ;;  %vm22192_vm0 = vmmov %vm22164_vm1 }
 0x4c6   : > { %15332 = vmatpush3.bf16.msra.mxu0 %v17558_v54  ;;  %15721 = vmatprep.mubr.msk.bf16.mxu1 %vm22049_vm7, %v22086_v40  ;;  %v10444_v54 = vrot.slane %v13322_v56, 1  ;;  %v17574_v56 = vld [vmem:[%s22004_s2 + $0xe0] sm:$0xff]   ;;  %vm22193_vm1 = vmmov %vm22192_vm0 }
 0x4c7   : > { %15333 = vmatprep.subr.bf16.mxu0 %v22086_v40  ;;  %vm22194_vm13 = vmmov %vm22192_vm0 }
 0x4c8   : > { %vm22196_vm14 = vmmov %vm22192_vm0 }
 0x4c9   : > { %15298 = vmatmul.mubr.bf16.gmra.mrb[48].mxu0 %v7901_v6  ;;  %v10446_v6 = vsel %vm22183_vm2, %v10444_v54, %v10445_v48  ;;  %v17578_v54 = vld [vmem:[%s22004_s2 + $0x110] sm:$0xff]   ;;  %vm22198_vm2 = vmmov %vm22192_vm0 }
 0x4ca   : > { %15301 = vmatprep.mubr.msk.bf16.mxu0 %vm22049_vm7, %v22086_v40  ;;  %15334 = vmatpush3.bf16.msra.mxu0 %v17559_v25  ;;  %v7910_v25 = vrot.slane %v17736_v36, 1 }
 0x4cb   : > { %15335 = vmatprep.subr.bf16.mxu0 %v22086_v40 }
 0x4cd   : > { %15722 = vmatmul.mubr.bf16.gmra.mrb[56].mxu1 %v20466_v62  ;;  %v7905_v62 = vsel %vm22180_vm3, %v7902_v29, %v7904_v47  ;;  %v17737_v29 = vld [vmem:[#allocation2 + $0x58] sm:$0xff]   ;;  %v17738_v47 = vld [vmem:[#allocation2 + $0x10] sm:$0xff]   ;;  %vm22195_vm3 = vmmov %vm22192_vm0 }
 0x4ce   : > { %15336 = vmatpush3.bf16.msra.mxu0 %v17561_v22  ;;  %15725 = vmatprep.mubr.msk.bf16.mxu1 %vm22049_vm7, %v22086_v40  ;;  %v17567_v22 = vld [vmem:[%s22004_s2 + $0xc8] sm:$0xff]  }
 0x4cf   : > { %15373 = vmatprep.subr.bf16.mxu0 %v22086_v40 }
 0x4d1   : > { %15302 = vmatmul.mubr.bf16.gmra.mrb[52].mxu0 %v7903_v41  ;;  %v10447_v41 = vrot.slane %v17737_v29, 1 }
 0x4d2   : > { %15305 = vmatprep.mubr.msk.bf16.mxu0 %vm22049_vm7, %v22086_v40 }
 0x4d3   : > { %v10448_v24 = vsel %vm22185_vm15, %v10445_v48, %v10447_v41  ;;  %vm22200_vm15 = vmmov %vm22192_vm0 }
 0x4d5   : > { %15726 = vmatmul.mubr.bf16.gmra.mrb[60].mxu1 %v20485_v50  ;;  %v17733_v50 = vld [vmem:[#allocation2 + $0x40] sm:$0xff]  }
 0x4d6   : > { %15729 = vmatprep.mubr.msk.bf16.mxu1 %vm22049_vm7, %v22086_v40  ;;  %v7908_v49 = vrot.slane %v17733_v50, 1  ;;  %v17571_v50 = vld [vmem:[%s22004_s2 + $0xd8] sm:$0xff]  }
 0x4d8   : > { %v7911_v8 = vsel %vm22184_vm4, %v7908_v49, %v7910_v25  ;;  %v17741_v25 = vld [vmem:[#allocation2 + $0x68] sm:$0xff]   ;;  %vm22199_vm4 = vmmov %vm22192_vm0 }
 0x4d9   : > { %15306 = vmatmul.mubr.bf16.gmra.mrb[56].mxu0 %v7905_v62  ;;  %v8177_v62 = vrot.slane %v17738_v47, 1  ;;  %v17582_v47 = vld [vmem:[%s22004_s2 + $0x120] sm:$0xff]  }
 0x4da   : > { %15309 = vmatprep.mubr.msk.bf16.mxu0 %vm22049_vm7, %v22086_v40 }
 0x4dd   : > { %15730 = vmatmul.mubr.bf16.gmra.mrb[64].mxu1 %v20512_v46  ;;  %v7909_v46 = vsel %vm22182_vm12, %v7906_v43, %v7908_v49  ;;  %v8176_v43 = vrot.slane %v20405_v9, 1  ;;  %v10449_v9 = vrot.slane %v17739_v38, 1  ;;  %vm22197_vm12 = vmmov %vm22192_vm0 }
 0x4de   : > { %15733 = vmatprep.mubr.msk.bf16.mxu1 %vm22049_vm7, %v22086_v40 }
 0x4df   : > { %v8178_v49 = vsel %vm22186_vm8, %v8176_v43, %v8177_v62  ;;  %v10450_v48 = vsel %vm22187_vm11, %v10447_v41, %v10449_v9  ;;  %v17583_v41 = vld [vmem:[%s22004_s2 + $0xf0] sm:$0xff]   ;;  %vm22201_vm8 = vmmov %vm22192_vm0 }
 0x4e0   : > { %v17743_v43 = vld [vmem:[#allocation2 + $0x70] sm:$0xff]   ;;  %vm22202_vm11 = vmmov %vm22192_vm0 }
 0x4e1   : > { %15310 = vmatmul.mubr.bf16.gmra.mrb[60].mxu0 %v7907_v13  ;;  %v17575_v13 = vld [vmem:[%s22004_s2 + $0x100] sm:$0xff]  }
 0x4e2   : > { %15313 = vmatprep.mubr.msk.bf16.mxu0 %vm22049_vm7, %v22086_v40 }
 0x4e5   : > { %15734 = vmatmul.mubr.bf16.gmra.mrb[68].mxu1 %v20690_v39 }
 0x4e6   : > { %15753 = vmatprep.mubr.msk.bf16.mxu1 %vm22049_vm7, %v22086_v40 }
 0x4e9   : > { %15314 = vmatmul.mubr.bf16.gmra.mrb[64].mxu0 %v7909_v46  ;;  %v17740_v46 = vld [vmem:[#allocation2 + $0x18] sm:$0xff]  }
 0x4ea   : > { %15317 = vmatprep.mubr.msk.bf16.mxu0 %vm22049_vm7, %v22086_v40  ;;  %v8179_v21 = vrot.slane %v17740_v46, 1  ;;  %v17745_v46 = vld [vmem:[#allocation2 + $0x78] sm:$0xff]  }
 0x4ec   : > { %v8180_v36 = vsel %vm22188_vm6, %v8177_v62, %v8179_v21  ;;  %vm22203_vm6 = vmmov %vm22192_vm0 }
 0x4ed   : > { %15754 = vmatmul.mubr.bf16.vlgmr.msra.gmra.mrb[36].mxu1 %v10446_v6  ;;  %v10451_v6 = vrot.slane %v17741_v25, 1 }
 0x4ee   : > { %15790 = vmatpush3.bf16.msra.mxu1 %v17565_v33  ;;  %15757 = vmatprep.mubr.msk.bf16.mxu1 %vm22049_vm7, %v22086_v40  ;;  %v17579_v33 = vld [vmem:[%s22004_s2 + $0xe8] sm:$0xff]  }
 0x4ef   : > { %15791 = vmatprep.subr.bf16.mxu1 %v22086_v40 }
 0x4f1   : > { %15318 = vmatmul.mubr.bf16.gmra.mrb[68].mxu0 %v7911_v8  ;;  %v17742_v8 = vld [vmem:[#allocation2 + $0x20] sm:$0xff]  }
 0x4f2   : > { %15337 = vmatprep.mubr.msk.bf16.mxu0 %vm22049_vm7, %v22086_v40  ;;  %15792 = vmatpush3.bf16.msra.mxu1 %v17567_v22  ;;  %v17580_v22 = vld [vmem:[%s22004_s2 + $0x118] sm:$0xff]   ;;  %v8181_v29 = vrot.slane %v17742_v8, 1 }
 0x4f3   : > { %15793 = vmatprep.subr.bf16.mxu1 %v22086_v40  ;;  %v17748_v8 = vld [vmem:[#allocation2 + $0x38] sm:$0xff]  }
 0x4f4   : > { %v8182_v62 = vsel %vm22190_vm5, %v8179_v21, %v8181_v29  ;;  %v10455_v21 = vrot.slane %v17745_v46, 1  ;;  %vm22205_vm5 = vmmov %vm22192_vm0 }
 0x4f5   : > { %15758 = vmatmul.mubr.bf16.gmra.mrb[40].mxu1 %v10448_v24  ;;  %v17587_v24 = vld [vmem:[%s22004_s2 + $0xf8] sm:$0xff]  }
 0x4f6   : > { %15761 = vmatprep.mubr.msk.bf16.mxu1 %vm22049_vm7, %v22086_v40  ;;  %15794 = vmatpush3.bf16.msra.mxu1 %v17569_v53  ;;  %v10452_v53 = vsel %vm22189_vm9, %v10449_v9, %v10451_v6  ;;  %vm22204_vm9 = vmmov %vm22192_vm0 }
 0x4f7   : > { %15795 = vmatprep.subr.bf16.mxu1 %v22086_v40 }
 0x4f9   : > { %15338 = vmatmul.mubr.bf16.vlgmr.msra.gmra.mrb[36].mxu0 %v8178_v49  ;;  %v17744_v49 = vld [vmem:[#allocation2 + $0x28] sm:$0xff]  }
 0x4fa   : > { %15341 = vmatprep.mubr.msk.bf16.mxu0 %vm22049_vm7, %v22086_v40  ;;  %15374 = vmatpush3.bf16.msra.mxu0 %v17575_v13  ;;  %v10453_v13 = vrot.slane %v17743_v43, 1  ;;  %v8183_v38 = vrot.slane %v17744_v49, 1 }
 0x4fb   : > { %15796 = vmatpush3.bf16.msra.mxu1 %v17571_v50  ;;  %15375 = vmatprep.subr.bf16.mxu0 %v22086_v40  ;;  %v17584_v50 = vld [vmem:[%s22004_s2 + $0x128] sm:$0xff]  }
 0x4fc   : > { %15797 = vmatprep.subr.bf16.mxu1 %v22086_v40  ;;  %v10454_v9 = vsel %vm22191_vm10, %v10451_v6, %v10453_v13  ;;  %v17747_v6 = vld [vmem:[#allocation2 + $0x80] sm:$0xff]   ;;  %vm22206_vm10 = vmmov %vm22192_vm0 }
 0x4fd   : > { %15762 = vmatmul.mubr.bf16.gmra.mrb[44].mxu1 %v10450_v48  ;;  %v17588_v48 = vld [vmem:[%s22004_s2 + $0x138] sm:$0xff]  }
 0x4fe   : > { %15376 = vmatpush3.bf16.msra.mxu0 %v17576_v52  ;;  %15765 = vmatprep.mubr.msk.bf16.mxu1 %vm22049_vm7, %v22086_v40  ;;  %v17586_v52 = vld [vmem:[%s22004_s2 + $0x130] sm:$0xff]  }
 0x4ff   : > { %15798 = vmatpush3.bf16.msra.mxu1 %v17574_v56  ;;  %15377 = vmatprep.subr.bf16.mxu0 %v22086_v40  ;;  %v8184_v56 = vsel %vm22192_vm0, %v8181_v29, %v8183_v38  ;;  %v8187_v29 = vrot.slane %v17748_v8, 1  ;;  %v17600_v8 = vld [vmem:[%s22004_s2 + $0x140] sm:$0xff]  }
 0x500   : > { %15799 = vmatprep.subr.bf16.mxu1 %v22086_v40 }
 0x501   : > { %15342 = vmatmul.mubr.bf16.gmra.mrb[40].mxu0 %v8180_v36  ;;  %v10456_v36 = vsel %vm22193_vm1, %v10453_v13, %v10455_v21  ;;  %vm22207_vm1 = vmmov %vm22192_vm0 }
 0x502   : > { %15345 = vmatprep.mubr.msk.bf16.mxu0 %vm22049_vm7, %v22086_v40  ;;  %15378 = vmatpush3.bf16.msra.mxu0 %v17578_v54  ;;  %v17746_v54 = vld [vmem:[#allocation2 + $0x30] sm:$0xff]  }
 0x503   : > { %15800 = vmatpush3.bf16.msra.mxu1 %v17579_v33  ;;  %15379 = vmatprep.subr.bf16.mxu0 %v22086_v40  ;;  %v8185_v33 = vrot.slane %v17746_v54, 1 }
 0x504   : > { %15801 = vmatprep.subr.bf16.mxu1 %v22086_v40 }
 0x505   : > { %15766 = vmatmul.mubr.bf16.gmra.mrb[48].mxu1 %v10452_v53  ;;  %v8186_v25 = vsel %vm22194_vm13, %v8183_v38, %v8185_v33  ;;  %v8188_v53 = vsel %vm22196_vm14, %v8185_v33, %v8187_v29  ;;  %vm22208_vm13 = vmmov %vm22192_vm0  ;;  %vm22210_vm14 = vsmask.f32 6400 }
 0x506   : > { %15380 = vmatpush3.bf16.msra.mxu0 %v17580_v22  ;;  %15769 = vmatprep.mubr.msk.bf16.mxu1 %vm22049_vm7, %v22086_v40  ;;  %v10457_v22 = vrot.slane %v17747_v6, 1  ;;  %v17595_v6 = vld [vmem:[%s22004_s2 + $0x110] sm:$0xff]  }
 0x507   : > { %15381 = vmatprep.subr.bf16.mxu0 %v22086_v40  ;;  %15802 = vmatpush3.bf16.msra.mxu1 %v17583_v41 }
 0x508   : > { %15803 = vmatprep.subr.bf16.mxu1 %v22086_v40  ;;  %v10458_v41 = vsel %vm22195_vm3, %v10455_v21, %v10457_v22  ;;  %v17591_v21 = vld [vmem:[%s22004_s2 + $0x100] sm:$0xff]   ;;  %vm22209_vm3 = vmmov %vm22192_vm0 }
 0x509   : > { %15346 = vmatmul.mubr.bf16.gmra.mrb[44].mxu0 %v8182_v62  ;;  %v17749_v62 = vld [vmem:[#allocation2 + $0x40] sm:$0xff]  }
 0x50a   : > { %15349 = vmatprep.mubr.msk.bf16.mxu0 %vm22049_vm7, %v22086_v40  ;;  %15382 = vmatpush3.bf16.msra.mxu0 %v17582_v47  ;;  %v10459_v47 = vrot.slane %v20690_v39, 1  ;;  %v17750_v39 = vld [vmem:[#allocation2 + $0x48] sm:$0xff]  }
 0x50b   : > { %15383 = vmatprep.subr.bf16.mxu0 %v22086_v40  ;;  %15804 = vmatpush3.bf16.msra.mxu1 %v17587_v24  ;;  %v8189_v24 = vrot.slane %v17749_v62, 1  ;;  %v8191_v49 = vrot.slane %v17750_v39, 1  ;;  %v17599_v62 = vld [vmem:[%s22004_s2 + $0x120] sm:$0xff]   ;;  %v17606_v39 = vld [vmem:[%s22004_s2 + $0x158] sm:$0xff]  }
 0x50c   : > { %15841 = vmatprep.subr.bf16.mxu1 %v22086_v40  ;;  %v10460_v43 = vsel %vm22197_vm12, %v10457_v22, %v10459_v47  ;;  %vm22220_vm12 = vmmov %vm22210_vm14 }
 0x50d   : > { %15770 = vmatmul.mubr.bf16.gmra.mrb[52].mxu1 %v10454_v9  ;;  %v8190_v13 = vsel %vm22198_vm2, %v8187_v29, %v8189_v24  ;;  %v8192_v9 = vsel %vm22200_vm15, %v8189_v24, %v8191_v49  ;;  %v17597_v29 = vld [vmem:[%s22004_s2 + $0x118] sm:$0xff]   ;;  %v17603_v24 = vld [vmem:[%s22004_s2 + $0x150] sm:$0xff]   ;;  %vm22226_vm2 = vcmask 1045504  }
 0x50e   : > { %15384 = vmatpush3.bf16.msra.mxu0 %v17584_v50  ;;  %15773 = vmatprep.mubr.msk.bf16.mxu1 %vm22049_vm7, %v22086_v40  ;;  %v10461_v50 = vrot.slane %v20739_v10, 1  ;;  %v17751_v10 = vld [vmem:[#allocation2 + $0x58] sm:$0xff]   ;;  %vm22230_vm15 = vmmov %vm22226_vm2 }
 0x50f   : > { %15385 = vmatprep.subr.bf16.mxu0 %v22086_v40  ;;  %v10727_v46 = vrot.slane %v17751_v10, 1  ;;  %v17610_v10 = vld [vmem:[%s22004_s2 + $0x168] sm:$0xff]  }
 0x510   : > { %v10462_v38 = vsel %vm22199_vm4, %v10459_v47, %v10461_v50  ;;  %v17602_v47 = vld [vmem:[%s22004_s2 + $0x148] sm:$0xff]   ;;  %vm22228_vm4 = vmmov %vm22226_vm2 }
 0x511   : > { %15350 = vmatmul.mubr.bf16.gmra.mrb[48].mxu0 %v8184_v56  ;;  %v10726_v56 = vrot.slane %v20528_v60, 1  ;;  %v17593_v60 = vld [vmem:[%s22004_s2 + $0x108] sm:$0xff]  }
 0x512   : > { %15353 = vmatprep.mubr.msk.bf16.mxu0 %vm22049_vm7, %v22086_v40  ;;  %15386 = vmatpush3.bf16.msra.mxu0 %v17586_v52  ;;  %v17585_v52 = vld [vmem:[#allocation2 + $0x50] ss:$0 sps:$4 sm:$0x11]  }
 0x513   : > { %15387 = vmatprep.subr.bf16.mxu0 %v22086_v40  ;;  %v10728_v54 = vsel %vm22201_vm8, %v10726_v56, %v10727_v46  ;;  %vm22232_vm8 = vmmov %vm22226_vm2 }
 0x515   : > { %15774 = vmatmul.mubr.bf16.gmra.mrb[56].mxu1 %v10456_v36  ;;  %v17752_v36 = vld [vmem:[#allocation2 + $0x60] sm:$0xff]  }
 0x516   : > { %15388 = vmatpush3.bf16.msra.mxu0 %v17588_v48  ;;  %15777 = vmatprep.mubr.msk.bf16.mxu1 %vm22049_vm7, %v22086_v40  ;;  %v8193_v48 = vrot.slane %v17585_v52, 1  ;;  %v17755_v52 = vld [vmem:[#allocation2 + $0x78] sm:$0xff]  }
 0x517   : > { %15425 = vmatprep.subr.bf16.mxu0 %v22086_v40  ;;  %v10735_v56 = vrot.slane %v17755_v52, 1  ;;  %v17627_v52 = vld [vmem:[%s22004_s2 + $0x1a0] sm:$0xff]  }
 0x518   : > { %v8194_v33 = vsel %vm22202_vm11, %v8191_v49, %v8193_v48  ;;  %v17608_v49 = vld [vmem:[%s22004_s2 + $0x130] sm:$0xff]   ;;  %vm22234_vm11 = vmmov %vm22226_vm2 }
 0x519   : > { %15354 = vmatmul.mubr.bf16.gmra.mrb[52].mxu0 %v8186_v25  ;;  %v10729_v25 = vrot.slane %v17752_v36, 1 }
 0x51a   : > { %15357 = vmatprep.mubr.msk.bf16.mxu0 %vm22049_vm7, %v22086_v40 }
 0x51b   : > { %v10730_v22 = vsel %vm22203_vm6, %v10727_v46, %v10729_v25  ;;  %vm22236_vm6 = vmmov %vm22226_vm2 }
 0x51d   : > { %15778 = vmatmul.mubr.bf16.gmra.mrb[60].mxu1 %v10458_v41  ;;  %v17753_v41 = vld [vmem:[#allocation2 + $0x68] sm:$0xff]  }
 0x51e   : > { %15781 = vmatprep.mubr.msk.bf16.mxu1 %vm22049_vm7, %v22086_v40 }
 0x521   : > { %15358 = vmatmul.mubr.bf16.gmra.mrb[56].mxu0 %v8188_v53  ;;  %v10731_v53 = vrot.slane %v17753_v41, 1 }
 0x522   : > { %15361 = vmatprep.mubr.msk.bf16.mxu0 %vm22049_vm7, %v22086_v40 }
 0x525   : > { %15782 = vmatmul.mubr.bf16.gmra.mrb[64].mxu1 %v10460_v43  ;;  %v17604_v43 = vld [vmem:[%s22004_s2 + $0x128] sm:$0xff]  }
 0x526   : > { %15785 = vmatprep.mubr.msk.bf16.mxu1 %vm22049_vm7, %v22086_v40 }
 0x529   : > { %15362 = vmatmul.mubr.bf16.gmra.mrb[60].mxu0 %v8190_v13  ;;  %v17754_v13 = vld [vmem:[#allocation2 + $0x70] sm:$0xff]  }
 0x52a   : > { %15365 = vmatprep.mubr.msk.bf16.mxu0 %vm22049_vm7, %v22086_v40  ;;  %v10733_v50 = vrot.slane %v17754_v13, 1  ;;  %v17621_v13 = vld [vmem:[%s22004_s2 + $0x160] sm:$0xff]  }
 0x52c   : > { %v10736_v46 = vsel %vm22206_vm10, %v10733_v50, %v10735_v56  ;;  %vm22241_vm10 = vmmov %vm22226_vm2 }
 0x52d   : > { %15786 = vmatmul.mubr.bf16.gmra.mrb[68].mxu1 %v10462_v38  ;;  %v17607_v38 = vld [vmem:[%s22004_s2 + $0x160] sm:$0xff]  }
 0x52e   : > { %15805 = vmatprep.mubr.msk.bf16.mxu1 %vm22049_vm7, %v22086_v40 }
 0x531   : > { %15366 = vmatmul.mubr.bf16.gmra.mrb[64].mxu0 %v8192_v9  ;;  %v17614_v9 = vld [vmem:[%s22004_s2 + $0x138] sm:$0xff]  }
 0x532   : > { %15369 = vmatprep.mubr.msk.bf16.mxu0 %vm22049_vm7, %v22086_v40 }
 0x535   : > { %15806 = vmatmul.mubr.bf16.vlgmr.msra.gmra.mrb[36].mxu1 %v10728_v54  ;;  %v17615_v54 = vld [vmem:[%s22004_s2 + $0x178] sm:$0xff]  }
 0x536   : > { %15842 = vmatpush3.bf16.msra.mxu1 %v17591_v21  ;;  %15809 = vmatprep.mubr.msk.bf16.mxu1 %vm22049_vm7, %v22086_v40  ;;  %v17756_v21 = vld [vmem:[#allocation2 + $0x80] sm:$0xff]  }
 0x537   : > { %15843 = vmatprep.subr.bf16.mxu1 %v22086_v40  ;;  %v10737_v48 = vrot.slane %v17756_v21, 1  ;;  %v22215_v21 = vld [vmem:[#allocation6_spill] sm:$0xff] }
 0x539   : > { %15370 = vmatmul.mubr.bf16.gmra.mrb[68].mxu0 %v8194_v33 }
 0x53a   : > { %15389 = vmatprep.mubr.msk.bf16.mxu0 %vm22049_vm7, %v22086_v40  ;;  %15844 = vmatpush3.bf16.msra.mxu1 %v17593_v60  ;;  %v10738_v60 = vsel %vm22192_vm0, %v10735_v56, %v10737_v48  ;;  %v17632_v56 = vld [vmem:[%s22004_s2 + $0x178] sm:$0xff]   ;;  %vm22242_vm0 = vmmov %vm22226_vm2 }
 0x53b   : > { %15845 = vmatprep.subr.bf16.mxu1 %v22086_v40 }
 0x53d   : > { %15810 = vmatmul.mubr.bf16.gmra.mrb[40].mxu1 %v10730_v22  ;;  %v17613_v22 = vld [vmem:[#allocation2 + $0x98] ss:$0 sps:$4 sm:$0x11]  }
 0x53e   : > { %15813 = vmatprep.mubr.msk.bf16.mxu1 %vm22049_vm7, %v22086_v40  ;;  %15846 = vmatpush3.bf16.msra.mxu1 %v17595_v6 }
 0x53f   : > { %15847 = vmatprep.subr.bf16.mxu1 %v22086_v40 }
 0x541   : > { %15390 = vmatmul.mubr.bf16.vlgmr.msra.gmra.mrb[36].mxu0 %v20461_v51  ;;  %v10732_v51 = vsel %vm22204_vm9, %v10729_v25, %v10731_v53  ;;  %v17758_v25 = vld [vmem:[#allocation2 + $0x90] sm:$0xff]   ;;  %vm22238_vm9 = vmmov %vm22226_vm2 }
 0x542   : > { %15393 = vmatprep.mubr.msk.bf16.mxu0 %vm22049_vm7, %v22086_v40  ;;  %15426 = vmatpush3.bf16.msra.mxu0 %v17600_v8  ;;  %v10741_v6 = vrot.slane %v17758_v25, 1  ;;  %v10743_v8 = vrot.slane %v17613_v22, 1  ;;  %v22218_v25 = vld [vmem:[#allocation11_spill] sm:$0xff]  ;;  %v22221_v22 = vld [vmem:[#allocation12_spill] sm:$0xff] }
 0x543   : > { %15848 = vmatpush3.bf16.msra.mxu1 %v17597_v29  ;;  %15427 = vmatprep.subr.bf16.mxu0 %v22086_v40  ;;  %v17759_v29 = vld [vmem:[#allocation2 + $0x50] ss:$0 sps:$4 sm:$0x33]  }
 0x544   : > { %15849 = vmatprep.subr.bf16.mxu1 %v22086_v40  ;;  %v8480_v41 = vshll.u32 %v17759_v29, 16 }
 0x545   : > { %15814 = vmatmul.mubr.bf16.gmra.mrb[44].mxu1 %v10732_v51 }
 0x546   : > { %15428 = vmatpush3.bf16.msra.mxu0 %v17602_v47  ;;  %15817 = vmatprep.mubr.msk.bf16.mxu1 %vm22049_vm7, %v22086_v40 }
 0x547   : > { %15850 = vmatpush3.bf16.msra.mxu1 %v17599_v62  ;;  %15429 = vmatprep.subr.bf16.mxu0 %v22086_v40  ;;  %v8482_v62 = vrot.slane %v8480_v41, 2  ;;  %v17641_v41 = vld [vmem:[%s22004_s2 + $0x190] sm:$0xff]  }
 0x548   : > { %15851 = vmatprep.subr.bf16.mxu1 %v22086_v40 }
 0x549   : > { %15394 = vmatmul.mubr.bf16.gmra.mrb[40].mxu0 %v20477_v11  ;;  %v10734_v11 = vsel %vm22205_vm5, %v10731_v53, %v10733_v50  ;;  %v10744_v53 = vsel %vm22209_vm3, %v10741_v6, %v10743_v8  ;;  %v22211_v50 = vld [vmem:[#allocation8_spill] sm:$0xff]  ;;  %vm22240_vm5 = vmmov %vm22226_vm2 }
 0x54a   : > { %15397 = vmatprep.mubr.msk.bf16.mxu0 %vm22049_vm7, %v22086_v40  ;;  %15430 = vmatpush3.bf16.msra.mxu0 %v17603_v24  ;;  %v17618_v24 = vld [vmem:[%s22004_s2 + $0x148] sm:$0xff]   ;;  %v22222_v8 = vld [vmem:[#allocation16_spill] sm:$0xff]  ;;  %vm22247_vm3 = vmmov %vm22242_vm0 }
 0x54b   : > { %15852 = vmatpush3.bf16.msra.mxu1 %v17604_v43  ;;  %15431 = vmatprep.subr.bf16.mxu0 %v22086_v40  ;;  %v17622_v43 = vld [vmem:[%s22004_s2 + $0x180] sm:$0xff]  }
 0x54c   : > { %15853 = vmatprep.subr.bf16.mxu1 %v22086_v40 }
 0x54d   : > { %15818 = vmatmul.mubr.bf16.gmra.mrb[48].mxu1 %v10734_v11  ;;  %v17626_v11 = vld [vmem:[%s22004_s2 + $0x198] sm:$0xff]  }
 0x54e   : > { %15432 = vmatpush3.bf16.msra.mxu0 %v17606_v39  ;;  %15821 = vmatprep.mubr.msk.bf16.mxu1 %vm22049_vm7, %v22086_v40  ;;  %v17625_v39 = vld [vmem:[%s22004_s2 + $0x168] sm:$0xff]  }
 0x54f   : > { %15433 = vmatprep.subr.bf16.mxu0 %v22086_v40  ;;  %15854 = vmatpush3.bf16.msra.mxu1 %v17608_v49  ;;  %v22212_v49 = vld [vmem:[#allocation4_spill] sm:$0xff] }
 0x550   : > { %15855 = vmatprep.subr.bf16.mxu1 %v22086_v40 }
 0x551   : > { %15398 = vmatmul.mubr.bf16.gmra.mrb[44].mxu0 %v20489_v17  ;;  %v17612_v17 = vld [vmem:[%s22004_s2 + $0x170] sm:$0xff]  }
 0x552   : > { %15401 = vmatprep.mubr.msk.bf16.mxu0 %vm22049_vm7, %v22086_v40  ;;  %15434 = vmatpush3.bf16.msra.mxu0 %v17607_v38  ;;  %v17628_v38 = vld [vmem:[%s22004_s2 + $0x170] sm:$0xff]  }
 0x553   : > { %15435 = vmatprep.subr.bf16.mxu0 %v22086_v40  ;;  %15856 = vmatpush3.bf16.msra.mxu1 %v17614_v9  ;;  %v22213_v9 = vld [vmem:[#allocation10_spill] sm:$0xff] }
 0x554   : > { %15893 = vmatprep.subr.bf16.mxu1 %v22086_v40 }
 0x555   : > { %15822 = vmatmul.mubr.bf16.gmra.mrb[52].mxu1 %v10736_v46  ;;  %v17629_v46 = vld [vmem:[%s22004_s2 + $0x1a8] sm:$0xff]  }
 0x556   : > { %15436 = vmatpush3.bf16.msra.mxu0 %v17610_v10  ;;  %15825 = vmatprep.mubr.msk.bf16.mxu1 %vm22049_vm7, %v22086_v40  ;;  %v22214_v10 = vld [vmem:[#allocation5_spill] sm:$0xff] }
 0x557   : > { %15437 = vmatprep.subr.bf16.mxu0 %v22086_v40 }
 0x559   : > { %15402 = vmatmul.mubr.bf16.gmra.mrb[48].mxu0 %v20504_v32  ;;  %v17757_v32 = vld [vmem:[#allocation2 + $0x88] sm:$0xff]  }
 0x55a   : > { %15405 = vmatprep.mubr.msk.bf16.mxu0 %vm22049_vm7, %v22086_v40  ;;  %15438 = vmatpush3.bf16.msra.mxu0 %v17612_v17  ;;  %v10739_v33 = vrot.slane %v17757_v32, 1  ;;  %v17630_v17 = vld [vmem:[%s22004_s2 + $0x1b0] sm:$0xff]  }
 0x55b   : > { %15439 = vmatprep.subr.bf16.mxu0 %v22086_v40 }
 0x55c   : > { %v10740_v36 = vsel %vm22207_vm1, %v10737_v48, %v10739_v33  ;;  %v22216_v48 = vld [vmem:[#allocation7_spill] sm:$0xff]  ;;  %vm22243_vm1 = vmmov %vm22242_vm0 }
 0x55d   : > { %15826 = vmatmul.mubr.bf16.gmra.mrb[56].mxu1 %v10738_v60  ;;  %v17760_v60 = vld [vmem:[#allocation2 + $0x98] ss:$0 sps:$4 sm:$0x33]  }
 0x55e   : > { %15440 = vmatpush3.bf16.msra.mxu0 %v17615_v54  ;;  %15829 = vmatprep.mubr.msk.bf16.mxu1 %vm22049_vm7, %v22086_v40  ;;  %v22217_v54 = vld [vmem:[#allocation9_spill] sm:$0xff]  ;;  %v11029_v32 = vshll.u32 %v17760_v60, 16 }
 0x55f   : > { %15477 = vmatprep.subr.bf16.mxu0 %v22086_v40 }
 0x561   : > { %15406 = vmatmul.mubr.bf16.gmra.mrb[52].mxu0 %v20519_v42  ;;  %v10742_v42 = vsel %vm22208_vm13, %v10739_v33, %v10741_v6  ;;  %v22219_v6 = vld [vmem:[#allocation14_spill] sm:$0xff]  ;;  %vm22245_vm13 = vmmov %vm22242_vm0 }
 0x562   : > { %15409 = vmatprep.mubr.msk.bf16.mxu0 %vm22049_vm7, %v22086_v40 }
 0x565   : > { %15830 = vmatmul.mubr.bf16.gmra.mrb[60].mxu1 %v10740_v36  ;;  %v11031_v36 = vrot.slane %v11029_v32, 2  ;;  %v17660_v32 = vld [vmem:[%s22004_s2 + $0x1f8] sm:$0xff]  }
 0x566   : > { %15833 = vmatprep.mubr.msk.bf16.mxu1 %vm22049_vm7, %v22086_v40 }
 0x569   : > { %15410 = vmatmul.mubr.bf16.gmra.mrb[56].mxu0 %v20540_v14  ;;  %v8477_v14 = vshrl.u32 %v17759_v29, 16  ;;  %v17639_v29 = vld [vmem:[%s22004_s2 + $0x188] sm:$0xff]  }
 0x56a   : > { %15413 = vmatprep.mubr.msk.bf16.mxu0 %vm22049_vm7, %v22086_v40 }
 0x56b   : > { %v8479_v47 = vrot.slane %v8477_v14, 1  ;;  %v22223_v14 = vld [vmem:[#allocation13_spill] sm:$0xff] }
 0x56d   : > { %15834 = vmatmul.mubr.bf16.gmra.mrb[64].mxu1 %v10742_v42  ;;  %v8483_v51 = vor.u32 %v8482_v62, %v8479_v47  ;;  %v22224_v62 = vld [vmem:[#allocation18_spill] sm:$0xff] }
 0x56e   : > { %15837 = vmatprep.mubr.msk.bf16.mxu1 %vm22049_vm7, %v22086_v40 }
 0x571   : > { %15414 = vmatmul.mubr.bf16.gmra.mrb[60].mxu0 %v20547_v23  ;;  %v17617_v23 = vld [vmem:[%s22004_s2 + $0x140] sm:$0xff]  }
 0x572   : > { %15417 = vmatprep.mubr.msk.bf16.mxu0 %vm22049_vm7, %v22086_v40 }
 0x575   : > { %15838 = vmatmul.mubr.bf16.gmra.mrb[68].mxu1 %v10744_v53  ;;  %v17761_v53 = vld [vmem:[#allocation2 + $0x18] sm:$0xff]  }
 0x576   : > { %15857 = vmatprep.mubr.msk.bf16.mxu1 %vm22049_vm7, %v22086_v40  ;;  %v8970_v47 = vrot.slane %v17761_v53, 2  ;;  %v17768_v53 = vld [vmem:[#allocation2 + $0x50] sm:$0xff]  }
 0x579   : > { %15418 = vmatmul.mubr.bf16.gmra.mrb[64].mxu0 %v20571_v19  ;;  %v8484_v19 = vsel %vm22210_vm14, %v20556_v55, %v8483_v51  ;;  %v17620_v55 = vld [vmem:[%s22004_s2 + $0x158] sm:$0xff]   ;;  %v22225_v51 = vld [vmem:[#allocation15_spill] sm:$0xff]  ;;  %vm22249_vm14 = vmmov %vm22242_vm0 }
 0x57a   : > { %15421 = vmatprep.mubr.msk.bf16.mxu0 %vm22049_vm7, %v22086_v40 }
 0x57d   : > { %15858 = vmatmul.mubr.bf16.vlgmr.msra.gmra.mrb[36].mxu1 %v20618_v4  ;;  %v17619_v4 = vld [vmem:[%s22004_s2 + $0x150] sm:$0xff]  }
 0x57e   : > { %15894 = vmatpush3.bf16.msra.mxu1 %v17617_v23  ;;  %15861 = vmatprep.mubr.msk.bf16.mxu1 %vm22049_vm7, %v22086_v40  ;;  %v8969_v23 = vrot.slane %v22224_v62, 2  ;;  %v22239_v62 = vld [vmem:[#allocation24_spill] sm:$0xff] }
 0x57f   : > { %15895 = vmatprep.subr.bf16.mxu1 %v22086_v40 }
 0x581   : > { %15422 = vmatmul.mubr.bf16.gmra.mrb[68].mxu0 %v8484_v19  ;;  %v17643_v19 = vld [vmem:[%s22004_s2 + $0x198] sm:$0xff]  }
 0x582   : > { %15441 = vmatprep.mubr.msk.bf16.mxu0 %vm22049_vm7, %v22086_v40  ;;  %15896 = vmatpush3.bf16.msra.mxu1 %v17618_v24  ;;  %v17647_v24 = vld [vmem:[%s22004_s2 + $0x1c0] sm:$0xff]  }
 0x583   : > { %15897 = vmatprep.subr.bf16.mxu1 %v22086_v40 }
 0x585   : > { %15862 = vmatmul.mubr.bf16.gmra.mrb[40].mxu1 %v20639_v57  ;;  %v17623_v57 = vld [vmem:[%s22004_s2 + $0x188] sm:$0xff]  }
 0x586   : > { %15865 = vmatprep.mubr.msk.bf16.mxu1 %vm22049_vm7, %v22086_v40  ;;  %15898 = vmatpush3.bf16.msra.mxu1 %v17619_v4  ;;  %v8971_v4 = vsel %vm22226_vm2, %v8969_v23, %v8970_v47  ;;  %vm22253_vm2 = vmmov %vm22242_vm0 }
 0x587   : > { %15899 = vmatprep.subr.bf16.mxu1 %v22086_v40 }
 0x589   : > { %15442 = vmatmul.mubr.bf16.vlgmr.msra.gmra.mrb[36].mxu0 %v20588_v45  ;;  %v17624_v45 = vld [vmem:[%s22004_s2 + $0x190] sm:$0xff]  }
 0x58a   : > { %15445 = vmatprep.mubr.msk.bf16.mxu0 %vm22049_vm7, %v22086_v40  ;;  %15478 = vmatpush3.bf16.msra.mxu0 %v17622_v43  ;;  %v17648_v43 = vld [vmem:[%s22004_s2 + $0x1c8] sm:$0xff]  }
 0x58b   : > { %15900 = vmatpush3.bf16.msra.mxu1 %v17620_v55  ;;  %15479 = vmatprep.subr.bf16.mxu0 %v22086_v40  ;;  %v17646_v55 = vld [vmem:[%s22004_s2 + $0x1a0] sm:$0xff]  }
 0x58c   : > { %15901 = vmatprep.subr.bf16.mxu1 %v22086_v40 }
 0x58d   : > { %15866 = vmatmul.mubr.bf16.gmra.mrb[44].mxu1 %v22211_v50  ;;  %v22227_v50 = vld [vmem:[#allocation17_spill] sm:$0xff] }
 0x58e   : > { %15480 = vmatpush3.bf16.msra.mxu0 %v17623_v57  ;;  %15869 = vmatprep.mubr.msk.bf16.mxu1 %vm22049_vm7, %v22086_v40  ;;  %v17762_v57 = vld [vmem:[#allocation2 + $0x20] sm:$0xff]  }
 0x58f   : > { %15902 = vmatpush3.bf16.msra.mxu1 %v17621_v13  ;;  %15481 = vmatprep.subr.bf16.mxu0 %v22086_v40  ;;  %v8972_v13 = vrot.slane %v17762_v57, 2 }
 0x590   : > { %15903 = vmatprep.subr.bf16.mxu1 %v22086_v40 }
 0x591   : > { %15446 = vmatmul.mubr.bf16.gmra.mrb[40].mxu0 %v22212_v49  ;;  %v8973_v49 = vsel %vm22228_vm4, %v8970_v47, %v8972_v13  ;;  %v8984_v47 = vrot.slane %v17768_v53, 2  ;;  %v17687_v53 = vld [vmem:[%s22004_s2 + $0x238] sm:$0xff]   ;;  %vm22255_vm4 = vmmov %vm22242_vm0 }
 0x592   : > { %15449 = vmatprep.mubr.msk.bf16.mxu0 %vm22049_vm7, %v22086_v40  ;;  %15482 = vmatpush3.bf16.msra.mxu0 %v17624_v45  ;;  %v17650_v45 = vld [vmem:[%s22004_s2 + $0x1d0] sm:$0xff]  }
 0x593   : > { %15904 = vmatpush3.bf16.msra.mxu1 %v17625_v39  ;;  %15483 = vmatprep.subr.bf16.mxu0 %v22086_v40  ;;  %v17651_v39 = vld [vmem:[%s22004_s2 + $0x1a8] sm:$0xff]  }
 0x594   : > { %15905 = vmatprep.subr.bf16.mxu1 %v22086_v40 }
 0x595   : > { %15870 = vmatmul.mubr.bf16.gmra.mrb[48].mxu1 %v22213_v9 }
 0x596   : > { %15484 = vmatpush3.bf16.msra.mxu0 %v17626_v11  ;;  %15873 = vmatprep.mubr.msk.bf16.mxu1 %vm22049_vm7, %v22086_v40  ;;  %v17652_v11 = vld [vmem:[%s22004_s2 + $0x1d8] sm:$0xff]  }
 0x597   : > { %15485 = vmatprep.subr.bf16.mxu0 %v22086_v40  ;;  %15906 = vmatpush3.bf16.msra.mxu1 %v17628_v38  ;;  %v17763_v38 = vld [vmem:[#allocation2 + $0x28] sm:$0xff]  }
 0x598   : > { %15907 = vmatprep.subr.bf16.mxu1 %v22086_v40  ;;  %v8974_v9 = vrot.slane %v17763_v38, 2  ;;  %v17669_v38 = vld [vmem:[%s22004_s2 + $0x1d8] sm:$0xff]  }
 0x599   : > { %15450 = vmatmul.mubr.bf16.gmra.mrb[44].mxu0 %v22214_v10  ;;  %v17654_v10 = vld [vmem:[%s22004_s2 + $0x1e0] sm:$0xff]  }
 0x59a   : > { %15453 = vmatprep.mubr.msk.bf16.mxu0 %vm22049_vm7, %v22086_v40  ;;  %15486 = vmatpush3.bf16.msra.mxu0 %v17627_v52  ;;  %v17655_v52 = vld [vmem:[%s22004_s2 + $0x1b0] sm:$0xff]  }
 0x59b   : > { %15487 = vmatprep.subr.bf16.mxu0 %v22086_v40  ;;  %15908 = vmatpush3.bf16.msra.mxu1 %v17632_v56  ;;  %v22229_v56 = vld [vmem:[#allocation19_spill] sm:$0xff] }
 0x59c   : > { %15945 = vmatprep.subr.bf16.mxu1 %v22086_v40 }
 0x59d   : > { %15874 = vmatmul.mubr.bf16.gmra.mrb[52].mxu1 %v20674_v28  ;;  %v17633_v28 = vld [vmem:[%s22004_s2 + $0x1b8] sm:$0xff]  }
 0x59e   : > { %15488 = vmatpush3.bf16.msra.mxu0 %v17629_v46  ;;  %15877 = vmatprep.mubr.msk.bf16.mxu1 %vm22049_vm7, %v22086_v40  ;;  %v8975_v46 = vsel %vm22230_vm15, %v8972_v13, %v8974_v9  ;;  %v17665_v13 = vld [vmem:[%s22004_s2 + $0x1c8] sm:$0xff]   ;;  %vm22257_vm15 = vmmov %vm22242_vm0 }
 0x59f   : > { %15489 = vmatprep.subr.bf16.mxu0 %v22086_v40 }
 0x5a1   : > { %15454 = vmatmul.mubr.bf16.gmra.mrb[48].mxu0 %v22215_v21  ;;  %v17656_v21 = vld [vmem:[%s22004_s2 + $0x1e8] sm:$0xff]  }
 0x5a2   : > { %15457 = vmatprep.mubr.msk.bf16.mxu0 %vm22049_vm7, %v22086_v40  ;;  %15490 = vmatpush3.bf16.msra.mxu0 %v17630_v17  ;;  %v17659_v17 = vld [vmem:[%s22004_s2 + $0x1b8] sm:$0xff]  }
 0x5a3   : > { %15491 = vmatprep.subr.bf16.mxu0 %v22086_v40 }
 0x5a5   : > { %15878 = vmatmul.mubr.bf16.gmra.mrb[56].mxu1 %v20685_v61  ;;  %v11026_v61 = vshrl.u32 %v17760_v60, 16  ;;  %v17658_v60 = vld [vmem:[%s22004_s2 + $0x1f0] sm:$0xff]  }
 0x5a6   : > { %15492 = vmatpush3.bf16.msra.mxu0 %v17633_v28  ;;  %15881 = vmatprep.mubr.msk.bf16.mxu1 %vm22049_vm7, %v22086_v40  ;;  %v17764_v28 = vld [vmem:[#allocation2 + $0x30] sm:$0xff]  }
 0x5a7   : > { %15529 = vmatprep.subr.bf16.mxu0 %v22086_v40  ;;  %v11028_v33 = vrot.slane %v11026_v61, 1 }
 0x5a9   : > { %15458 = vmatmul.mubr.bf16.gmra.mrb[52].mxu0 %v22216_v48  ;;  %v8976_v48 = vrot.slane %v17764_v28, 2  ;;  %v17676_v28 = vld [vmem:[%s22004_s2 + $0x1e8] sm:$0xff]  }
 0x5aa   : > { %15461 = vmatprep.mubr.msk.bf16.mxu0 %vm22049_vm7, %v22086_v40 }
 0x5ab   : > { %v8977_v61 = vsel %vm22232_vm8, %v8974_v9, %v8976_v48  ;;  %v22244_v9 = vld [vmem:[#allocation25_spill] sm:$0xff]  ;;  %vm22260_vm8 = vsmask.f32 5376 }
 0x5ad   : > { %15882 = vmatmul.mubr.bf16.gmra.mrb[60].mxu1 %v20693_v1  ;;  %v11032_v1 = vor.u32 %v11031_v36, %v11028_v33  ;;  %v17765_v33 = vld [vmem:[#allocation2 + $0x38] sm:$0xff]  }
 0x5ae   : > { %15885 = vmatprep.mubr.msk.bf16.mxu1 %vm22049_vm7, %v22086_v40  ;;  %v8978_v36 = vrot.slane %v17765_v33, 2 }
 0x5af   : > { %v11033_v42 = vsel %vm22220_vm12, %v22219_v6, %v11032_v1  ;;  %v17766_v6 = vld [vmem:[#allocation2 + $0x40] sm:$0xff]   ;;  %vm22251_vm12 = vmmov %vm22242_vm0 }
 0x5b0   : > { %v8979_v1 = vsel %vm22234_vm11, %v8976_v48, %v8978_v36  ;;  %v22246_v48 = vld [vmem:[#allocation26_spill] sm:$0xff]  ;;  %vm22269_vm11 = vmmov %vm22260_vm8 }
 0x5b1   : > { %15462 = vmatmul.mubr.bf16.gmra.mrb[56].mxu0 %v22217_v54  ;;  %v22231_v54 = vld [vmem:[#allocation20_spill] sm:$0xff] }
 0x5b2   : > { %15465 = vmatprep.mubr.msk.bf16.mxu0 %vm22049_vm7, %v22086_v40 }
 0x5b5   : > { %15886 = vmatmul.mubr.bf16.gmra.mrb[64].mxu1 %v20706_v35  ;;  %v17637_v35 = vld [vmem:[%s22004_s2 + $0x180] sm:$0xff]  }
 0x5b6   : > { %15889 = vmatprep.mubr.msk.bf16.mxu1 %vm22049_vm7, %v22086_v40 }
 0x5b9   : > { %15466 = vmatmul.mubr.bf16.gmra.mrb[60].mxu0 %v22218_v25  ;;  %v22233_v25 = vld [vmem:[#allocation21_spill] sm:$0xff] }
 0x5ba   : > { %15469 = vmatprep.mubr.msk.bf16.mxu0 %vm22049_vm7, %v22086_v40 }
 0x5bd   : > { %15890 = vmatmul.mubr.bf16.gmra.mrb[68].mxu1 %v11033_v42  ;;  %v8980_v42 = vrot.slane %v17766_v6, 2  ;;  %v17773_v6 = vld [vmem:[#allocation2 + $0x80] sm:$0xff]  }
 0x5be   : > { %15909 = vmatprep.mubr.msk.bf16.mxu1 %vm22049_vm7, %v22086_v40 }
 0x5c1   : > { %15470 = vmatmul.mubr.bf16.gmra.mrb[64].mxu0 %v22221_v22  ;;  %v22235_v22 = vld [vmem:[#allocation22_spill] sm:$0xff] }
 0x5c2   : > { %15473 = vmatprep.mubr.msk.bf16.mxu0 %vm22049_vm7, %v22086_v40 }
 0x5c5   : > { %15910 = vmatmul.mubr.bf16.vlgmr.msra.gmra.mrb[36].mxu1 %v22222_v8  ;;  %v17767_v8 = vld [vmem:[#allocation2 + $0x48] sm:$0xff]  }
 0x5c6   : > { %15946 = vmatpush3.bf16.msra.mxu1 %v17637_v35  ;;  %15913 = vmatprep.mubr.msk.bf16.mxu1 %vm22049_vm7, %v22086_v40  ;;  %v8981_v35 = vsel %vm22236_vm6, %v8978_v36, %v8980_v42  ;;  %v17679_v36 = vld [vmem:[%s22004_s2 + $0x220] sm:$0xff]   ;;  %vm22271_vm6 = vcmask 1044480  }
 0x5c7   : > { %15947 = vmatprep.subr.bf16.mxu1 %v22086_v40 }
 0x5c9   : > { %15474 = vmatmul.mubr.bf16.gmra.mrb[68].mxu0 %v22223_v14  ;;  %v22237_v14 = vld [vmem:[#allocation23_spill] sm:$0xff] }
 0x5ca   : > { %15493 = vmatprep.mubr.msk.bf16.mxu0 %vm22049_vm7, %v22086_v40  ;;  %15948 = vmatpush3.bf16.msra.mxu1 %v17639_v29  ;;  %v8982_v29 = vrot.slane %v17767_v8, 2  ;;  %v17684_v8 = vld [vmem:[%s22004_s2 + $0x230] sm:$0xff]  }
 0x5cb   : > { %15949 = vmatprep.subr.bf16.mxu1 %v22086_v40 }
 0x5cc   : > { %v8985_v23 = vsel %vm22240_vm5, %v8982_v29, %v8984_v47  ;;  %vm22272_vm5 = vmmov %vm22271_vm6 }
 0x5cd   : > { %15914 = vmatmul.mubr.bf16.gmra.mrb[40].mxu1 %v22225_v51  ;;  %v17769_v51 = vld [vmem:[#allocation2 + $0x60] sm:$0xff]  }
 0x5ce   : > { %15917 = vmatprep.mubr.msk.bf16.mxu1 %vm22049_vm7, %v22086_v40  ;;  %15950 = vmatpush3.bf16.msra.mxu1 %v17641_v41  ;;  %v8983_v41 = vsel %vm22238_vm9, %v8980_v42, %v8982_v29  ;;  %v11525_v42 = vrot.slane %v17773_v6, 2  ;;  %v22250_v29 = vld [vmem:[#allocation28_spill] sm:$0xff]  ;;  %v17778_v6 = vld [vmem:[#allocation2 + $0xa0] ss:$0 sps:$4 sm:$0x77]  }
 0x5cf   : > { %15951 = vmatprep.subr.bf16.mxu1 %v22086_v40 }
 0x5d1   : > { %15494 = vmatmul.mubr.bf16.vlgmr.msra.gmra.mrb[36].mxu0 %v8971_v4  ;;  %v11516_v4 = vrot.slane %v20824_v0, 2  ;;  %v17770_v0 = vld [vmem:[#allocation2 + $0x68] sm:$0xff]  }
 0x5d2   : > { %15497 = vmatprep.mubr.msk.bf16.mxu0 %vm22049_vm7, %v22086_v40  ;;  %15530 = vmatpush3.bf16.msra.mxu0 %v17647_v24  ;;  %v11517_v24 = vrot.slane %v17769_v51, 2 }
 0x5d3   : > { %15952 = vmatpush3.bf16.msra.mxu1 %v17643_v19  ;;  %15531 = vmatprep.subr.bf16.mxu0 %v22086_v40  ;;  %v17657_v19 = vld [vmem:[#allocation2 + $0x58] ss:$0 sps:$4 sm:$0x33]  }
 0x5d4   : > { %15953 = vmatprep.subr.bf16.mxu1 %v22086_v40  ;;  %v8986_v57 = vrot.slane %v17657_v19, 2  ;;  %v22254_v19 = vld [vmem:[#allocation30_spill] sm:$0xff] }
 0x5d5   : > { %15918 = vmatmul.mubr.bf16.gmra.mrb[44].mxu1 %v22227_v50 }
 0x5d6   : > { %15532 = vmatpush3.bf16.msra.mxu0 %v17648_v43  ;;  %15921 = vmatprep.mubr.msk.bf16.mxu1 %vm22049_vm7, %v22086_v40  ;;  %v17663_v43 = vld [vmem:[%s22004_s2 + $0x1c0] sm:$0xff]   ;;  %v8987_v50 = vsel %vm22242_vm0, %v8984_v47, %v8986_v57 }
 0x5d7   : > { %15954 = vmatpush3.bf16.msra.mxu1 %v17646_v55  ;;  %15533 = vmatprep.subr.bf16.mxu0 %v22086_v40  ;;  %v11518_v55 = vsel %vm22241_vm10, %v11516_v4, %v11517_v24  ;;  %v17776_v4 = vld [vmem:[#allocation2 + $0x98] sm:$0xff]   ;;  %v17685_v57 = vld [vmem:[#allocation2 + $0xa0] ss:$0 sps:$4 sm:$0x33]   ;;  %vm22273_vm10 = vmmov %vm22272_vm5 }
 0x5d8   : > { %15955 = vmatprep.subr.bf16.mxu1 %v22086_v40 }
 0x5d9   : > { %15498 = vmatmul.mubr.bf16.gmra.mrb[40].mxu0 %v8973_v49 }
 0x5da   : > { %15501 = vmatprep.mubr.msk.bf16.mxu0 %vm22049_vm7, %v22086_v40  ;;  %15534 = vmatpush3.bf16.msra.mxu0 %v17650_v45  ;;  %v11519_v45 = vrot.slane %v17770_v0, 2 }
 0x5db   : > { %15956 = vmatpush3.bf16.msra.mxu1 %v17651_v39  ;;  %15535 = vmatprep.subr.bf16.mxu0 %v22086_v40  ;;  %v17667_v39 = vld [vmem:[%s22004_s2 + $0x1d0] sm:$0xff]  }
 0x5dc   : > { %15957 = vmatprep.subr.bf16.mxu1 %v22086_v40  ;;  %v11520_v49 = vsel %vm22243_vm1, %v11517_v24, %v11519_v45  ;;  %vm22274_vm1 = vmmov %vm22272_vm5 }
 0x5dd   : > { %15922 = vmatmul.mubr.bf16.gmra.mrb[48].mxu1 %v22229_v56 }
 0x5de   : > { %15536 = vmatpush3.bf16.msra.mxu0 %v17652_v11  ;;  %15925 = vmatprep.mubr.msk.bf16.mxu1 %vm22049_vm7, %v22086_v40  ;;  %v17672_v11 = vld [vmem:[%s22004_s2 + $0x200] sm:$0xff]  }
 0x5df   : > { %15537 = vmatprep.subr.bf16.mxu0 %v22086_v40  ;;  %15958 = vmatpush3.bf16.msra.mxu1 %v17655_v52  ;;  %v17771_v52 = vld [vmem:[#allocation2 + $0x70] sm:$0xff]  }
 0x5e0   : > { %15959 = vmatprep.subr.bf16.mxu1 %v22086_v40  ;;  %v11521_v56 = vrot.slane %v17771_v52, 2  ;;  %v17689_v52 = vld [vmem:[%s22004_s2 + $0x200] sm:$0xff]  }
 0x5e1   : > { %15502 = vmatmul.mubr.bf16.gmra.mrb[44].mxu0 %v8975_v46  ;;  %v17671_v46 = vld [vmem:[%s22004_s2 + $0x1e0] sm:$0xff]  }
 0x5e2   : > { %15505 = vmatprep.mubr.msk.bf16.mxu0 %vm22049_vm7, %v22086_v40  ;;  %15538 = vmatpush3.bf16.msra.mxu0 %v17654_v10  ;;  %v17674_v10 = vld [vmem:[%s22004_s2 + $0x208] sm:$0xff]  }
 0x5e3   : > { %15539 = vmatprep.subr.bf16.mxu0 %v22086_v40  ;;  %15960 = vmatpush3.bf16.msra.mxu1 %v17659_v17  ;;  %v11522_v17 = vsel %vm22245_vm13, %v11519_v45, %v11521_v56  ;;  %v17777_v45 = vld [vmem:[#allocation2 + $0x58] ss:$0 sps:$4 sm:$0x77]  }
 0x5e4   : > { %15997 = vmatprep.subr.bf16.mxu1 %v22086_v40 }
 0x5e5   : > { %15926 = vmatmul.mubr.bf16.gmra.mrb[52].mxu1 %v22231_v54  ;;  %v17772_v54 = vld [vmem:[#allocation2 + $0x78] sm:$0xff]  }
 0x5e6   : > { %15540 = vmatpush3.bf16.msra.mxu0 %v17656_v21  ;;  %15929 = vmatprep.mubr.msk.bf16.mxu1 %vm22049_vm7, %v22086_v40  ;;  %v17675_v21 = vld [vmem:[%s22004_s2 + $0x210] sm:$0xff]  }
 0x5e7   : > { %15541 = vmatprep.subr.bf16.mxu0 %v22086_v40 }
 0x5e9   : > { %15506 = vmatmul.mubr.bf16.gmra.mrb[48].mxu0 %v8977_v61  ;;  %v17678_v61 = vld [vmem:[%s22004_s2 + $0x218] sm:$0xff]  }
 0x5ea   : > { %15509 = vmatprep.mubr.msk.bf16.mxu0 %vm22049_vm7, %v22086_v40  ;;  %15542 = vmatpush3.bf16.msra.mxu0 %v17658_v60  ;;  %v11523_v60 = vrot.slane %v17772_v54, 2  ;;  %v17693_v54 = vld [vmem:[%s22004_s2 + $0x220] sm:$0xff]  }
 0x5eb   : > { %15543 = vmatprep.subr.bf16.mxu0 %v22086_v40 }
 0x5ec   : > { %v11524_v33 = vsel %vm22247_vm3, %v11521_v56, %v11523_v60 }
 0x5ed   : > { %15930 = vmatmul.mubr.bf16.gmra.mrb[56].mxu1 %v22233_v25  ;;  %v17686_v25 = vld [vmem:[%s22004_s2 + $0x1f8] sm:$0xff]  }
 0x5ee   : > { %15544 = vmatpush3.bf16.msra.mxu0 %v17660_v32  ;;  %15933 = vmatprep.mubr.msk.bf16.mxu1 %vm22049_vm7, %v22086_v40  ;;  %v17680_v32 = vld [vmem:[%s22004_s2 + $0x1f0] sm:$0xff]  }
 0x5ef   : > { %15581 = vmatprep.subr.bf16.mxu0 %v22086_v40 }
 0x5f1   : > { %15510 = vmatmul.mubr.bf16.gmra.mrb[52].mxu0 %v8979_v1  ;;  %v22248_v1 = vld [vmem:[#allocation27_spill] sm:$0xff] }
 0x5f2   : > { %15513 = vmatprep.mubr.msk.bf16.mxu0 %vm22049_vm7, %v22086_v40 }
 0x5f5   : > { %15934 = vmatmul.mubr.bf16.gmra.mrb[60].mxu1 %v22235_v22  ;;  %v17682_v22 = vld [vmem:[%s22004_s2 + $0x228] sm:$0xff]  }
 0x5f6   : > { %15937 = vmatprep.mubr.msk.bf16.mxu1 %vm22049_vm7, %v22086_v40 }
 0x5f9   : > { %15514 = vmatmul.mubr.bf16.gmra.mrb[56].mxu0 %v8981_v35  ;;  %v11526_v35 = vsel %vm22249_vm14, %v11523_v60, %v11525_v42  ;;  %v22263_v60 = vld [vmem:[#allocation39_spill] sm:$0xff]  ;;  %vm22275_vm14 = vmmov %vm22274_vm1 }
 0x5fa   : > { %15517 = vmatprep.mubr.msk.bf16.mxu0 %vm22049_vm7, %v22086_v40 }
 0x5fd   : > { %15938 = vmatmul.mubr.bf16.gmra.mrb[64].mxu1 %v22237_v14  ;;  %v17774_v14 = vld [vmem:[#allocation2 + $0x88] sm:$0xff]  }
 0x5fe   : > { %15941 = vmatprep.mubr.msk.bf16.mxu1 %vm22049_vm7, %v22086_v40 }
 0x601   : > { %15518 = vmatmul.mubr.bf16.gmra.mrb[60].mxu0 %v8983_v41  ;;  %v11527_v41 = vrot.slane %v17774_v14, 2 }
 0x602   : > { %15521 = vmatprep.mubr.msk.bf16.mxu0 %vm22049_vm7, %v22086_v40 }
 0x603   : > { %v11528_v47 = vsel %vm22251_vm12, %v11525_v42, %v11527_v41  ;;  %v11816_v42 = vshrl.u32 %v17778_v6, 16 }
 0x605   : > { %15942 = vmatmul.mubr.bf16.gmra.mrb[68].mxu1 %v22239_v62  ;;  %v22252_v62 = vld [vmem:[#allocation29_spill] sm:$0xff] }
 0x606   : > { %15961 = vmatprep.mubr.msk.bf16.mxu1 %vm22049_vm7, %v22086_v40 }
 0x609   : > { %15522 = vmatmul.mubr.bf16.gmra.mrb[64].mxu0 %v8985_v23  ;;  %v17775_v23 = vld [vmem:[#allocation2 + $0x90] sm:$0xff]  }
 0x60a   : > { %15525 = vmatprep.mubr.msk.bf16.mxu0 %vm22049_vm7, %v22086_v40  ;;  %v11529_v51 = vrot.slane %v17775_v23, 2 }
 0x60c   : > { %v11530_v24 = vsel %vm22253_vm2, %v11527_v41, %v11529_v51  ;;  %vm22276_vm2 = vmmov %vm22274_vm1 }
 0x60d   : > { %15962 = vmatmul.mubr.bf16.vlgmr.msra.gmra.mrb[36].mxu1 %v11518_v55 }
 0x60e   : > { %15998 = vmatpush3.bf16.msra.mxu1 %v17663_v43  ;;  %15965 = vmatprep.mubr.msk.bf16.mxu1 %vm22049_vm7, %v22086_v40  ;;  %v11531_v43 = vrot.slane %v17776_v4, 2 }
 0x60f   : > { %15999 = vmatprep.subr.bf16.mxu1 %v22086_v40 }
 0x610   : > { %v11532_v55 = vsel %vm22255_vm4, %v11529_v51, %v11531_v43  ;;  %v13602_v51 = vld [vmem:[%s17871_s10 + $0x18] sm:$0xff]   ;;  %vm22277_vm4 = vmmov %vm22274_vm1 }
 0x611   : > { %15526 = vmatmul.mubr.bf16.gmra.mrb[68].mxu0 %v8987_v50  ;;  %v11533_v50 = vrot.slane %v17685_v57, 2 }
 0x612   : > { %15545 = vmatprep.mubr.msk.bf16.mxu0 %vm22049_vm7, %v22086_v40  ;;  %16000 = vmatpush3.bf16.msra.mxu1 %v17665_v13  ;;  %v22256_v13 = vld [vmem:[#allocation31_spill] sm:$0xff] }
 0x613   : > { %16001 = vmatprep.subr.bf16.mxu1 %v22086_v40  ;;  %v11534_v0 = vsel %vm22257_vm15, %v11531_v43, %v11533_v50 }
 0x615   : > { %15966 = vmatmul.mubr.bf16.gmra.mrb[40].mxu1 %v11520_v49  ;;  %v9273_v49 = vshll.u32 %v17777_v45, 16 }
 0x616   : > { %15969 = vmatprep.mubr.msk.bf16.mxu1 %vm22049_vm7, %v22086_v40  ;;  %16002 = vmatpush3.bf16.msra.mxu1 %v17667_v39  ;;  %v9270_v39 = vshrl.u32 %v17777_v45, 16 }
 0x617   : > { %16003 = vmatprep.subr.bf16.mxu1 %v22086_v40 }
 0x619   : > { %15546 = vmatmul.mubr.bf16.vlgmr.msra.gmra.mrb[36].mxu0 %v22244_v9  ;;  %v9275_v9 = vrot.slane %v9273_v49, 3 }
 0x61a   : > { %15549 = vmatprep.mubr.msk.bf16.mxu0 %vm22049_vm7, %v22086_v40  ;;  %15582 = vmatpush3.bf16.msra.mxu0 %v17672_v11  ;;  %v22258_v11 = vld [vmem:[#allocation33_spill] sm:$0xff] }
 0x61b   : > { %16004 = vmatpush3.bf16.msra.mxu1 %v17669_v38  ;;  %15583 = vmatprep.subr.bf16.mxu0 %v22086_v40  ;;  %v9272_v38 = vrot.slane %v9270_v39, 2 }
 0x61c   : > { %16005 = vmatprep.subr.bf16.mxu1 %v22086_v40 }
 0x61d   : > { %15970 = vmatmul.mubr.bf16.gmra.mrb[44].mxu1 %v11522_v17  ;;  %v9276_v56 = vor.u32 %v9275_v9, %v9272_v38 }
 0x61e   : > { %15584 = vmatpush3.bf16.msra.mxu0 %v17674_v10  ;;  %15973 = vmatprep.mubr.msk.bf16.mxu1 %vm22049_vm7, %v22086_v40  ;;  %v17690_v10 = vld [vmem:[%s22004_s2 + $0x208] sm:$0xff]  }
 0x61f   : > { %16006 = vmatpush3.bf16.msra.mxu1 %v17671_v46  ;;  %15585 = vmatprep.subr.bf16.mxu0 %v22086_v40  ;;  %v22259_v46 = vld [vmem:[#allocation32_spill] sm:$0xff] }
 0x620   : > { %16007 = vmatprep.subr.bf16.mxu1 %v22086_v40  ;;  %v9277_v17 = vsel %vm22260_vm8, %v22259_v46, %v9276_v56  ;;  %vm22278_vm8 = vmmov %vm22274_vm1 }
 0x621   : > { %15550 = vmatmul.mubr.bf16.gmra.mrb[40].mxu0 %v22246_v48  ;;  %v22262_v48 = vld [vmem:[#allocation34_spill] sm:$0xff] }
 0x622   : > { %15553 = vmatprep.mubr.msk.bf16.mxu0 %vm22049_vm7, %v22086_v40  ;;  %15586 = vmatpush3.bf16.msra.mxu0 %v17675_v21  ;;  %v22261_v21 = vld [vmem:[#allocation38_spill] sm:$0xff] }
 0x623   : > { %16008 = vmatpush3.bf16.msra.mxu1 %v17676_v28  ;;  %15587 = vmatprep.subr.bf16.mxu0 %v22086_v40  ;;  %v17692_v28 = vld [vmem:[%s22004_s2 + $0x218] sm:$0xff]  }
 0x624   : > { %16009 = vmatprep.subr.bf16.mxu1 %v22086_v40 }
 0x625   : > { %15974 = vmatmul.mubr.bf16.gmra.mrb[48].mxu1 %v11524_v33  ;;  %v17695_v33 = vld [vmem:[%s22004_s2 + $0x230] sm:$0xff]  }
 0x626   : > { %15588 = vmatpush3.bf16.msra.mxu0 %v17678_v61  ;;  %15977 = vmatprep.mubr.msk.bf16.mxu1 %vm22049_vm7, %v22086_v40  ;;  %v17694_v61 = vld [vmem:[%s22004_s2 + $0x228] sm:$0xff]  }
 0x627   : > { %15589 = vmatprep.subr.bf16.mxu0 %v22086_v40  ;;  %16010 = vmatpush3.bf16.msra.mxu1 %v17680_v32  ;;  %v22264_v32 = vld [vmem:[#allocation35_spill] sm:$0xff] }
 0x628   : > { %16011 = vmatprep.subr.bf16.mxu1 %v22086_v40 }
 0x629   : > { %15554 = vmatmul.mubr.bf16.gmra.mrb[44].mxu0 %v22248_v1  ;;  %v22267_v1 = vld [vmem:[#allocation40_spill] sm:$0xff] }
 0x62a   : > { %15557 = vmatprep.mubr.msk.bf16.mxu0 %vm22049_vm7, %v22086_v40  ;;  %15590 = vmatpush3.bf16.msra.mxu0 %v17679_v36  ;;  %v17697_v36 = vld [vmem:[%s22004_s2 + $0x238] sm:$0xff]  }
 0x62b   : > { %15591 = vmatprep.subr.bf16.mxu0 %v22086_v40  ;;  %16012 = vmatpush3.bf16.msra.mxu1 %v17686_v25  ;;  %v22265_v25 = vld [vmem:[#allocation36_spill] sm:$0xff] }
 0x62c   : > { %16049 = vmatprep.subr.bf16.mxu1 %v22086_v40 }
 0x62d   : > { %15978 = vmatmul.mubr.bf16.gmra.mrb[52].mxu1 %v11526_v35 }
 0x62e   : > { %15592 = vmatpush3.bf16.msra.mxu0 %v17682_v22  ;;  %15981 = vmatprep.mubr.msk.bf16.mxu1 %vm22049_vm7, %v22086_v40  ;;  %v11819_v22 = vshll.u32 %v17778_v6, 16 }
 0x62f   : > { %15593 = vmatprep.subr.bf16.mxu0 %v22086_v40 }
 0x630   : > { %v11821_v35 = vrot.slane %v11819_v22, 3 }
 0x631   : > { %15558 = vmatmul.mubr.bf16.gmra.mrb[48].mxu0 %v22250_v29 }
 0x632   : > { %15561 = vmatprep.mubr.msk.bf16.mxu0 %vm22049_vm7, %v22086_v40  ;;  %15594 = vmatpush3.bf16.msra.mxu0 %v17684_v8 }
 0x633   : > { %15595 = vmatprep.subr.bf16.mxu0 %v22086_v40 }
 0x635   : > { %15982 = vmatmul.mubr.bf16.gmra.mrb[56].mxu1 %v11528_v47 }
 0x636   : > { %15596 = vmatpush3.bf16.msra.mxu0 %v17687_v53  ;;  %15985 = vmatprep.mubr.msk.bf16.mxu1 %vm22049_vm7, %v22086_v40 }
 0x639   : > { %15562 = vmatmul.mubr.bf16.gmra.mrb[52].mxu0 %v22252_v62 }
 0x63a   : > { %15565 = vmatprep.mubr.msk.bf16.mxu0 %vm22049_vm7, %v22086_v40 }
 0x63d   : > { %15986 = vmatmul.mubr.bf16.gmra.mrb[60].mxu1 %v11530_v24 }
 0x63e   : > { %15989 = vmatprep.mubr.msk.bf16.mxu1 %vm22049_vm7, %v22086_v40 }
 0x641   : > { %15566 = vmatmul.mubr.bf16.gmra.mrb[56].mxu0 %v22254_v19 }
 0x642   : > { %15569 = vmatprep.mubr.msk.bf16.mxu0 %vm22049_vm7, %v22086_v40 }
 0x645   : > { %15990 = vmatmul.mubr.bf16.gmra.mrb[64].mxu1 %v11532_v55  ;;  %v13543_v55 = vunpack.c.l.bf16 %v13602_v51 }
 0x646   : > { %15993 = vmatprep.mubr.msk.bf16.mxu1 %vm22049_vm7, %v22086_v40 }
 0x647   : > { %v9841_v56 = vrot.slane %v13543_v55, 3 }
 0x649   : > { %15570 = vmatmul.mubr.bf16.gmra.mrb[60].mxu0 %v22256_v13 }
 0x64a   : > { %15573 = vmatprep.mubr.msk.bf16.mxu0 %vm22049_vm7, %v22086_v40 }
 0x64d   : > { %15994 = vmatmul.mubr.bf16.gmra.mrb[68].mxu1 %v11534_v0 }
 0x64e   : > { %16013 = vmatprep.mubr.msk.bf16.mxu1 %vm22049_vm7, %v22086_v40 }
 0x651   : > { %15574 = vmatmul.mubr.bf16.gmra.mrb[64].mxu0 %v22258_v11 }
 0x652   : > { %15577 = vmatprep.mubr.msk.bf16.mxu0 %vm22049_vm7, %v22086_v40 }
 0x655   : > { %16014 = vmatmul.mubr.bf16.vlgmr.msra.gmra.mrb[36].mxu1 %v20901_v20  ;;  %v17691_v20 = vld [vmem:[%s22004_s2 + $0x210] sm:$0xff]  }
 0x656   : > { %16050 = vmatpush3.bf16.msra.mxu1 %v17689_v52  ;;  %16017 = vmatprep.mubr.msk.bf16.mxu1 %vm22049_vm7, %v22086_v40 }
 0x657   : > { %16051 = vmatprep.subr.bf16.mxu1 %v22086_v40 }
 0x659   : > { %15578 = vmatmul.mubr.bf16.gmra.mrb[68].mxu0 %v9277_v17 }
 0x65a   : > { %15597 = vmatprep.mubr.msk.bf16.mxu0 %vm22049_vm7, %v22086_v40  ;;  %16052 = vmatpush3.bf16.msra.mxu1 %v17690_v10 }
 0x65b   : > { %16053 = vmatprep.subr.bf16.mxu1 %v22086_v40 }
 0x65d   : > { %16018 = vmatmul.mubr.bf16.gmra.mrb[40].mxu1 %v22261_v21  ;;  %v13603_v21 = vld [vmem:[%s17871_s10 + $0x20] sm:$0xff]  }
 0x65e   : > { %16021 = vmatprep.mubr.msk.bf16.mxu1 %vm22049_vm7, %v22086_v40  ;;  %16054 = vmatpush3.bf16.msra.mxu1 %v17691_v20 }
 0x65f   : > { %16055 = vmatprep.subr.bf16.mxu1 %v22086_v40 }
 0x661   : > { %15598 = vmatmul.mubr.bf16.vlgmr.msra.gmra.mrb[36].mxu0 %v22262_v48 }
 0x662   : > { %15601 = vmatprep.mubr.msk.bf16.mxu0 %vm22049_vm7, %v22086_v40  ;;  %16056 = vmatpush3.bf16.msra.mxu1 %v17692_v28 }
 0x663   : > { %16057 = vmatprep.subr.bf16.mxu1 %v22086_v40 }
 0x665   : > { %16022 = vmatmul.mubr.bf16.gmra.mrb[44].mxu1 %v22263_v60 }
 0x666   : > { %16025 = vmatprep.mubr.msk.bf16.mxu1 %vm22049_vm7, %v22086_v40  ;;  %16058 = vmatpush3.bf16.msra.mxu1 %v17693_v54  ;;  %v13544_v54 = vunpack.c.h.bf16 %v13602_v51 }
 0x667   : > { %16059 = vmatprep.subr.bf16.mxu1 %v22086_v40 }
 0x669   : > { %15602 = vmatmul.mubr.bf16.gmra.mrb[40].mxu0 %v22264_v32 }
 0x66a   : > { %15605 = vmatprep.mubr.msk.bf16.mxu0 %vm22049_vm7, %v22086_v40  ;;  %16060 = vmatpush3.bf16.msra.mxu1 %v17694_v61 }
 0x66b   : > { %16061 = vmatprep.subr.bf16.mxu1 %v22086_v40 }
 0x66d   : > { %16026 = vmatmul.mubr.bf16.gmra.mrb[48].mxu1 %v20949_v18  ;;  %v22266_v18 = vld [vmem:[#allocation37_spill] sm:$0xff] }
 0x66e   : > { %16029 = vmatprep.mubr.msk.bf16.mxu1 %vm22049_vm7, %v22086_v40  ;;  %16062 = vmatpush3.bf16.msra.mxu1 %v17695_v33  ;;  %v13547_v33 = vunpack.c.l.bf16 %v13603_v21 }
 0x66f   : > { %16063 = vmatprep.subr.bf16.mxu1 %v22086_v40 }
 0x671   : > { %15606 = vmatmul.mubr.bf16.gmra.mrb[44].mxu0 %v22265_v25 }
 0x672   : > { %15609 = vmatprep.mubr.msk.bf16.mxu0 %vm22049_vm7, %v22086_v40  ;;  %16064 = vmatpush3.bf16.msra.mxu1 %v17697_v36 }
 0x675   : > { %16030 = vmatmul.mubr.bf16.gmra.mrb[52].mxu1 %v20961_v3  ;;  %v22268_v3 = vld [vmem:[#allocation41_spill] sm:$0xff] }
 0x676   : > { %16033 = vmatprep.mubr.msk.bf16.mxu1 %vm22049_vm7, %v22086_v40 }
 0x679   : > { %15610 = vmatmul.mubr.bf16.gmra.mrb[48].mxu0 %v22266_v18 }
 0x67a   : > { %15613 = vmatprep.mubr.msk.bf16.mxu0 %vm22049_vm7, %v22086_v40 }
 0x67d   : > { %16034 = vmatmul.mubr.bf16.gmra.mrb[56].mxu1 %v20980_v44  ;;  %v11818_v44 = vrot.slane %v11816_v42, 2 }
 0x67e   : > { %16037 = vmatprep.mubr.msk.bf16.mxu1 %vm22049_vm7, %v22086_v40 }
 0x681   : > { %15614 = vmatmul.mubr.bf16.gmra.mrb[52].mxu0 %v22267_v1 }
 0x682   : > { %15617 = vmatprep.mubr.msk.bf16.mxu0 %vm22049_vm7, %v22086_v40 }
 0x685   : > { %16038 = vmatmul.mubr.bf16.gmra.mrb[60].mxu1 %v20984_v30  ;;  %v11822_v30 = vor.u32 %v11821_v35, %v11818_v44 }
 0x686   : > { %16041 = vmatprep.mubr.msk.bf16.mxu1 %vm22049_vm7, %v22086_v40 }
 0x687   : > { %v11823_v8 = vsel %vm22269_vm11, %v20995_v5, %v11822_v30  ;;  %v21814_v5 = vld [vmem:[%s17871_s10 + $0xc] ss:$72 sps:$4 sm:$0xff]   ;;  %v9845_v30 = vrot.slane %v13547_v33, 3 }
 0x689   : > { %15618 = vmatmul.mubr.bf16.gmra.mrb[56].mxu0 %v22268_v3  ;;  %v9843_v3 = vrot.slane %v13544_v54, 3 }
 0x68a   : > { %15621 = vmatprep.mubr.msk.bf16.mxu0 %vm22049_vm7, %v22086_v40 }
 0x68d   : > { %16042 = vmatmul.mubr.bf16.gmra.mrb[64].mxu1 %v21010_v26 }
 0x68e   : > { %16045 = vmatprep.mubr.msk.bf16.mxu1 %vm22049_vm7, %v22086_v40 }
 0x691   : > { %15622 = vmatmul.mubr.bf16.gmra.mrb[60].mxu0 %v20953_v15  ;;  %v22270_v15 = vld [vmem:[#allocation3_spill] sm:$0xff] }
 0x692   : > { %15625 = vmatprep.mubr.msk.bf16.mxu0 %vm22049_vm7, %v22086_v40  ;;  %v9702_v26 = vsub.s32 3, %v22270_v15 }
 0x695   : > { %16046 = vmatmul.mubr.bf16.gmra.mrb[68].mxu1 %v11823_v8 }
 0x696   : > { %16065 = vmatprep.mubr.msk.bf16.mxu1 %vm22049_vm7, %v22086_v40 }
 0x699   : > { %15626 = vmatmul.mubr.bf16.gmra.mrb[64].mxu0 %v20964_v2  ;;  %v9680_v2 = vsub.s32 2, %v22270_v15  ;;  %v13604_v15 = vld [vmem:[%s17871_s10 + $0x28] sm:$0xff]  }
 0x69a   : > { %15629 = vmatprep.mubr.msk.bf16.mxu0 %vm22049_vm7, %v22086_v40 }
 0x69d   : > { %16066 = vmatmul.mubr.bf16.vlgmr.msra.gmra.mrb[36].mxu1 %v21013_v27  ;;  %v13601_v27 = vld [vmem:[%s17871_s10 + $0x10] sm:$0xff]  }
 0x69e   : > { %16069 = vmatprep.mubr.msk.bf16.mxu1 %vm22049_vm7, %v22086_v40  ;;  %v13540_v24 = vunpack.c.h.bf16 %v13601_v27 }
 0x6a0   : > { %v9839_v39 = vrot.slane %v13540_v24, 3 }
 0x6a1   : > { %15630 = vmatmul.mubr.bf16.gmra.mrb[68].mxu0 %v20987_v58  ;;  %v9776_v58 = vld [vmem:[%s17871_s10 + $0x8] sm:$0xe] }
 0x6a2   : > { %v9842_v60 = vsel %vm22274_vm1, %v9839_v39, %v9841_v56 }
 0x6a5   : > { %16070 = vmatmul.mubr.bf16.gmra.mrb[40].mxu1 %v21016_v16  ;;  %v17779_v16 = vld [vmem:[%s22005_s3] sm:$0xff] }
 0x6a6   : > { %16073 = vmatprep.mubr.msk.bf16.mxu1 %vm22049_vm7, %v22086_v40 }
 0x6ad   : > { %16074 = vmatmul.mubr.bf16.gmra.mrb[44].mxu1 %v21019_v31  ;;  %v21821_v31 = vrot.slane %v17779_v16, %v9680_v2  ;;  %v13548_v2 = vunpack.c.h.bf16 %v13603_v21 }
 0x6ae   : > { %16077 = vmatprep.mubr.msk.bf16.mxu1 %vm22049_vm7, %v22086_v40 }
 0x6b5   : > { %16078 = vmatmul.mubr.bf16.gmra.mrb[48].mxu1 %v21022_v34  ;;  %v9795_v34 = vunpack.c.l.bf16 %v9776_v58 }
 0x6b6   : > { %16081 = vmatprep.mubr.msk.bf16.mxu1 %vm22049_vm7, %v22086_v40 }
 0x6bd   : > { %16082 = vmatmul.mubr.bf16.gmra.mrb[52].mxu1 %v21025_v7  ;;  %v21824_v7 = vrot.slane %v17779_v16, %v9702_v26  ;;  %v9844_v26 = vsel %vm22275_vm14, %v9841_v56, %v9843_v3  ;;  %v13551_v16 = vunpack.c.l.bf16 %v13604_v15  ;;  %vm22282_vm14 = vmmov %vm22274_vm1 }
 0x6be   : > { %16085 = vmatprep.mubr.msk.bf16.mxu1 %vm22049_vm7, %v22086_v40 }
 0x6c5   : > { %16086 = vmatmul.mubr.bf16.gmra.mrb[56].mxu1 %v21028_v63  ;;  %v13539_v63 = vunpack.c.l.bf16 %v13601_v27 }
 0x6c6   : > { %16089 = vmatprep.mubr.msk.bf16.mxu1 %vm22049_vm7, %v22086_v40 }
 0x6c7   : > { %v9837_v62 = vrot.slane %v13539_v63, 3  ;;  %v9846_v63 = vsel %vm22276_vm2, %v9843_v3, %v9845_v30  ;;  %vm22283_vm2 = vmmov %vm22274_vm1 }
 0x6c9   : > { %v9840_v20 = vsel %vm22273_vm10, %v9837_v62, %v9839_v39  ;;  %vm22281_vm10 = vmmov %vm22274_vm1 }
 0x6cd   : > { %16090 = vmatmul.mubr.bf16.gmra.mrb[60].mxu1 %v21046_v37 }
 0x6ce   : > { %16093 = vmatprep.mubr.msk.bf16.mxu1 %vm22049_vm7, %v22086_v40 }
 0x6d5   : > { %16094 = vmatmul.mubr.bf16.gmra.mrb[64].mxu1 %v21049_v59 }
 0x6d6   : > { %16097 = vmatprep.mubr.msk.bf16.mxu1 %vm22049_vm7, %v22086_v40  ;;  %v9796_v40 = vunpack.c.l.bf16 %v21814_v5 }
 0x6d8   : > { %v9835_v29 = vrot.slane %v9796_v40, 3 }
 0x6da   : > { %v9838_v50 = vsel %vm22272_vm5, %v9835_v29, %v9837_v62  ;;  %v9849_v62 = vrot.slane %v13551_v16, 3  ;;  %vm22280_vm5 = vmmov %vm22274_vm1 }
 0x6dd   : > { %16098 = vmatmul.mubr.bf16.gmra.mrb[68].mxu1 %v21052_v12  ;;  %v9834_v12 = vrot.slane %v9795_v34, 3 }
 0x6df   : > { %v9836_v4 = vsel %vm22271_vm6, %v9834_v12, %v9835_v29  ;;  %v9847_v12 = vrot.slane %v13548_v2, 3  ;;  %vm22279_vm6 = vmmov %vm22274_vm1 }
 0x734   : > { %v9589_v37 = vpop.f32.mrb[36].mxu0 }
 0x735   : > { %v9682_v59 = vmul.f32 %v21821_v31, %v9589_v37  ;;  %v15599_v14 = vpop.f32.mrb[37].mxu0 }
 0x736   : > { %v9592_v41 = vpop.f32.mrb[38].mxu0 }
 0x737   : > { %v9704_v53 = vadd.f32 %v21824_v7, %v9682_v59  ;;  %v9683_v47 = vmul.f32 %v21821_v31, %v9592_v41  ;;  %v15600_v23 = vpop.f32.mrb[39].mxu0 }
 0x739   : > { %vm9722_vm7 = vcmp.ge.f32.partialorder %v9704_v53, 0.0  ;;  %v9740_v19 = vmul.f32 0.01, %v9704_v53  ;;  %v9705_v43 = vadd.f32 %v21824_v7, %v9683_v47 }
 0x73b   : > { %v9758_v57 = vsel %vm9722_vm7, %v9704_v53, %v9740_v19  ;;  %vm9723_vm9 = vcmp.ge.f32.partialorder %v9705_v43, 0.0  ;;  %v9741_v13 = vmul.f32 0.01, %v9705_v43  ;;  %v9848_v19 = vsel %vm22277_vm4, %v9845_v30, %v9847_v12  ;;  %vm22284_vm4 = vmmov %vm22274_vm1 }
 0x73c   : > { %v9889_v0 = vadd.f32 %v9836_v4, %v9758_v57  ;;  %v9597_v45 = vpop.f32.mrb[40].mxu0  ;;  %v13605_v4 = vld [vmem:[%s17871_s10 + $0x30] sm:$0xff]   ;;  %v13552_v57 = vunpack.c.h.bf16 %v13604_v15 }
 0x73d   : > { %v9759_v49 = vsel %vm9723_vm9, %v9705_v43, %v9741_v13  ;;  %v9684_v11 = vmul.f32 %v21821_v31, %v9597_v45  ;;  %v15603_v38 = vpop.f32.mrb[41].mxu0  ;;  %v9850_v13 = vsel %vm22278_vm8, %v9847_v12, %v9849_v62  ;;  %v13555_v45 = vunpack.c.l.bf16 %v13605_v4  ;;  %vm22285_vm8 = vmmov %vm22274_vm1 }
 0x73e   : > { %9907 = vst [vmem:[%s21836_s28] sm:$0xff] %v9889_v0  ;;  %v9890_v9 = vadd.f32 %v9838_v50, %v9759_v49  ;;  %v9600_v52 = vpop.f32.mrb[42].mxu0 }
 0x73f   : > { %v9706_v10 = vadd.f32 %v21824_v7, %v9684_v11  ;;  %v9685_v46 = vmul.f32 %v21821_v31, %v9600_v52  ;;  %v15604_v17 = vpop.f32.mrb[43].mxu0 }
 0x740   : > { %9908 = vst [vmem:[%s21836_s28 + $0x8] sm:$0xff] %v9890_v9  ;;  %v9851_v9 = vrot.slane %v13552_v57, 3 }
 0x741   : > { %vm9724_vm0 = vcmp.ge.f32.partialorder %v9706_v10, 0.0  ;;  %v9742_v28 = vmul.f32 0.01, %v9706_v10  ;;  %v9707_v48 = vadd.f32 %v21824_v7, %v9685_v46 }
 0x743   : > { %v9760_v61 = vsel %vm9724_vm0, %v9706_v10, %v9742_v28  ;;  %vm9725_vm13 = vcmp.ge.f32.partialorder %v9707_v48, 0.0  ;;  %v9743_v32 = vmul.f32 0.01, %v9707_v48  ;;  %v13606_v28 = vld [vmem:[%s17871_s10 + $0x38] sm:$0xff]  }
 0x744   : > { %v9891_v36 = vadd.f32 %v9840_v20, %v9760_v61  ;;  %v9605_v25 = vpop.f32.mrb[44].mxu0  ;;  %v9853_v20 = vrot.slane %v13555_v45, 3  ;;  %v12313_v45 = vld [vmem:[%s17871_s10 + $0x50] sm:$0xe] }
 0x745   : > { %v9761_v18 = vsel %vm9725_vm13, %v9707_v48, %v9743_v32  ;;  %v9686_v1 = vmul.f32 %v21821_v31, %v9605_v25  ;;  %v15607_v6 = vpop.f32.mrb[45].mxu0  ;;  %v13556_v48 = vunpack.c.h.bf16 %v13605_v4  ;;  %v13559_v32 = vunpack.c.l.bf16 %v13606_v28 }
 0x746   : > { %9909 = vst [vmem:[%s21836_s28 + $0x10] sm:$0xff] %v9891_v36  ;;  %v9892_v42 = vadd.f32 %v9842_v60, %v9761_v18  ;;  %v9608_v22 = vpop.f32.mrb[46].mxu0  ;;  %v9852_v60 = vsel %vm22279_vm6, %v9849_v62, %v9851_v9  ;;  %v9854_v25 = vsel %vm22280_vm5, %v9851_v9, %v9853_v20 }
 0x747   : > { %v9708_v44 = vadd.f32 %v21824_v7, %v9686_v1  ;;  %v9687_v35 = vmul.f32 %v21821_v31, %v9608_v22  ;;  %v15608_v8 = vpop.f32.mrb[47].mxu0  ;;  %v9855_v3 = vrot.slane %v13556_v48, 3  ;;  %v9857_v30 = vrot.slane %v13559_v32, 3 }
 0x748   : > { %9910 = vst [vmem:[%s21836_s28 + $0x18] sm:$0xff] %v9892_v42 }
 0x749   : > { %vm9726_vm3 = vcmp.ge.f32.partialorder %v9708_v44, 0.0  ;;  %v9744_v58 = vmul.f32 0.01, %v9708_v44  ;;  %v9709_v27 = vadd.f32 %v21824_v7, %v9687_v35 }
 0x74b   : > { %v9762_v34 = vsel %vm9726_vm3, %v9708_v44, %v9744_v58  ;;  %vm9727_vm12 = vcmp.ge.f32.partialorder %v9709_v27, 0.0  ;;  %v9745_v40 = vmul.f32 0.01, %v9709_v27  ;;  %v9856_v58 = vsel %vm22281_vm10, %v9853_v20, %v9855_v3  ;;  %vm22288_vm10 = vmmov %vm22274_vm1 }
 0x74c   : > { %v9893_v37 = vadd.f32 %v9844_v26, %v9762_v34  ;;  %v9613_v59 = vpop.f32.mrb[48].mxu0  ;;  %v13607_v26 = vld [vmem:[%s17871_s10 + $0x40] sm:$0xff]   ;;  %v13560_v34 = vunpack.c.h.bf16 %v13606_v28  ;;  %v13609_v28 = vld [vmem:[%s17871_s10 + $0x58] sm:$0xff]  }
 0x74d   : > { %v9763_v29 = vsel %vm9727_vm12, %v9709_v27, %v9745_v40  ;;  %v9688_v14 = vmul.f32 %v21821_v31, %v9613_v59  ;;  %v15611_v41 = vpop.f32.mrb[49].mxu0  ;;  %v9858_v40 = vsel %vm22274_vm1, %v9855_v3, %v9857_v30  ;;  %v13563_v59 = vunpack.c.l.bf16 %v13607_v26 }
 0x74e   : > { %9911 = vst [vmem:[%s21836_s28 + $0x20] sm:$0xff] %v9893_v37  ;;  %v9894_v53 = vadd.f32 %v9846_v63, %v9763_v29  ;;  %v9616_v47 = vpop.f32.mrb[50].mxu0 }
 0x74f   : > { %v9710_v23 = vadd.f32 %v21824_v7, %v9688_v14  ;;  %v9689_v51 = vmul.f32 %v21821_v31, %v9616_v47  ;;  %v15612_v24 = vpop.f32.mrb[51].mxu0 }
 0x750   : > { %9912 = vst [vmem:[%s21836_s28 + $0x28] sm:$0xff] %v9894_v53  ;;  %v9859_v53 = vrot.slane %v13560_v34, 3 }
 0x751   : > { %vm9728_vm15 = vcmp.ge.f32.partialorder %v9710_v23, 0.0  ;;  %v9746_v43 = vmul.f32 0.01, %v9710_v23  ;;  %v9711_v55 = vadd.f32 %v21824_v7, %v9689_v51 }
 0x753   : > { %v9764_v50 = vsel %vm9728_vm15, %v9710_v23, %v9746_v43  ;;  %vm9729_vm11 = vcmp.ge.f32.partialorder %v9711_v55, 0.0  ;;  %v9747_v0 = vmul.f32 0.01, %v9711_v55  ;;  %v13608_v43 = vld [vmem:[%s17871_s10 + $0x48] sm:$0xff]  }
 0x754   : > { %v9895_v39 = vadd.f32 %v9848_v19, %v9764_v50  ;;  %v9621_v49 = vpop.f32.mrb[52].mxu0  ;;  %v9861_v19 = vrot.slane %v13563_v59, 3 }
 0x755   : > { %v9765_v11 = vsel %vm9729_vm11, %v9711_v55, %v9747_v0  ;;  %v9690_v38 = vmul.f32 %v21821_v31, %v9621_v49  ;;  %v15615_v52 = vpop.f32.mrb[53].mxu0  ;;  %v13564_v55 = vunpack.c.h.bf16 %v13607_v26  ;;  %v13567_v0 = vunpack.c.l.bf16 %v13608_v43 }
 0x756   : > { %9913 = vst [vmem:[%s21836_s28 + $0x30] sm:$0xff] %v9895_v39  ;;  %v9896_v56 = vadd.f32 %v9850_v13, %v9765_v11  ;;  %v9624_v10 = vpop.f32.mrb[54].mxu0  ;;  %v9860_v13 = vsel %vm22282_vm14, %v9857_v30, %v9859_v53  ;;  %v9862_v11 = vsel %vm22283_vm2, %v9859_v53, %v9861_v19 }
 0x757   : > { %v9712_v46 = vadd.f32 %v21824_v7, %v9690_v38  ;;  %v9691_v17 = vmul.f32 %v21821_v31, %v9624_v10  ;;  %v15616_v21 = vpop.f32.mrb[55].mxu0  ;;  %v9794_v38 = vld [vmem:[%s17871_s10 + $0x50] sm:$0x3]  ;;  %v12333_v10 = vunpack.c.h.bf16 %v21814_v5 }
 0x758   : > { %9914 = vst [vmem:[%s21836_s28 + $0x38] sm:$0xff] %v9896_v56  ;;  %v9863_v56 = vrot.slane %v13564_v55, 3  ;;  %v12332_v21 = vunpack.c.l.bf16 %v12313_v45  ;;  %v9813_v32 = vunpack.c.l.bf16 %v9794_v38 }
 0x759   : > { %vm9730_vm7 = vcmp.ge.f32.partialorder %v9712_v46, 0.0  ;;  %v9748_v54 = vmul.f32 0.01, %v9712_v46  ;;  %v9713_v61 = vadd.f32 %v21824_v7, %v9691_v17 }
 0x75a   : > { %v9864_v5 = vsel %vm22284_vm4, %v9861_v19, %v9863_v56  ;;  %v9869_v30 = vrot.slane %v9813_v32, 3 }
 0x75b   : > { %v9766_v33 = vsel %vm9730_vm7, %v9712_v46, %v9748_v54  ;;  %vm9731_vm9 = vcmp.ge.f32.partialorder %v9713_v61, 0.0  ;;  %v9749_v36 = vmul.f32 0.01, %v9713_v61  ;;  %vm22286_vm7 = vmmov %vm22274_vm1 }
 0x75c   : > { %v9897_v18 = vadd.f32 %v9852_v60, %v9766_v33  ;;  %v9629_v1 = vpop.f32.mrb[56].mxu0  ;;  %v9865_v60 = vrot.slane %v13567_v0, 3 }
 0x75d   : > { %v9767_v6 = vsel %vm9731_vm9, %v9713_v61, %v9749_v36  ;;  %v9692_v42 = vmul.f32 %v21821_v31, %v9629_v1  ;;  %v15619_v22 = vpop.f32.mrb[57].mxu0  ;;  %v13568_v61 = vunpack.c.h.bf16 %v13608_v43  ;;  %v13571_v1 = vunpack.c.l.bf16 %v13609_v28  ;;  %vm22287_vm9 = vmmov %vm22274_vm1 }
 0x75e   : > { %9915 = vst [vmem:[%s21836_s28 + $0x40] sm:$0xff] %v9897_v18  ;;  %v9898_v44 = vadd.f32 %v9854_v25, %v9767_v6  ;;  %v9632_v35 = vpop.f32.mrb[58].mxu0  ;;  %v12371_v18 = vrot.slane %v12333_v10, 3  ;;  %v12370_v22 = vrot.slane %v12332_v21, 3 }
 0x75f   : > { %v9714_v8 = vadd.f32 %v21824_v7, %v9692_v42  ;;  %v9693_v15 = vmul.f32 %v21821_v31, %v9632_v35  ;;  %v15620_v2 = vpop.f32.mrb[59].mxu0  ;;  %v9867_v35 = vrot.slane %v13568_v61, 3  ;;  %v12373_v59 = vrot.slane %v13571_v1, 3 }
 0x760   : > { %9916 = vst [vmem:[%s21836_s28 + $0x48] sm:$0xff] %v9898_v44  ;;  %v9866_v44 = vsel %vm22285_vm8, %v9863_v56, %v9865_v60  ;;  %v21907_v2 = vld [vmem:[%s17871_s10 + $0x60] sm:$0xff]   ;;  %v12372_v53 = vsel %vm22286_vm7, %v12370_v22, %v12371_v18  ;;  %vm22293_vm7 = vmmov %vm22274_vm1 }
 0x761   : > { %vm9732_vm0 = vcmp.ge.f32.partialorder %v9714_v8, 0.0  ;;  %v9750_v27 = vmul.f32 0.01, %v9714_v8  ;;  %v9715_v16 = vadd.f32 %v21824_v7, %v9693_v15  ;;  %v12374_v0 = vsel %vm22288_vm10, %v12371_v18, %v12373_v59 }
 0x762   : > { %v9870_v38 = vsel %vm22274_vm1, %v9867_v35, %v9869_v30 }
 0x763   : > { %v9768_v63 = vsel %vm9732_vm0, %v9714_v8, %v9750_v27  ;;  %vm9733_vm13 = vcmp.ge.f32.partialorder %v9715_v16, 0.0  ;;  %v9751_v37 = vmul.f32 0.01, %v9715_v16 }
 0x764   : > { %v9899_v12 = vadd.f32 %v9856_v58, %v9768_v63  ;;  %v9637_v29 = vpop.f32.mrb[60].mxu0 }
 0x765   : > { %v9769_v14 = vsel %vm9733_vm13, %v9715_v16, %v9751_v37  ;;  %v9694_v41 = vmul.f32 %v21821_v31, %v9637_v29  ;;  %v15623_v47 = vpop.f32.mrb[61].mxu0  ;;  %v13572_v16 = vunpack.c.h.bf16 %v13609_v28 }
 0x766   : > { %9917 = vst [vmem:[%s21836_s28 + $0x50] sm:$0xff] %v9899_v12  ;;  %v9900_v62 = vadd.f32 %v9858_v40, %v9769_v14  ;;  %v9640_v23 = vpop.f32.mrb[62].mxu0  ;;  %v13575_v47 = vunpack.c.l.bf16 %v21907_v2 }
 0x767   : > { %v9716_v51 = vadd.f32 %v21824_v7, %v9694_v41  ;;  %v9695_v24 = vmul.f32 %v21821_v31, %v9640_v23  ;;  %v15624_v4 = vpop.f32.mrb[63].mxu0 }
 0x768   : > { %9918 = vst [vmem:[%s21836_s28 + $0x58] sm:$0xff] %v9900_v62  ;;  %v9868_v4 = vsel %vm22287_vm9, %v9865_v60, %v9867_v35  ;;  %v12377_v10 = vrot.slane %v13575_v47, 3  ;;  %vm22294_vm9 = vmmov %vm22274_vm1 }
 0x769   : > { %vm9734_vm3 = vcmp.ge.f32.partialorder %v9716_v51, 0.0  ;;  %v9752_v57 = vmul.f32 0.01, %v9716_v51  ;;  %v9717_v50 = vadd.f32 %v21824_v7, %v9695_v24 }
 0x76b   : > { %v9770_v39 = vsel %vm9734_vm3, %v9716_v51, %v9752_v57  ;;  %vm9735_vm12 = vcmp.ge.f32.partialorder %v9717_v50, 0.0  ;;  %v9753_v49 = vmul.f32 0.01, %v9717_v50  ;;  %v12375_v57 = vrot.slane %v13572_v16, 3  ;;  %vm22289_vm3 = vmmov %vm22274_vm1 }
 0x76c   : > { %v9901_v9 = vadd.f32 %v9860_v13, %v9770_v39  ;;  %v9645_v52 = vpop.f32.mrb[64].mxu0 }
 0x76d   : > { %v9771_v46 = vsel %vm9735_vm12, %v9717_v50, %v9753_v49  ;;  %v9696_v17 = vmul.f32 %v21821_v31, %v9645_v52  ;;  %v15627_v20 = vpop.f32.mrb[65].mxu0  ;;  %v12376_v32 = vsel %vm22289_vm3, %v12373_v59, %v12375_v57  ;;  %vm22290_vm12 = vmmov %vm22274_vm1 }
 0x76e   : > { %9919 = vst [vmem:[%s21836_s28 + $0x60] sm:$0xff] %v9901_v9  ;;  %v9902_v48 = vadd.f32 %v9862_v11, %v9771_v46  ;;  %v9648_v54 = vpop.f32.mrb[66].mxu0  ;;  %v12378_v1 = vsel %vm22290_vm12, %v12375_v57, %v12377_v10 }
 0x76f   : > { %v9718_v33 = vadd.f32 %v21824_v7, %v9696_v17  ;;  %v9697_v36 = vmul.f32 %v21821_v31, %v9648_v54  ;;  %v15628_v25 = vpop.f32.mrb[67].mxu0 }
 0x770   : > { %9920 = vst [vmem:[%s21836_s28 + $0x68] sm:$0xff] %v9902_v48  ;;  %v12134_v42 = vpop.f32.mrb[36].mxu1 }
 0x771   : > { %vm9736_vm15 = vcmp.ge.f32.partialorder %v9718_v33, 0.0  ;;  %v9754_v3 = vmul.f32 0.01, %v9718_v33  ;;  %v9719_v6 = vadd.f32 %v21824_v7, %v9697_v36  ;;  %v12223_v8 = vmul.f32 %v12134_v42, %v21821_v31  ;;  %v16067_v15 = vpop.f32.mrb[37].mxu1  ;;  %v13611_v36 = vld [vmem:[%s17871_s10 + $0x68] sm:$0xff]  }
 0x772   : > { %v12137_v27 = vpop.f32.mrb[38].mxu1  ;;  %v13579_v42 = vunpack.c.l.bf16 %v13611_v36 }
 0x773   : > { %v9772_v58 = vsel %vm9736_vm15, %v9718_v33, %v9754_v3  ;;  %vm9737_vm11 = vcmp.ge.f32.partialorder %v9719_v6, 0.0  ;;  %v9755_v26 = vmul.f32 0.01, %v9719_v6  ;;  %v12241_v63 = vadd.f32 %v12223_v8, %v21824_v7  ;;  %v16068_v12 = vpop.f32.mrb[39].mxu1  ;;  %vm22291_vm15 = vmmov %vm22274_vm1 }
 0x774   : > { %v9903_v34 = vadd.f32 %v9864_v5, %v9772_v58  ;;  %v9653_v40 = vpop.f32.mrb[68].mxu0  ;;  %v12224_v37 = vmul.f32 %v12137_v27, %v21821_v31  ;;  %v13576_v33 = vunpack.c.h.bf16 %v21907_v2  ;;  %v12381_v16 = vrot.slane %v13579_v42, 3 }
 0x775   : > { %v9773_v29 = vsel %vm9737_vm11, %v9719_v6, %v9755_v26  ;;  %v9698_v14 = vmul.f32 %v21821_v31, %v9653_v40  ;;  %v15631_v41 = vpop.f32.mrb[69].mxu0  ;;  %vm12259_vm6 = vcmp.ge.f32.partialorder %v12241_v63, 0.0  ;;  %v12277_v51 = vmul.f32 0.01, %v12241_v63  ;;  %v13612_v40 = vld [vmem:[%s17871_s10 + $0x70] sm:$0xff]   ;;  %vm22292_vm11 = vmmov %vm22274_vm1 }
 0x776   : > { %9921 = vst [vmem:[%s21836_s28 + $0x70] sm:$0xff] %v9903_v34  ;;  %v9904_v62 = vadd.f32 %v9866_v44, %v9773_v29  ;;  %v9656_v23 = vpop.f32.mrb[70].mxu0  ;;  %v12242_v24 = vadd.f32 %v12224_v37, %v21824_v7  ;;  %v12379_v8 = vrot.slane %v13576_v33, 3  ;;  %v13583_v29 = vunpack.c.l.bf16 %v13612_v40 }
 0x777   : > { %v9720_v19 = vadd.f32 %v21824_v7, %v9698_v14  ;;  %v9699_v43 = vmul.f32 %v21821_v31, %v9656_v23  ;;  %v15632_v55 = vpop.f32.mrb[71].mxu0  ;;  %v12295_v13 = vsel %vm12259_vm6, %v12241_v63, %v12277_v51  ;;  %v13580_v63 = vunpack.c.h.bf16 %v13611_v36  ;;  %v13614_v36 = vld [vmem:[%s17871_s10 + $0x80] sm:$0xff]  }
 0x778   : > { %9922 = vst [vmem:[%s21836_s28 + $0x78] sm:$0xff] %v9904_v62  ;;  %vm12260_vm5 = vcmp.ge.f32.partialorder %v12242_v24, 0.0  ;;  %v12278_v50 = vmul.f32 0.01, %v12242_v24  ;;  %v12425_v49 = vadd.f32 %v12372_v53, %v12295_v13  ;;  %v12142_v11 = vpop.f32.mrb[40].mxu1  ;;  %v12380_v59 = vsel %vm22291_vm15, %v12377_v10, %v12379_v8 }
 0x779   : > { %vm9738_vm0 = vcmp.ge.f32.partialorder %v9720_v19, 0.0  ;;  %v9756_v45 = vmul.f32 0.01, %v9720_v19  ;;  %v9721_v39 = vadd.f32 %v21824_v7, %v9699_v43  ;;  %v12225_v52 = vmul.f32 %v12142_v11, %v21821_v31  ;;  %v16071_v56 = vpop.f32.mrb[41].mxu1 }
 0x77a   : > { %v12296_v9 = vsel %vm12260_vm5, %v12242_v24, %v12278_v50  ;;  %12443 = vst [vmem:[%s21836_s28 + $0x90] sm:$0xff] %v12425_v49  ;;  %v12145_v21 = vpop.f32.mrb[42].mxu1  ;;  %v12382_v53 = vsel %vm22292_vm11, %v12379_v8, %v12381_v16  ;;  %v12383_v23 = vrot.slane %v13580_v63, 3  ;;  %v12385_v55 = vrot.slane %v13583_v29, 3 }
 0x77b   : > { %v9774_v46 = vsel %vm9738_vm0, %v9720_v19, %v9756_v45  ;;  %vm9739_vm13 = vcmp.ge.f32.partialorder %v9721_v39, 0.0  ;;  %v9757_v17 = vmul.f32 0.01, %v9721_v39  ;;  %v12426_v20 = vadd.f32 %v12374_v0, %v12296_v9  ;;  %v16072_v60 = vpop.f32.mrb[43].mxu1  ;;  %v13613_v45 = vld [vmem:[%s17871_s10 + $0x78] sm:$0xff]   ;;  %vm22295_vm0 = vmmov %vm22274_vm1 }
 0x77c   : > { %v9905_v28 = vadd.f32 %v9868_v4, %v9774_v46  ;;  %v12243_v48 = vadd.f32 %v12225_v52, %v21824_v7  ;;  %v12226_v54 = vmul.f32 %v12145_v21, %v21821_v31  ;;  %v12384_v0 = vsel %vm22293_vm7, %v12381_v16, %v12383_v23  ;;  %vm22297_vm3 = vmmov %vm22295_vm0 }
 0x77d   : > { %v9775_v61 = vsel %vm9739_vm13, %v9721_v39, %v9757_v17  ;;  %12444 = vst [vmem:[%s21836_s28 + $0x98] sm:$0xff] %v12426_v20  ;;  %v13584_v11 = vunpack.c.h.bf16 %v13612_v40  ;;  %v13587_v56 = vunpack.c.l.bf16 %v13613_v45  ;;  %vm22296_vm13 = vmmov %vm22295_vm0  ;;  %v13592_v29 = vunpack.c.h.bf16 %v13614_v36 }
 0x77e   : > { %9923 = vst [vmem:[%s21836_s28 + $0x80] sm:$0xff] %v9905_v28  ;;  %v9906_v25 = vadd.f32 %v9870_v38, %v9775_v61  ;;  %vm12261_vm14 = vcmp.ge.f32.partialorder %v12243_v48, 0.0  ;;  %v12279_v5 = vmul.f32 0.01, %v12243_v48  ;;  %v12244_v18 = vadd.f32 %v12226_v54, %v21824_v7  ;;  %vm22298_vm12 = vmmov %vm22295_vm0 }
 0x77f   : > { %v12386_v38 = vsel %vm22294_vm9, %v12383_v23, %v12385_v55  ;;  %v12387_v21 = vrot.slane %v13584_v11, 3  ;;  %vm22299_vm15 = vmmov %vm22295_vm0 }
 0x780   : > { %9924 = vst [vmem:[%s21836_s28 + $0x88] sm:$0xff] %v9906_v25  ;;  %v12297_v3 = vsel %vm12261_vm14, %v12243_v48, %v12279_v5  ;;  %vm12262_vm2 = vcmp.ge.f32.partialorder %v12244_v18, 0.0  ;;  %v12280_v6 = vmul.f32 0.01, %v12244_v18  ;;  %v12150_v44 = vpop.f32.mrb[44].mxu1  ;;  %v13588_v25 = vunpack.c.h.bf16 %v13613_v45  ;;  %v13616_v45 = vld [vmem:[%s17871_s10 + $0x90] sm:$0xff]   ;;  %vm22300_vm11 = vmmov %vm22295_vm0 }
 0x781   : > { %v12427_v22 = vadd.f32 %v12376_v32, %v12297_v3  ;;  %v12227_v30 = vmul.f32 %v12150_v44, %v21821_v31  ;;  %v16075_v15 = vpop.f32.mrb[45].mxu1  ;;  %v12389_v32 = vrot.slane %v13587_v56, 3  ;;  %v13591_v3 = vunpack.c.l.bf16 %v13614_v36  ;;  %vm22301_vm7 = vmmov %vm22295_vm0 }
 0x782   : > { %v12298_v35 = vsel %vm12262_vm2, %v12244_v18, %v12280_v6  ;;  %v12153_v58 = vpop.f32.mrb[46].mxu1  ;;  %v12388_v18 = vsel %vm22295_vm0, %v12385_v55, %v12387_v21  ;;  %vm22302_vm9 = vmmov %vm22295_vm0 }
 0x783   : > { %12445 = vst [vmem:[%s21836_s28 + $0xa0] sm:$0xff] %v12427_v22  ;;  %v12428_v2 = vadd.f32 %v12378_v1, %v12298_v35  ;;  %v12245_v26 = vadd.f32 %v12227_v30, %v21824_v7  ;;  %v12228_v27 = vmul.f32 %v12153_v58, %v21821_v31  ;;  %v16076_v34 = vpop.f32.mrb[47].mxu1  ;;  %v12390_v22 = vsel %vm22296_vm13, %v12387_v21, %v12389_v32  ;;  %vm22303_vm13 = vmmov %vm22295_vm0 }
 0x784   : > { %v12391_v30 = vrot.slane %v13588_v25, 3 }
 0x785   : > { %12446 = vst [vmem:[%s21836_s28 + $0xa8] sm:$0xff] %v12428_v2  ;;  %vm12263_vm4 = vcmp.ge.f32.partialorder %v12245_v26, 0.0  ;;  %v12281_v37 = vmul.f32 0.01, %v12245_v26  ;;  %v12246_v12 = vadd.f32 %v12228_v27, %v21824_v7  ;;  %v12393_v27 = vrot.slane %v13591_v3, 3 }
 0x786   : > { %v12392_v63 = vsel %vm22297_vm3, %v12389_v32, %v12391_v30  ;;  %v13600_v3 = vunpack.c.h.bf16 %v13616_v45 }
 0x787   : > { %v12299_v14 = vsel %vm12263_vm4, %v12245_v26, %v12281_v37  ;;  %vm12264_vm8 = vcmp.ge.f32.partialorder %v12246_v12, 0.0  ;;  %v12282_v41 = vmul.f32 0.01, %v12246_v12  ;;  %v13615_v37 = vld [vmem:[%s17871_s10 + $0x88] sm:$0xff]  }
 0x788   : > { %v12429_v47 = vadd.f32 %v12380_v59, %v12299_v14  ;;  %v12158_v62 = vpop.f32.mrb[48].mxu1  ;;  %v12394_v14 = vsel %vm22298_vm12, %v12391_v30, %v12393_v27 }
 0x789   : > { %v12300_v51 = vsel %vm12264_vm8, %v12246_v12, %v12282_v41  ;;  %v12229_v24 = vmul.f32 %v12158_v62, %v21821_v31  ;;  %v16079_v19 = vpop.f32.mrb[49].mxu1 }
 0x78a   : > { %12447 = vst [vmem:[%s21836_s28 + $0xb0] sm:$0xff] %v12429_v47  ;;  %v12430_v4 = vadd.f32 %v12382_v53, %v12300_v51  ;;  %v12161_v43 = vpop.f32.mrb[50].mxu1  ;;  %v13595_v47 = vunpack.c.l.bf16 %v13615_v37  ;;  %v12395_v19 = vrot.slane %v13592_v29, 3 }
 0x78b   : > { %v12247_v57 = vadd.f32 %v12229_v24, %v21824_v7  ;;  %v12230_v13 = vmul.f32 %v12161_v43, %v21821_v31  ;;  %v16080_v50 = vpop.f32.mrb[51].mxu1 }
 0x78c   : > { %12448 = vst [vmem:[%s21836_s28 + $0xb8] sm:$0xff] %v12430_v4  ;;  %v12397_v50 = vrot.slane %v13595_v47, 3  ;;  %v12396_v11 = vsel %vm22299_vm15, %v12393_v27, %v12395_v19 }
 0x78d   : > { %vm12265_vm6 = vcmp.ge.f32.partialorder %v12247_v57, 0.0  ;;  %v12283_v39 = vmul.f32 0.01, %v12247_v57  ;;  %v12248_v49 = vadd.f32 %v12230_v13, %v21824_v7 }
 0x78f   : > { %v12301_v9 = vsel %vm12265_vm6, %v12247_v57, %v12283_v39  ;;  %vm12266_vm5 = vcmp.ge.f32.partialorder %v12248_v49, 0.0  ;;  %v12284_v52 = vmul.f32 0.01, %v12248_v49  ;;  %v13596_v39 = vunpack.c.h.bf16 %v13615_v37 }
 0x790   : > { %v12431_v10 = vadd.f32 %v12384_v0, %v12301_v9  ;;  %v12166_v46 = vpop.f32.mrb[52].mxu1  ;;  %v13599_v9 = vunpack.c.l.bf16 %v13616_v45 }
 0x791   : > { %v12302_v17 = vsel %vm12266_vm5, %v12248_v49, %v12284_v52  ;;  %v12231_v20 = vmul.f32 %v12166_v46, %v21821_v31  ;;  %v16083_v28 = vpop.f32.mrb[53].mxu1 }
 0x792   : > { %12449 = vst [vmem:[%s21836_s28 + $0xc0] sm:$0xff] %v12431_v10  ;;  %v12432_v48 = vadd.f32 %v12386_v38, %v12302_v17  ;;  %v12169_v54 = vpop.f32.mrb[54].mxu1  ;;  %v12398_v10 = vsel %vm22300_vm11, %v12395_v19, %v12397_v50 }
 0x793   : > { %v12249_v60 = vadd.f32 %v12231_v20, %v21824_v7  ;;  %v12232_v61 = vmul.f32 %v12169_v54, %v21821_v31  ;;  %v16084_v33 = vpop.f32.mrb[55].mxu1  ;;  %v12399_v20 = vrot.slane %v13596_v39, 3 }
 0x794   : > { %12450 = vst [vmem:[%s21836_s28 + $0xc8] sm:$0xff] %v12432_v48 }
 0x795   : > { %vm12267_vm10 = vcmp.ge.f32.partialorder %v12249_v60, 0.0  ;;  %v12285_v5 = vmul.f32 0.01, %v12249_v60  ;;  %v12250_v1 = vadd.f32 %v12232_v61, %v21824_v7  ;;  %v12401_v61 = vrot.slane %v13599_v9, 3 }
 0x796   : > { %v12400_v25 = vsel %vm22301_vm7, %v12397_v50, %v12399_v20 }
 0x797   : > { %v12303_v6 = vsel %vm12267_vm10, %v12249_v60, %v12285_v5  ;;  %vm12268_vm1 = vcmp.ge.f32.partialorder %v12250_v1, 0.0  ;;  %v12286_v42 = vmul.f32 0.01, %v12250_v1  ;;  %v12331_v5 = vld [vmem:[%s17871_s10 + $0x98] sm:$0x3] }
 0x798   : > { %v12433_v44 = vadd.f32 %v12388_v18, %v12303_v6  ;;  %v12174_v35 = vpop.f32.mrb[56].mxu1  ;;  %v12402_v6 = vsel %vm22302_vm9, %v12399_v20, %v12401_v61 }
 0x799   : > { %v12304_v8 = vsel %vm12268_vm1, %v12250_v1, %v12286_v42  ;;  %v12233_v15 = vmul.f32 %v12174_v35, %v21821_v31  ;;  %v16087_v2 = vpop.f32.mrb[57].mxu1 }
 0x79a   : > { %12451 = vst [vmem:[%s21836_s28 + $0xd0] sm:$0xff] %v12433_v44  ;;  %v12434_v58 = vadd.f32 %v12390_v22, %v12304_v8  ;;  %v12177_v26 = vpop.f32.mrb[58].mxu1  ;;  %v12350_v44 = vunpack.c.l.bf16 %v12331_v5  ;;  %v12403_v2 = vrot.slane %v13600_v3, 3 }
 0x79b   : > { %v12251_v16 = vadd.f32 %v12233_v15, %v21824_v7  ;;  %v12234_v34 = vmul.f32 %v12177_v26, %v21821_v31  ;;  %v16088_v40 = vpop.f32.mrb[59].mxu1 }
 0x79c   : > { %12452 = vst [vmem:[%s21836_s28 + $0xd8] sm:$0xff] %v12434_v58  ;;  %v12405_v40 = vrot.slane %v12350_v44, 3 }
 0x79d   : > { %vm12269_vm14 = vcmp.ge.f32.partialorder %v12251_v16, 0.0  ;;  %v12287_v59 = vmul.f32 0.01, %v12251_v16  ;;  %v12252_v12 = vadd.f32 %v12234_v34, %v21824_v7 }
 0x79f   : > { %v12305_v41 = vsel %vm12269_vm14, %v12251_v16, %v12287_v59  ;;  %vm12270_vm2 = vcmp.ge.f32.partialorder %v12252_v12, 0.0  ;;  %v12288_v53 = vmul.f32 0.01, %v12252_v12  ;;  %v12404_v59 = vsel %vm22295_vm0, %v12401_v61, %v12403_v2 }
 0x7a0   : > { %v12435_v62 = vadd.f32 %v12392_v63, %v12305_v41  ;;  %v12182_v23 = vpop.f32.mrb[60].mxu1  ;;  %v12406_v41 = vsel %vm22303_vm13, %v12403_v2, %v12405_v40 }
 0x7a1   : > { %v12306_v51 = vsel %vm12270_vm2, %v12252_v12, %v12288_v53  ;;  %v12235_v24 = vmul.f32 %v12182_v23, %v21821_v31  ;;  %v16091_v4 = vpop.f32.mrb[61].mxu1 }
 0x7a2   : > { %12453 = vst [vmem:[%s21836_s28 + $0xe0] sm:$0xff] %v12435_v62  ;;  %v12436_v43 = vadd.f32 %v12394_v14, %v12306_v51  ;;  %v12185_v55 = vpop.f32.mrb[62].mxu1 }
 0x7a3   : > { %v12253_v57 = vadd.f32 %v12235_v24, %v21824_v7  ;;  %v12236_v13 = vmul.f32 %v12185_v55, %v21821_v31  ;;  %v16092_v0 = vpop.f32.mrb[63].mxu1 }
 0x7a4   : > { %12454 = vst [vmem:[%s21836_s28 + $0xe8] sm:$0xff] %v12436_v43 }
 0x7a5   : > { %vm12271_vm4 = vcmp.ge.f32.partialorder %v12253_v57, 0.0  ;;  %v12289_v49 = vmul.f32 0.01, %v12253_v57  ;;  %v12254_v38 = vadd.f32 %v12236_v13, %v21824_v7 }
 0x7a7   : > { %v12307_v52 = vsel %vm12271_vm4, %v12253_v57, %v12289_v49  ;;  %vm12272_vm8 = vcmp.ge.f32.partialorder %v12254_v38, 0.0  ;;  %v12290_v56 = vmul.f32 0.01, %v12254_v38 }
 0x7a8   : > { %v12437_v46 = vadd.f32 %v12396_v11, %v12307_v52  ;;  %v12190_v17 = vpop.f32.mrb[64].mxu1 }
 0x7a9   : > { %v12308_v21 = vsel %vm12272_vm8, %v12254_v38, %v12290_v56  ;;  %v12237_v28 = vmul.f32 %v12190_v17, %v21821_v31  ;;  %v16095_v48 = vpop.f32.mrb[65].mxu1 }
 0x7aa   : > { %12455 = vst [vmem:[%s21836_s28 + $0xf0] sm:$0xff] %v12437_v46  ;;  %v12438_v54 = vadd.f32 %v12398_v10, %v12308_v21  ;;  %v12193_v60 = vpop.f32.mrb[66].mxu1 }
 0x7ab   : > { %v12255_v32 = vadd.f32 %v12237_v28, %v21824_v7  ;;  %v12238_v33 = vmul.f32 %v12193_v60, %v21821_v31  ;;  %v16096_v36 = vpop.f32.mrb[67].mxu1 }
 0x7ac   : > { %12456 = vst [vmem:[%s21836_s28 + $0xf8] sm:$0xff] %v12438_v54 }
 0x7ad   : > { %vm12273_vm6 = vcmp.ge.f32.partialorder %v12255_v32, 0.0  ;;  %v12291_v18 = vmul.f32 0.01, %v12255_v32  ;;  %v12256_v1 = vadd.f32 %v12238_v33, %v21824_v7 }
 0x7af   : > { %v12309_v42 = vsel %vm12273_vm6, %v12255_v32, %v12291_v18  ;;  %vm12274_vm5 = vcmp.ge.f32.partialorder %v12256_v1, 0.0  ;;  %v12292_v22 = vmul.f32 0.01, %v12256_v1 }
 0x7b0   : > { %v12439_v35 = vadd.f32 %v12400_v25, %v12309_v42  ;;  %v12198_v30 = vpop.f32.mrb[68].mxu1 }
 0x7b1   : > { %v12310_v8 = vsel %vm12274_vm5, %v12256_v1, %v12292_v22  ;;  %v12239_v15 = vmul.f32 %v12198_v30, %v21821_v31  ;;  %v16099_v58 = vpop.f32.mrb[69].mxu1 }
 0x7b2   : > { %12457 = vst [vmem:[%s21836_s28 + $0x100] sm:$0xff] %v12439_v35  ;;  %v12440_v26 = vadd.f32 %v12402_v6, %v12310_v8  ;;  %v12201_v27 = vpop.f32.mrb[70].mxu1 }
 0x7b3   : > { %v12257_v16 = vadd.f32 %v12239_v15, %v21824_v7  ;;  %v12240_v34 = vmul.f32 %v12201_v27, %v21821_v31  ;;  %v16100_v63 = vpop.f32.mrb[71].mxu1 }
 0x7b4   : > { %12458 = vst [vmem:[%s21836_s28 + $0x108] sm:$0xff] %v12440_v26 }
 0x7b5   : > { %vm12275_vm10 = vcmp.ge.f32.partialorder %v12257_v16, 0.0  ;;  %v12293_v37 = vmul.f32 0.01, %v12257_v16  ;;  %v12258_v12 = vadd.f32 %v12240_v34, %v21824_v7 }
 0x7b7   : > { %v12311_v29 = vsel %vm12275_vm10, %v12257_v16, %v12293_v37  ;;  %vm12276_vm1 = vcmp.ge.f32.partialorder %v12258_v12, 0.0  ;;  %v12294_v14 = vmul.f32 0.01, %v12258_v12 }
 0x7b8   : > { %v12441_v53 = vadd.f32 %v12404_v59, %v12311_v29 }
 0x7b9   : > { %v12312_v47 = vsel %vm12276_vm1, %v12258_v12, %v12294_v14 }
 0x7ba   : > { %12459 = vst [vmem:[%s21836_s28 + $0x110] sm:$0xff] %v12441_v53  ;;  %v12442_v62 = vadd.f32 %v12406_v41, %v12312_v47 }
 0x7bc   : > { %12460 = vst [vmem:[%s21836_s28 + $0x118] sm:$0xff] %v12442_v62 }
 0x7bd PF: > { %s14_s15 = sadd.s32 1, %s17786_s15  }
 0x7be   : > { %p11_p4 = scmp.ge.s32.totalorder %s14_s15, 4  }
 0x7c0   :  { %13 = sbr.rel (!%p11_p4) target bundleno = 1 (0x1), region = 82 }

</bundles_post_ra>
